<compile_context>
chip_gen: v7x
topology: tpu7x:2x2x1
jax: 0.10.0
libtpu: 0.0.40
codegen_flags: <defaults>
</compile_context>

<pallas_src>
import jax
import jax.numpy as jnp
import numpy as np
from jax.experimental import pallas as pl
from jax.experimental.pallas import tpu as pltpu


# ----------------------------------------------------------------------------
# Pallas kernel.
# Shapes inside the kernel (single grid step, whole batch B):
#   x_ref:    (T, B, Dp)     time-major, D zero-padded to Dp
#   mask_ref: (T, B)         1.0 where t < length[b], else 0.0
#   wih0:     (Dp, 4H)  b0: (1, 4H)        [gate order i, f, g, o; i/f/o cols
#   wbig:     (2H, 8H) = [[whh0, wih1],      of all weights/biases pre-scaled
#                         [0,    whh1]]      by 0.5 for sigmoid-via-tanh]
#   b1:       (1, 4H)
#   wout:     (1, H)    bout: (1, 1)
#   y_ref:    (T, B)
#   xg_ref:   (T, B, 4H)  VMEM scratch (precomputed layer-0 input projection)
#   hacc_ref: (T, B, H)   VMEM scratch (per-step layer-1 hidden states)
#   lhs_ref:  (B, 2H)     VMEM scratch ([h0 | h1] slab feeding the fused dot)
# ----------------------------------------------------------------------------
def timing_lstm_kernel(x_ref, mask_ref,
                       wih0_ref, b0_ref, wbig_ref, b1_ref,
                       wout_ref, bout_ref,
                       y_ref,
                       xg_ref, hacc_ref, lhs_ref):
    T, B, Dp = x_ref.shape
    H = wout_ref.shape[1]
    G = 4 * H

    # ---- loop-invariant broadcast (hoisted) ---------------------------------
    b1b = jnp.broadcast_to(b1_ref[...], (B, G))                    # (B, 4H)

    # ---- layer-0 input projection for ALL timesteps: one big MXU call -------
    x_flat = x_ref[...].reshape(T * B, Dp)
    xg = jnp.dot(x_flat, wih0_ref[...],
                 preferred_element_type=jnp.float32) + b0_ref[...]
    xg_ref[...] = xg.reshape(T, B, G)

    def cell(g, c):
        # i/f/o gate columns were pre-scaled by 0.5 in the wrapper, so
        # sigmoid(orig) == 0.5 * tanh(g) + 0.5 -> ONE tanh over the 4H block.
        t = jnp.tanh(g)
        i = 0.5 * t[:, 0 * H:1 * H] + 0.5
        f = 0.5 * t[:, 1 * H:2 * H] + 0.5
        gg = t[:, 2 * H:3 * H]
        o = 0.5 * t[:, 3 * H:4 * H] + 0.5
        c_new = f * c + i * gg
        h_new = o * jnp.tanh(c_new)
        return h_new, c_new

    zeros = jnp.zeros((B, H), jnp.float32)

    # ---- prologue: layer-0 step 0 (h0[-1] = h1[-1] = 0) ----------------------
    h0_0, c0_0 = cell(xg_ref[0], zeros)
    lhs_ref[:, 0:H] = h0_0
    lhs_ref[:, H:2 * H] = zeros

    # ---- wavefront recurrence: ONE fused matmul per step ---------------------
    #   comb = [h0[t-1] | h1[t-2]] @ [[whh0, wih1], [0, whh1]]
    #        = [ h0[t-1]@whh0  |  h0[t-1]@wih1 + h1[t-2]@whh1 ]
    #   -> layer-0 gates for step t   and   layer-1 gates for step t-1.
    def body(t, carry):
        c0_prev, c1_prev = carry
        comb = jnp.dot(lhs_ref[...], wbig_ref[...],
                       preferred_element_type=jnp.float32)          # (B, 8H)
        h0_new, c0_new = cell(xg_ref[t] + comb[:, :G], c0_prev)     # layer 0, t
        h1_new, c1_new = cell(comb[:, G:] + b1b, c1_prev)           # layer 1, t-1
        hacc_ref[t - 1] = h1_new
        lhs_ref[:, 0:H] = h0_new
        lhs_ref[:, H:2 * H] = h1_new
        return c0_new, c1_new

    _, c1_last = jax.lax.fori_loop(1, T, body, (c0_0, zeros), unroll=True)

    # ---- epilogue: final layer-1 step (uses the [wih1; whh1] half of wbig) ---
    g1 = jnp.dot(lhs_ref[...], wbig_ref[:, G:],
                 preferred_element_type=jnp.float32) + b1b
    h1_fin, _ = cell(g1, c1_last)
    hacc_ref[T - 1] = h1_fin

    # ---- head: tanh + VPU row-scale + lane reduction + masked bias ----------
    out = jnp.tanh(hacc_ref[...])                                   # (T, B, H)
    yh = jnp.sum(out * wout_ref[...], axis=-1)                      # (T, B)
    # mask is 0/1 per (t, b):  (tanh(h)*m) . wout  ==  (tanh(h) . wout) * m
    y_ref[...] = yh * mask_ref[...] + bout_ref[...]


# ----------------------------------------------------------------------------
# Wrapper: layout, mask construction, weight fusion/pre-scaling, pallas_call.
# ----------------------------------------------------------------------------
@jax.jit
def timing_lstm_forward(x, lengths, params):
    """x: (B, T, D) batch-first, lengths: (B,) int32 -> y_hat: (B, T, 1)."""
    B, T, D = x.shape
    H = params["whh0"].shape[0]
    G = 4 * H

    # Pre-scale i/f/o gate columns by 0.5 so the kernel can use one tanh per
    # gate block:  sigmoid(x) == 0.5 * tanh(0.5 * x) + 0.5  (exact identity).
    col_scale = jnp.concatenate(
        [jnp.full((1, H), 0.5, jnp.float32),     # i
         jnp.full((1, H), 0.5, jnp.float32),     # f
         jnp.ones((1, H), jnp.float32),          # g (plain tanh)
         jnp.full((1, H), 0.5, jnp.float32)],    # o
        axis=1)                                                    # (1, 4H)

    wih0_s = params["wih0"] * col_scale
    whh0_s = params["whh0"] * col_scale
    b0_s = params["b0"] * col_scale
    wih1_s = params["wih1"] * col_scale
    whh1_s = params["whh1"] * col_scale
    b1_s = params["b1"] * col_scale

    # Pad the feature dim to a sublane multiple (15 -> 16) with zeros.
    Dp = max(8, ((D + 7) // 8) * 8)
    x_pad = jnp.concatenate(
        [x.astype(jnp.float32), jnp.zeros((B, T, Dp - D), jnp.float32)],
        axis=-1)
    wih0_pad = jnp.concatenate(
        [wih0_s, jnp.zeros((Dp - D, G), jnp.float32)], axis=0)     # (Dp, 4H)

    # Block-stacked recurrent weight for the wavefront-fused per-step matmul.
    wbig = jnp.concatenate(
        [jnp.concatenate([whh0_s, wih1_s], axis=1),
         jnp.concatenate([jnp.zeros((H, G), jnp.float32), whh1_s], axis=1)],
        axis=0)                                                    # (2H, 8H)

    x_tm = jnp.transpose(x_pad, (1, 0, 2))                         # (T, B, Dp)
    mask = (jnp.arange(T)[:, None] < lengths[None, :]).astype(jnp.float32)
    woutT = jnp.transpose(params["wout"])                          # (1, H)
    bout = params["bout"]                                          # (1, 1)

    def const_spec(a):
        nd = a.ndim
        return pl.BlockSpec(a.shape, lambda i, nd=nd: (0,) * nd)

    grid_spec = pltpu.PrefetchScalarGridSpec(
        num_scalar_prefetch=0,
        grid=(1,),   # whole batch in one step (optimal for 1-TC v5e/v6e)
        in_specs=[
            pl.BlockSpec((T, B, Dp), lambda i: (0, 0, 0)),   # x (time-major)
            pl.BlockSpec((T, B), lambda i: (0, 0)),          # mask
            const_spec(wih0_pad),
            const_spec(b0_s),
            const_spec(wbig),
            const_spec(b1_s),
            const_spec(woutT),
            const_spec(bout),
        ],
        out_specs=pl.BlockSpec((T, B), lambda i: (0, 0)),
        scratch_shapes=[
            pltpu.VMEM((T, B, G), jnp.float32),      # precomputed input proj
            pltpu.VMEM((T, B, H), jnp.float32),      # layer-1 hidden states
            pltpu.VMEM((B, 2 * H), jnp.float32),     # [h0 | h1] fused-dot LHS
        ],
    )

    y_tm = pl.pallas_call(
        timing_lstm_kernel,
        out_shape=jax.ShapeDtypeStruct((T, B), jnp.float32),
        grid_spec=grid_spec,
        compiler_params=pltpu.CompilerParams(
            dimension_semantics=("arbitrary",)),
    )(x_tm, mask, wih0_pad, b0_s, wbig, b1_s, woutT, bout)

    return jnp.transpose(y_tm)[:, :, None]                          # (B, T, 1)


# ----------------------------------------------------------------------------
# Pure-JAX reference (unfused, unscaled weights, HIGHEST precision).
# ----------------------------------------------------------------------------
def timing_lstm_reference(x, lengths, params):
    B, T, D = x.shape
    H = params["whh0"].shape[0]
    x_tm = jnp.transpose(x, (1, 0, 2)).astype(jnp.float32)
    mask = (jnp.arange(T)[:, None] < lengths[None, :]).astype(jnp.float32)[..., None]
    hi = jax.lax.Precision.HIGHEST

    def cell(x_in, h, c, wih, whh, b):
        g = (jnp.dot(x_in, wih, precision=hi)
             + jnp.dot(h, whh, precision=hi) + b)
        i = jax.nn.sigmoid(g[:, 0 * H:1 * H])
        f = jax.nn.sigmoid(g[:, 1 * H:2 * H])
        gg = jnp.tanh(g[:, 2 * H:3 * H])
        o = jax.nn.sigmoid(g[:, 3 * H:4 * H])
        c_new = f * c + i * gg
        return o * jnp.tanh(c_new), c_new

    def step(carry, inp):
        h0, c0, h1, c1 = carry
        x_t, m_t = inp
        h0, c0 = cell(x_t, h0, c0, params["wih0"], params["whh0"], params["b0"])
        h1, c1 = cell(h0, h1, c1, params["wih1"], params["whh1"], params["b1"])
        out = jnp.tanh(h1) * m_t
        y = jnp.dot(out, params["wout"], precision=hi) + params["bout"]
        return (h0, c0, h1, c1), y

    zeros = jnp.zeros((B, H), jnp.float32)
    _, ys = jax.lax.scan(step, (zeros, zeros, zeros, zeros), (x_tm, mask))
    return jnp.transpose(ys, (1, 0, 2))


# ----------------------------------------------------------------------------
# Deterministic parameter init (PyTorch-style uniform(-1/sqrt(H), 1/sqrt(H))).
# Weights stored transposed relative to PyTorch: (in_features, 4H) for x @ W.
# ----------------------------------------------------------------------------
def init_params(key, input_dim, hidden):
    k = 1.0 / np.sqrt(hidden)
    keys = jax.random.split(key, 12)

    def u(kk, shape):
        return jax.random.uniform(kk, shape, jnp.float32, -k, k)

    wih0 = u(keys[0], (input_dim, 4 * hidden))
    whh0 = u(keys[1], (hidden, 4 * hidden))
    b0 = u(keys[2], (1, 4 * hidden)) + u(keys[3], (1, 4 * hidden))   # b_ih + b_hh
    wih1 = u(keys[4], (hidden, 4 * hidden))
    whh1 = u(keys[5], (hidden, 4 * hidden))
    b1 = u(keys[6], (1, 4 * hidden)) + u(keys[7], (1, 4 * hidden))
    wout = u(keys[8], (hidden, 1))
    bout = u(keys[9], (1, 1))
    return dict(wih0=wih0, whh0=whh0, b0=b0,
                wih1=wih1, whh1=whh1, b1=b1,
                wout=wout, bout=bout)


if __name__ == "__main__":
    # Small shapes consistent with the module: input_dim=15, 2 LSTM layers.
    # H=128 keeps each gate on a full 128-lane tile; B=16 (sublane multiple).
    B, T, D, H = 16, 10, 15, 128

    key = jax.random.PRNGKey(0)
    kx, kp = jax.random.split(key)
    x = jax.random.normal(kx, (B, T, D), jnp.float32)
    lengths = jnp.array([10, 7, 5, 3, 9, 8, 2, 6, 10, 1, 4, 7, 5, 9, 3, 8],
                        jnp.int32)          # variable sequence lengths
    params = init_params(kp, D, H)

    y_hat = jax.block_until_ready(timing_lstm_forward(x, lengths, params))
    assert y_hat.shape == (B, T, 1), y_hat.shape

    y_ref = jax.block_until_ready(timing_lstm_reference(x, lengths, params))
    np.testing.assert_allclose(np.asarray(y_hat), np.asarray(y_ref),
                               rtol=5e-4, atol=5e-4)

    print("KERNEL_OK")
</pallas_src>

<mosaic_0001>
module attributes {stable_mosaic.version = 11 : i64} {
  func.func @timing_lstm_kernel(%arg0: i32, %arg1: memref<10x16x16xf32, #tpu.memory_space<vmem>>, %arg2: memref<10x16xf32, #tpu.memory_space<vmem>>, %arg3: memref<16x512xf32, #tpu.memory_space<vmem>>, %arg4: memref<1x512xf32, #tpu.memory_space<vmem>>, %arg5: memref<256x1024xf32, #tpu.memory_space<vmem>>, %arg6: memref<1x512xf32, #tpu.memory_space<vmem>>, %arg7: memref<1x128xf32, #tpu.memory_space<vmem>>, %arg8: memref<1x1xf32, #tpu.memory_space<vmem>>, %arg9: memref<10x16xf32, #tpu.memory_space<vmem>>, %arg10: memref<10x16x512xf32, #tpu.memory_space<vmem>>, %arg11: memref<10x16x128xf32, #tpu.memory_space<vmem>>, %arg12: memref<16x256xf32, #tpu.memory_space<vmem>>) attributes {dimension_semantics = [#tpu.dimension_semantics<arbitrary>], iteration_bounds = array<i64: 1>, scalar_prefetch = 0 : i64, scratch_operands = 3 : i64, tpu.core_type = #tpu.core_type<tc>, window_params = [{pipeline_mode = #tpu.pipeline_mode<synchronous>, transform_indices = @transform_0, window_bounds = array<i64: 10, 16, 16>}, {pipeline_mode = #tpu.pipeline_mode<synchronous>, transform_indices = @transform_1, window_bounds = array<i64: 10, 16>}, {pipeline_mode = #tpu.pipeline_mode<synchronous>, transform_indices = @transform_2, window_bounds = array<i64: 16, 512>}, {pipeline_mode = #tpu.pipeline_mode<synchronous>, transform_indices = @transform_3, window_bounds = array<i64: 1, 512>}, {pipeline_mode = #tpu.pipeline_mode<synchronous>, transform_indices = @transform_4, window_bounds = array<i64: 256, 1024>}, {pipeline_mode = #tpu.pipeline_mode<synchronous>, transform_indices = @transform_5, window_bounds = array<i64: 1, 512>}, {pipeline_mode = #tpu.pipeline_mode<synchronous>, transform_indices = @transform_6, window_bounds = array<i64: 1, 128>}, {pipeline_mode = #tpu.pipeline_mode<synchronous>, transform_indices = @transform_7, window_bounds = array<i64: 1, 1>}, {pipeline_mode = #tpu.pipeline_mode<synchronous>, transform_indices = @transform_8, window_bounds = array<i64: 10, 16>}]} {
    %c0 = arith.constant 0 : index
    %c0_0 = arith.constant 0 : index
    %0 = vector.load %arg6[%c0, %c0_0] : memref<1x512xf32, #tpu.memory_space<vmem>>, vector<1x512xf32>
    %1 = vector.shape_cast %0 : vector<1x512xf32> to vector<1x512xf32>
    %2 = vector.broadcast %1 : vector<1x512xf32> to vector<16x512xf32>
    %c0_1 = arith.constant 0 : index
    %c0_2 = arith.constant 0 : index
    %c0_3 = arith.constant 0 : index
    %3 = vector.load %arg1[%c0_1, %c0_2, %c0_3] : memref<10x16x16xf32, #tpu.memory_space<vmem>>, vector<10x16x16xf32>
    %4 = vector.shape_cast %3 : vector<10x16x16xf32> to vector<160x16xf32>
    %c0_4 = arith.constant 0 : index
    %c0_5 = arith.constant 0 : index
    %5 = vector.load %arg3[%c0_4, %c0_5] : memref<16x512xf32, #tpu.memory_space<vmem>>, vector<16x512xf32>
    %cst = arith.constant dense<0.000000e+00> : vector<160x512xf32>
    %6 = tpu.matmul %4, %5, %cst {dimension_numbers = #tpu.dot_dimension_numbers<[1], [0], [0], [1], [0, 0, 1, 1], [], []>} : vector<160x16xf32>, vector<16x512xf32>, vector<160x512xf32> -> vector<160x512xf32>
    %c0_6 = arith.constant 0 : index
    %c0_7 = arith.constant 0 : index
    %7 = vector.load %arg4[%c0_6, %c0_7] : memref<1x512xf32, #tpu.memory_space<vmem>>, vector<1x512xf32>
    %8 = vector.broadcast %7 : vector<1x512xf32> to vector<160x512xf32>
    %9 = arith.addf %6, %8 : vector<160x512xf32>
    %10 = vector.shape_cast %9 : vector<160x512xf32> to vector<10x16x512xf32>
    %c0_8 = arith.constant 0 : index
    %c0_9 = arith.constant 0 : index
    %c0_10 = arith.constant 0 : index
    %11 = vector.load %arg10[%c0_8, %c0_9, %c0_10] : memref<10x16x512xf32, #tpu.memory_space<vmem>>, vector<10x16x512xf32>
    tpu.vector_store %arg10[%c0_8, %c0_9, %c0_10], %10 {strides = array<i32>} : memref<10x16x512xf32, #tpu.memory_space<vmem>>, vector<10x16x512xf32>,
    %cst_11 = arith.constant 0.000000e+00 : f32
    %12 = vector.broadcast %cst_11 : f32 to vector<16x128xf32>
    %c0_12 = arith.constant 0 : index
    %c0_13 = arith.constant 0 : index
    %c0_14 = arith.constant 0 : index
    %13 = vector.load %arg10[%c0_12, %c0_13, %c0_14] : memref<10x16x512xf32, #tpu.memory_space<vmem>>, vector<1x16x512xf32>
    %14 = vector.shape_cast %13 : vector<1x16x512xf32> to vector<16x512xf32>
    %15 = math.tanh %14 : vector<16x512xf32>
    %16 = vector.extract_strided_slice %15 {offsets = [0, 0], sizes = [16, 128], strides = [1, 1]} : vector<16x512xf32> to vector<16x128xf32>
    %cst_15 = arith.constant 5.000000e-01 : f32
    %17 = vector.broadcast %cst_15 : f32 to vector<16x128xf32>
    %18 = arith.mulf %17, %16 : vector<16x128xf32>
    %cst_16 = arith.constant 5.000000e-01 : f32
    %19 = vector.broadcast %cst_16 : f32 to vector<16x128xf32>
    %20 = arith.addf %18, %19 : vector<16x128xf32>
    %21 = vector.extract_strided_slice %15 {offsets = [0, 128], sizes = [16, 128], strides = [1, 1]} : vector<16x512xf32> to vector<16x128xf32>
    %cst_17 = arith.constant 5.000000e-01 : f32
    %22 = vector.broadcast %cst_17 : f32 to vector<16x128xf32>
    %23 = arith.mulf %22, %21 : vector<16x128xf32>
    %cst_18 = arith.constant 5.000000e-01 : f32
    %24 = vector.broadcast %cst_18 : f32 to vector<16x128xf32>
    %25 = arith.addf %23, %24 : vector<16x128xf32>
    %26 = vector.extract_strided_slice %15 {offsets = [0, 256], sizes = [16, 128], strides = [1, 1]} : vector<16x512xf32> to vector<16x128xf32>
    %27 = vector.extract_strided_slice %15 {offsets = [0, 384], sizes = [16, 128], strides = [1, 1]} : vector<16x512xf32> to vector<16x128xf32>
    %cst_19 = arith.constant 5.000000e-01 : f32
    %28 = vector.broadcast %cst_19 : f32 to vector<16x128xf32>
    %29 = arith.mulf %28, %27 : vector<16x128xf32>
    %cst_20 = arith.constant 5.000000e-01 : f32
    %30 = vector.broadcast %cst_20 : f32 to vector<16x128xf32>
    %31 = arith.addf %29, %30 : vector<16x128xf32>
    %32 = arith.mulf %25, %12 : vector<16x128xf32>
    %33 = arith.mulf %20, %26 : vector<16x128xf32>
    %34 = arith.addf %32, %33 : vector<16x128xf32>
    %35 = math.tanh %34 : vector<16x128xf32>
    %36 = arith.mulf %31, %35 : vector<16x128xf32>
    %c0_21 = arith.constant 0 : index
    %c0_22 = arith.constant 0 : index
    %37 = vector.load %arg12[%c0_21, %c0_22] : memref<16x256xf32, #tpu.memory_space<vmem>>, vector<16x128xf32>
    tpu.vector_store %arg12[%c0_21, %c0_22], %36 {strides = array<i32>} : memref<16x256xf32, #tpu.memory_space<vmem>>, vector<16x128xf32>,
    %c0_23 = arith.constant 0 : index
    %c128 = arith.constant 128 : index
    %38 = vector.load %arg12[%c0_23, %c128] : memref<16x256xf32, #tpu.memory_space<vmem>>, vector<16x128xf32>
    tpu.vector_store %arg12[%c0_23, %c128], %12 {strides = array<i32>} : memref<16x256xf32, #tpu.memory_space<vmem>>, vector<16x128xf32>,
    %c1_i32 = arith.constant 1 : i32
    %c0_24 = arith.constant 0 : index
    %c0_25 = arith.constant 0 : index
    %39 = vector.load %arg12[%c0_24, %c0_25] : memref<16x256xf32, #tpu.memory_space<vmem>>, vector<16x256xf32>
    %c0_26 = arith.constant 0 : index
    %c0_27 = arith.constant 0 : index
    %40 = vector.load %arg5[%c0_26, %c0_27] : memref<256x1024xf32, #tpu.memory_space<vmem>>, vector<256x1024xf32>
    %cst_28 = arith.constant dense<0.000000e+00> : vector<16x1024xf32>
    %41 = tpu.matmul %39, %40, %cst_28 {dimension_numbers = #tpu.dot_dimension_numbers<[1], [0], [0], [1], [0, 0, 1, 1], [], []>} : vector<16x256xf32>, vector<256x1024xf32>, vector<16x1024xf32> -> vector<16x1024xf32>
    %42 = arith.index_cast %c1_i32 : i32 to index
    %c0_29 = arith.constant 0 : index
    %c0_30 = arith.constant 0 : index
    %43 = vector.load %arg10[%42, %c0_29, %c0_30] : memref<10x16x512xf32, #tpu.memory_space<vmem>>, vector<1x16x512xf32>
    %44 = vector.shape_cast %43 : vector<1x16x512xf32> to vector<16x512xf32>
    %45 = vector.extract_strided_slice %41 {offsets = [0, 0], sizes = [16, 512], strides = [1, 1]} : vector<16x1024xf32> to vector<16x512xf32>
    %46 = arith.addf %44, %45 : vector<16x512xf32>
    %47 = math.tanh %46 : vector<16x512xf32>
    %48 = vector.extract_strided_slice %47 {offsets = [0, 0], sizes = [16, 128], strides = [1, 1]} : vector<16x512xf32> to vector<16x128xf32>
    %cst_31 = arith.constant 5.000000e-01 : f32
    %49 = vector.broadcast %cst_31 : f32 to vector<16x128xf32>
    %50 = arith.mulf %49, %48 : vector<16x128xf32>
    %cst_32 = arith.constant 5.000000e-01 : f32
    %51 = vector.broadcast %cst_32 : f32 to vector<16x128xf32>
    %52 = arith.addf %50, %51 : vector<16x128xf32>
    %53 = vector.extract_strided_slice %47 {offsets = [0, 128], sizes = [16, 128], strides = [1, 1]} : vector<16x512xf32> to vector<16x128xf32>
    %cst_33 = arith.constant 5.000000e-01 : f32
    %54 = vector.broadcast %cst_33 : f32 to vector<16x128xf32>
    %55 = arith.mulf %54, %53 : vector<16x128xf32>
    %cst_34 = arith.constant 5.000000e-01 : f32
    %56 = vector.broadcast %cst_34 : f32 to vector<16x128xf32>
    %57 = arith.addf %55, %56 : vector<16x128xf32>
    %58 = vector.extract_strided_slice %47 {offsets = [0, 256], sizes = [16, 128], strides = [1, 1]} : vector<16x512xf32> to vector<16x128xf32>
    %59 = vector.extract_strided_slice %47 {offsets = [0, 384], sizes = [16, 128], strides = [1, 1]} : vector<16x512xf32> to vector<16x128xf32>
    %cst_35 = arith.constant 5.000000e-01 : f32
    %60 = vector.broadcast %cst_35 : f32 to vector<16x128xf32>
    %61 = arith.mulf %60, %59 : vector<16x128xf32>
    %cst_36 = arith.constant 5.000000e-01 : f32
    %62 = vector.broadcast %cst_36 : f32 to vector<16x128xf32>
    %63 = arith.addf %61, %62 : vector<16x128xf32>
    %64 = arith.mulf %57, %34 : vector<16x128xf32>
    %65 = arith.mulf %52, %58 : vector<16x128xf32>
    %66 = arith.addf %64, %65 : vector<16x128xf32>
    %67 = math.tanh %66 : vector<16x128xf32>
    %68 = arith.mulf %63, %67 : vector<16x128xf32>
    %69 = vector.extract_strided_slice %41 {offsets = [0, 512], sizes = [16, 512], strides = [1, 1]} : vector<16x1024xf32> to vector<16x512xf32>
    %70 = arith.addf %69, %2 : vector<16x512xf32>
    %71 = math.tanh %70 : vector<16x512xf32>
    %72 = vector.extract_strided_slice %71 {offsets = [0, 0], sizes = [16, 128], strides = [1, 1]} : vector<16x512xf32> to vector<16x128xf32>
    %cst_37 = arith.constant 5.000000e-01 : f32
    %73 = vector.broadcast %cst_37 : f32 to vector<16x128xf32>
    %74 = arith.mulf %73, %72 : vector<16x128xf32>
    %cst_38 = arith.constant 5.000000e-01 : f32
    %75 = vector.broadcast %cst_38 : f32 to vector<16x128xf32>
    %76 = arith.addf %74, %75 : vector<16x128xf32>
    %77 = vector.extract_strided_slice %71 {offsets = [0, 128], sizes = [16, 128], strides = [1, 1]} : vector<16x512xf32> to vector<16x128xf32>
    %cst_39 = arith.constant 5.000000e-01 : f32
    %78 = vector.broadcast %cst_39 : f32 to vector<16x128xf32>
    %79 = arith.mulf %78, %77 : vector<16x128xf32>
    %cst_40 = arith.constant 5.000000e-01 : f32
    %80 = vector.broadcast %cst_40 : f32 to vector<16x128xf32>
    %81 = arith.addf %79, %80 : vector<16x128xf32>
    %82 = vector.extract_strided_slice %71 {offsets = [0, 256], sizes = [16, 128], strides = [1, 1]} : vector<16x512xf32> to vector<16x128xf32>
    %83 = vector.extract_strided_slice %71 {offsets = [0, 384], sizes = [16, 128], strides = [1, 1]} : vector<16x512xf32> to vector<16x128xf32>
    %cst_41 = arith.constant 5.000000e-01 : f32
    %84 = vector.broadcast %cst_41 : f32 to vector<16x128xf32>
    %85 = arith.mulf %84, %83 : vector<16x128xf32>
    %cst_42 = arith.constant 5.000000e-01 : f32
    %86 = vector.broadcast %cst_42 : f32 to vector<16x128xf32>
    %87 = arith.addf %85, %86 : vector<16x128xf32>
    %88 = arith.mulf %81, %12 : vector<16x128xf32>
    %89 = arith.mulf %76, %82 : vector<16x128xf32>
    %90 = arith.addf %88, %89 : vector<16x128xf32>
    %91 = math.tanh %90 : vector<16x128xf32>
    %92 = arith.mulf %87, %91 : vector<16x128xf32>
    %c1_i32_43 = arith.constant 1 : i32
    %93 = arith.subi %c1_i32, %c1_i32_43 : i32
    %94 = arith.index_cast %93 : i32 to index
    %c0_44 = arith.constant 0 : index
    %c0_45 = arith.constant 0 : index
    %95 = vector.load %arg11[%94, %c0_44, %c0_45] : memref<10x16x128xf32, #tpu.memory_space<vmem>>, vector<1x16x128xf32>
    %96 = vector.shape_cast %95 : vector<1x16x128xf32> to vector<16x128xf32>
    %97 = vector.shape_cast %92 : vector<16x128xf32> to vector<1x16x128xf32>
    tpu.vector_store %arg11[%94, %c0_44, %c0_45], %97 {strides = array<i32>} : memref<10x16x128xf32, #tpu.memory_space<vmem>>, vector<1x16x128xf32>,
    %c0_46 = arith.constant 0 : index
    %c0_47 = arith.constant 0 : index
    %98 = vector.load %arg12[%c0_46, %c0_47] : memref<16x256xf32, #tpu.memory_space<vmem>>, vector<16x128xf32>
    tpu.vector_store %arg12[%c0_46, %c0_47], %68 {strides = array<i32>} : memref<16x256xf32, #tpu.memory_space<vmem>>, vector<16x128xf32>,
    %c0_48 = arith.constant 0 : index
    %c128_49 = arith.constant 128 : index
    %99 = vector.load %arg12[%c0_48, %c128_49] : memref<16x256xf32, #tpu.memory_space<vmem>>, vector<16x128xf32>
    tpu.vector_store %arg12[%c0_48, %c128_49], %92 {strides = array<i32>} : memref<16x256xf32, #tpu.memory_space<vmem>>, vector<16x128xf32>,
    %c2_i32 = arith.constant 2 : i32
    %c0_50 = arith.constant 0 : index
    %c0_51 = arith.constant 0 : index
    %100 = vector.load %arg12[%c0_50, %c0_51] : memref<16x256xf32, #tpu.memory_space<vmem>>, vector<16x256xf32>
    %c0_52 = arith.constant 0 : index
    %c0_53 = arith.constant 0 : index
    %101 = vector.load %arg5[%c0_52, %c0_53] : memref<256x1024xf32, #tpu.memory_space<vmem>>, vector<256x1024xf32>
    %cst_54 = arith.constant dense<0.000000e+00> : vector<16x1024xf32>
    %102 = tpu.matmul %100, %101, %cst_54 {dimension_numbers = #tpu.dot_dimension_numbers<[1], [0], [0], [1], [0, 0, 1, 1], [], []>} : vector<16x256xf32>, vector<256x1024xf32>, vector<16x1024xf32> -> vector<16x1024xf32>
    %103 = arith.index_cast %c2_i32 : i32 to index
    %c0_55 = arith.constant 0 : index
    %c0_56 = arith.constant 0 : index
    %104 = vector.load %arg10[%103, %c0_55, %c0_56] : memref<10x16x512xf32, #tpu.memory_space<vmem>>, vector<1x16x512xf32>
    %105 = vector.shape_cast %104 : vector<1x16x512xf32> to vector<16x512xf32>
    %106 = vector.extract_strided_slice %102 {offsets = [0, 0], sizes = [16, 512], strides = [1, 1]} : vector<16x1024xf32> to vector<16x512xf32>
    %107 = arith.addf %105, %106 : vector<16x512xf32>
    %108 = math.tanh %107 : vector<16x512xf32>
    %109 = vector.extract_strided_slice %108 {offsets = [0, 0], sizes = [16, 128], strides = [1, 1]} : vector<16x512xf32> to vector<16x128xf32>
    %cst_57 = arith.constant 5.000000e-01 : f32
    %110 = vector.broadcast %cst_57 : f32 to vector<16x128xf32>
    %111 = arith.mulf %110, %109 : vector<16x128xf32>
    %cst_58 = arith.constant 5.000000e-01 : f32
    %112 = vector.broadcast %cst_58 : f32 to vector<16x128xf32>
    %113 = arith.addf %111, %112 : vector<16x128xf32>
    %114 = vector.extract_strided_slice %108 {offsets = [0, 128], sizes = [16, 128], strides = [1, 1]} : vector<16x512xf32> to vector<16x128xf32>
    %cst_59 = arith.constant 5.000000e-01 : f32
    %115 = vector.broadcast %cst_59 : f32 to vector<16x128xf32>
    %116 = arith.mulf %115, %114 : vector<16x128xf32>
    %cst_60 = arith.constant 5.000000e-01 : f32
    %117 = vector.broadcast %cst_60 : f32 to vector<16x128xf32>
    %118 = arith.addf %116, %117 : vector<16x128xf32>
    %119 = vector.extract_strided_slice %108 {offsets = [0, 256], sizes = [16, 128], strides = [1, 1]} : vector<16x512xf32> to vector<16x128xf32>
    %120 = vector.extract_strided_slice %108 {offsets = [0, 384], sizes = [16, 128], strides = [1, 1]} : vector<16x512xf32> to vector<16x128xf32>
    %cst_61 = arith.constant 5.000000e-01 : f32
    %121 = vector.broadcast %cst_61 : f32 to vector<16x128xf32>
    %122 = arith.mulf %121, %120 : vector<16x128xf32>
    %cst_62 = arith.constant 5.000000e-01 : f32
    %123 = vector.broadcast %cst_62 : f32 to vector<16x128xf32>
    %124 = arith.addf %122, %123 : vector<16x128xf32>
    %125 = arith.mulf %118, %66 : vector<16x128xf32>
    %126 = arith.mulf %113, %119 : vector<16x128xf32>
    %127 = arith.addf %125, %126 : vector<16x128xf32>
    %128 = math.tanh %127 : vector<16x128xf32>
    %129 = arith.mulf %124, %128 : vector<16x128xf32>
    %130 = vector.extract_strided_slice %102 {offsets = [0, 512], sizes = [16, 512], strides = [1, 1]} : vector<16x1024xf32> to vector<16x512xf32>
    %131 = arith.addf %130, %2 : vector<16x512xf32>
    %132 = math.tanh %131 : vector<16x512xf32>
    %133 = vector.extract_strided_slice %132 {offsets = [0, 0], sizes = [16, 128], strides = [1, 1]} : vector<16x512xf32> to vector<16x128xf32>
    %cst_63 = arith.constant 5.000000e-01 : f32
    %134 = vector.broadcast %cst_63 : f32 to vector<16x128xf32>
    %135 = arith.mulf %134, %133 : vector<16x128xf32>
    %cst_64 = arith.constant 5.000000e-01 : f32
    %136 = vector.broadcast %cst_64 : f32 to vector<16x128xf32>
    %137 = arith.addf %135, %136 : vector<16x128xf32>
    %138 = vector.extract_strided_slice %132 {offsets = [0, 128], sizes = [16, 128], strides = [1, 1]} : vector<16x512xf32> to vector<16x128xf32>
    %cst_65 = arith.constant 5.000000e-01 : f32
    %139 = vector.broadcast %cst_65 : f32 to vector<16x128xf32>
    %140 = arith.mulf %139, %138 : vector<16x128xf32>
    %cst_66 = arith.constant 5.000000e-01 : f32
    %141 = vector.broadcast %cst_66 : f32 to vector<16x128xf32>
    %142 = arith.addf %140, %141 : vector<16x128xf32>
    %143 = vector.extract_strided_slice %132 {offsets = [0, 256], sizes = [16, 128], strides = [1, 1]} : vector<16x512xf32> to vector<16x128xf32>
    %144 = vector.extract_strided_slice %132 {offsets = [0, 384], sizes = [16, 128], strides = [1, 1]} : vector<16x512xf32> to vector<16x128xf32>
    %cst_67 = arith.constant 5.000000e-01 : f32
    %145 = vector.broadcast %cst_67 : f32 to vector<16x128xf32>
    %146 = arith.mulf %145, %144 : vector<16x128xf32>
    %cst_68 = arith.constant 5.000000e-01 : f32
    %147 = vector.broadcast %cst_68 : f32 to vector<16x128xf32>
    %148 = arith.addf %146, %147 : vector<16x128xf32>
    %149 = arith.mulf %142, %90 : vector<16x128xf32>
    %150 = arith.mulf %137, %143 : vector<16x128xf32>
    %151 = arith.addf %149, %150 : vector<16x128xf32>
    %152 = math.tanh %151 : vector<16x128xf32>
    %153 = arith.mulf %148, %152 : vector<16x128xf32>
    %c1_i32_69 = arith.constant 1 : i32
    %154 = arith.subi %c2_i32, %c1_i32_69 : i32
    %155 = arith.index_cast %154 : i32 to index
    %c0_70 = arith.constant 0 : index
    %c0_71 = arith.constant 0 : index
    %156 = vector.load %arg11[%155, %c0_70, %c0_71] : memref<10x16x128xf32, #tpu.memory_space<vmem>>, vector<1x16x128xf32>
    %157 = vector.shape_cast %156 : vector<1x16x128xf32> to vector<16x128xf32>
    %158 = vector.shape_cast %153 : vector<16x128xf32> to vector<1x16x128xf32>
    tpu.vector_store %arg11[%155, %c0_70, %c0_71], %158 {strides = array<i32>} : memref<10x16x128xf32, #tpu.memory_space<vmem>>, vector<1x16x128xf32>,
    %c0_72 = arith.constant 0 : index
    %c0_73 = arith.constant 0 : index
    %159 = vector.load %arg12[%c0_72, %c0_73] : memref<16x256xf32, #tpu.memory_space<vmem>>, vector<16x128xf32>
    tpu.vector_store %arg12[%c0_72, %c0_73], %129 {strides = array<i32>} : memref<16x256xf32, #tpu.memory_space<vmem>>, vector<16x128xf32>,
    %c0_74 = arith.constant 0 : index
    %c128_75 = arith.constant 128 : index
    %160 = vector.load %arg12[%c0_74, %c128_75] : memref<16x256xf32, #tpu.memory_space<vmem>>, vector<16x128xf32>
    tpu.vector_store %arg12[%c0_74, %c128_75], %153 {strides = array<i32>} : memref<16x256xf32, #tpu.memory_space<vmem>>, vector<16x128xf32>,
    %c3_i32 = arith.constant 3 : i32
    %c0_76 = arith.constant 0 : index
    %c0_77 = arith.constant 0 : index
    %161 = vector.load %arg12[%c0_76, %c0_77] : memref<16x256xf32, #tpu.memory_space<vmem>>, vector<16x256xf32>
    %c0_78 = arith.constant 0 : index
    %c0_79 = arith.constant 0 : index
    %162 = vector.load %arg5[%c0_78, %c0_79] : memref<256x1024xf32, #tpu.memory_space<vmem>>, vector<256x1024xf32>
    %cst_80 = arith.constant dense<0.000000e+00> : vector<16x1024xf32>
    %163 = tpu.matmul %161, %162, %cst_80 {dimension_numbers = #tpu.dot_dimension_numbers<[1], [0], [0], [1], [0, 0, 1, 1], [], []>} : vector<16x256xf32>, vector<256x1024xf32>, vector<16x1024xf32> -> vector<16x1024xf32>
    %164 = arith.index_cast %c3_i32 : i32 to index
    %c0_81 = arith.constant 0 : index
    %c0_82 = arith.constant 0 : index
    %165 = vector.load %arg10[%164, %c0_81, %c0_82] : memref<10x16x512xf32, #tpu.memory_space<vmem>>, vector<1x16x512xf32>
    %166 = vector.shape_cast %165 : vector<1x16x512xf32> to vector<16x512xf32>
    %167 = vector.extract_strided_slice %163 {offsets = [0, 0], sizes = [16, 512], strides = [1, 1]} : vector<16x1024xf32> to vector<16x512xf32>
    %168 = arith.addf %166, %167 : vector<16x512xf32>
    %169 = math.tanh %168 : vector<16x512xf32>
    %170 = vector.extract_strided_slice %169 {offsets = [0, 0], sizes = [16, 128], strides = [1, 1]} : vector<16x512xf32> to vector<16x128xf32>
    %cst_83 = arith.constant 5.000000e-01 : f32
    %171 = vector.broadcast %cst_83 : f32 to vector<16x128xf32>
    %172 = arith.mulf %171, %170 : vector<16x128xf32>
    %cst_84 = arith.constant 5.000000e-01 : f32
    %173 = vector.broadcast %cst_84 : f32 to vector<16x128xf32>
    %174 = arith.addf %172, %173 : vector<16x128xf32>
    %175 = vector.extract_strided_slice %169 {offsets = [0, 128], sizes = [16, 128], strides = [1, 1]} : vector<16x512xf32> to vector<16x128xf32>
    %cst_85 = arith.constant 5.000000e-01 : f32
    %176 = vector.broadcast %cst_85 : f32 to vector<16x128xf32>
    %177 = arith.mulf %176, %175 : vector<16x128xf32>
    %cst_86 = arith.constant 5.000000e-01 : f32
    %178 = vector.broadcast %cst_86 : f32 to vector<16x128xf32>
    %179 = arith.addf %177, %178 : vector<16x128xf32>
    %180 = vector.extract_strided_slice %169 {offsets = [0, 256], sizes = [16, 128], strides = [1, 1]} : vector<16x512xf32> to vector<16x128xf32>
    %181 = vector.extract_strided_slice %169 {offsets = [0, 384], sizes = [16, 128], strides = [1, 1]} : vector<16x512xf32> to vector<16x128xf32>
    %cst_87 = arith.constant 5.000000e-01 : f32
    %182 = vector.broadcast %cst_87 : f32 to vector<16x128xf32>
    %183 = arith.mulf %182, %181 : vector<16x128xf32>
    %cst_88 = arith.constant 5.000000e-01 : f32
    %184 = vector.broadcast %cst_88 : f32 to vector<16x128xf32>
    %185 = arith.addf %183, %184 : vector<16x128xf32>
    %186 = arith.mulf %179, %127 : vector<16x128xf32>
    %187 = arith.mulf %174, %180 : vector<16x128xf32>
    %188 = arith.addf %186, %187 : vector<16x128xf32>
    %189 = math.tanh %188 : vector<16x128xf32>
    %190 = arith.mulf %185, %189 : vector<16x128xf32>
    %191 = vector.extract_strided_slice %163 {offsets = [0, 512], sizes = [16, 512], strides = [1, 1]} : vector<16x1024xf32> to vector<16x512xf32>
    %192 = arith.addf %191, %2 : vector<16x512xf32>
    %193 = math.tanh %192 : vector<16x512xf32>
    %194 = vector.extract_strided_slice %193 {offsets = [0, 0], sizes = [16, 128], strides = [1, 1]} : vector<16x512xf32> to vector<16x128xf32>
    %cst_89 = arith.constant 5.000000e-01 : f32
    %195 = vector.broadcast %cst_89 : f32 to vector<16x128xf32>
    %196 = arith.mulf %195, %194 : vector<16x128xf32>
    %cst_90 = arith.constant 5.000000e-01 : f32
    %197 = vector.broadcast %cst_90 : f32 to vector<16x128xf32>
    %198 = arith.addf %196, %197 : vector<16x128xf32>
    %199 = vector.extract_strided_slice %193 {offsets = [0, 128], sizes = [16, 128], strides = [1, 1]} : vector<16x512xf32> to vector<16x128xf32>
    %cst_91 = arith.constant 5.000000e-01 : f32
    %200 = vector.broadcast %cst_91 : f32 to vector<16x128xf32>
    %201 = arith.mulf %200, %199 : vector<16x128xf32>
    %cst_92 = arith.constant 5.000000e-01 : f32
    %202 = vector.broadcast %cst_92 : f32 to vector<16x128xf32>
    %203 = arith.addf %201, %202 : vector<16x128xf32>
    %204 = vector.extract_strided_slice %193 {offsets = [0, 256], sizes = [16, 128], strides = [1, 1]} : vector<16x512xf32> to vector<16x128xf32>
    %205 = vector.extract_strided_slice %193 {offsets = [0, 384], sizes = [16, 128], strides = [1, 1]} : vector<16x512xf32> to vector<16x128xf32>
    %cst_93 = arith.constant 5.000000e-01 : f32
    %206 = vector.broadcast %cst_93 : f32 to vector<16x128xf32>
    %207 = arith.mulf %206, %205 : vector<16x128xf32>
    %cst_94 = arith.constant 5.000000e-01 : f32
    %208 = vector.broadcast %cst_94 : f32 to vector<16x128xf32>
    %209 = arith.addf %207, %208 : vector<16x128xf32>
    %210 = arith.mulf %203, %151 : vector<16x128xf32>
    %211 = arith.mulf %198, %204 : vector<16x128xf32>
    %212 = arith.addf %210, %211 : vector<16x128xf32>
    %213 = math.tanh %212 : vector<16x128xf32>
    %214 = arith.mulf %209, %213 : vector<16x128xf32>
    %c1_i32_95 = arith.constant 1 : i32
    %215 = arith.subi %c3_i32, %c1_i32_95 : i32
    %216 = arith.index_cast %215 : i32 to index
    %c0_96 = arith.constant 0 : index
    %c0_97 = arith.constant 0 : index
    %217 = vector.load %arg11[%216, %c0_96, %c0_97] : memref<10x16x128xf32, #tpu.memory_space<vmem>>, vector<1x16x128xf32>
    %218 = vector.shape_cast %217 : vector<1x16x128xf32> to vector<16x128xf32>
    %219 = vector.shape_cast %214 : vector<16x128xf32> to vector<1x16x128xf32>
    tpu.vector_store %arg11[%216, %c0_96, %c0_97], %219 {strides = array<i32>} : memref<10x16x128xf32, #tpu.memory_space<vmem>>, vector<1x16x128xf32>,
    %c0_98 = arith.constant 0 : index
    %c0_99 = arith.constant 0 : index
    %220 = vector.load %arg12[%c0_98, %c0_99] : memref<16x256xf32, #tpu.memory_space<vmem>>, vector<16x128xf32>
    tpu.vector_store %arg12[%c0_98, %c0_99], %190 {strides = array<i32>} : memref<16x256xf32, #tpu.memory_space<vmem>>, vector<16x128xf32>,
    %c0_100 = arith.constant 0 : index
    %c128_101 = arith.constant 128 : index
    %221 = vector.load %arg12[%c0_100, %c128_101] : memref<16x256xf32, #tpu.memory_space<vmem>>, vector<16x128xf32>
    tpu.vector_store %arg12[%c0_100, %c128_101], %214 {strides = array<i32>} : memref<16x256xf32, #tpu.memory_space<vmem>>, vector<16x128xf32>,
    %c4_i32 = arith.constant 4 : i32
    %c0_102 = arith.constant 0 : index
    %c0_103 = arith.constant 0 : index
    %222 = vector.load %arg12[%c0_102, %c0_103] : memref<16x256xf32, #tpu.memory_space<vmem>>, vector<16x256xf32>
    %c0_104 = arith.constant 0 : index
    %c0_105 = arith.constant 0 : index
    %223 = vector.load %arg5[%c0_104, %c0_105] : memref<256x1024xf32, #tpu.memory_space<vmem>>, vector<256x1024xf32>
    %cst_106 = arith.constant dense<0.000000e+00> : vector<16x1024xf32>
    %224 = tpu.matmul %222, %223, %cst_106 {dimension_numbers = #tpu.dot_dimension_numbers<[1], [0], [0], [1], [0, 0, 1, 1], [], []>} : vector<16x256xf32>, vector<256x1024xf32>, vector<16x1024xf32> -> vector<16x1024xf32>
    %225 = arith.index_cast %c4_i32 : i32 to index
    %c0_107 = arith.constant 0 : index
    %c0_108 = arith.constant 0 : index
    %226 = vector.load %arg10[%225, %c0_107, %c0_108] : memref<10x16x512xf32, #tpu.memory_space<vmem>>, vector<1x16x512xf32>
    %227 = vector.shape_cast %226 : vector<1x16x512xf32> to vector<16x512xf32>
    %228 = vector.extract_strided_slice %224 {offsets = [0, 0], sizes = [16, 512], strides = [1, 1]} : vector<16x1024xf32> to vector<16x512xf32>
    %229 = arith.addf %227, %228 : vector<16x512xf32>
    %230 = math.tanh %229 : vector<16x512xf32>
    %231 = vector.extract_strided_slice %230 {offsets = [0, 0], sizes = [16, 128], strides = [1, 1]} : vector<16x512xf32> to vector<16x128xf32>
    %cst_109 = arith.constant 5.000000e-01 : f32
    %232 = vector.broadcast %cst_109 : f32 to vector<16x128xf32>
    %233 = arith.mulf %232, %231 : vector<16x128xf32>
    %cst_110 = arith.constant 5.000000e-01 : f32
    %234 = vector.broadcast %cst_110 : f32 to vector<16x128xf32>
    %235 = arith.addf %233, %234 : vector<16x128xf32>
    %236 = vector.extract_strided_slice %230 {offsets = [0, 128], sizes = [16, 128], strides = [1, 1]} : vector<16x512xf32> to vector<16x128xf32>
    %cst_111 = arith.constant 5.000000e-01 : f32
    %237 = vector.broadcast %cst_111 : f32 to vector<16x128xf32>
    %238 = arith.mulf %237, %236 : vector<16x128xf32>
    %cst_112 = arith.constant 5.000000e-01 : f32
    %239 = vector.broadcast %cst_112 : f32 to vector<16x128xf32>
    %240 = arith.addf %238, %239 : vector<16x128xf32>
    %241 = vector.extract_strided_slice %230 {offsets = [0, 256], sizes = [16, 128], strides = [1, 1]} : vector<16x512xf32> to vector<16x128xf32>
    %242 = vector.extract_strided_slice %230 {offsets = [0, 384], sizes = [16, 128], strides = [1, 1]} : vector<16x512xf32> to vector<16x128xf32>
    %cst_113 = arith.constant 5.000000e-01 : f32
    %243 = vector.broadcast %cst_113 : f32 to vector<16x128xf32>
    %244 = arith.mulf %243, %242 : vector<16x128xf32>
    %cst_114 = arith.constant 5.000000e-01 : f32
    %245 = vector.broadcast %cst_114 : f32 to vector<16x128xf32>
    %246 = arith.addf %244, %245 : vector<16x128xf32>
    %247 = arith.mulf %240, %188 : vector<16x128xf32>
    %248 = arith.mulf %235, %241 : vector<16x128xf32>
    %249 = arith.addf %247, %248 : vector<16x128xf32>
    %250 = math.tanh %249 : vector<16x128xf32>
    %251 = arith.mulf %246, %250 : vector<16x128xf32>
    %252 = vector.extract_strided_slice %224 {offsets = [0, 512], sizes = [16, 512], strides = [1, 1]} : vector<16x1024xf32> to vector<16x512xf32>
    %253 = arith.addf %252, %2 : vector<16x512xf32>
    %254 = math.tanh %253 : vector<16x512xf32>
    %255 = vector.extract_strided_slice %254 {offsets = [0, 0], sizes = [16, 128], strides = [1, 1]} : vector<16x512xf32> to vector<16x128xf32>
    %cst_115 = arith.constant 5.000000e-01 : f32
    %256 = vector.broadcast %cst_115 : f32 to vector<16x128xf32>
    %257 = arith.mulf %256, %255 : vector<16x128xf32>
    %cst_116 = arith.constant 5.000000e-01 : f32
    %258 = vector.broadcast %cst_116 : f32 to vector<16x128xf32>
    %259 = arith.addf %257, %258 : vector<16x128xf32>
    %260 = vector.extract_strided_slice %254 {offsets = [0, 128], sizes = [16, 128], strides = [1, 1]} : vector<16x512xf32> to vector<16x128xf32>
    %cst_117 = arith.constant 5.000000e-01 : f32
    %261 = vector.broadcast %cst_117 : f32 to vector<16x128xf32>
    %262 = arith.mulf %261, %260 : vector<16x128xf32>
    %cst_118 = arith.constant 5.000000e-01 : f32
    %263 = vector.broadcast %cst_118 : f32 to vector<16x128xf32>
    %264 = arith.addf %262, %263 : vector<16x128xf32>
    %265 = vector.extract_strided_slice %254 {offsets = [0, 256], sizes = [16, 128], strides = [1, 1]} : vector<16x512xf32> to vector<16x128xf32>
    %266 = vector.extract_strided_slice %254 {offsets = [0, 384], sizes = [16, 128], strides = [1, 1]} : vector<16x512xf32> to vector<16x128xf32>
    %cst_119 = arith.constant 5.000000e-01 : f32
    %267 = vector.broadcast %cst_119 : f32 to vector<16x128xf32>
    %268 = arith.mulf %267, %266 : vector<16x128xf32>
    %cst_120 = arith.constant 5.000000e-01 : f32
    %269 = vector.broadcast %cst_120 : f32 to vector<16x128xf32>
    %270 = arith.addf %268, %269 : vector<16x128xf32>
    %271 = arith.mulf %264, %212 : vector<16x128xf32>
    %272 = arith.mulf %259, %265 : vector<16x128xf32>
    %273 = arith.addf %271, %272 : vector<16x128xf32>
    %274 = math.tanh %273 : vector<16x128xf32>
    %275 = arith.mulf %270, %274 : vector<16x128xf32>
    %c1_i32_121 = arith.constant 1 : i32
    %276 = arith.subi %c4_i32, %c1_i32_121 : i32
    %277 = arith.index_cast %276 : i32 to index
    %c0_122 = arith.constant 0 : index
    %c0_123 = arith.constant 0 : index
    %278 = vector.load %arg11[%277, %c0_122, %c0_123] : memref<10x16x128xf32, #tpu.memory_space<vmem>>, vector<1x16x128xf32>
    %279 = vector.shape_cast %278 : vector<1x16x128xf32> to vector<16x128xf32>
    %280 = vector.shape_cast %275 : vector<16x128xf32> to vector<1x16x128xf32>
    tpu.vector_store %arg11[%277, %c0_122, %c0_123], %280 {strides = array<i32>} : memref<10x16x128xf32, #tpu.memory_space<vmem>>, vector<1x16x128xf32>,
    %c0_124 = arith.constant 0 : index
    %c0_125 = arith.constant 0 : index
    %281 = vector.load %arg12[%c0_124, %c0_125] : memref<16x256xf32, #tpu.memory_space<vmem>>, vector<16x128xf32>
    tpu.vector_store %arg12[%c0_124, %c0_125], %251 {strides = array<i32>} : memref<16x256xf32, #tpu.memory_space<vmem>>, vector<16x128xf32>,
    %c0_126 = arith.constant 0 : index
    %c128_127 = arith.constant 128 : index
    %282 = vector.load %arg12[%c0_126, %c128_127] : memref<16x256xf32, #tpu.memory_space<vmem>>, vector<16x128xf32>
    tpu.vector_store %arg12[%c0_126, %c128_127], %275 {strides = array<i32>} : memref<16x256xf32, #tpu.memory_space<vmem>>, vector<16x128xf32>,
    %c5_i32 = arith.constant 5 : i32
    %c0_128 = arith.constant 0 : index
    %c0_129 = arith.constant 0 : index
    %283 = vector.load %arg12[%c0_128, %c0_129] : memref<16x256xf32, #tpu.memory_space<vmem>>, vector<16x256xf32>
    %c0_130 = arith.constant 0 : index
    %c0_131 = arith.constant 0 : index
    %284 = vector.load %arg5[%c0_130, %c0_131] : memref<256x1024xf32, #tpu.memory_space<vmem>>, vector<256x1024xf32>
    %cst_132 = arith.constant dense<0.000000e+00> : vector<16x1024xf32>
    %285 = tpu.matmul %283, %284, %cst_132 {dimension_numbers = #tpu.dot_dimension_numbers<[1], [0], [0], [1], [0, 0, 1, 1], [], []>} : vector<16x256xf32>, vector<256x1024xf32>, vector<16x1024xf32> -> vector<16x1024xf32>
    %286 = arith.index_cast %c5_i32 : i32 to index
    %c0_133 = arith.constant 0 : index
    %c0_134 = arith.constant 0 : index
    %287 = vector.load %arg10[%286, %c0_133, %c0_134] : memref<10x16x512xf32, #tpu.memory_space<vmem>>, vector<1x16x512xf32>
    %288 = vector.shape_cast %287 : vector<1x16x512xf32> to vector<16x512xf32>
    %289 = vector.extract_strided_slice %285 {offsets = [0, 0], sizes = [16, 512], strides = [1, 1]} : vector<16x1024xf32> to vector<16x512xf32>
    %290 = arith.addf %288, %289 : vector<16x512xf32>
    %291 = math.tanh %290 : vector<16x512xf32>
    %292 = vector.extract_strided_slice %291 {offsets = [0, 0], sizes = [16, 128], strides = [1, 1]} : vector<16x512xf32> to vector<16x128xf32>
    %cst_135 = arith.constant 5.000000e-01 : f32
    %293 = vector.broadcast %cst_135 : f32 to vector<16x128xf32>
    %294 = arith.mulf %293, %292 : vector<16x128xf32>
    %cst_136 = arith.constant 5.000000e-01 : f32
    %295 = vector.broadcast %cst_136 : f32 to vector<16x128xf32>
    %296 = arith.addf %294, %295 : vector<16x128xf32>
    %297 = vector.extract_strided_slice %291 {offsets = [0, 128], sizes = [16, 128], strides = [1, 1]} : vector<16x512xf32> to vector<16x128xf32>
    %cst_137 = arith.constant 5.000000e-01 : f32
    %298 = vector.broadcast %cst_137 : f32 to vector<16x128xf32>
    %299 = arith.mulf %298, %297 : vector<16x128xf32>
    %cst_138 = arith.constant 5.000000e-01 : f32
    %300 = vector.broadcast %cst_138 : f32 to vector<16x128xf32>
    %301 = arith.addf %299, %300 : vector<16x128xf32>
    %302 = vector.extract_strided_slice %291 {offsets = [0, 256], sizes = [16, 128], strides = [1, 1]} : vector<16x512xf32> to vector<16x128xf32>
    %303 = vector.extract_strided_slice %291 {offsets = [0, 384], sizes = [16, 128], strides = [1, 1]} : vector<16x512xf32> to vector<16x128xf32>
    %cst_139 = arith.constant 5.000000e-01 : f32
    %304 = vector.broadcast %cst_139 : f32 to vector<16x128xf32>
    %305 = arith.mulf %304, %303 : vector<16x128xf32>
    %cst_140 = arith.constant 5.000000e-01 : f32
    %306 = vector.broadcast %cst_140 : f32 to vector<16x128xf32>
    %307 = arith.addf %305, %306 : vector<16x128xf32>
    %308 = arith.mulf %301, %249 : vector<16x128xf32>
    %309 = arith.mulf %296, %302 : vector<16x128xf32>
    %310 = arith.addf %308, %309 : vector<16x128xf32>
    %311 = math.tanh %310 : vector<16x128xf32>
    %312 = arith.mulf %307, %311 : vector<16x128xf32>
    %313 = vector.extract_strided_slice %285 {offsets = [0, 512], sizes = [16, 512], strides = [1, 1]} : vector<16x1024xf32> to vector<16x512xf32>
    %314 = arith.addf %313, %2 : vector<16x512xf32>
    %315 = math.tanh %314 : vector<16x512xf32>
    %316 = vector.extract_strided_slice %315 {offsets = [0, 0], sizes = [16, 128], strides = [1, 1]} : vector<16x512xf32> to vector<16x128xf32>
    %cst_141 = arith.constant 5.000000e-01 : f32
    %317 = vector.broadcast %cst_141 : f32 to vector<16x128xf32>
    %318 = arith.mulf %317, %316 : vector<16x128xf32>
    %cst_142 = arith.constant 5.000000e-01 : f32
    %319 = vector.broadcast %cst_142 : f32 to vector<16x128xf32>
    %320 = arith.addf %318, %319 : vector<16x128xf32>
    %321 = vector.extract_strided_slice %315 {offsets = [0, 128], sizes = [16, 128], strides = [1, 1]} : vector<16x512xf32> to vector<16x128xf32>
    %cst_143 = arith.constant 5.000000e-01 : f32
    %322 = vector.broadcast %cst_143 : f32 to vector<16x128xf32>
    %323 = arith.mulf %322, %321 : vector<16x128xf32>
    %cst_144 = arith.constant 5.000000e-01 : f32
    %324 = vector.broadcast %cst_144 : f32 to vector<16x128xf32>
    %325 = arith.addf %323, %324 : vector<16x128xf32>
    %326 = vector.extract_strided_slice %315 {offsets = [0, 256], sizes = [16, 128], strides = [1, 1]} : vector<16x512xf32> to vector<16x128xf32>
    %327 = vector.extract_strided_slice %315 {offsets = [0, 384], sizes = [16, 128], strides = [1, 1]} : vector<16x512xf32> to vector<16x128xf32>
    %cst_145 = arith.constant 5.000000e-01 : f32
    %328 = vector.broadcast %cst_145 : f32 to vector<16x128xf32>
    %329 = arith.mulf %328, %327 : vector<16x128xf32>
    %cst_146 = arith.constant 5.000000e-01 : f32
    %330 = vector.broadcast %cst_146 : f32 to vector<16x128xf32>
    %331 = arith.addf %329, %330 : vector<16x128xf32>
    %332 = arith.mulf %325, %273 : vector<16x128xf32>
    %333 = arith.mulf %320, %326 : vector<16x128xf32>
    %334 = arith.addf %332, %333 : vector<16x128xf32>
    %335 = math.tanh %334 : vector<16x128xf32>
    %336 = arith.mulf %331, %335 : vector<16x128xf32>
    %c1_i32_147 = arith.constant 1 : i32
    %337 = arith.subi %c5_i32, %c1_i32_147 : i32
    %338 = arith.index_cast %337 : i32 to index
    %c0_148 = arith.constant 0 : index
    %c0_149 = arith.constant 0 : index
    %339 = vector.load %arg11[%338, %c0_148, %c0_149] : memref<10x16x128xf32, #tpu.memory_space<vmem>>, vector<1x16x128xf32>
    %340 = vector.shape_cast %339 : vector<1x16x128xf32> to vector<16x128xf32>
    %341 = vector.shape_cast %336 : vector<16x128xf32> to vector<1x16x128xf32>
    tpu.vector_store %arg11[%338, %c0_148, %c0_149], %341 {strides = array<i32>} : memref<10x16x128xf32, #tpu.memory_space<vmem>>, vector<1x16x128xf32>,
    %c0_150 = arith.constant 0 : index
    %c0_151 = arith.constant 0 : index
    %342 = vector.load %arg12[%c0_150, %c0_151] : memref<16x256xf32, #tpu.memory_space<vmem>>, vector<16x128xf32>
    tpu.vector_store %arg12[%c0_150, %c0_151], %312 {strides = array<i32>} : memref<16x256xf32, #tpu.memory_space<vmem>>, vector<16x128xf32>,
    %c0_152 = arith.constant 0 : index
    %c128_153 = arith.constant 128 : index
    %343 = vector.load %arg12[%c0_152, %c128_153] : memref<16x256xf32, #tpu.memory_space<vmem>>, vector<16x128xf32>
    tpu.vector_store %arg12[%c0_152, %c128_153], %336 {strides = array<i32>} : memref<16x256xf32, #tpu.memory_space<vmem>>, vector<16x128xf32>,
    %c6_i32 = arith.constant 6 : i32
    %c0_154 = arith.constant 0 : index
    %c0_155 = arith.constant 0 : index
    %344 = vector.load %arg12[%c0_154, %c0_155] : memref<16x256xf32, #tpu.memory_space<vmem>>, vector<16x256xf32>
    %c0_156 = arith.constant 0 : index
    %c0_157 = arith.constant 0 : index
    %345 = vector.load %arg5[%c0_156, %c0_157] : memref<256x1024xf32, #tpu.memory_space<vmem>>, vector<256x1024xf32>
    %cst_158 = arith.constant dense<0.000000e+00> : vector<16x1024xf32>
    %346 = tpu.matmul %344, %345, %cst_158 {dimension_numbers = #tpu.dot_dimension_numbers<[1], [0], [0], [1], [0, 0, 1, 1], [], []>} : vector<16x256xf32>, vector<256x1024xf32>, vector<16x1024xf32> -> vector<16x1024xf32>
    %347 = arith.index_cast %c6_i32 : i32 to index
    %c0_159 = arith.constant 0 : index
    %c0_160 = arith.constant 0 : index
    %348 = vector.load %arg10[%347, %c0_159, %c0_160] : memref<10x16x512xf32, #tpu.memory_space<vmem>>, vector<1x16x512xf32>
    %349 = vector.shape_cast %348 : vector<1x16x512xf32> to vector<16x512xf32>
    %350 = vector.extract_strided_slice %346 {offsets = [0, 0], sizes = [16, 512], strides = [1, 1]} : vector<16x1024xf32> to vector<16x512xf32>
    %351 = arith.addf %349, %350 : vector<16x512xf32>
    %352 = math.tanh %351 : vector<16x512xf32>
    %353 = vector.extract_strided_slice %352 {offsets = [0, 0], sizes = [16, 128], strides = [1, 1]} : vector<16x512xf32> to vector<16x128xf32>
    %cst_161 = arith.constant 5.000000e-01 : f32
    %354 = vector.broadcast %cst_161 : f32 to vector<16x128xf32>
    %355 = arith.mulf %354, %353 : vector<16x128xf32>
    %cst_162 = arith.constant 5.000000e-01 : f32
    %356 = vector.broadcast %cst_162 : f32 to vector<16x128xf32>
    %357 = arith.addf %355, %356 : vector<16x128xf32>
    %358 = vector.extract_strided_slice %352 {offsets = [0, 128], sizes = [16, 128], strides = [1, 1]} : vector<16x512xf32> to vector<16x128xf32>
    %cst_163 = arith.constant 5.000000e-01 : f32
    %359 = vector.broadcast %cst_163 : f32 to vector<16x128xf32>
    %360 = arith.mulf %359, %358 : vector<16x128xf32>
    %cst_164 = arith.constant 5.000000e-01 : f32
    %361 = vector.broadcast %cst_164 : f32 to vector<16x128xf32>
    %362 = arith.addf %360, %361 : vector<16x128xf32>
    %363 = vector.extract_strided_slice %352 {offsets = [0, 256], sizes = [16, 128], strides = [1, 1]} : vector<16x512xf32> to vector<16x128xf32>
    %364 = vector.extract_strided_slice %352 {offsets = [0, 384], sizes = [16, 128], strides = [1, 1]} : vector<16x512xf32> to vector<16x128xf32>
    %cst_165 = arith.constant 5.000000e-01 : f32
    %365 = vector.broadcast %cst_165 : f32 to vector<16x128xf32>
    %366 = arith.mulf %365, %364 : vector<16x128xf32>
    %cst_166 = arith.constant 5.000000e-01 : f32
    %367 = vector.broadcast %cst_166 : f32 to vector<16x128xf32>
    %368 = arith.addf %366, %367 : vector<16x128xf32>
    %369 = arith.mulf %362, %310 : vector<16x128xf32>
    %370 = arith.mulf %357, %363 : vector<16x128xf32>
    %371 = arith.addf %369, %370 : vector<16x128xf32>
    %372 = math.tanh %371 : vector<16x128xf32>
    %373 = arith.mulf %368, %372 : vector<16x128xf32>
    %374 = vector.extract_strided_slice %346 {offsets = [0, 512], sizes = [16, 512], strides = [1, 1]} : vector<16x1024xf32> to vector<16x512xf32>
    %375 = arith.addf %374, %2 : vector<16x512xf32>
    %376 = math.tanh %375 : vector<16x512xf32>
    %377 = vector.extract_strided_slice %376 {offsets = [0, 0], sizes = [16, 128], strides = [1, 1]} : vector<16x512xf32> to vector<16x128xf32>
    %cst_167 = arith.constant 5.000000e-01 : f32
    %378 = vector.broadcast %cst_167 : f32 to vector<16x128xf32>
    %379 = arith.mulf %378, %377 : vector<16x128xf32>
    %cst_168 = arith.constant 5.000000e-01 : f32
    %380 = vector.broadcast %cst_168 : f32 to vector<16x128xf32>
    %381 = arith.addf %379, %380 : vector<16x128xf32>
    %382 = vector.extract_strided_slice %376 {offsets = [0, 128], sizes = [16, 128], strides = [1, 1]} : vector<16x512xf32> to vector<16x128xf32>
    %cst_169 = arith.constant 5.000000e-01 : f32
    %383 = vector.broadcast %cst_169 : f32 to vector<16x128xf32>
    %384 = arith.mulf %383, %382 : vector<16x128xf32>
    %cst_170 = arith.constant 5.000000e-01 : f32
    %385 = vector.broadcast %cst_170 : f32 to vector<16x128xf32>
    %386 = arith.addf %384, %385 : vector<16x128xf32>
    %387 = vector.extract_strided_slice %376 {offsets = [0, 256], sizes = [16, 128], strides = [1, 1]} : vector<16x512xf32> to vector<16x128xf32>
    %388 = vector.extract_strided_slice %376 {offsets = [0, 384], sizes = [16, 128], strides = [1, 1]} : vector<16x512xf32> to vector<16x128xf32>
    %cst_171 = arith.constant 5.000000e-01 : f32
    %389 = vector.broadcast %cst_171 : f32 to vector<16x128xf32>
    %390 = arith.mulf %389, %388 : vector<16x128xf32>
    %cst_172 = arith.constant 5.000000e-01 : f32
    %391 = vector.broadcast %cst_172 : f32 to vector<16x128xf32>
    %392 = arith.addf %390, %391 : vector<16x128xf32>
    %393 = arith.mulf %386, %334 : vector<16x128xf32>
    %394 = arith.mulf %381, %387 : vector<16x128xf32>
    %395 = arith.addf %393, %394 : vector<16x128xf32>
    %396 = math.tanh %395 : vector<16x128xf32>
    %397 = arith.mulf %392, %396 : vector<16x128xf32>
    %c1_i32_173 = arith.constant 1 : i32
    %398 = arith.subi %c6_i32, %c1_i32_173 : i32
    %399 = arith.index_cast %398 : i32 to index
    %c0_174 = arith.constant 0 : index
    %c0_175 = arith.constant 0 : index
    %400 = vector.load %arg11[%399, %c0_174, %c0_175] : memref<10x16x128xf32, #tpu.memory_space<vmem>>, vector<1x16x128xf32>
    %401 = vector.shape_cast %400 : vector<1x16x128xf32> to vector<16x128xf32>
    %402 = vector.shape_cast %397 : vector<16x128xf32> to vector<1x16x128xf32>
    tpu.vector_store %arg11[%399, %c0_174, %c0_175], %402 {strides = array<i32>} : memref<10x16x128xf32, #tpu.memory_space<vmem>>, vector<1x16x128xf32>,
    %c0_176 = arith.constant 0 : index
    %c0_177 = arith.constant 0 : index
    %403 = vector.load %arg12[%c0_176, %c0_177] : memref<16x256xf32, #tpu.memory_space<vmem>>, vector<16x128xf32>
    tpu.vector_store %arg12[%c0_176, %c0_177], %373 {strides = array<i32>} : memref<16x256xf32, #tpu.memory_space<vmem>>, vector<16x128xf32>,
    %c0_178 = arith.constant 0 : index
    %c128_179 = arith.constant 128 : index
    %404 = vector.load %arg12[%c0_178, %c128_179] : memref<16x256xf32, #tpu.memory_space<vmem>>, vector<16x128xf32>
    tpu.vector_store %arg12[%c0_178, %c128_179], %397 {strides = array<i32>} : memref<16x256xf32, #tpu.memory_space<vmem>>, vector<16x128xf32>,
    %c7_i32 = arith.constant 7 : i32
    %c0_180 = arith.constant 0 : index
    %c0_181 = arith.constant 0 : index
    %405 = vector.load %arg12[%c0_180, %c0_181] : memref<16x256xf32, #tpu.memory_space<vmem>>, vector<16x256xf32>
    %c0_182 = arith.constant 0 : index
    %c0_183 = arith.constant 0 : index
    %406 = vector.load %arg5[%c0_182, %c0_183] : memref<256x1024xf32, #tpu.memory_space<vmem>>, vector<256x1024xf32>
    %cst_184 = arith.constant dense<0.000000e+00> : vector<16x1024xf32>
    %407 = tpu.matmul %405, %406, %cst_184 {dimension_numbers = #tpu.dot_dimension_numbers<[1], [0], [0], [1], [0, 0, 1, 1], [], []>} : vector<16x256xf32>, vector<256x1024xf32>, vector<16x1024xf32> -> vector<16x1024xf32>
    %408 = arith.index_cast %c7_i32 : i32 to index
    %c0_185 = arith.constant 0 : index
    %c0_186 = arith.constant 0 : index
    %409 = vector.load %arg10[%408, %c0_185, %c0_186] : memref<10x16x512xf32, #tpu.memory_space<vmem>>, vector<1x16x512xf32>
    %410 = vector.shape_cast %409 : vector<1x16x512xf32> to vector<16x512xf32>
    %411 = vector.extract_strided_slice %407 {offsets = [0, 0], sizes = [16, 512], strides = [1, 1]} : vector<16x1024xf32> to vector<16x512xf32>
    %412 = arith.addf %410, %411 : vector<16x512xf32>
    %413 = math.tanh %412 : vector<16x512xf32>
    %414 = vector.extract_strided_slice %413 {offsets = [0, 0], sizes = [16, 128], strides = [1, 1]} : vector<16x512xf32> to vector<16x128xf32>
    %cst_187 = arith.constant 5.000000e-01 : f32
    %415 = vector.broadcast %cst_187 : f32 to vector<16x128xf32>
    %416 = arith.mulf %415, %414 : vector<16x128xf32>
    %cst_188 = arith.constant 5.000000e-01 : f32
    %417 = vector.broadcast %cst_188 : f32 to vector<16x128xf32>
    %418 = arith.addf %416, %417 : vector<16x128xf32>
    %419 = vector.extract_strided_slice %413 {offsets = [0, 128], sizes = [16, 128], strides = [1, 1]} : vector<16x512xf32> to vector<16x128xf32>
    %cst_189 = arith.constant 5.000000e-01 : f32
    %420 = vector.broadcast %cst_189 : f32 to vector<16x128xf32>
    %421 = arith.mulf %420, %419 : vector<16x128xf32>
    %cst_190 = arith.constant 5.000000e-01 : f32
    %422 = vector.broadcast %cst_190 : f32 to vector<16x128xf32>
    %423 = arith.addf %421, %422 : vector<16x128xf32>
    %424 = vector.extract_strided_slice %413 {offsets = [0, 256], sizes = [16, 128], strides = [1, 1]} : vector<16x512xf32> to vector<16x128xf32>
    %425 = vector.extract_strided_slice %413 {offsets = [0, 384], sizes = [16, 128], strides = [1, 1]} : vector<16x512xf32> to vector<16x128xf32>
    %cst_191 = arith.constant 5.000000e-01 : f32
    %426 = vector.broadcast %cst_191 : f32 to vector<16x128xf32>
    %427 = arith.mulf %426, %425 : vector<16x128xf32>
    %cst_192 = arith.constant 5.000000e-01 : f32
    %428 = vector.broadcast %cst_192 : f32 to vector<16x128xf32>
    %429 = arith.addf %427, %428 : vector<16x128xf32>
    %430 = arith.mulf %423, %371 : vector<16x128xf32>
    %431 = arith.mulf %418, %424 : vector<16x128xf32>
    %432 = arith.addf %430, %431 : vector<16x128xf32>
    %433 = math.tanh %432 : vector<16x128xf32>
    %434 = arith.mulf %429, %433 : vector<16x128xf32>
    %435 = vector.extract_strided_slice %407 {offsets = [0, 512], sizes = [16, 512], strides = [1, 1]} : vector<16x1024xf32> to vector<16x512xf32>
    %436 = arith.addf %435, %2 : vector<16x512xf32>
    %437 = math.tanh %436 : vector<16x512xf32>
    %438 = vector.extract_strided_slice %437 {offsets = [0, 0], sizes = [16, 128], strides = [1, 1]} : vector<16x512xf32> to vector<16x128xf32>
    %cst_193 = arith.constant 5.000000e-01 : f32
    %439 = vector.broadcast %cst_193 : f32 to vector<16x128xf32>
    %440 = arith.mulf %439, %438 : vector<16x128xf32>
    %cst_194 = arith.constant 5.000000e-01 : f32
    %441 = vector.broadcast %cst_194 : f32 to vector<16x128xf32>
    %442 = arith.addf %440, %441 : vector<16x128xf32>
    %443 = vector.extract_strided_slice %437 {offsets = [0, 128], sizes = [16, 128], strides = [1, 1]} : vector<16x512xf32> to vector<16x128xf32>
    %cst_195 = arith.constant 5.000000e-01 : f32
    %444 = vector.broadcast %cst_195 : f32 to vector<16x128xf32>
    %445 = arith.mulf %444, %443 : vector<16x128xf32>
    %cst_196 = arith.constant 5.000000e-01 : f32
    %446 = vector.broadcast %cst_196 : f32 to vector<16x128xf32>
    %447 = arith.addf %445, %446 : vector<16x128xf32>
    %448 = vector.extract_strided_slice %437 {offsets = [0, 256], sizes = [16, 128], strides = [1, 1]} : vector<16x512xf32> to vector<16x128xf32>
    %449 = vector.extract_strided_slice %437 {offsets = [0, 384], sizes = [16, 128], strides = [1, 1]} : vector<16x512xf32> to vector<16x128xf32>
    %cst_197 = arith.constant 5.000000e-01 : f32
    %450 = vector.broadcast %cst_197 : f32 to vector<16x128xf32>
    %451 = arith.mulf %450, %449 : vector<16x128xf32>
    %cst_198 = arith.constant 5.000000e-01 : f32
    %452 = vector.broadcast %cst_198 : f32 to vector<16x128xf32>
    %453 = arith.addf %451, %452 : vector<16x128xf32>
    %454 = arith.mulf %447, %395 : vector<16x128xf32>
    %455 = arith.mulf %442, %448 : vector<16x128xf32>
    %456 = arith.addf %454, %455 : vector<16x128xf32>
    %457 = math.tanh %456 : vector<16x128xf32>
    %458 = arith.mulf %453, %457 : vector<16x128xf32>
    %c1_i32_199 = arith.constant 1 : i32
    %459 = arith.subi %c7_i32, %c1_i32_199 : i32
    %460 = arith.index_cast %459 : i32 to index
    %c0_200 = arith.constant 0 : index
    %c0_201 = arith.constant 0 : index
    %461 = vector.load %arg11[%460, %c0_200, %c0_201] : memref<10x16x128xf32, #tpu.memory_space<vmem>>, vector<1x16x128xf32>
    %462 = vector.shape_cast %461 : vector<1x16x128xf32> to vector<16x128xf32>
    %463 = vector.shape_cast %458 : vector<16x128xf32> to vector<1x16x128xf32>
    tpu.vector_store %arg11[%460, %c0_200, %c0_201], %463 {strides = array<i32>} : memref<10x16x128xf32, #tpu.memory_space<vmem>>, vector<1x16x128xf32>,
    %c0_202 = arith.constant 0 : index
    %c0_203 = arith.constant 0 : index
    %464 = vector.load %arg12[%c0_202, %c0_203] : memref<16x256xf32, #tpu.memory_space<vmem>>, vector<16x128xf32>
    tpu.vector_store %arg12[%c0_202, %c0_203], %434 {strides = array<i32>} : memref<16x256xf32, #tpu.memory_space<vmem>>, vector<16x128xf32>,
    %c0_204 = arith.constant 0 : index
    %c128_205 = arith.constant 128 : index
    %465 = vector.load %arg12[%c0_204, %c128_205] : memref<16x256xf32, #tpu.memory_space<vmem>>, vector<16x128xf32>
    tpu.vector_store %arg12[%c0_204, %c128_205], %458 {strides = array<i32>} : memref<16x256xf32, #tpu.memory_space<vmem>>, vector<16x128xf32>,
    %c8_i32 = arith.constant 8 : i32
    %c0_206 = arith.constant 0 : index
    %c0_207 = arith.constant 0 : index
    %466 = vector.load %arg12[%c0_206, %c0_207] : memref<16x256xf32, #tpu.memory_space<vmem>>, vector<16x256xf32>
    %c0_208 = arith.constant 0 : index
    %c0_209 = arith.constant 0 : index
    %467 = vector.load %arg5[%c0_208, %c0_209] : memref<256x1024xf32, #tpu.memory_space<vmem>>, vector<256x1024xf32>
    %cst_210 = arith.constant dense<0.000000e+00> : vector<16x1024xf32>
    %468 = tpu.matmul %466, %467, %cst_210 {dimension_numbers = #tpu.dot_dimension_numbers<[1], [0], [0], [1], [0, 0, 1, 1], [], []>} : vector<16x256xf32>, vector<256x1024xf32>, vector<16x1024xf32> -> vector<16x1024xf32>
    %469 = arith.index_cast %c8_i32 : i32 to index
    %c0_211 = arith.constant 0 : index
    %c0_212 = arith.constant 0 : index
    %470 = vector.load %arg10[%469, %c0_211, %c0_212] : memref<10x16x512xf32, #tpu.memory_space<vmem>>, vector<1x16x512xf32>
    %471 = vector.shape_cast %470 : vector<1x16x512xf32> to vector<16x512xf32>
    %472 = vector.extract_strided_slice %468 {offsets = [0, 0], sizes = [16, 512], strides = [1, 1]} : vector<16x1024xf32> to vector<16x512xf32>
    %473 = arith.addf %471, %472 : vector<16x512xf32>
    %474 = math.tanh %473 : vector<16x512xf32>
    %475 = vector.extract_strided_slice %474 {offsets = [0, 0], sizes = [16, 128], strides = [1, 1]} : vector<16x512xf32> to vector<16x128xf32>
    %cst_213 = arith.constant 5.000000e-01 : f32
    %476 = vector.broadcast %cst_213 : f32 to vector<16x128xf32>
    %477 = arith.mulf %476, %475 : vector<16x128xf32>
    %cst_214 = arith.constant 5.000000e-01 : f32
    %478 = vector.broadcast %cst_214 : f32 to vector<16x128xf32>
    %479 = arith.addf %477, %478 : vector<16x128xf32>
    %480 = vector.extract_strided_slice %474 {offsets = [0, 128], sizes = [16, 128], strides = [1, 1]} : vector<16x512xf32> to vector<16x128xf32>
    %cst_215 = arith.constant 5.000000e-01 : f32
    %481 = vector.broadcast %cst_215 : f32 to vector<16x128xf32>
    %482 = arith.mulf %481, %480 : vector<16x128xf32>
    %cst_216 = arith.constant 5.000000e-01 : f32
    %483 = vector.broadcast %cst_216 : f32 to vector<16x128xf32>
    %484 = arith.addf %482, %483 : vector<16x128xf32>
    %485 = vector.extract_strided_slice %474 {offsets = [0, 256], sizes = [16, 128], strides = [1, 1]} : vector<16x512xf32> to vector<16x128xf32>
    %486 = vector.extract_strided_slice %474 {offsets = [0, 384], sizes = [16, 128], strides = [1, 1]} : vector<16x512xf32> to vector<16x128xf32>
    %cst_217 = arith.constant 5.000000e-01 : f32
    %487 = vector.broadcast %cst_217 : f32 to vector<16x128xf32>
    %488 = arith.mulf %487, %486 : vector<16x128xf32>
    %cst_218 = arith.constant 5.000000e-01 : f32
    %489 = vector.broadcast %cst_218 : f32 to vector<16x128xf32>
    %490 = arith.addf %488, %489 : vector<16x128xf32>
    %491 = arith.mulf %484, %432 : vector<16x128xf32>
    %492 = arith.mulf %479, %485 : vector<16x128xf32>
    %493 = arith.addf %491, %492 : vector<16x128xf32>
    %494 = math.tanh %493 : vector<16x128xf32>
    %495 = arith.mulf %490, %494 : vector<16x128xf32>
    %496 = vector.extract_strided_slice %468 {offsets = [0, 512], sizes = [16, 512], strides = [1, 1]} : vector<16x1024xf32> to vector<16x512xf32>
    %497 = arith.addf %496, %2 : vector<16x512xf32>
    %498 = math.tanh %497 : vector<16x512xf32>
    %499 = vector.extract_strided_slice %498 {offsets = [0, 0], sizes = [16, 128], strides = [1, 1]} : vector<16x512xf32> to vector<16x128xf32>
    %cst_219 = arith.constant 5.000000e-01 : f32
    %500 = vector.broadcast %cst_219 : f32 to vector<16x128xf32>
    %501 = arith.mulf %500, %499 : vector<16x128xf32>
    %cst_220 = arith.constant 5.000000e-01 : f32
    %502 = vector.broadcast %cst_220 : f32 to vector<16x128xf32>
    %503 = arith.addf %501, %502 : vector<16x128xf32>
    %504 = vector.extract_strided_slice %498 {offsets = [0, 128], sizes = [16, 128], strides = [1, 1]} : vector<16x512xf32> to vector<16x128xf32>
    %cst_221 = arith.constant 5.000000e-01 : f32
    %505 = vector.broadcast %cst_221 : f32 to vector<16x128xf32>
    %506 = arith.mulf %505, %504 : vector<16x128xf32>
    %cst_222 = arith.constant 5.000000e-01 : f32
    %507 = vector.broadcast %cst_222 : f32 to vector<16x128xf32>
    %508 = arith.addf %506, %507 : vector<16x128xf32>
    %509 = vector.extract_strided_slice %498 {offsets = [0, 256], sizes = [16, 128], strides = [1, 1]} : vector<16x512xf32> to vector<16x128xf32>
    %510 = vector.extract_strided_slice %498 {offsets = [0, 384], sizes = [16, 128], strides = [1, 1]} : vector<16x512xf32> to vector<16x128xf32>
    %cst_223 = arith.constant 5.000000e-01 : f32
    %511 = vector.broadcast %cst_223 : f32 to vector<16x128xf32>
    %512 = arith.mulf %511, %510 : vector<16x128xf32>
    %cst_224 = arith.constant 5.000000e-01 : f32
    %513 = vector.broadcast %cst_224 : f32 to vector<16x128xf32>
    %514 = arith.addf %512, %513 : vector<16x128xf32>
    %515 = arith.mulf %508, %456 : vector<16x128xf32>
    %516 = arith.mulf %503, %509 : vector<16x128xf32>
    %517 = arith.addf %515, %516 : vector<16x128xf32>
    %518 = math.tanh %517 : vector<16x128xf32>
    %519 = arith.mulf %514, %518 : vector<16x128xf32>
    %c1_i32_225 = arith.constant 1 : i32
    %520 = arith.subi %c8_i32, %c1_i32_225 : i32
    %521 = arith.index_cast %520 : i32 to index
    %c0_226 = arith.constant 0 : index
    %c0_227 = arith.constant 0 : index
    %522 = vector.load %arg11[%521, %c0_226, %c0_227] : memref<10x16x128xf32, #tpu.memory_space<vmem>>, vector<1x16x128xf32>
    %523 = vector.shape_cast %522 : vector<1x16x128xf32> to vector<16x128xf32>
    %524 = vector.shape_cast %519 : vector<16x128xf32> to vector<1x16x128xf32>
    tpu.vector_store %arg11[%521, %c0_226, %c0_227], %524 {strides = array<i32>} : memref<10x16x128xf32, #tpu.memory_space<vmem>>, vector<1x16x128xf32>,
    %c0_228 = arith.constant 0 : index
    %c0_229 = arith.constant 0 : index
    %525 = vector.load %arg12[%c0_228, %c0_229] : memref<16x256xf32, #tpu.memory_space<vmem>>, vector<16x128xf32>
    tpu.vector_store %arg12[%c0_228, %c0_229], %495 {strides = array<i32>} : memref<16x256xf32, #tpu.memory_space<vmem>>, vector<16x128xf32>,
    %c0_230 = arith.constant 0 : index
    %c128_231 = arith.constant 128 : index
    %526 = vector.load %arg12[%c0_230, %c128_231] : memref<16x256xf32, #tpu.memory_space<vmem>>, vector<16x128xf32>
    tpu.vector_store %arg12[%c0_230, %c128_231], %519 {strides = array<i32>} : memref<16x256xf32, #tpu.memory_space<vmem>>, vector<16x128xf32>,
    %c9_i32 = arith.constant 9 : i32
    %c0_232 = arith.constant 0 : index
    %c0_233 = arith.constant 0 : index
    %527 = vector.load %arg12[%c0_232, %c0_233] : memref<16x256xf32, #tpu.memory_space<vmem>>, vector<16x256xf32>
    %c0_234 = arith.constant 0 : index
    %c0_235 = arith.constant 0 : index
    %528 = vector.load %arg5[%c0_234, %c0_235] : memref<256x1024xf32, #tpu.memory_space<vmem>>, vector<256x1024xf32>
    %cst_236 = arith.constant dense<0.000000e+00> : vector<16x1024xf32>
    %529 = tpu.matmul %527, %528, %cst_236 {dimension_numbers = #tpu.dot_dimension_numbers<[1], [0], [0], [1], [0, 0, 1, 1], [], []>} : vector<16x256xf32>, vector<256x1024xf32>, vector<16x1024xf32> -> vector<16x1024xf32>
    %530 = arith.index_cast %c9_i32 : i32 to index
    %c0_237 = arith.constant 0 : index
    %c0_238 = arith.constant 0 : index
    %531 = vector.load %arg10[%530, %c0_237, %c0_238] : memref<10x16x512xf32, #tpu.memory_space<vmem>>, vector<1x16x512xf32>
    %532 = vector.shape_cast %531 : vector<1x16x512xf32> to vector<16x512xf32>
    %533 = vector.extract_strided_slice %529 {offsets = [0, 0], sizes = [16, 512], strides = [1, 1]} : vector<16x1024xf32> to vector<16x512xf32>
    %534 = arith.addf %532, %533 : vector<16x512xf32>
    %535 = math.tanh %534 : vector<16x512xf32>
    %536 = vector.extract_strided_slice %535 {offsets = [0, 0], sizes = [16, 128], strides = [1, 1]} : vector<16x512xf32> to vector<16x128xf32>
    %cst_239 = arith.constant 5.000000e-01 : f32
    %537 = vector.broadcast %cst_239 : f32 to vector<16x128xf32>
    %538 = arith.mulf %537, %536 : vector<16x128xf32>
    %cst_240 = arith.constant 5.000000e-01 : f32
    %539 = vector.broadcast %cst_240 : f32 to vector<16x128xf32>
    %540 = arith.addf %538, %539 : vector<16x128xf32>
    %541 = vector.extract_strided_slice %535 {offsets = [0, 128], sizes = [16, 128], strides = [1, 1]} : vector<16x512xf32> to vector<16x128xf32>
    %cst_241 = arith.constant 5.000000e-01 : f32
    %542 = vector.broadcast %cst_241 : f32 to vector<16x128xf32>
    %543 = arith.mulf %542, %541 : vector<16x128xf32>
    %cst_242 = arith.constant 5.000000e-01 : f32
    %544 = vector.broadcast %cst_242 : f32 to vector<16x128xf32>
    %545 = arith.addf %543, %544 : vector<16x128xf32>
    %546 = vector.extract_strided_slice %535 {offsets = [0, 256], sizes = [16, 128], strides = [1, 1]} : vector<16x512xf32> to vector<16x128xf32>
    %547 = vector.extract_strided_slice %535 {offsets = [0, 384], sizes = [16, 128], strides = [1, 1]} : vector<16x512xf32> to vector<16x128xf32>
    %cst_243 = arith.constant 5.000000e-01 : f32
    %548 = vector.broadcast %cst_243 : f32 to vector<16x128xf32>
    %549 = arith.mulf %548, %547 : vector<16x128xf32>
    %cst_244 = arith.constant 5.000000e-01 : f32
    %550 = vector.broadcast %cst_244 : f32 to vector<16x128xf32>
    %551 = arith.addf %549, %550 : vector<16x128xf32>
    %552 = arith.mulf %545, %493 : vector<16x128xf32>
    %553 = arith.mulf %540, %546 : vector<16x128xf32>
    %554 = arith.addf %552, %553 : vector<16x128xf32>
    %555 = math.tanh %554 : vector<16x128xf32>
    %556 = arith.mulf %551, %555 : vector<16x128xf32>
    %557 = vector.extract_strided_slice %529 {offsets = [0, 512], sizes = [16, 512], strides = [1, 1]} : vector<16x1024xf32> to vector<16x512xf32>
    %558 = arith.addf %557, %2 : vector<16x512xf32>
    %559 = math.tanh %558 : vector<16x512xf32>
    %560 = vector.extract_strided_slice %559 {offsets = [0, 0], sizes = [16, 128], strides = [1, 1]} : vector<16x512xf32> to vector<16x128xf32>
    %cst_245 = arith.constant 5.000000e-01 : f32
    %561 = vector.broadcast %cst_245 : f32 to vector<16x128xf32>
    %562 = arith.mulf %561, %560 : vector<16x128xf32>
    %cst_246 = arith.constant 5.000000e-01 : f32
    %563 = vector.broadcast %cst_246 : f32 to vector<16x128xf32>
    %564 = arith.addf %562, %563 : vector<16x128xf32>
    %565 = vector.extract_strided_slice %559 {offsets = [0, 128], sizes = [16, 128], strides = [1, 1]} : vector<16x512xf32> to vector<16x128xf32>
    %cst_247 = arith.constant 5.000000e-01 : f32
    %566 = vector.broadcast %cst_247 : f32 to vector<16x128xf32>
    %567 = arith.mulf %566, %565 : vector<16x128xf32>
    %cst_248 = arith.constant 5.000000e-01 : f32
    %568 = vector.broadcast %cst_248 : f32 to vector<16x128xf32>
    %569 = arith.addf %567, %568 : vector<16x128xf32>
    %570 = vector.extract_strided_slice %559 {offsets = [0, 256], sizes = [16, 128], strides = [1, 1]} : vector<16x512xf32> to vector<16x128xf32>
    %571 = vector.extract_strided_slice %559 {offsets = [0, 384], sizes = [16, 128], strides = [1, 1]} : vector<16x512xf32> to vector<16x128xf32>
    %cst_249 = arith.constant 5.000000e-01 : f32
    %572 = vector.broadcast %cst_249 : f32 to vector<16x128xf32>
    %573 = arith.mulf %572, %571 : vector<16x128xf32>
    %cst_250 = arith.constant 5.000000e-01 : f32
    %574 = vector.broadcast %cst_250 : f32 to vector<16x128xf32>
    %575 = arith.addf %573, %574 : vector<16x128xf32>
    %576 = arith.mulf %569, %517 : vector<16x128xf32>
    %577 = arith.mulf %564, %570 : vector<16x128xf32>
    %578 = arith.addf %576, %577 : vector<16x128xf32>
    %579 = math.tanh %578 : vector<16x128xf32>
    %580 = arith.mulf %575, %579 : vector<16x128xf32>
    %c1_i32_251 = arith.constant 1 : i32
    %581 = arith.subi %c9_i32, %c1_i32_251 : i32
    %582 = arith.index_cast %581 : i32 to index
    %c0_252 = arith.constant 0 : index
    %c0_253 = arith.constant 0 : index
    %583 = vector.load %arg11[%582, %c0_252, %c0_253] : memref<10x16x128xf32, #tpu.memory_space<vmem>>, vector<1x16x128xf32>
    %584 = vector.shape_cast %583 : vector<1x16x128xf32> to vector<16x128xf32>
    %585 = vector.shape_cast %580 : vector<16x128xf32> to vector<1x16x128xf32>
    tpu.vector_store %arg11[%582, %c0_252, %c0_253], %585 {strides = array<i32>} : memref<10x16x128xf32, #tpu.memory_space<vmem>>, vector<1x16x128xf32>,
    %c0_254 = arith.constant 0 : index
    %c0_255 = arith.constant 0 : index
    %586 = vector.load %arg12[%c0_254, %c0_255] : memref<16x256xf32, #tpu.memory_space<vmem>>, vector<16x128xf32>
    tpu.vector_store %arg12[%c0_254, %c0_255], %556 {strides = array<i32>} : memref<16x256xf32, #tpu.memory_space<vmem>>, vector<16x128xf32>,
    %c0_256 = arith.constant 0 : index
    %c128_257 = arith.constant 128 : index
    %587 = vector.load %arg12[%c0_256, %c128_257] : memref<16x256xf32, #tpu.memory_space<vmem>>, vector<16x128xf32>
    tpu.vector_store %arg12[%c0_256, %c128_257], %580 {strides = array<i32>} : memref<16x256xf32, #tpu.memory_space<vmem>>, vector<16x128xf32>,
    %c9_i32_258 = arith.constant 9 : i32
    %c0_259 = arith.constant 0 : index
    %c0_260 = arith.constant 0 : index
    %588 = vector.load %arg12[%c0_259, %c0_260] : memref<16x256xf32, #tpu.memory_space<vmem>>, vector<16x256xf32>
    %c0_261 = arith.constant 0 : index
    %c512 = arith.constant 512 : index
    %589 = vector.load %arg5[%c0_261, %c512] : memref<256x1024xf32, #tpu.memory_space<vmem>>, vector<256x512xf32>
    %cst_262 = arith.constant dense<0.000000e+00> : vector<16x512xf32>
    %590 = tpu.matmul %588, %589, %cst_262 {dimension_numbers = #tpu.dot_dimension_numbers<[1], [0], [0], [1], [0, 0, 1, 1], [], []>} : vector<16x256xf32>, vector<256x512xf32>, vector<16x512xf32> -> vector<16x512xf32>
    %591 = arith.addf %590, %2 : vector<16x512xf32>
    %592 = math.tanh %591 : vector<16x512xf32>
    %593 = vector.extract_strided_slice %592 {offsets = [0, 0], sizes = [16, 128], strides = [1, 1]} : vector<16x512xf32> to vector<16x128xf32>
    %cst_263 = arith.constant 5.000000e-01 : f32
    %594 = vector.broadcast %cst_263 : f32 to vector<16x128xf32>
    %595 = arith.mulf %594, %593 : vector<16x128xf32>
    %cst_264 = arith.constant 5.000000e-01 : f32
    %596 = vector.broadcast %cst_264 : f32 to vector<16x128xf32>
    %597 = arith.addf %595, %596 : vector<16x128xf32>
    %598 = vector.extract_strided_slice %592 {offsets = [0, 128], sizes = [16, 128], strides = [1, 1]} : vector<16x512xf32> to vector<16x128xf32>
    %cst_265 = arith.constant 5.000000e-01 : f32
    %599 = vector.broadcast %cst_265 : f32 to vector<16x128xf32>
    %600 = arith.mulf %599, %598 : vector<16x128xf32>
    %cst_266 = arith.constant 5.000000e-01 : f32
    %601 = vector.broadcast %cst_266 : f32 to vector<16x128xf32>
    %602 = arith.addf %600, %601 : vector<16x128xf32>
    %603 = vector.extract_strided_slice %592 {offsets = [0, 256], sizes = [16, 128], strides = [1, 1]} : vector<16x512xf32> to vector<16x128xf32>
    %604 = vector.extract_strided_slice %592 {offsets = [0, 384], sizes = [16, 128], strides = [1, 1]} : vector<16x512xf32> to vector<16x128xf32>
    %cst_267 = arith.constant 5.000000e-01 : f32
    %605 = vector.broadcast %cst_267 : f32 to vector<16x128xf32>
    %606 = arith.mulf %605, %604 : vector<16x128xf32>
    %cst_268 = arith.constant 5.000000e-01 : f32
    %607 = vector.broadcast %cst_268 : f32 to vector<16x128xf32>
    %608 = arith.addf %606, %607 : vector<16x128xf32>
    %609 = arith.mulf %602, %578 : vector<16x128xf32>
    %610 = arith.mulf %597, %603 : vector<16x128xf32>
    %611 = arith.addf %609, %610 : vector<16x128xf32>
    %612 = math.tanh %611 : vector<16x128xf32>
    %613 = arith.mulf %608, %612 : vector<16x128xf32>
    %c9 = arith.constant 9 : index
    %c0_269 = arith.constant 0 : index
    %c0_270 = arith.constant 0 : index
    %614 = vector.load %arg11[%c9, %c0_269, %c0_270] : memref<10x16x128xf32, #tpu.memory_space<vmem>>, vector<1x16x128xf32>
    %615 = vector.shape_cast %614 : vector<1x16x128xf32> to vector<16x128xf32>
    %616 = vector.shape_cast %613 : vector<16x128xf32> to vector<1x16x128xf32>
    tpu.vector_store %arg11[%c9, %c0_269, %c0_270], %616 {strides = array<i32>} : memref<10x16x128xf32, #tpu.memory_space<vmem>>, vector<1x16x128xf32>,
    %c0_271 = arith.constant 0 : index
    %c0_272 = arith.constant 0 : index
    %c0_273 = arith.constant 0 : index
    %617 = vector.load %arg11[%c0_271, %c0_272, %c0_273] : memref<10x16x128xf32, #tpu.memory_space<vmem>>, vector<10x16x128xf32>
    %618 = math.tanh %617 : vector<10x16x128xf32>
    %c0_274 = arith.constant 0 : index
    %c0_275 = arith.constant 0 : index
    %619 = vector.load %arg7[%c0_274, %c0_275] : memref<1x128xf32, #tpu.memory_space<vmem>>, vector<1x128xf32>
    %620 = vector.shape_cast %619 : vector<1x128xf32> to vector<1x1x128xf32>
    %621 = vector.broadcast %620 : vector<1x1x128xf32> to vector<10x16x128xf32>
    %622 = arith.mulf %618, %621 : vector<10x16x128xf32>
    %cst_276 = arith.constant dense<0.000000e+00> : vector<10x16xf32>
    %623 = vector.multi_reduction <add>, %622, %cst_276 [2] : vector<10x16x128xf32> to vector<10x16xf32>
    %c0_277 = arith.constant 0 : index
    %c0_278 = arith.constant 0 : index
    %624 = vector.load %arg2[%c0_277, %c0_278] : memref<10x16xf32, #tpu.memory_space<vmem>>, vector<10x16xf32>
    %625 = arith.mulf %623, %624 : vector<10x16xf32>
    %c0_279 = arith.constant 0 : index
    %c0_280 = arith.constant 0 : index
    %626 = vector.load %arg8[%c0_279, %c0_280] : memref<1x1xf32, #tpu.memory_space<vmem>>, vector<1x1xf32>
    %627 = vector.broadcast %626 : vector<1x1xf32> to vector<10x16xf32>
    %628 = arith.addf %625, %627 : vector<10x16xf32>
    %c0_281 = arith.constant 0 : index
    %c0_282 = arith.constant 0 : index
    %629 = vector.load %arg9[%c0_281, %c0_282] : memref<10x16xf32, #tpu.memory_space<vmem>>, vector<10x16xf32>
    tpu.vector_store %arg9[%c0_281, %c0_282], %628 {strides = array<i32>} : memref<10x16xf32, #tpu.memory_space<vmem>>, vector<10x16xf32>,
    return
  }
  func.func @transform_0(%arg0: i32) -> (i32, i32, i32) {
    %c0_i32 = arith.constant 0 : i32
    %c0_i32_0 = arith.constant 0 : i32
    %c0_i32_1 = arith.constant 0 : i32
    %c0_i32_2 = arith.constant 0 : i32
    return %c0_i32, %c0_i32_0, %c0_i32_1 : i32, i32, i32
  }
  func.func @transform_1(%arg0: i32) -> (i32, i32) {
    %c0_i32 = arith.constant 0 : i32
    %c0_i32_0 = arith.constant 0 : i32
    %c0_i32_1 = arith.constant 0 : i32
    return %c0_i32, %c0_i32_0 : i32, i32
  }
  func.func @transform_2(%arg0: i32) -> (i32, i32) {
    %c0_i32 = arith.constant 0 : i32
    %c0_i32_0 = arith.constant 0 : i32
    %c0_i32_1 = arith.constant 0 : i32
    return %c0_i32, %c0_i32_0 : i32, i32
  }
  func.func @transform_3(%arg0: i32) -> (i32, i32) {
    %c0_i32 = arith.constant 0 : i32
    %c0_i32_0 = arith.constant 0 : i32
    %c0_i32_1 = arith.constant 0 : i32
    return %c0_i32, %c0_i32_0 : i32, i32
  }
  func.func @transform_4(%arg0: i32) -> (i32, i32) {
    %c0_i32 = arith.constant 0 : i32
    %c0_i32_0 = arith.constant 0 : i32
    %c0_i32_1 = arith.constant 0 : i32
    return %c0_i32, %c0_i32_0 : i32, i32
  }
  func.func @transform_5(%arg0: i32) -> (i32, i32) {
    %c0_i32 = arith.constant 0 : i32
    %c0_i32_0 = arith.constant 0 : i32
    %c0_i32_1 = arith.constant 0 : i32
    return %c0_i32, %c0_i32_0 : i32, i32
  }
  func.func @transform_6(%arg0: i32) -> (i32, i32) {
    %c0_i32 = arith.constant 0 : i32
    %c0_i32_0 = arith.constant 0 : i32
    %c0_i32_1 = arith.constant 0 : i32
    return %c0_i32, %c0_i32_0 : i32, i32
  }
  func.func @transform_7(%arg0: i32) -> (i32, i32) {
    %c0_i32 = arith.constant 0 : i32
    %c0_i32_0 = arith.constant 0 : i32
    %c0_i32_1 = arith.constant 0 : i32
    return %c0_i32, %c0_i32_0 : i32, i32
  }
  func.func @transform_8(%arg0: i32) -> (i32, i32) {
    %c0_i32 = arith.constant 0 : i32
    %c0_i32_0 = arith.constant 0 : i32
    %c0_i32_1 = arith.constant 0 : i32
    return %c0_i32, %c0_i32_0 : i32, i32
  }
}

</mosaic_0001>

<bundles_post_ra>
// kernel: timing_lstm_forward.1
= control target key start
LH: loop header
LB: loop body
LE: loop exit
PB: predicated region body
PF: predicated region fallthrough
CT: control target
= control target key end

     0   :  { %v10482_v3 = vmov 0.0   ;;  %vm103_vm0 = vcmask 130048   ;;  %vm7296_vm1 = vcmask 130112   ;;  %vm7379_vm2 = vcmask 1041409   ;;  %s18564_s2 = inlined_call_operand.vmem [shape: f32[16,512], index: 2, kind: input, shape index: {}]   ;;  %s18565_s0 = inlined_call_operand.vmem [shape: f32[10,16,16], index: 0, kind: input, shape index: {}]   ;;  %s18566_s4 = inlined_call_operand.vmem [shape: f32[256,1024], index: 4, kind: input, shape index: {}]   ;;  %s18567_s3 = inlined_call_operand.vmem [shape: f32[1,512], index: 3, kind: input, shape index: {}]   ;;  %s18568_s7 = inlined_call_operand.<no memory space> [shape: f32[1,1], index: 7, kind: input, shape index: {}]   ;;  %s18569_s1 = inlined_call_operand.vmem [shape: f32[10,16], index: 1, kind: input, shape index: {}]   ;;  %s18570_s5 = inlined_call_operand.vmem [shape: f32[1,512], index: 5, kind: input, shape index: {}]   ;;  %s18571_s6 = inlined_call_operand.vmem [shape: f32[1,128], index: 6, kind: input, shape index: {}]   ;;  %s18572_s8 = inlined_call_operand.vmem [shape: f32[10,16], index: 8, kind: output, shape index: {}]  }
   0x1   :  { %v74_v0 = vld [vmem:[%s18564_s2 + $0x8] sm:$0xff]  ;;  %v73_v2 = vld [vmem:[%s18564_s2] sm:$0xff]  ;;  %228 = vmatprep.mubr.f32.mxu0 %v10482_v3  ;;  %413 = vmatprep.mubr.f32.mxu1 %v10482_v3  ;;  %v76_v6 = vld [vmem:[%s18564_s2 + $0x18] sm:$0xff]  ;;  %vm7381_vm3 = vcmask 1042434   ;;  %vm7383_vm4 = vcmask 1043459   ;;  %vm7385_vm5 = vcmask 1044484  }
   0x2   :  { %v78_v1 = vld [vmem:[%s18564_s2 + $0x28] sm:$0xff]  ;;  %v77_v5 = vld [vmem:[%s18564_s2 + $0x20] sm:$0xff]  ;;  %v80_v8 = vld [vmem:[%s18564_s2 + $0x38] sm:$0xff]  ;;  %vm7387_vm6 = vcmask 1045509   ;;  %vm7389_vm7 = vcmask 1046534   ;;  %vm7391_vm8 = vcmask 1047559  }
   0x3   :  { %v7445_v4 = vpack.c.bf16 %v78_v1, %v74_v0  ;;  %v7447_v7 = vpack.c.bf16 %v77_v5, %v73_v2  ;;  %v75_v9 = vld [vmem:[%s18564_s2 + $0x10] sm:$0xff]  ;;  %v53_v11 = vld [vmem:[%s18565_s0] sm:$0xff]  ;;  %v7449_v12 = vpack.c.bf16 %v80_v8, %v76_v6  ;;  %v661_v14 = vld [vmem:[%s18566_s4 + $0x8] sm:$0xff]  ;;  %vm7397_vm9 = vcmask 123904  }
   0x4   :  { %v79_v10 = vld [vmem:[%s18564_s2 + $0x30] sm:$0xff]  ;;  %v669_v15 = vld [vmem:[%s18566_s4 + $0x48] sm:$0xff]  ;;  %v660_v17 = vld [vmem:[%s18566_s4] sm:$0xff] }
   0x5   :  { %7446 = vmatprep.subr.bf16.mxu0 %v7445_v4  ;;  %v7451_v13 = vpack.c.bf16 %v79_v10, %v75_v9  ;;  %v7453_v16 = vpack.c.bf16 %v669_v15, %v661_v14  ;;  %v668_v18 = vld [vmem:[%s18566_s4 + $0x40] sm:$0xff]  ;;  %v677_v19 = vld [vmem:[%s18566_s4 + $0x88] sm:$0xff]  ;;  %7450 = vmatprep.subr.bf16.mxu1 %v7449_v12  ;;  %v663_v22 = vld [vmem:[%s18566_s4 + $0x18] sm:$0xff] }
   0x6   :  { %7448 = vmatpush1.bf16.msra.mxu0 %v7447_v7  ;;  %v7455_v20 = vpack.c.bf16 %v668_v18, %v660_v17  ;;  %v685_v21 = vld [vmem:[%s18566_s4 + $0xc8] sm:$0xff]  ;;  %v671_v23 = vld [vmem:[%s18566_s4 + $0x58] sm:$0xff]  ;;  %v676_v26 = vld [vmem:[%s18566_s4 + $0x80] sm:$0xff] }
   0x7   :  { %7452 = vmatpush1.bf16.msra.mxu1 %v7451_v13  ;;  %7454 = vmatprep.subr.bf16.mxu0 %v7453_v16  ;;  %v7457_v24 = vpack.c.bf16 %v685_v21, %v677_v19  ;;  %v7517_v25 = vpack.c.bf16 %v671_v23, %v663_v22  ;;  %v684_v27 = vld [vmem:[%s18566_s4 + $0xc0] sm:$0xff]  ;;  %v662_v28 = vld [vmem:[%s18566_s4 + $0x10] sm:$0xff]  ;;  %v54_v29 = vld [vmem:[%s18565_s0 + $0x8] sm:$0xff] }
   0x8   :  { %v670_v30 = vld [vmem:[%s18566_s4 + $0x50] sm:$0xff]  ;;  %v693_v31 = vld [vmem:[%s18566_s4 + $0x108] sm:$0xff]  ;;  %v7459_v32 = vpack.c.bf16 %v684_v27, %v676_v26  ;;  %v679_v35 = vld [vmem:[%s18566_s4 + $0x98] sm:$0xff] }
   0x9   :  { %7403 = vmatmul.mubr.msk.f32.vlgmr.msra.gmra.mrb[0].mxu0 %vm103_vm0, %v53_v11  ;;  %v7519_v33 = vpack.c.bf16 %v670_v30, %v662_v28  ;;  %v701_v34 = vld [vmem:[%s18566_s4 + $0x148] sm:$0xff]  ;;  %v687_v36 = vld [vmem:[%s18566_s4 + $0xd8] sm:$0xff]  ;;  %v692_v38 = vld [vmem:[%s18566_s4 + $0x100] sm:$0xff]  ;;  %7518 = vmatprep.subr.bf16.mxu1 %v7517_v25 }
   0xa   :  { %234 = vmatprep.mubr.f32.mxu0 %v10482_v3  ;;  %7456 = vmatpush1.bf16.msra.mxu0 %v7455_v20  ;;  %v7461_v37 = vpack.c.bf16 %v701_v34, %v693_v31  ;;  %v700_v39 = vld [vmem:[%s18566_s4 + $0x140] sm:$0xff]  ;;  %v678_v40 = vld [vmem:[%s18566_s4 + $0x90] sm:$0xff]  ;;  %v7521_v41 = vpack.c.bf16 %v687_v36, %v679_v35  ;;  %v709_v43 = vld [vmem:[%s18566_s4 + $0x188] sm:$0xff] }
   0xb   :  { %7423 = vmatmul.mubr.msk.f32.vlgmr.msra.gmra.mrb[0].mxu1 %vm103_vm0, %v53_v11  ;;  %7458 = vmatprep.subr.bf16.mxu0 %v7457_v24  ;;  %v686_v42 = vld [vmem:[%s18566_s4 + $0xd0] sm:$0xff]  ;;  %v717_v45 = vld [vmem:[%s18566_s4 + $0x1c8] sm:$0xff]  ;;  %v695_v46 = vld [vmem:[%s18566_s4 + $0x118] sm:$0xff]  ;;  %v7463_v49 = vpack.c.bf16 %v700_v39, %v692_v38 }
   0xc   :  { %419 = vmatprep.mubr.f32.mxu1 %v10482_v3  ;;  %7520 = vmatpush1.bf16.msra.mxu1 %v7519_v33  ;;  %v7523_v44 = vpack.c.bf16 %v686_v42, %v678_v40  ;;  %v703_v47 = vld [vmem:[%s18566_s4 + $0x158] sm:$0xff]  ;;  %v55_v48 = vld [vmem:[%s18565_s0 + $0x10] sm:$0xff]  ;;  %v7465_v51 = vpack.c.bf16 %v717_v45, %v709_v43  ;;  %v708_v52 = vld [vmem:[%s18566_s4 + $0x180] sm:$0xff] }
   0xd   :  { %7404 = vmatmul.mubr.msk.f32.gmra.mrb[2].mxu0 %vm103_vm0, %v54_v29  ;;  %v694_v50 = vld [vmem:[%s18566_s4 + $0x110] sm:$0xff]  ;;  %v716_v53 = vld [vmem:[%s18566_s4 + $0x1c0] sm:$0xff]  ;;  %7522 = vmatprep.subr.bf16.mxu1 %v7521_v41  ;;  %v7525_v55 = vpack.c.bf16 %v703_v47, %v695_v46  ;;  %v725_v56 = vld [vmem:[%s18566_s4 + $0x208] sm:$0xff] }
   0xe   :  { %7460 = vmatpush1.bf16.msra.mxu0 %v7459_v32  ;;  %240 = vmatprep.mubr.f32.mxu0 %v10482_v3  ;;  %v702_v54 = vld [vmem:[%s18566_s4 + $0x150] sm:$0xff]  ;;  %v733_v57 = vld [vmem:[%s18566_s4 + $0x248] sm:$0xff]  ;;  %v711_v59 = vld [vmem:[%s18566_s4 + $0x198] sm:$0xff]  ;;  %v7467_v62 = vpack.c.bf16 %v716_v53, %v708_v52 }
   0xf   :  { %7424 = vmatmul.mubr.msk.f32.gmra.mrb[2].mxu1 %vm103_vm0, %v54_v29  ;;  %7462 = vmatprep.subr.bf16.mxu0 %v7461_v37  ;;  %v7527_v58 = vpack.c.bf16 %v702_v54, %v694_v50  ;;  %v719_v60 = vld [vmem:[%s18566_s4 + $0x1d8] sm:$0xff]  ;;  %v710_v63 = vld [vmem:[%s18566_s4 + $0x190] sm:$0xff]  ;;  %v7469_v1 = vpack.c.bf16 %v733_v57, %v725_v56  ;;  %v724_v2 = vld [vmem:[%s18566_s4 + $0x200] sm:$0xff] }
  0x10   :  { %425 = vmatprep.mubr.f32.mxu1 %v10482_v3  ;;  %7524 = vmatpush1.bf16.msra.mxu1 %v7523_v44  ;;  %v56_v61 = vld [vmem:[%s18565_s0 + $0x18] sm:$0xff]  ;;  %v718_v0 = vld [vmem:[%s18566_s4 + $0x1d0] sm:$0xff]  ;;  %v732_v4 = vld [vmem:[%s18566_s4 + $0x240] sm:$0xff]  ;;  %v7529_v5 = vpack.c.bf16 %v719_v60, %v711_v59 }
  0x11   :  { %7405 = vmatmul.mubr.msk.f32.gmra.mrb[4].mxu0 %vm103_vm0, %v55_v48  ;;  %7526 = vmatprep.subr.bf16.mxu1 %v7525_v55  ;;  %v741_v6 = vld [vmem:[%s18566_s4 + $0x288] sm:$0xff]  ;;  %v7531_v8 = vpack.c.bf16 %v718_v0, %v710_v63  ;;  %v727_v9 = vld [vmem:[%s18566_s4 + $0x218] sm:$0xff]  ;;  %v57_v11 = vld [vmem:[%s18565_s0 + $0x20] sm:$0xff]  ;;  %v7471_v12 = vpack.c.bf16 %v732_v4, %v724_v2 }
  0x12   :  { %7464 = vmatpush1.bf16.msra.mxu0 %v7463_v49  ;;  %246 = vmatprep.mubr.f32.mxu0 %v10482_v3  ;;  %v749_v7 = vld [vmem:[%s18566_s4 + $0x2c8] sm:$0xff]  ;;  %v735_v10 = vld [vmem:[%s18566_s4 + $0x258] sm:$0xff]  ;;  %v726_v13 = vld [vmem:[%s18566_s4 + $0x210] sm:$0xff] }
  0x13   :  { %7425 = vmatmul.mubr.msk.f32.gmra.mrb[4].mxu1 %vm103_vm0, %v55_v48  ;;  %7466 = vmatprep.subr.bf16.mxu0 %v7465_v51  ;;  %v734_v14 = vld [vmem:[%s18566_s4 + $0x250] sm:$0xff]  ;;  %v7473_v15 = vpack.c.bf16 %v749_v7, %v741_v6  ;;  %v740_v16 = vld [vmem:[%s18566_s4 + $0x280] sm:$0xff]  ;;  %v7533_v18 = vpack.c.bf16 %v735_v10, %v727_v9  ;;  %v757_v19 = vld [vmem:[%s18566_s4 + $0x308] sm:$0xff] }
  0x14   :  { %431 = vmatprep.mubr.f32.mxu1 %v10482_v3  ;;  %7528 = vmatpush1.bf16.msra.mxu1 %v7527_v58  ;;  %v748_v17 = vld [vmem:[%s18566_s4 + $0x2c0] sm:$0xff]  ;;  %v765_v20 = vld [vmem:[%s18566_s4 + $0x348] sm:$0xff]  ;;  %v7535_v21 = vpack.c.bf16 %v734_v14, %v726_v13  ;;  %v743_v22 = vld [vmem:[%s18566_s4 + $0x298] sm:$0xff] }
  0x15   :  { %7406 = vmatmul.mubr.msk.f32.gmra.mrb[6].mxu0 %vm103_vm0, %v56_v61  ;;  %7530 = vmatprep.subr.bf16.mxu1 %v7529_v5  ;;  %v751_v23 = vld [vmem:[%s18566_s4 + $0x2d8] sm:$0xff]  ;;  %v58_v24 = vld [vmem:[%s18565_s0 + $0x28] sm:$0xff]  ;;  %v7475_v25 = vpack.c.bf16 %v748_v17, %v740_v16  ;;  %v742_v26 = vld [vmem:[%s18566_s4 + $0x290] sm:$0xff]  ;;  %v7477_v28 = vpack.c.bf16 %v765_v20, %v757_v19 }
  0x16   :  { %252 = vmatprep.mubr.f32.mxu0 %v10482_v3  ;;  %7468 = vmatpush1.bf16.msra.mxu0 %v7467_v62  ;;  %v750_v27 = vld [vmem:[%s18566_s4 + $0x2d0] sm:$0xff]  ;;  %v756_v29 = vld [vmem:[%s18566_s4 + $0x300] sm:$0xff]  ;;  %v7537_v31 = vpack.c.bf16 %v751_v23, %v743_v22  ;;  %v773_v32 = vld [vmem:[%s18566_s4 + $0x388] sm:$0xff] }
  0x17   :  { %7426 = vmatmul.mubr.msk.f32.gmra.mrb[6].mxu1 %vm103_vm0, %v56_v61  ;;  %7470 = vmatprep.subr.bf16.mxu0 %v7469_v1  ;;  %v764_v30 = vld [vmem:[%s18566_s4 + $0x340] sm:$0xff]  ;;  %v781_v33 = vld [vmem:[%s18566_s4 + $0x3c8] sm:$0xff]  ;;  %v7539_v34 = vpack.c.bf16 %v750_v27, %v742_v26  ;;  %v759_v35 = vld [vmem:[%s18566_s4 + $0x318] sm:$0xff] }
  0x18   :  { %437 = vmatprep.mubr.f32.mxu1 %v10482_v3  ;;  %7532 = vmatpush1.bf16.msra.mxu1 %v7531_v8  ;;  %v767_v36 = vld [vmem:[%s18566_s4 + $0x358] sm:$0xff]  ;;  %v59_v37 = vld [vmem:[%s18565_s0 + $0x30] sm:$0xff]  ;;  %v7479_v38 = vpack.c.bf16 %v764_v30, %v756_v29  ;;  %v7481_v41 = vpack.c.bf16 %v781_v33, %v773_v32  ;;  %v772_v42 = vld [vmem:[%s18566_s4 + $0x380] sm:$0xff] }
  0x19   :  { %7407 = vmatmul.mubr.msk.f32.gmra.mrb[8].mxu0 %vm103_vm0, %v57_v11  ;;  %7534 = vmatprep.subr.bf16.mxu1 %v7533_v18  ;;  %v758_v39 = vld [vmem:[%s18566_s4 + $0x310] sm:$0xff]  ;;  %v780_v43 = vld [vmem:[%s18566_s4 + $0x3c0] sm:$0xff]  ;;  %v7541_v44 = vpack.c.bf16 %v767_v36, %v759_v35  ;;  %v789_v45 = vld [vmem:[%s18566_s4 + $0x408] sm:$0xff] }
  0x1a   :  { %258 = vmatprep.mubr.f32.mxu0 %v10482_v3  ;;  %7472 = vmatpush1.bf16.msra.mxu0 %v7471_v12  ;;  %v766_v40 = vld [vmem:[%s18566_s4 + $0x350] sm:$0xff]  ;;  %v797_v46 = vld [vmem:[%s18566_s4 + $0x448] sm:$0xff]  ;;  %v775_v48 = vld [vmem:[%s18566_s4 + $0x398] sm:$0xff]  ;;  %v7483_v51 = vpack.c.bf16 %v780_v43, %v772_v42 }
  0x1b   :  { %7427 = vmatmul.mubr.msk.f32.gmra.mrb[8].mxu1 %vm103_vm0, %v57_v11  ;;  %7474 = vmatprep.subr.bf16.mxu0 %v7473_v15  ;;  %v7543_v47 = vpack.c.bf16 %v766_v40, %v758_v39  ;;  %v783_v49 = vld [vmem:[%s18566_s4 + $0x3d8] sm:$0xff]  ;;  %v774_v52 = vld [vmem:[%s18566_s4 + $0x390] sm:$0xff]  ;;  %v7485_v54 = vpack.c.bf16 %v797_v46, %v789_v45  ;;  %v788_v55 = vld [vmem:[%s18566_s4 + $0x400] sm:$0xff] }
  0x1c   :  { %443 = vmatprep.mubr.f32.mxu1 %v10482_v3  ;;  %7536 = vmatpush1.bf16.msra.mxu1 %v7535_v21  ;;  %v60_v50 = vld [vmem:[%s18565_s0 + $0x38] sm:$0xff]  ;;  %v782_v53 = vld [vmem:[%s18566_s4 + $0x3d0] sm:$0xff]  ;;  %v796_v56 = vld [vmem:[%s18566_s4 + $0x440] sm:$0xff]  ;;  %v7545_v57 = vpack.c.bf16 %v783_v49, %v775_v48 }
  0x1d   :  { %7408 = vmatmul.mubr.msk.f32.gmra.mrb[10].mxu0 %vm103_vm0, %v58_v24  ;;  %7538 = vmatprep.subr.bf16.mxu1 %v7537_v31  ;;  %v7547_v58 = vpack.c.bf16 %v782_v53, %v774_v52  ;;  %v61_v59 = vld [vmem:[%s18565_s0 + $0x40] sm:$0xff]  ;;  %v7487_v60 = vpack.c.bf16 %v796_v56, %v788_v55  ;;  %v62_v61 = vld [vmem:[%s18565_s0 + $0x48] sm:$0xff]  ;;  %v63_v62 = vld [vmem:[%s18565_s0 + $0x50] sm:$0xff] }
  0x1e   :  { %264 = vmatprep.mubr.f32.mxu0 %v10482_v3  ;;  %7476 = vmatpush1.bf16.msra.mxu0 %v7475_v25  ;;  %v64_v63 = vld [vmem:[%s18565_s0 + $0x58] sm:$0xff]  ;;  %v790_v4 = vld [vmem:[%s18566_s4 + $0x410] sm:$0xff]  ;;  %v65_v7 = vld [vmem:[%s18565_s0 + $0x60] sm:$0xff] }
  0x1f   :  { %7428 = vmatmul.mubr.msk.f32.gmra.mrb[10].mxu1 %vm103_vm0, %v58_v24  ;;  %7478 = vmatprep.subr.bf16.mxu0 %v7477_v28  ;;  %v791_v0 = vld [vmem:[%s18566_s4 + $0x418] sm:$0xff]  ;;  %v798_v5 = vld [vmem:[%s18566_s4 + $0x450] sm:$0xff]  ;;  %v805_v8 = vld [vmem:[%s18566_s4 + $0x488] sm:$0xff] }
  0x20   :  { %449 = vmatprep.mubr.f32.mxu1 %v10482_v3  ;;  %7540 = vmatpush1.bf16.msra.mxu1 %v7539_v34  ;;  %v799_v1 = vld [vmem:[%s18566_s4 + $0x458] sm:$0xff]  ;;  %v7551_v6 = vpack.c.bf16 %v798_v5, %v790_v4  ;;  %v813_v9 = vld [vmem:[%s18566_s4 + $0x4c8] sm:$0xff]  ;;  %v804_v12 = vld [vmem:[%s18566_s4 + $0x480] sm:$0xff] }
  0x21   :  { %7409 = vmatmul.mubr.msk.f32.gmra.mrb[12].mxu0 %vm103_vm0, %v59_v37  ;;  %7542 = vmatprep.subr.bf16.mxu1 %v7541_v44  ;;  %v7549_v2 = vpack.c.bf16 %v799_v1, %v791_v0  ;;  %v807_v10 = vld [vmem:[%s18566_s4 + $0x498] sm:$0xff]  ;;  %v7489_v11 = vpack.c.bf16 %v813_v9, %v805_v8  ;;  %v812_v13 = vld [vmem:[%s18566_s4 + $0x4c0] sm:$0xff]  ;;  %v806_v17 = vld [vmem:[%s18566_s4 + $0x490] sm:$0xff] }
  0x22   :  { %270 = vmatprep.mubr.f32.mxu0 %v10482_v3  ;;  %7480 = vmatpush1.bf16.msra.mxu0 %v7479_v38  ;;  %v815_v14 = vld [vmem:[%s18566_s4 + $0x4d8] sm:$0xff]  ;;  %v7491_v15 = vpack.c.bf16 %v812_v13, %v804_v12  ;;  %v814_v18 = vld [vmem:[%s18566_s4 + $0x4d0] sm:$0xff]  ;;  %v66_v20 = vld [vmem:[%s18565_s0 + $0x68] sm:$0xff] }
  0x23   :  { %7429 = vmatmul.mubr.msk.f32.gmra.mrb[12].mxu1 %vm103_vm0, %v59_v37  ;;  %7482 = vmatprep.subr.bf16.mxu0 %v7481_v41  ;;  %v7553_v16 = vpack.c.bf16 %v815_v14, %v807_v10  ;;  %v7555_v19 = vpack.c.bf16 %v814_v18, %v806_v17  ;;  %v821_v21 = vld [vmem:[%s18566_s4 + $0x508] sm:$0xff]  ;;  %v823_v23 = vld [vmem:[%s18566_s4 + $0x518] sm:$0xff]  ;;  %v820_v25 = vld [vmem:[%s18566_s4 + $0x500] sm:$0xff] }
  0x24   :  { %455 = vmatprep.mubr.f32.mxu1 %v10482_v3  ;;  %7544 = vmatpush1.bf16.msra.mxu1 %v7543_v47  ;;  %v829_v22 = vld [vmem:[%s18566_s4 + $0x548] sm:$0xff]  ;;  %v828_v26 = vld [vmem:[%s18566_s4 + $0x540] sm:$0xff]  ;;  %v831_v27 = vld [vmem:[%s18566_s4 + $0x558] sm:$0xff] }
  0x25   :  { %7410 = vmatmul.mubr.msk.f32.gmra.mrb[14].mxu0 %vm103_vm0, %v60_v50  ;;  %7546 = vmatprep.subr.bf16.mxu1 %v7545_v57  ;;  %v7493_v24 = vpack.c.bf16 %v829_v22, %v821_v21  ;;  %v7495_v28 = vpack.c.bf16 %v828_v26, %v820_v25  ;;  %v7557_v29 = vpack.c.bf16 %v831_v27, %v823_v23  ;;  %v822_v30 = vld [vmem:[%s18566_s4 + $0x510] sm:$0xff]  ;;  %v837_v34 = vld [vmem:[%s18566_s4 + $0x588] sm:$0xff]  ;;  %v839_v36 = vld [vmem:[%s18566_s4 + $0x598] sm:$0xff] }
  0x26   :  { %276 = vmatprep.mubr.f32.mxu0 %v10482_v3  ;;  %7484 = vmatpush1.bf16.msra.mxu0 %v7483_v51  ;;  %v830_v31 = vld [vmem:[%s18566_s4 + $0x550] sm:$0xff]  ;;  %v845_v35 = vld [vmem:[%s18566_s4 + $0x5c8] sm:$0xff]  ;;  %v836_v38 = vld [vmem:[%s18566_s4 + $0x580] sm:$0xff] }
  0x27   :  { %7430 = vmatmul.mubr.msk.f32.gmra.mrb[14].mxu1 %vm103_vm0, %v60_v50  ;;  %7486 = vmatprep.subr.bf16.mxu0 %v7485_v54  ;;  %v7559_v32 = vpack.c.bf16 %v830_v31, %v822_v30  ;;  %v67_v33 = vld [vmem:[%s18565_s0 + $0x70] sm:$0xff]  ;;  %v7497_v37 = vpack.c.bf16 %v845_v35, %v837_v34  ;;  %v844_v39 = vld [vmem:[%s18566_s4 + $0x5c0] sm:$0xff]  ;;  %v847_v40 = vld [vmem:[%s18566_s4 + $0x5d8] sm:$0xff] }
  0x28   :  { %461 = vmatprep.mubr.f32.mxu1 %v10482_v3  ;;  %7548 = vmatpush1.bf16.msra.mxu1 %v7547_v58  ;;  %v7499_v41 = vpack.c.bf16 %v844_v39, %v836_v38  ;;  %v7561_v42 = vpack.c.bf16 %v847_v40, %v839_v36  ;;  %v838_v43 = vld [vmem:[%s18566_s4 + $0x590] sm:$0xff]  ;;  %v68_v45 = vld [vmem:[%s18565_s0 + $0x78] sm:$0xff]  ;;  %v853_v47 = vld [vmem:[%s18566_s4 + $0x608] sm:$0xff] }
  0x29   :  { %7411 = vmatmul.mubr.msk.f32.gmra.mrb[16].mxu0 %vm103_vm0, %v61_v59  ;;  %7550 = vmatprep.subr.bf16.mxu1 %v7549_v2  ;;  %v846_v44 = vld [vmem:[%s18566_s4 + $0x5d0] sm:$0xff]  ;;  %v861_v48 = vld [vmem:[%s18566_s4 + $0x648] sm:$0xff]  ;;  %v855_v49 = vld [vmem:[%s18566_s4 + $0x618] sm:$0xff] }
  0x2a   :  { %282 = vmatprep.mubr.f32.mxu0 %v10482_v3  ;;  %7488 = vmatpush1.bf16.msra.mxu0 %v7487_v60  ;;  %v7563_v46 = vpack.c.bf16 %v846_v44, %v838_v43  ;;  %v7501_v50 = vpack.c.bf16 %v861_v48, %v853_v47  ;;  %v852_v51 = vld [vmem:[%s18566_s4 + $0x600] sm:$0xff]  ;;  %v863_v53 = vld [vmem:[%s18566_s4 + $0x658] sm:$0xff]  ;;  %v854_v56 = vld [vmem:[%s18566_s4 + $0x610] sm:$0xff] }
  0x2b   :  { %7431 = vmatmul.mubr.msk.f32.gmra.mrb[16].mxu1 %vm103_vm0, %v61_v59  ;;  %7490 = vmatprep.subr.bf16.mxu0 %v7489_v11  ;;  %v860_v52 = vld [vmem:[%s18566_s4 + $0x640] sm:$0xff]  ;;  %v7565_v55 = vpack.c.bf16 %v863_v53, %v855_v49  ;;  %v862_v57 = vld [vmem:[%s18566_s4 + $0x650] sm:$0xff]  ;;  %v869_v60 = vld [vmem:[%s18566_s4 + $0x688] sm:$0xff] }
  0x2c   :  { %467 = vmatprep.mubr.f32.mxu1 %v10482_v3  ;;  %7552 = vmatpush1.bf16.msra.mxu1 %v7551_v6  ;;  %v7503_v54 = vpack.c.bf16 %v860_v52, %v852_v51  ;;  %v69_v58 = vld [vmem:[%s18565_s0 + $0x80] sm:$0xff]  ;;  %v7567_v59 = vpack.c.bf16 %v862_v57, %v854_v56  ;;  %v879_v2 = vld [vmem:[%s18566_s4 + $0x6d8] sm:$0xff]  ;;  %v870_v6 = vld [vmem:[%s18566_s4 + $0x690] sm:$0xff] }
  0x2d   :  { %7412 = vmatmul.mubr.msk.f32.gmra.mrb[18].mxu0 %vm103_vm0, %v62_v61  ;;  %7554 = vmatprep.subr.bf16.mxu1 %v7553_v16  ;;  %v868_v0 = vld [vmem:[%s18566_s4 + $0x680] sm:$0xff]  ;;  %v70_v8 = vld [vmem:[%s18565_s0 + $0x88] sm:$0xff]  ;;  %v887_v12 = vld [vmem:[%s18566_s4 + $0x718] sm:$0xff] }
  0x2e   :  { %288 = vmatprep.mubr.f32.mxu0 %v10482_v3  ;;  %7492 = vmatpush1.bf16.msra.mxu0 %v7491_v15  ;;  %v876_v1 = vld [vmem:[%s18566_s4 + $0x6c0] sm:$0xff]  ;;  %v885_v10 = vld [vmem:[%s18566_s4 + $0x708] sm:$0xff]  ;;  %v895_v16 = vld [vmem:[%s18566_s4 + $0x758] sm:$0xff] }
  0x2f   :  { %7432 = vmatmul.mubr.msk.f32.gmra.mrb[18].mxu1 %vm103_vm0, %v62_v61  ;;  %7494 = vmatprep.subr.bf16.mxu0 %v7493_v24  ;;  %v877_v61 = vld [vmem:[%s18566_s4 + $0x6c8] sm:$0xff]  ;;  %v7507_v4 = vpack.c.bf16 %v876_v1, %v868_v0  ;;  %v884_v14 = vld [vmem:[%s18566_s4 + $0x700] sm:$0xff]  ;;  %v7573_v18 = vpack.c.bf16 %v895_v16, %v887_v12  ;;  %v71_v21 = vld [vmem:[%s18565_s0 + $0x90] sm:$0xff] }
  0x30   :  { %473 = vmatprep.mubr.f32.mxu1 %v10482_v3  ;;  %7556 = vmatpush1.bf16.msra.mxu1 %v7555_v19  ;;  %v893_v11 = vld [vmem:[%s18566_s4 + $0x748] sm:$0xff]  ;;  %v892_v15 = vld [vmem:[%s18566_s4 + $0x740] sm:$0xff]  ;;  %v886_v19 = vld [vmem:[%s18566_s4 + $0x710] sm:$0xff] }
  0x31   :  { %7413 = vmatmul.mubr.msk.f32.gmra.mrb[20].mxu0 %vm103_vm0, %v63_v62  ;;  %7558 = vmatprep.subr.bf16.mxu1 %v7557_v29  ;;  %v7509_v13 = vpack.c.bf16 %v893_v11, %v885_v10  ;;  %v7511_v17 = vpack.c.bf16 %v892_v15, %v884_v14  ;;  %v901_v23 = vld [vmem:[%s18566_s4 + $0x788] sm:$0xff]  ;;  %v903_v25 = vld [vmem:[%s18566_s4 + $0x798] sm:$0xff]  ;;  %v900_v27 = vld [vmem:[%s18566_s4 + $0x780] sm:$0xff] }
  0x32   :  { %294 = vmatprep.mubr.f32.mxu0 %v10482_v3  ;;  %7496 = vmatpush1.bf16.msra.mxu0 %v7495_v28  ;;  %v909_v24 = vld [vmem:[%s18566_s4 + $0x7c8] sm:$0xff]  ;;  %v908_v28 = vld [vmem:[%s18566_s4 + $0x7c0] sm:$0xff]  ;;  %v911_v29 = vld [vmem:[%s18566_s4 + $0x7d8] sm:$0xff] }
  0x33   :  { %7433 = vmatmul.mubr.msk.f32.gmra.mrb[20].mxu1 %vm103_vm0, %v63_v62  ;;  %7498 = vmatprep.subr.bf16.mxu0 %v7497_v37  ;;  %v871_v62 = vld [vmem:[%s18566_s4 + $0x698] sm:$0xff]  ;;  %v7513_v26 = vpack.c.bf16 %v909_v24, %v901_v23  ;;  %v7515_v30 = vpack.c.bf16 %v908_v28, %v900_v27  ;;  %v7577_v31 = vpack.c.bf16 %v911_v29, %v903_v25  ;;  %v665_v36 = vld [vmem:[%s18566_s4 + $0x28] sm:$0xff]  ;;  %v664_v29 = vld [vmem:[%s18566_s4 + $0x20] sm:$0xff] }
  0x34   :  { %479 = vmatprep.mubr.f32.mxu1 %v10482_v3  ;;  %7560 = vmatpush1.bf16.msra.mxu1 %v7559_v32  ;;  %v7569_v5 = vpack.c.bf16 %v879_v2, %v871_v62  ;;  %v902_v32 = vld [vmem:[%s18566_s4 + $0x790] sm:$0xff]  ;;  %v72_v34 = vld [vmem:[%s18565_s0 + $0x98] sm:$0xff]  ;;  %v673_v37 = vld [vmem:[%s18566_s4 + $0x68] sm:$0xff] }
  0x35   :  { %7414 = vmatmul.mubr.msk.f32.gmra.mrb[22].mxu0 %vm103_vm0, %v64_v63  ;;  %7562 = vmatprep.subr.bf16.mxu1 %v7561_v42  ;;  %v667_v38 = vld [vmem:[%s18566_s4 + $0x38] sm:$0xff]  ;;  %v7581_v39 = vpack.c.bf16 %v673_v37, %v665_v36  ;;  %v18573_v42 = vlaneseq  ;;  %v689_v36 = vld [vmem:[%s18566_s4 + $0xe8] sm:$0xff] }
  0x36   :  { %300 = vmatprep.mubr.f32.mxu0 %v10482_v3  ;;  %7500 = vmatpush1.bf16.msra.mxu0 %v7499_v41  ;;  %v675_v40 = vld [vmem:[%s18566_s4 + $0x78] sm:$0xff] }
  0x37   :  { %7434 = vmatmul.mubr.msk.f32.gmra.mrb[22].mxu1 %vm103_vm0, %v64_v63  ;;  %7502 = vmatprep.subr.bf16.mxu0 %v7501_v50  ;;  %v7505_v63 = vpack.c.bf16 %v877_v61, %v869_v60  ;;  %v7645_v41 = vpack.c.bf16 %v675_v40, %v667_v38  ;;  %v11092_v43 = vshrl.u32 %v18573_v42, 7  ;;  %v683_v37 = vld [vmem:[%s18566_s4 + $0xb8] sm:$0xff]  ;;  %v6095_v42 = vld [vmem:[%s18566_s4 + $0x4e0] sm:$0xff] }
  0x38   :  { %485 = vmatprep.mubr.f32.mxu1 %v10482_v3  ;;  %7564 = vmatpush1.bf16.msra.mxu1 %v7563_v46  ;;  %v691_v38 = vld [vmem:[%s18566_s4 + $0xf8] sm:$0xff] }
  0x39   :  { %7415 = vmatmul.mubr.msk.f32.gmra.mrb[24].mxu0 %vm103_vm0, %v65_v7  ;;  %7566 = vmatprep.subr.bf16.mxu1 %v7565_v55  ;;  %18610 = vst [vmem:[#allocation6_spill] sm:$0xff] %v11092_v43  ;;  %v11095_v44 = vsub.s32 0, %v11092_v43  ;;  %v11101_v46 = vsub.s32 1, %v11092_v43  ;;  %v11104_v47 = vsub.s32 2, %v11092_v43  ;;  %v11119_v57 = vsub.s32 3, %v11092_v43 }
  0x3a   :  { %306 = vmatprep.mubr.f32.mxu0 %v10482_v3  ;;  %7504 = vmatpush1.bf16.msra.mxu0 %v7503_v54 }
  0x3b   :  { %7435 = vmatmul.mubr.msk.f32.gmra.mrb[24].mxu1 %vm103_vm0, %v65_v7  ;;  %v878_v7 = vld [vmem:[%s18566_s4 + $0x6d0] sm:$0xff]  ;;  %7506 = vmatprep.subr.bf16.mxu0 %v7505_v63  ;;  %18611 = vst [vmem:[#allocation7_spill] sm:$0xff] %v11101_v46 }
  0x3c   :  { %491 = vmatprep.mubr.f32.mxu1 %v10482_v3  ;;  %7568 = vmatpush1.bf16.msra.mxu1 %v7567_v59  ;;  %v7571_v9 = vpack.c.bf16 %v878_v7, %v870_v6 }
  0x3d   :  { %7416 = vmatmul.mubr.msk.f32.gmra.mrb[26].mxu0 %vm103_vm0, %v66_v20  ;;  %7570 = vmatprep.subr.bf16.mxu1 %v7569_v5 }
  0x3e   :  { %312 = vmatprep.mubr.f32.mxu0 %v10482_v3  ;;  %7508 = vmatpush1.bf16.msra.mxu0 %v7507_v4 }
  0x3f   :  { %7436 = vmatmul.mubr.msk.f32.gmra.mrb[26].mxu1 %vm103_vm0, %v66_v20  ;;  %v894_v20 = vld [vmem:[%s18566_s4 + $0x750] sm:$0xff]  ;;  %7510 = vmatprep.subr.bf16.mxu0 %v7509_v13 }
  0x40   :  { %497 = vmatprep.mubr.f32.mxu1 %v10482_v3  ;;  %7572 = vmatpush1.bf16.msra.mxu1 %v7571_v9  ;;  %v7575_v22 = vpack.c.bf16 %v894_v20, %v886_v19 }
  0x41   :  { %7417 = vmatmul.mubr.msk.f32.gmra.mrb[28].mxu0 %vm103_vm0, %v67_v33  ;;  %7574 = vmatprep.subr.bf16.mxu1 %v7573_v18 }
  0x42   :  { %318 = vmatprep.mubr.f32.mxu0 %v10482_v3  ;;  %7512 = vmatpush1.bf16.msra.mxu0 %v7511_v17 }
  0x43   :  { %7437 = vmatmul.mubr.msk.f32.gmra.mrb[28].mxu1 %vm103_vm0, %v67_v33  ;;  %v910_v33 = vld [vmem:[%s18566_s4 + $0x7d0] sm:$0xff]  ;;  %7514 = vmatprep.subr.bf16.mxu0 %v7513_v26 }
  0x44   :  { %503 = vmatprep.mubr.f32.mxu1 %v10482_v3  ;;  %7576 = vmatpush1.bf16.msra.mxu1 %v7575_v22  ;;  %v7579_v35 = vpack.c.bf16 %v910_v33, %v902_v32  ;;  %v666_v32 = vld [vmem:[%s18566_s4 + $0x30] sm:$0xff] }
  0x45   :  { %7418 = vmatmul.mubr.msk.f32.gmra.mrb[30].mxu0 %vm103_vm0, %v68_v45  ;;  %7578 = vmatprep.subr.bf16.mxu1 %v7577_v31  ;;  %v672_v31 = vld [vmem:[%s18566_s4 + $0x60] sm:$0xff]  ;;  %v674_v33 = vld [vmem:[%s18566_s4 + $0x70] sm:$0xff] }
  0x46   :  { %324 = vmatprep.mubr.f32.mxu0 %v10482_v3  ;;  %7516 = vmatpush1.bf16.msra.mxu0 %v7515_v30  ;;  %v7583_v40 = vpack.c.bf16 %v672_v31, %v664_v29  ;;  %v728_v31 = vld [vmem:[%s18566_s4 + $0x220] sm:$0xff] }
  0x47   :  { %7438 = vmatmul.mubr.msk.f32.gmra.mrb[30].mxu1 %vm103_vm0, %v68_v45  ;;  %7582 = vmatprep.subr.bf16.mxu0 %v7581_v39  ;;  %v81_v45 = vld [vmem:[%s18567_s3] sm:$0xf] }
  0x48   :  { %509 = vmatprep.mubr.f32.mxu1 %v10482_v3  ;;  %7580 = vmatpush1.bf16.msra.mxu1 %v7579_v35  ;;  %v11107_v48 = vrot.slane %v81_v45, %v11095_v44  ;;  %v11110_v49 = vrot.slane %v81_v45, %v11101_v46  ;;  %v11113_v50 = vrot.slane %v81_v45, %v11104_v47 }
  0x49   :  { %7419 = vmatmul.mubr.msk.f32.gmra.mrb[32].mxu0 %vm103_vm0, %v69_v58  ;;  %7646 = vmatprep.subr.bf16.mxu1 %v7645_v41  ;;  %v11124_v0 = vrot.slane %v81_v45, %v11119_v57  ;;  %v7647_v41 = vpack.c.bf16 %v674_v33, %v666_v32  ;;  %v680_v45 = vld [vmem:[%s18566_s4 + $0xa0] sm:$0xff] }
  0x4a   :  { %330 = vmatprep.mubr.f32.mxu0 %v10482_v3  ;;  %18612 = vst [vmem:[#allocation8_spill] sm:$0xff] %v11107_v48  ;;  %18613 = vst [vmem:[#allocation9_spill] sm:$0xff] %v11110_v49  ;;  %v736_v32 = vld [vmem:[%s18566_s4 + $0x260] sm:$0xff] }
  0x4b   :  { %7439 = vmatmul.mubr.msk.f32.gmra.mrb[32].mxu1 %vm103_vm0, %v69_v58  ;;  %18614 = vst [vmem:[#allocation10_spill] sm:$0xff] %v11113_v50  ;;  %18615 = vst [vmem:[#allocation11_spill] sm:$0xff] %v11124_v0 }
  0x4c   :  { %515 = vmatprep.mubr.f32.mxu1 %v10482_v3 }
  0x4d   :  { %7420 = vmatmul.mubr.msk.f32.gmra.mrb[34].mxu0 %vm103_vm0, %v70_v8 }
  0x4e   :  { %336 = vmatprep.mubr.f32.mxu0 %v10482_v3 }
  0x4f   :  { %7440 = vmatmul.mubr.msk.f32.gmra.mrb[34].mxu1 %vm103_vm0, %v70_v8 }
  0x50   :  { %521 = vmatprep.mubr.f32.mxu1 %v10482_v3 }
  0x51   :  { %7421 = vmatmul.mubr.msk.f32.gmra.mrb[36].mxu0 %vm103_vm0, %v71_v21 }
  0x52   :  { %342 = vmatprep.mubr.f32.mxu0 %v10482_v3 }
  0x53   :  { %7441 = vmatmul.mubr.msk.f32.gmra.mrb[36].mxu1 %vm103_vm0, %v71_v21 }
  0x54   :  { %527 = vmatprep.mubr.f32.mxu1 %v10482_v3 }
  0x55   :  { %7422 = vmatmul.mubr.msk.f32.gmra.mrb[38].mxu0 %vm103_vm0, %v72_v34 }
  0x56   :  { %980 = vmatprep.mubr.f32.mxu0 %v10482_v3 }
  0x57   :  { %7442 = vmatmul.mubr.msk.f32.gmra.mrb[38].mxu1 %vm103_vm0, %v72_v34  ;;  %v681_v34 = vld [vmem:[%s18566_s4 + $0xa8] sm:$0xff] }
  0x58   :  { %1057 = vmatprep.mubr.f32.mxu1 %v10482_v3 }
  0xdc   :  { %v230_v51 = vpop.f32.mrb[0].mxu0 }
  0xdd   :  { %v231_v52 = vadd.f32 %v230_v51, %v11107_v48  ;;  %v232_v53 = vpop.f32.mrb[1].mxu0  ;;  %v688_v51 = vld [vmem:[%s18566_s4 + $0xe0] sm:$0xff] }
  0xde   :  { %v233_v54 = vadd.f32 %v232_v53, %v11110_v49  ;;  %v415_v55 = vpop.f32.mrb[0].mxu1 }
  0xdf   :  { %10033 = vtanh.f32 %v231_v52  ;;  %v416_v56 = vadd.f32 %v415_v55, %v11113_v50  ;;  %v417_v58 = vpop.f32.mrb[1].mxu1  ;;  %v690_v55 = vld [vmem:[%s18566_s4 + $0xf0] sm:$0xff] }
  0xe0   :  { %10035 = vtanh.f32 %v233_v54  ;;  %v236_v59 = vpop.f32.mrb[2].mxu0  ;;  %v418_v4 = vadd.f32 %v417_v58, %v11124_v0  ;;  %v682_v54 = vld [vmem:[%s18566_s4 + $0xb0] sm:$0xff]  ;;  %v7585_v58 = vpack.c.bf16 %v689_v36, %v681_v34 }
  0xe1   :  { %v237_v60 = vadd.f32 %v236_v59, %v11107_v48  ;;  %10037 = vtanh.f32 %v416_v56  ;;  %v238_v61 = vpop.f32.mrb[3].mxu0  ;;  %v697_v56 = vld [vmem:[%s18566_s4 + $0x128] sm:$0xff]  ;;  %v7649_v59 = vpack.c.bf16 %v691_v38, %v683_v37  ;;  %v738_v36 = vld [vmem:[%s18566_s4 + $0x270] sm:$0xff] }
  0xe2   :  { %v239_v62 = vadd.f32 %v238_v61, %v11110_v49  ;;  %v421_v63 = vpop.f32.mrb[2].mxu1  ;;  %v699_v61 = vld [vmem:[%s18566_s4 + $0x138] sm:$0xff]  ;;  %v745_v37 = vld [vmem:[%s18566_s4 + $0x2a8] sm:$0xff] }
  0xe3   :  { %10039 = vtanh.f32 %v237_v60  ;;  %v422_v1 = vadd.f32 %v421_v63, %v11113_v50  ;;  %v423_v2 = vpop.f32.mrb[3].mxu1  ;;  %v705_v60 = vld [vmem:[%s18566_s4 + $0x168] sm:$0xff] }
  0xe4   :  { %10041 = vtanh.f32 %v239_v62  ;;  %v424_v6 = vadd.f32 %v423_v2, %v11124_v0  ;;  %v707_v62 = vld [vmem:[%s18566_s4 + $0x178] sm:$0xff]  ;;  %v7651_v2 = vpack.c.bf16 %v690_v55, %v682_v54  ;;  %v753_v38 = vld [vmem:[%s18566_s4 + $0x2e8] sm:$0xff] }
  0xe5   :  { %10043 = vtanh.f32 %v422_v1  ;;  %v7587_v1 = vpack.c.bf16 %v688_v51, %v680_v45  ;;  %v744_v51 = vld [vmem:[%s18566_s4 + $0x2a0] sm:$0xff]  ;;  %v7601_v54 = vpack.c.bf16 %v753_v38, %v745_v37  ;;  %v817_v37 = vld [vmem:[%s18566_s4 + $0x4e8] sm:$0xff]  ;;  %v811_v38 = vld [vmem:[%s18566_s4 + $0x4b8] sm:$0xff] }
  0xe6   :  { %10045 = vtanh.f32 %v418_v4  ;;  %v696_v4 = vld [vmem:[%s18566_s4 + $0x120] sm:$0xff] }
  0xe7   :  { %10047 = vtanh.f32 %v424_v6 }
  0xe9   :  { %v10034_v5 = vpop.eup %10033 }
  0xea   :  { %v10036_v7 = vpop.eup %10035  ;;  %v630_v8 = vmul.f32 0.5, %v10034_v5  ;;  %v704_v5 = vld [vmem:[%s18566_s4 + $0x160] sm:$0xff] }
  0xeb   :  { %v10038_v9 = vpop.eup %10037  ;;  %v634_v10 = vmul.f32 0.5, %v10036_v7  ;;  %v7589_v7 = vpack.c.bf16 %v705_v60, %v697_v56  ;;  %v746_v56 = vld [vmem:[%s18566_s4 + $0x2b0] sm:$0xff]  ;;  %v769_v60 = vld [vmem:[%s18566_s4 + $0x368] sm:$0xff] }
  0xec   :  { %v632_v11 = vadd.f32 0.5, %v630_v8  ;;  %v7653_v8 = vpack.c.bf16 %v707_v62, %v699_v61  ;;  %v763_v61 = vld [vmem:[%s18566_s4 + $0x338] sm:$0xff] }
  0xed   :  { %v10040_v12 = vpop.eup %10039  ;;  %v636_v13 = vadd.f32 0.5, %v634_v10  ;;  %v706_v10 = vld [vmem:[%s18566_s4 + $0x170] sm:$0xff]  ;;  %v771_v62 = vld [vmem:[%s18566_s4 + $0x378] sm:$0xff] }
  0xee   :  { %v10042_v14 = vpop.eup %10041  ;;  %v631_v15 = vmul.f32 0.5, %v10040_v12  ;;  %v644_v16 = vmul.f32 %v10038_v9, %v632_v11  ;;  %v698_v9 = vld [vmem:[%s18566_s4 + $0x130] sm:$0xff]  ;;  %v713_v11 = vld [vmem:[%s18566_s4 + $0x1a8] sm:$0xff] }
  0xef   :  { %v10044_v17 = vpop.eup %10043  ;;  %v642_v18 = vmul.f32 0.0, %v636_v13  ;;  %v635_v19 = vmul.f32 0.5, %v10042_v14  ;;  %v721_v12 = vld [vmem:[%s18566_s4 + $0x1e8] sm:$0xff]  ;;  %v715_v13 = vld [vmem:[%s18566_s4 + $0x1b8] sm:$0xff] }
  0xf0   :  { %v633_v20 = vadd.f32 0.5, %v631_v15  ;;  %v10046_v25 = vpop.eup %10045  ;;  %v723_v14 = vld [vmem:[%s18566_s4 + $0x1f8] sm:$0xff]  ;;  %v7591_v15 = vpack.c.bf16 %v704_v5, %v696_v4  ;;  %v768_v4 = vld [vmem:[%s18566_s4 + $0x360] sm:$0xff] }
  0xf1   :  { %v11129_v21 = vadd.f32 %v644_v16, %v642_v18  ;;  %v637_v22 = vadd.f32 0.5, %v635_v19  ;;  %v10048_v27 = vpop.eup %10047  ;;  %v638_v28 = vmul.f32 0.5, %v10046_v25  ;;  %v7655_v16 = vpack.c.bf16 %v706_v10, %v698_v9  ;;  %v720_v18 = vld [vmem:[%s18566_s4 + $0x1e0] sm:$0xff]  ;;  %v737_v25 = vld [vmem:[%s18566_s4 + $0x268] sm:$0xff]  ;;  %v770_v9 = vld [vmem:[%s18566_s4 + $0x370] sm:$0xff] }
  0xf2   :  { %v645_v23 = vmul.f32 %v10044_v17, %v633_v20  ;;  %v639_v30 = vmul.f32 0.5, %v10048_v27  ;;  %v712_v17 = vld [vmem:[%s18566_s4 + $0x1a0] sm:$0xff]  ;;  %v7593_v19 = vpack.c.bf16 %v721_v12, %v713_v11  ;;  %v7657_v20 = vpack.c.bf16 %v723_v14, %v715_v13  ;;  %v731_v27 = vld [vmem:[%s18566_s4 + $0x238] sm:$0xff]  ;;  %v777_v10 = vld [vmem:[%s18566_s4 + $0x3a8] sm:$0xff] }
  0xf3   :  { %10049 = vtanh.f32 %v11129_v21  ;;  %v643_v24 = vmul.f32 0.0, %v637_v22  ;;  %v640_v35 = vadd.f32 0.5, %v638_v28  ;;  %v714_v22 = vld [vmem:[%s18566_s4 + $0x1b0] sm:$0xff]  ;;  %v739_v28 = vld [vmem:[%s18566_s4 + $0x278] sm:$0xff]  ;;  %v7595_v29 = vpack.c.bf16 %v720_v18, %v712_v17  ;;  %v785_v11 = vld [vmem:[%s18566_s4 + $0x3e8] sm:$0xff] }
  0xf4   :  { %v641_v53 = vadd.f32 0.5, %v639_v30  ;;  %v7661_v34 = vpack.c.bf16 %v739_v28, %v731_v27  ;;  %v779_v12 = vld [vmem:[%s18566_s4 + $0x3b8] sm:$0xff]  ;;  %v784_v17 = vld [vmem:[%s18566_s4 + $0x3e0] sm:$0xff]  ;;  %v7609_v18 = vpack.c.bf16 %v785_v11, %v777_v10  ;;  %v849_v10 = vld [vmem:[%s18566_s4 + $0x5e8] sm:$0xff] }
  0xf5   :  { %v11132_v26 = vadd.f32 %v645_v23, %v643_v24  ;;  %v722_v23 = vld [vmem:[%s18566_s4 + $0x1f0] sm:$0xff]  ;;  %v729_v24 = vld [vmem:[%s18566_s4 + $0x228] sm:$0xff]  ;;  %v787_v13 = vld [vmem:[%s18566_s4 + $0x3f8] sm:$0xff] }
  0xf6   :  { %v7659_v30 = vpack.c.bf16 %v722_v23, %v714_v22  ;;  %v7597_v33 = vpack.c.bf16 %v737_v25, %v729_v24  ;;  %v786_v22 = vld [vmem:[%s18566_s4 + $0x3f0] sm:$0xff]  ;;  %v793_v23 = vld [vmem:[%s18566_s4 + $0x428] sm:$0xff]  ;;  %v795_v25 = vld [vmem:[%s18566_s4 + $0x438] sm:$0xff] }
  0xf7   :  { %10051 = vtanh.f32 %v11132_v26  ;;  %v801_v24 = vld [vmem:[%s18566_s4 + $0x468] sm:$0xff]  ;;  %v803_v27 = vld [vmem:[%s18566_s4 + $0x478] sm:$0xff] }
  0xf8   :  { %v843_v11 = vld [vmem:[%s18566_s4 + $0x5b8] sm:$0xff] }
  0xfd   :  { %v10050_v39 = vpop.eup %10049 }
  0xfe   :  { %v11165_v52 = vmul.f32 %v10050_v39, %v640_v35  ;;  %v730_v35 = vld [vmem:[%s18566_s4 + $0x230] sm:$0xff]  ;;  %v747_v39 = vld [vmem:[%s18566_s4 + $0x2b8] sm:$0xff] }
  0xff   :  { %v7663_v45 = vpack.c.bf16 %v738_v36, %v730_v35  ;;  %v802_v35 = vld [vmem:[%s18566_s4 + $0x470] sm:$0xff]  ;;  %v809_v36 = vld [vmem:[%s18566_s4 + $0x4a8] sm:$0xff] }
 0x100   :  { %981 = vmatmul.mubr.f32.vlgmr.msra.gmra.mrb[4].mxu0 %v11165_v52  ;;  %1058 = vmatmul.mubr.f32.vlgmr.msra.gmra.mrb[4].mxu1 %v11165_v52 }
 0x101   :  { %v10052_v63 = vpop.eup %10051  ;;  %7584 = vmatpush1.bf16.msra.mxu0 %v7583_v40  ;;  %7648 = vmatpush1.bf16.msra.mxu1 %v7647_v41  ;;  %v755_v40 = vld [vmem:[%s18566_s4 + $0x2f8] sm:$0xff]  ;;  %v7599_v41 = vpack.c.bf16 %v736_v32, %v728_v31  ;;  %v800_v31 = vld [vmem:[%s18566_s4 + $0x460] sm:$0xff]  ;;  %v7613_v32 = vpack.c.bf16 %v801_v24, %v793_v23  ;;  %v865_v23 = vld [vmem:[%s18566_s4 + $0x668] sm:$0xff] }
 0x102   :  { %v11193_v6 = vmul.f32 %v10052_v63, %v641_v53  ;;  %986 = vmatprep.mubr.f32.mxu0 %v10482_v3  ;;  %1063 = vmatprep.mubr.f32.mxu1 %v10482_v3  ;;  %v752_v53 = vld [vmem:[%s18566_s4 + $0x2e0] sm:$0xff]  ;;  %v7665_v55 = vpack.c.bf16 %v755_v40, %v747_v39  ;;  %v819_v39 = vld [vmem:[%s18566_s4 + $0x4f8] sm:$0xff] }
 0x103   :  { %7586 = vmatprep.subr.bf16.mxu0 %v7585_v58  ;;  %7650 = vmatprep.subr.bf16.mxu1 %v7649_v59  ;;  %v754_v58 = vld [vmem:[%s18566_s4 + $0x2f0] sm:$0xff]  ;;  %v761_v59 = vld [vmem:[%s18566_s4 + $0x328] sm:$0xff]  ;;  %v7603_v63 = vpack.c.bf16 %v752_v53, %v744_v51  ;;  %v816_v51 = vld [vmem:[%s18566_s4 + $0x4e0] sm:$0xff]  ;;  %v7617_v53 = vpack.c.bf16 %v817_v37, %v809_v36 }
 0x104   :  { %987 = vmatmul.mubr.f32.gmra.mrb[6].mxu0 %v11193_v6  ;;  %1064 = vmatmul.mubr.f32.gmra.mrb[6].mxu1 %v11193_v6  ;;  %v7605_v5 = vpack.c.bf16 %v769_v60, %v761_v59  ;;  %v833_v59 = vld [vmem:[%s18566_s4 + $0x568] sm:$0xff]  ;;  %v827_v60 = vld [vmem:[%s18566_s4 + $0x538] sm:$0xff] }
 0x105   :  { %7588 = vmatpush1.bf16.msra.mxu0 %v7587_v1  ;;  %7652 = vmatpush1.bf16.msra.mxu1 %v7651_v2  ;;  %v7667_v1 = vpack.c.bf16 %v754_v58, %v746_v56  ;;  %v760_v2 = vld [vmem:[%s18566_s4 + $0x320] sm:$0xff]  ;;  %v818_v56 = vld [vmem:[%s18566_s4 + $0x4f0] sm:$0xff]  ;;  %v825_v58 = vld [vmem:[%s18566_s4 + $0x528] sm:$0xff] }
 0x106   :  { %7590 = vmatprep.subr.bf16.mxu0 %v7589_v7  ;;  %7654 = vmatprep.subr.bf16.mxu1 %v7653_v8  ;;  %v7669_v7 = vpack.c.bf16 %v771_v62, %v763_v61  ;;  %v762_v8 = vld [vmem:[%s18566_s4 + $0x330] sm:$0xff]  ;;  %v7607_v14 = vpack.c.bf16 %v768_v4, %v760_v2  ;;  %v835_v61 = vld [vmem:[%s18566_s4 + $0x578] sm:$0xff]  ;;  %v832_v2 = vld [vmem:[%s18566_s4 + $0x560] sm:$0xff]  ;;  %v7621_v4 = vpack.c.bf16 %v833_v59, %v825_v58 }
 0x107   :  { %1134 = vmatprep.mubr.f32.mxu0 %v10482_v3  ;;  %1211 = vmatprep.mubr.f32.mxu1 %v10482_v3  ;;  %v859_v24 = vld [vmem:[%s18566_s4 + $0x638] sm:$0xff]  ;;  %v881_v36 = vld [vmem:[%s18566_s4 + $0x6e8] sm:$0xff] }
 0x108   :  { %v875_v37 = vld [vmem:[%s18566_s4 + $0x6b8] sm:$0xff]  ;;  %v897_v58 = vld [vmem:[%s18566_s4 + $0x768] sm:$0xff] }
 0x109   :  { %7592 = vmatpush1.bf16.msra.mxu0 %v7591_v15  ;;  %7656 = vmatpush1.bf16.msra.mxu1 %v7655_v16  ;;  %v7671_v15 = vpack.c.bf16 %v770_v9, %v762_v8  ;;  %v776_v16 = vld [vmem:[%s18566_s4 + $0x3a0] sm:$0xff]  ;;  %v834_v8 = vld [vmem:[%s18566_s4 + $0x570] sm:$0xff]  ;;  %v841_v9 = vld [vmem:[%s18566_s4 + $0x5a8] sm:$0xff] }
 0x10a   :  { %7594 = vmatprep.subr.bf16.mxu0 %v7593_v19  ;;  %7658 = vmatprep.subr.bf16.mxu1 %v7657_v20  ;;  %v7673_v19 = vpack.c.bf16 %v787_v13, %v779_v12  ;;  %v778_v20 = vld [vmem:[%s18566_s4 + $0x3b0] sm:$0xff]  ;;  %v7611_v28 = vpack.c.bf16 %v784_v17, %v776_v16  ;;  %v851_v12 = vld [vmem:[%s18566_s4 + $0x5f8] sm:$0xff]  ;;  %v848_v16 = vld [vmem:[%s18566_s4 + $0x5e0] sm:$0xff]  ;;  %v7625_v17 = vpack.c.bf16 %v849_v10, %v841_v9 }
 0x10b   :  { %v891_v59 = vld [vmem:[%s18566_s4 + $0x738] sm:$0xff]  ;;  %v913_v9 = vld [vmem:[%s18566_s4 + $0x7e8] sm:$0xff] }
 0x10c   :  { %v907_v10 = vld [vmem:[%s18566_s4 + $0x7b8] sm:$0xff] }
 0x10d   :  { %7596 = vmatpush1.bf16.msra.mxu0 %v7595_v29  ;;  %7660 = vmatpush1.bf16.msra.mxu1 %v7659_v30  ;;  %v7675_v29 = vpack.c.bf16 %v786_v22, %v778_v20  ;;  %v792_v30 = vld [vmem:[%s18566_s4 + $0x420] sm:$0xff]  ;;  %v850_v20 = vld [vmem:[%s18566_s4 + $0x5f0] sm:$0xff]  ;;  %v857_v22 = vld [vmem:[%s18566_s4 + $0x628] sm:$0xff] }
 0x10e   :  { %7598 = vmatprep.subr.bf16.mxu0 %v7597_v33  ;;  %7662 = vmatprep.subr.bf16.mxu1 %v7661_v34  ;;  %v7677_v33 = vpack.c.bf16 %v803_v27, %v795_v25  ;;  %v794_v34 = vld [vmem:[%s18566_s4 + $0x430] sm:$0xff]  ;;  %v7615_v40 = vpack.c.bf16 %v800_v31, %v792_v30  ;;  %v867_v25 = vld [vmem:[%s18566_s4 + $0x678] sm:$0xff]  ;;  %v864_v30 = vld [vmem:[%s18566_s4 + $0x660] sm:$0xff]  ;;  %v7629_v31 = vpack.c.bf16 %v865_v23, %v857_v22 }
 0x10f   :  { %v1320_v23 = vld [vmem:[%s18566_s4 + $0x8] sm:$0xff] }
 0x111   :  { %7600 = vmatpush1.bf16.msra.mxu0 %v7599_v41  ;;  %7664 = vmatpush1.bf16.msra.mxu1 %v7663_v45  ;;  %v7679_v41 = vpack.c.bf16 %v802_v35, %v794_v34  ;;  %v808_v45 = vld [vmem:[%s18566_s4 + $0x4a0] sm:$0xff]  ;;  %v866_v34 = vld [vmem:[%s18566_s4 + $0x670] sm:$0xff]  ;;  %v873_v35 = vld [vmem:[%s18566_s4 + $0x6a8] sm:$0xff] }
 0x112   :  { %7602 = vmatprep.subr.bf16.mxu0 %v7601_v54  ;;  %7666 = vmatprep.subr.bf16.mxu1 %v7665_v55  ;;  %v7681_v54 = vpack.c.bf16 %v819_v39, %v811_v38  ;;  %v810_v55 = vld [vmem:[%s18566_s4 + $0x4b0] sm:$0xff]  ;;  %v7619_v62 = vpack.c.bf16 %v816_v51, %v808_v45  ;;  %v883_v38 = vld [vmem:[%s18566_s4 + $0x6f8] sm:$0xff]  ;;  %v880_v45 = vld [vmem:[%s18566_s4 + $0x6e0] sm:$0xff]  ;;  %v7633_v51 = vpack.c.bf16 %v881_v36, %v873_v35 }
 0x113   :  { %v1338_v35 = vld [vmem:[%s18566_s4 + $0x98] sm:$0xff] }
 0x115   :  { %7604 = vmatpush1.bf16.msra.mxu0 %v7603_v63  ;;  %7668 = vmatpush1.bf16.msra.mxu1 %v7667_v1  ;;  %v7683_v63 = vpack.c.bf16 %v818_v56, %v810_v55  ;;  %v824_v1 = vld [vmem:[%s18566_s4 + $0x520] sm:$0xff]  ;;  %v882_v55 = vld [vmem:[%s18566_s4 + $0x6f0] sm:$0xff]  ;;  %v889_v56 = vld [vmem:[%s18566_s4 + $0x728] sm:$0xff] }
 0x116   :  { %7606 = vmatprep.subr.bf16.mxu0 %v7605_v5  ;;  %7670 = vmatprep.subr.bf16.mxu1 %v7669_v7  ;;  %v7685_v5 = vpack.c.bf16 %v835_v61, %v827_v60  ;;  %v826_v7 = vld [vmem:[%s18566_s4 + $0x530] sm:$0xff]  ;;  %v7623_v13 = vpack.c.bf16 %v832_v2, %v824_v1  ;;  %v899_v60 = vld [vmem:[%s18566_s4 + $0x778] sm:$0xff]  ;;  %v896_v1 = vld [vmem:[%s18566_s4 + $0x760] sm:$0xff]  ;;  %v7637_v2 = vpack.c.bf16 %v897_v58, %v889_v56 }
 0x117   :  { %v1360_v58 = vld [vmem:[%s18566_s4 + $0x148] sm:$0xff] }
 0x119   :  { %7608 = vmatpush1.bf16.msra.mxu0 %v7607_v14  ;;  %7672 = vmatpush1.bf16.msra.mxu1 %v7671_v15  ;;  %v7687_v14 = vpack.c.bf16 %v834_v8, %v826_v7  ;;  %v840_v15 = vld [vmem:[%s18566_s4 + $0x5a0] sm:$0xff]  ;;  %v898_v7 = vld [vmem:[%s18566_s4 + $0x770] sm:$0xff]  ;;  %v905_v8 = vld [vmem:[%s18566_s4 + $0x7a8] sm:$0xff] }
 0x11a   :  { %7610 = vmatprep.subr.bf16.mxu0 %v7609_v18  ;;  %7674 = vmatprep.subr.bf16.mxu1 %v7673_v19  ;;  %v7689_v18 = vpack.c.bf16 %v851_v12, %v843_v11  ;;  %v842_v19 = vld [vmem:[%s18566_s4 + $0x5b0] sm:$0xff]  ;;  %v7627_v27 = vpack.c.bf16 %v848_v16, %v840_v15  ;;  %v915_v11 = vld [vmem:[%s18566_s4 + $0x7f8] sm:$0xff]  ;;  %v7641_v15 = vpack.c.bf16 %v913_v9, %v905_v8  ;;  %v1376_v8 = vld [vmem:[%s18566_s4 + $0x1c8] sm:$0xff] }
 0x11b   :  { %v7705_v16 = vpack.c.bf16 %v915_v11, %v907_v10  ;;  %v1370_v11 = vld [vmem:[%s18566_s4 + $0x198] sm:$0xff] }
 0x11d   :  { %7612 = vmatpush1.bf16.msra.mxu0 %v7611_v28  ;;  %7676 = vmatpush1.bf16.msra.mxu1 %v7675_v29  ;;  %v7691_v28 = vpack.c.bf16 %v850_v20, %v842_v19  ;;  %v856_v29 = vld [vmem:[%s18566_s4 + $0x620] sm:$0xff]  ;;  %v914_v19 = vld [vmem:[%s18566_s4 + $0x7f0] sm:$0xff] }
 0x11e   :  { %7614 = vmatprep.subr.bf16.mxu0 %v7613_v32  ;;  %7678 = vmatprep.subr.bf16.mxu1 %v7677_v33  ;;  %v7693_v32 = vpack.c.bf16 %v867_v25, %v859_v24  ;;  %v858_v33 = vld [vmem:[%s18566_s4 + $0x630] sm:$0xff]  ;;  %v7631_v39 = vpack.c.bf16 %v864_v30, %v856_v29  ;;  %v1328_v24 = vld [vmem:[%s18566_s4 + $0x48] sm:$0xff] }
 0x11f   :  { %v7709_v25 = vpack.c.bf16 %v1328_v24, %v1320_v23  ;;  %v1321_v30 = vld [vmem:[%s18566_s4 + $0x10] sm:$0xff] }
 0x121   :  { %7616 = vmatpush1.bf16.msra.mxu0 %v7615_v40  ;;  %7680 = vmatpush1.bf16.msra.mxu1 %v7679_v41  ;;  %v7695_v40 = vpack.c.bf16 %v866_v34, %v858_v33  ;;  %v872_v41 = vld [vmem:[%s18566_s4 + $0x6a0] sm:$0xff]  ;;  %v1336_v33 = vld [vmem:[%s18566_s4 + $0x88] sm:$0xff] }
 0x122   :  { %7618 = vmatprep.subr.bf16.mxu0 %v7617_v53  ;;  %7682 = vmatprep.subr.bf16.mxu1 %v7681_v54  ;;  %v7697_v53 = vpack.c.bf16 %v883_v38, %v875_v37  ;;  %v874_v54 = vld [vmem:[%s18566_s4 + $0x6b0] sm:$0xff]  ;;  %v7635_v61 = vpack.c.bf16 %v880_v45, %v872_v41  ;;  %v1344_v34 = vld [vmem:[%s18566_s4 + $0xc8] sm:$0xff]  ;;  %v1346_v37 = vld [vmem:[%s18566_s4 + $0xd8] sm:$0xff] }
 0x123   :  { %v7713_v36 = vpack.c.bf16 %v1344_v34, %v1336_v33  ;;  %v1335_v38 = vld [vmem:[%s18566_s4 + $0x80] sm:$0xff]  ;;  %v1337_v45 = vld [vmem:[%s18566_s4 + $0x90] sm:$0xff] }
 0x125   :  { %7620 = vmatpush1.bf16.msra.mxu0 %v7619_v62  ;;  %7684 = vmatpush1.bf16.msra.mxu1 %v7683_v63  ;;  %v7699_v62 = vpack.c.bf16 %v882_v55, %v874_v54  ;;  %v888_v63 = vld [vmem:[%s18566_s4 + $0x720] sm:$0xff]  ;;  %v10483_v54 = vmov 0   ;;  %v13_v55 = vstv %s18568_s7 }
 0x126   :  { %7622 = vmatprep.subr.bf16.mxu0 %v7621_v4  ;;  %7686 = vmatprep.subr.bf16.mxu1 %v7685_v5  ;;  %v7701_v4 = vpack.c.bf16 %v899_v60, %v891_v59  ;;  %v890_v5 = vld [vmem:[%s18566_s4 + $0x730] sm:$0xff]  ;;  %v7639_v12 = vpack.c.bf16 %v896_v1, %v888_v63  ;;  %v1354_v59 = vld [vmem:[%s18566_s4 + $0x118] sm:$0xff]  ;;  %14 = vst [vmem:[#allocation5] sm:$0x1] %v13_v55  ;;  %v1351_v63 = vld [vmem:[%s18566_s4 + $0x100] sm:$0xff] }
 0x127   :  { %10031 = vset.pattern.permute.xlu0 %v10483_v54  ;;  %10032 = vset.pattern.permute.xlu1 %v10483_v54  ;;  %v1362_v60 = vld [vmem:[%s18566_s4 + $0x158] sm:$0xff]  ;;  %v1359_v1 = vld [vmem:[%s18566_s4 + $0x140] sm:$0xff] }
 0x129   :  { %7624 = vmatpush1.bf16.msra.mxu0 %v7623_v13  ;;  %7688 = vmatpush1.bf16.msra.mxu1 %v7687_v14  ;;  %v7703_v13 = vpack.c.bf16 %v898_v7, %v890_v5  ;;  %v904_v14 = vld [vmem:[%s18566_s4 + $0x7a0] sm:$0xff]  ;;  %v1361_v5 = vld [vmem:[%s18566_s4 + $0x150] sm:$0xff]  ;;  %v1368_v7 = vld [vmem:[%s18566_s4 + $0x188] sm:$0xff] }
 0x12a   :  { %7626 = vmatprep.subr.bf16.mxu0 %v7625_v17  ;;  %7690 = vmatprep.subr.bf16.mxu1 %v7689_v18  ;;  %v912_v17 = vld [vmem:[%s18566_s4 + $0x7e0] sm:$0xff]  ;;  %v906_v18 = vld [vmem:[%s18566_s4 + $0x7b0] sm:$0xff]  ;;  %v7721_v10 = vpack.c.bf16 %v1376_v8, %v1368_v7  ;;  %v1434_v7 = vld [vmem:[%s18566_s4 + $0x398] sm:$0xff] }
 0x12b   :  { %v7643_v20 = vpack.c.bf16 %v912_v17, %v904_v14  ;;  %v7707_v22 = vpack.c.bf16 %v914_v19, %v906_v18  ;;  %v1377_v17 = vld [vmem:[%s18566_s4 + $0x1d0] sm:$0xff]  ;;  %v1384_v19 = vld [vmem:[%s18566_s4 + $0x208] sm:$0xff] }
 0x12d   :  { %7628 = vmatpush1.bf16.msra.mxu0 %v7627_v27  ;;  %7692 = vmatpush1.bf16.msra.mxu1 %v7691_v28  ;;  %v1327_v27 = vld [vmem:[%s18566_s4 + $0x40] sm:$0xff] }
 0x12e   :  { %7630 = vmatprep.subr.bf16.mxu0 %v7629_v31  ;;  %7694 = vmatprep.subr.bf16.mxu1 %v7693_v32  ;;  %v1329_v31 = vld [vmem:[%s18566_s4 + $0x50] sm:$0xff]  ;;  %v7444_v55 = vld [vmem:[#allocation5] ss:$0 sm:$0xff] }
 0x12f   :  { %v7775_v32 = vpack.c.bf16 %v1329_v31, %v1321_v30  ;;  %v1408_v30 = vld [vmem:[%s18566_s4 + $0x2c8] sm:$0xff]  ;;  %v1402_v31 = vld [vmem:[%s18566_s4 + $0x298] sm:$0xff]  ;;  %7182 = vperm.xlu0 %10031, %v7444_v55  }
 0x131   :  { %7632 = vmatpush1.bf16.msra.mxu0 %v7631_v39  ;;  %7696 = vmatpush1.bf16.msra.mxu1 %v7695_v40  ;;  %v1343_v39 = vld [vmem:[%s18566_s4 + $0xc0] sm:$0xff]  ;;  %v7777_v40 = vpack.c.bf16 %v1346_v37, %v1338_v35 }
 0x132   :  { %7634 = vmatprep.subr.bf16.mxu0 %v7633_v51  ;;  %7698 = vmatprep.subr.bf16.mxu1 %v7697_v53  ;;  %v7715_v41 = vpack.c.bf16 %v1343_v39, %v1335_v38  ;;  %v1345_v51 = vld [vmem:[%s18566_s4 + $0xd0] sm:$0xff]  ;;  %v1352_v53 = vld [vmem:[%s18566_s4 + $0x108] sm:$0xff]  ;;  %v1407_v37 = vld [vmem:[%s18566_s4 + $0x2c0] sm:$0xff] }
 0x133   :  { %v7779_v56 = vpack.c.bf16 %v1345_v51, %v1337_v45  ;;  %v1401_v38 = vld [vmem:[%s18566_s4 + $0x290] sm:$0xff]  ;;  %v1424_v45 = vld [vmem:[%s18566_s4 + $0x348] sm:$0xff]  ;;  %v1418_v51 = vld [vmem:[%s18566_s4 + $0x318] sm:$0xff] }
 0x135   :  { %7636 = vmatpush1.bf16.msra.mxu0 %v7635_v61  ;;  %7700 = vmatpush1.bf16.msra.mxu1 %v7699_v62  ;;  %v7717_v61 = vpack.c.bf16 %v1360_v58, %v1352_v53  ;;  %v7781_v62 = vpack.c.bf16 %v1362_v60, %v1354_v59  ;;  %v1426_v53 = vld [vmem:[%s18566_s4 + $0x358] sm:$0xff]  ;;  %v1415_v59 = vld [vmem:[%s18566_s4 + $0x300] sm:$0xff] }
 0x136   :  { %7638 = vmatprep.subr.bf16.mxu0 %v7637_v2  ;;  %7702 = vmatprep.subr.bf16.mxu1 %v7701_v4  ;;  %v1353_v2 = vld [vmem:[%s18566_s4 + $0x110] sm:$0xff]  ;;  %v7719_v4 = vpack.c.bf16 %v1359_v1, %v1351_v63  ;;  %v1423_v60 = vld [vmem:[%s18566_s4 + $0x340] sm:$0xff] }
 0x137   :  { %v7783_v9 = vpack.c.bf16 %v1361_v5, %v1353_v2  ;;  %v1425_v63 = vld [vmem:[%s18566_s4 + $0x350] sm:$0xff]  ;;  %v7735_v1 = vpack.c.bf16 %v1423_v60, %v1415_v59  ;;  %v1440_v5 = vld [vmem:[%s18566_s4 + $0x3c8] sm:$0xff]  ;;  %v1482_v59 = vld [vmem:[%s18566_s4 + $0x518] sm:$0xff] }
 0x139   :  { %7640 = vmatpush1.bf16.msra.mxu0 %v7639_v12  ;;  %7704 = vmatpush1.bf16.msra.mxu1 %v7703_v13  ;;  %v1378_v12 = vld [vmem:[%s18566_s4 + $0x1d8] sm:$0xff]  ;;  %v1367_v13 = vld [vmem:[%s18566_s4 + $0x180] sm:$0xff] }
 0x13a   :  { %7642 = vmatprep.subr.bf16.mxu0 %v7641_v15  ;;  %7706 = vmatprep.subr.bf16.mxu1 %v7705_v16  ;;  %v7785_v14 = vpack.c.bf16 %v1378_v12, %v1370_v11  ;;  %v1375_v15 = vld [vmem:[%s18566_s4 + $0x1c0] sm:$0xff]  ;;  %v1369_v16 = vld [vmem:[%s18566_s4 + $0x190] sm:$0xff] }
 0x13b   :  { %v7723_v18 = vpack.c.bf16 %v1375_v15, %v1367_v13  ;;  %v7787_v23 = vpack.c.bf16 %v1377_v17, %v1369_v16  ;;  %v1431_v11 = vld [vmem:[%s18566_s4 + $0x380] sm:$0xff]  ;;  %v1433_v13 = vld [vmem:[%s18566_s4 + $0x390] sm:$0xff] }
 0x13c   :  { %v1439_v12 = vld [vmem:[%s18566_s4 + $0x3c0] sm:$0xff]  ;;  %v1441_v16 = vld [vmem:[%s18566_s4 + $0x3d0] sm:$0xff] }
 0x13d   :  { %7644 = vmatpush1.bf16.msra.mxu0 %v7643_v20  ;;  %7708 = vmatpush1.bf16.msra.mxu1 %v7707_v22  ;;  %v1392_v20 = vld [vmem:[%s18566_s4 + $0x248] sm:$0xff]  ;;  %v1386_v22 = vld [vmem:[%s18566_s4 + $0x218] sm:$0xff]  ;;  %v7739_v15 = vpack.c.bf16 %v1439_v12, %v1431_v11  ;;  %v11724_v17 = vld [vmem:[%s18569_s1] sm:$0xff] }
 0x13e   :  { %7710 = vmatprep.subr.bf16.mxu0 %v7709_v25  ;;  %v7725_v24 = vpack.c.bf16 %v1392_v20, %v1384_v19  ;;  %v1383_v25 = vld [vmem:[%s18566_s4 + $0x200] sm:$0xff]  ;;  %v1448_v20 = vld [vmem:[%s18566_s4 + $0x408] sm:$0xff]  ;;  %v1498_v12 = vld [vmem:[%s18566_s4 + $0x598] sm:$0xff] }
 0x13f   :  { %v1504_v11 = vld [vmem:[%s18566_s4 + $0x5c8] sm:$0xff] }
 0x140   :  { %1135 = vmatmul.mubr.f32.vlgmr.msra.gmra.mrb[40].mxu0 %v11165_v52  ;;  %1212 = vmatmul.mubr.f32.vlgmr.msra.gmra.mrb[40].mxu1 %v11165_v52  ;;  %v1322_v52 = vld [vmem:[%s18566_s4 + $0x18] sm:$0xff] }
 0x141   :  { %1140 = vmatprep.mubr.f32.mxu0 %v10482_v3  ;;  %1217 = vmatprep.mubr.f32.mxu1 %v10482_v3  ;;  %v1330_v3 = vld [vmem:[%s18566_s4 + $0x58] sm:$0xff] }
 0x142   :  { %v7773_v28 = vpack.c.bf16 %v1330_v3, %v1322_v52  ;;  %v1394_v52 = vld [vmem:[%s18566_s4 + $0x258] sm:$0xff]  ;;  %v1391_v3 = vld [vmem:[%s18566_s4 + $0x240] sm:$0xff] }
 0x143   :  { %v7727_v33 = vpack.c.bf16 %v1391_v3, %v1383_v25  ;;  %v1447_v25 = vld [vmem:[%s18566_s4 + $0x400] sm:$0xff] }
 0x144   :  { %1141 = vmatmul.mubr.f32.gmra.mrb[42].mxu0 %v11193_v6  ;;  %1218 = vmatmul.mubr.f32.gmra.mrb[42].mxu1 %v11193_v6  ;;  %v1319_v6 = vld [vmem:[%s18566_s4] sm:$0xff] }
 0x145   :  { %v7711_v29 = vpack.c.bf16 %v1327_v27, %v1319_v6  ;;  %7774 = vmatprep.subr.bf16.mxu1 %v7773_v28  ;;  %v7789_v6 = vpack.c.bf16 %v1394_v52, %v1386_v22  ;;  %v1385_v27 = vld [vmem:[%s18566_s4 + $0x210] sm:$0xff]  ;;  %v1456_v22 = vld [vmem:[%s18566_s4 + $0x448] sm:$0xff]  ;;  %v1458_v52 = vld [vmem:[%s18566_s4 + $0x458] sm:$0xff] }
 0x146   :  { %7776 = vmatpush1.bf16.msra.mxu1 %v7775_v32  ;;  %v1393_v28 = vld [vmem:[%s18566_s4 + $0x250] sm:$0xff]  ;;  %v1410_v32 = vld [vmem:[%s18566_s4 + $0x2d8] sm:$0xff]  ;;  %v1455_v3 = vld [vmem:[%s18566_s4 + $0x440] sm:$0xff] }
 0x147   :  { %7712 = vmatpush1.bf16.msra.mxu0 %v7711_v29  ;;  %7778 = vmatprep.subr.bf16.mxu1 %v7777_v40  ;;  %v1400_v29 = vld [vmem:[%s18566_s4 + $0x288] sm:$0xff]  ;;  %v7791_v34 = vpack.c.bf16 %v1393_v28, %v1385_v27  ;;  %v7793_v39 = vpack.c.bf16 %v1410_v32, %v1402_v31  ;;  %v1409_v40 = vld [vmem:[%s18566_s4 + $0x2d0] sm:$0xff]  ;;  %v7743_v28 = vpack.c.bf16 %v1455_v3, %v1447_v25 }
 0x148   :  { %7714 = vmatprep.subr.bf16.mxu0 %v7713_v36  ;;  %v7729_v35 = vpack.c.bf16 %v1408_v30, %v1400_v29  ;;  %v1399_v36 = vld [vmem:[%s18566_s4 + $0x280] sm:$0xff]  ;;  %v1449_v29 = vld [vmem:[%s18566_s4 + $0x410] sm:$0xff]  ;;  %v1512_v3 = vld [vmem:[%s18566_s4 + $0x608] sm:$0xff] }
 0x149   :  { %v7731_v54 = vpack.c.bf16 %v1407_v37, %v1399_v36  ;;  %v1457_v30 = vld [vmem:[%s18566_s4 + $0x450] sm:$0xff]  ;;  %v1474_v37 = vld [vmem:[%s18566_s4 + $0x4d8] sm:$0xff] }
 0x14a   :  { %7780 = vmatpush1.bf16.msra.mxu1 %v7779_v56  ;;  %v7795_v56 = vpack.c.bf16 %v1409_v40, %v1401_v38  ;;  %v7807_v31 = vpack.c.bf16 %v1457_v30, %v1449_v29  ;;  %v1463_v38 = vld [vmem:[%s18566_s4 + $0x480] sm:$0xff]  ;;  %v7093_v40 = vsub.s32 6, %v11092_v43  ;;  %v1522_v29 = vld [vmem:[%s18566_s4 + $0x658] sm:$0xff] }
 0x14b   :  { %7716 = vmatpush1.bf16.msra.mxu0 %v7715_v41  ;;  %7782 = vmatprep.subr.bf16.mxu1 %v7781_v62  ;;  %v1416_v41 = vld [vmem:[%s18566_s4 + $0x308] sm:$0xff]  ;;  %v1417_v62 = vld [vmem:[%s18566_s4 + $0x310] sm:$0xff]  ;;  %v1511_v30 = vld [vmem:[%s18566_s4 + $0x600] sm:$0xff] }
 0x14c   :  { %7718 = vmatprep.subr.bf16.mxu0 %v7717_v61  ;;  %v7733_v58 = vpack.c.bf16 %v1424_v45, %v1416_v41  ;;  %v7797_v61 = vpack.c.bf16 %v1426_v53, %v1418_v51  ;;  %v7799_v2 = vpack.c.bf16 %v1425_v63, %v1417_v62  ;;  %v1465_v51 = vld [vmem:[%s18566_s4 + $0x490] sm:$0xff]  ;;  %v11785_v55 = vrot.slane %v11724_v17, %v7093_v40  ;;  %v1479_v62 = vld [vmem:[%s18566_s4 + $0x500] sm:$0xff]  ;;  %v1530_v40 = vld [vmem:[%s18566_s4 + $0x698] sm:$0xff] }
 0x14d   :  { %v1473_v53 = vld [vmem:[%s18566_s4 + $0x4d0] sm:$0xff]  ;;  %v1487_v63 = vld [vmem:[%s18566_s4 + $0x540] sm:$0xff] }
 0x14e   :  { %7784 = vmatpush1.bf16.msra.mxu1 %v7783_v9  ;;  %v1442_v9 = vld [vmem:[%s18566_s4 + $0x3d8] sm:$0xff] }
 0x14f   :  { %7720 = vmatpush1.bf16.msra.mxu0 %v7719_v4  ;;  %7786 = vmatprep.subr.bf16.mxu1 %v7785_v14  ;;  %v1432_v4 = vld [vmem:[%s18566_s4 + $0x388] sm:$0xff]  ;;  %v7071_v14 = vsub.s32 4, %v11092_v43 }
 0x150   :  { %7722 = vmatprep.subr.bf16.mxu0 %v7721_v10  ;;  %v7737_v8 = vpack.c.bf16 %v1440_v5, %v1432_v4  ;;  %v7801_v10 = vpack.c.bf16 %v1442_v9, %v1434_v7  ;;  %v7751_v4 = vpack.c.bf16 %v1487_v63, %v1479_v62  ;;  %v1481_v5 = vld [vmem:[%s18566_s4 + $0x510] sm:$0xff]  ;;  %v1552_v62 = vld [vmem:[%s18566_s4 + $0x748] sm:$0xff]  ;;  %v1546_v63 = vld [vmem:[%s18566_s4 + $0x718] sm:$0xff] }
 0x151   :  { %v11727_v19 = vrot.slane %v11724_v17, %v7071_v14  ;;  %v1489_v7 = vld [vmem:[%s18566_s4 + $0x550] sm:$0xff]  ;;  %v1506_v14 = vld [vmem:[%s18566_s4 + $0x5d8] sm:$0xff] }
 0x152   :  { %7788 = vmatpush1.bf16.msra.mxu1 %v7787_v23  ;;  %v1450_v23 = vld [vmem:[%s18566_s4 + $0x418] sm:$0xff] }
 0x153   :  { %7724 = vmatpush1.bf16.msra.mxu0 %v7723_v18  ;;  %7790 = vmatprep.subr.bf16.mxu1 %v7789_v6  ;;  %v7803_v18 = vpack.c.bf16 %v1441_v16, %v1433_v13  ;;  %v7082_v6 = vsub.s32 5, %v11092_v43  ;;  %v7805_v27 = vpack.c.bf16 %v1458_v52, %v1450_v23  ;;  %v1503_v16 = vld [vmem:[%s18566_s4 + $0x5c0] sm:$0xff]  ;;  %v1505_v23 = vld [vmem:[%s18566_s4 + $0x5d0] sm:$0xff] }
 0x154   :  { %7726 = vmatprep.subr.bf16.mxu0 %v7725_v24  ;;  %7074 = vbcast.lane.b32.xlu0 %v11727_v19, 256  ;;  %v7741_v24 = vpack.c.bf16 %v1456_v22, %v1448_v20  ;;  %v1497_v22 = vld [vmem:[%s18566_s4 + $0x590] sm:$0xff] }
 0x155   :  { %v11756_v32 = vrot.slane %v11724_v17, %v7082_v6  ;;  %v7819_v52 = vpack.c.bf16 %v1505_v23, %v1497_v22  ;;  %v1520_v6 = vld [vmem:[%s18566_s4 + $0x648] sm:$0xff]  ;;  %v1567_v22 = vld [vmem:[%s18566_s4 + $0x7c0] sm:$0xff] }
 0x156   :  { %7792 = vmatpush1.bf16.msra.mxu1 %v7791_v34  ;;  %v1472_v34 = vld [vmem:[%s18566_s4 + $0x4c8] sm:$0xff] }
 0x157   :  { %7728 = vmatpush1.bf16.msra.mxu0 %v7727_v33  ;;  %7794 = vmatprep.subr.bf16.mxu1 %v7793_v39  ;;  %v1464_v33 = vld [vmem:[%s18566_s4 + $0x488] sm:$0xff]  ;;  %v1471_v39 = vld [vmem:[%s18566_s4 + $0x4c0] sm:$0xff] }
 0x158   :  { %7730 = vmatprep.subr.bf16.mxu0 %v7729_v35  ;;  %v1466_v35 = vld [vmem:[%s18566_s4 + $0x498] sm:$0xff]  ;;  %7085 = vbcast.lane.b32.xlu0 %v11756_v32, 256  ;;  %v7745_v36 = vpack.c.bf16 %v1472_v34, %v1464_v33  ;;  %v7747_v45 = vpack.c.bf16 %v1471_v39, %v1463_v38  ;;  %v1528_v38 = vld [vmem:[%s18566_s4 + $0x688] sm:$0xff] }
 0x159   :  { %v7809_v41 = vpack.c.bf16 %v1474_v37, %v1466_v35  ;;  %v1513_v35 = vld [vmem:[%s18566_s4 + $0x610] sm:$0xff]  ;;  %v1536_v39 = vld [vmem:[%s18566_s4 + $0x6c8] sm:$0xff] }
 0x15a   :  { %7796 = vmatpush1.bf16.msra.mxu1 %v7795_v56  ;;  %v1480_v56 = vld [vmem:[%s18566_s4 + $0x508] sm:$0xff] }
 0x15b   :  { %7732 = vmatpush1.bf16.msra.mxu0 %v7731_v54  ;;  %7798 = vmatprep.subr.bf16.mxu1 %v7797_v61  ;;  %v7811_v54 = vpack.c.bf16 %v1473_v53, %v1465_v51  ;;  %v1490_v61 = vld [vmem:[%s18566_s4 + $0x558] sm:$0xff]  ;;  %v1527_v51 = vld [vmem:[%s18566_s4 + $0x680] sm:$0xff] }
 0x15c   :  { %7734 = vmatprep.subr.bf16.mxu0 %v7733_v58  ;;  %v1488_v58 = vld [vmem:[%s18566_s4 + $0x548] sm:$0xff]  ;;  %7096 = vbcast.lane.b32.xlu0 %v11785_v55, 256  ;;  %v1535_v53 = vld [vmem:[%s18566_s4 + $0x6c0] sm:$0xff] }
 0x15d   :  { %v7749_v60 = vpack.c.bf16 %v1488_v58, %v1480_v56  ;;  %v7763_v56 = vpack.c.bf16 %v1535_v53, %v1527_v51  ;;  %v1529_v58 = vld [vmem:[%s18566_s4 + $0x690] sm:$0xff] }
 0x15e   :  { %7800 = vmatpush1.bf16.msra.mxu1 %v7799_v2  ;;  %v7813_v2 = vpack.c.bf16 %v1490_v61, %v1482_v59  ;;  %v1537_v59 = vld [vmem:[%s18566_s4 + $0x6d0] sm:$0xff]  ;;  %v1544_v61 = vld [vmem:[%s18566_s4 + $0x708] sm:$0xff] }
 0x15f   :  { %7736 = vmatpush1.bf16.msra.mxu0 %v7735_v1  ;;  %7802 = vmatprep.subr.bf16.mxu1 %v7801_v10  ;;  %v7104_v1 = vsub.s32 7, %v11092_v43  ;;  %v1496_v10 = vld [vmem:[%s18566_s4 + $0x588] sm:$0xff] }
 0x160   :  { %7738 = vmatprep.subr.bf16.mxu0 %v7737_v8  ;;  %v7815_v8 = vpack.c.bf16 %v1489_v7, %v1481_v5  ;;  %v7753_v13 = vpack.c.bf16 %v1504_v11, %v1496_v10  ;;  %v1551_v5 = vld [vmem:[%s18566_s4 + $0x740] sm:$0xff]  ;;  %v1545_v10 = vld [vmem:[%s18566_s4 + $0x710] sm:$0xff] }
 0x161   :  { %v11814_v9 = vrot.slane %v11724_v17, %v7104_v1  ;;  %v7765_v1 = vpack.c.bf16 %v1552_v62, %v1544_v61  ;;  %v1553_v11 = vld [vmem:[%s18566_s4 + $0x750] sm:$0xff] }
 0x162   :  { %7804 = vmatpush1.bf16.msra.mxu1 %v7803_v18  ;;  %v7817_v18 = vpack.c.bf16 %v1506_v14, %v1498_v12  ;;  %v7831_v12 = vpack.c.bf16 %v1553_v11, %v1545_v10  ;;  %v1568_v14 = vld [vmem:[%s18566_s4 + $0x7c8] sm:$0xff] }
 0x163   :  { %7740 = vmatpush1.bf16.msra.mxu0 %v7739_v15  ;;  %7806 = vmatprep.subr.bf16.mxu1 %v7805_v27  ;;  %v1495_v15 = vld [vmem:[%s18566_s4 + $0x580] sm:$0xff]  ;;  %v1514_v27 = vld [vmem:[%s18566_s4 + $0x618] sm:$0xff] }
 0x164   :  { %7742 = vmatprep.subr.bf16.mxu0 %v7741_v24  ;;  %7107 = vbcast.lane.b32.xlu0 %v11814_v9, 256  ;;  %v7755_v20 = vpack.c.bf16 %v1503_v16, %v1495_v15  ;;  %v7022_v24 = vld [vmem:[%s18569_s1 + $0x8] sm:$0x3]  ;;  %v7821_v33 = vpack.c.bf16 %v1522_v29, %v1514_v27  ;;  %v1562_v15 = vld [vmem:[%s18566_s4 + $0x798] sm:$0xff] }
 0x165   :  { %v11845_v25 = vrot.slane %v7022_v24, %v11095_v44  ;;  %v1324_v27 = vld [vmem:[%s18566_s4 + $0x28] sm:$0xff]  ;;  %v1326_v29 = vld [vmem:[%s18566_s4 + $0x38] sm:$0xff] }
 0x166   :  { %7808 = vmatpush1.bf16.msra.mxu1 %v7807_v31  ;;  %v1519_v31 = vld [vmem:[%s18566_s4 + $0x640] sm:$0xff] }
 0x167   :  { %7744 = vmatpush1.bf16.msra.mxu0 %v7743_v28  ;;  %7810 = vmatprep.subr.bf16.mxu1 %v7809_v41  ;;  %v7757_v28 = vpack.c.bf16 %v1520_v6, %v1512_v3  ;;  %v7759_v34 = vpack.c.bf16 %v1519_v31, %v1511_v30  ;;  %v7761_v41 = vpack.c.bf16 %v1536_v39, %v1528_v38  ;;  %v1569_v3 = vld [vmem:[%s18566_s4 + $0x7d0] sm:$0xff]  ;;  %v1334_v31 = vld [vmem:[%s18566_s4 + $0x78] sm:$0xff] }
 0x168   :  { %7746 = vmatprep.subr.bf16.mxu0 %v7745_v36  ;;  %7118 = vbcast.lane.b32.xlu0 %v11845_v25, 256  ;;  %v1521_v36 = vld [vmem:[%s18566_s4 + $0x650] sm:$0xff] }
 0x169   :  { %v7823_v37 = vpack.c.bf16 %v1521_v36, %v1513_v35 }
 0x16a   :  { %7812 = vmatpush1.bf16.msra.mxu1 %v7811_v54 }
 0x16b   :  { %7748 = vmatpush1.bf16.msra.mxu0 %v7747_v45  ;;  %7814 = vmatprep.subr.bf16.mxu1 %v7813_v2  ;;  %v1538_v45 = vld [vmem:[%s18566_s4 + $0x6d8] sm:$0xff] }
 0x16c   :  { %7750 = vmatprep.subr.bf16.mxu0 %v7749_v60  ;;  %v7825_v54 = vpack.c.bf16 %v1538_v45, %v1530_v40  ;;  %v7827_v60 = vpack.c.bf16 %v1537_v59, %v1529_v58  ;;  %v1554_v2 = vld [vmem:[%s18566_s4 + $0x758] sm:$0xff]  ;;  %v7028_v59 = vrot.slane %v11724_v17, %v11095_v44 }
 0x16d   :  { %v7829_v7 = vpack.c.bf16 %v1554_v2, %v1546_v63 }
 0x16e   :  { %7816 = vmatpush1.bf16.msra.mxu1 %v7815_v8  ;;  %7030 = vbcast.lane.b32.xlu1 %v7028_v59, 256 }
 0x16f   :  { %7752 = vmatpush1.bf16.msra.mxu0 %v7751_v4  ;;  %7818 = vmatprep.subr.bf16.mxu1 %v7817_v18  ;;  %v1543_v4 = vld [vmem:[%s18566_s4 + $0x700] sm:$0xff]  ;;  %v1570_v18 = vld [vmem:[%s18566_s4 + $0x7d8] sm:$0xff] }
 0x170   :  { %7754 = vmatprep.subr.bf16.mxu0 %v7753_v13  ;;  %v7767_v8 = vpack.c.bf16 %v1551_v5, %v1543_v4  ;;  %v1560_v13 = vld [vmem:[%s18566_s4 + $0x788] sm:$0xff]  ;;  %v7833_v23 = vpack.c.bf16 %v1570_v18, %v1562_v15 }
 0x171   :  { %v7769_v16 = vpack.c.bf16 %v1568_v14, %v1560_v13 }
 0x172   :  { %7820 = vmatpush1.bf16.msra.mxu1 %v7819_v52  ;;  %v1561_v52 = vld [vmem:[%s18566_s4 + $0x790] sm:$0xff]  ;;  %7034 = vbcast.lane.b32.xlu1 %v7028_v59, 264 }
 0x173   :  { %7756 = vmatpush1.bf16.msra.mxu0 %v7755_v20  ;;  %7822 = vmatprep.subr.bf16.mxu1 %v7821_v33  ;;  %v1559_v20 = vld [vmem:[%s18566_s4 + $0x780] sm:$0xff]  ;;  %v7835_v6 = vpack.c.bf16 %v1569_v3, %v1561_v52  ;;  %v7901_v33 = vpack.c.bf16 %v1334_v31, %v1326_v29 }
 0x174   :  { %7758 = vmatprep.subr.bf16.mxu0 %v7757_v28  ;;  %v7771_v24 = vpack.c.bf16 %v1567_v22, %v1559_v20  ;;  %v1332_v28 = vld [vmem:[%s18566_s4 + $0x68] sm:$0xff]  ;;  %v31_v22 = vld [vmem:[%s18570_s5] sm:$0xf] }
 0x175   :  { %v7837_v30 = vpack.c.bf16 %v1332_v28, %v1324_v27 }
 0x176   :  { %7824 = vmatpush1.bf16.msra.mxu1 %v7823_v37 }
 0x177   :  { %7760 = vmatpush1.bf16.msra.mxu0 %v7759_v34  ;;  %7826 = vmatprep.subr.bf16.mxu1 %v7825_v54 }
 0x178   :  { %7762 = vmatprep.subr.bf16.mxu0 %v7761_v41 }
 0x17a   :  { %7828 = vmatpush1.bf16.msra.mxu1 %v7827_v60 }
 0x17b   :  { %7764 = vmatpush1.bf16.msra.mxu0 %v7763_v56  ;;  %7830 = vmatprep.subr.bf16.mxu1 %v7829_v7 }
 0x17c   :  { %7766 = vmatprep.subr.bf16.mxu0 %v7765_v1 }
 0x17e   :  { %7832 = vmatpush1.bf16.msra.mxu1 %v7831_v12 }
 0x17f   :  { %7768 = vmatpush1.bf16.msra.mxu0 %v7767_v8  ;;  %7834 = vmatprep.subr.bf16.mxu1 %v7833_v23  ;;  %v11978_v23 = vrot.slane %v31_v22, %v11095_v44 }
 0x180   :  { %7770 = vmatprep.subr.bf16.mxu0 %v7769_v16 }
 0x181   :  { %18616 = vst [vmem:[#allocation12_spill] sm:$0xff] %v11978_v23 }
 0x182   :  { %7836 = vmatpush1.bf16.msra.mxu1 %v7835_v6 }
 0x183   :  { %7772 = vmatpush1.bf16.msra.mxu0 %v7771_v24  ;;  %7902 = vmatprep.subr.bf16.mxu1 %v7901_v33  ;;  %v11984_v24 = vrot.slane %v31_v22, %v11101_v46 }
 0x184   :  { %7838 = vmatprep.subr.bf16.mxu0 %v7837_v30 }
 0x185   :  { %18618 = vst [vmem:[#allocation14_spill] sm:$0xff] %v11984_v24 }
 0x1d3   :  { %v982_v34 = vpop.f32.mrb[4].mxu0  ;;  %v1059_v35 = vpop.f32.mrb[4].mxu1 }
 0x1d4   :  { %v9885_v36 = vadd.f32 %v982_v34, %v11107_v48  ;;  %v984_v37 = vpop.f32.mrb[5].mxu0  ;;  %v11957_v38 = vpop.f32.mrb[5].mxu1  ;;  %v9921_v39 = vadd.f32 %v1059_v35, %v11113_v50 }
 0x1d5   :  { %v9886_v40 = vadd.f32 %v984_v37, %v11110_v49  ;;  %v11993_v37 = vrot.slane %v31_v22, %v11119_v57 }
 0x1d6   :  { %10053 = vtanh.f32 %v9885_v36 }
 0x1d7   :  { %v988_v41 = vpop.f32.mrb[6].mxu0  ;;  %v1065_v45 = vpop.f32.mrb[6].mxu1  ;;  %10055 = vtanh.f32 %v9886_v40  ;;  %18619 = vst [vmem:[#allocation15_spill] sm:$0xff] %v11993_v37 }
 0x1d8   :  { %v9887_v51 = vadd.f32 %v988_v41, %v11107_v48  ;;  %v990_v53 = vpop.f32.mrb[7].mxu0  ;;  %v11962_v54 = vpop.f32.mrb[7].mxu1  ;;  %10057 = vtanh.f32 %v9921_v39  ;;  %v9923_v58 = vadd.f32 %v1065_v45, %v11113_v50  ;;  %v9922_v41 = vadd.f32 %v11957_v38, %v11124_v0 }
 0x1d9   :  { %v9888_v56 = vadd.f32 %v990_v53, %v11110_v49 }
 0x1da   :  { %10059 = vtanh.f32 %v9887_v51 }
 0x1db   :  { %10061 = vtanh.f32 %v9888_v56 }
 0x1dc   :  { %10063 = vtanh.f32 %v9923_v58 }
 0x1e0   :  { %v10054_v60 = vpop.eup %10053 }
 0x1e1   :  { %v1249_v61 = vmul.f32 0.5, %v10054_v60  ;;  %v10056_v62 = vpop.eup %10055 }
 0x1e2   :  { %v10058_v63 = vpop.eup %10057  ;;  %v1253_v2 = vmul.f32 0.5, %v10056_v62 }
 0x1e3   :  { %v1251_v1 = vadd.f32 0.5, %v1249_v61  ;;  %v9924_v61 = vadd.f32 %v11962_v54, %v11124_v0 }
 0x1e4   :  { %v10060_v4 = vpop.eup %10059  ;;  %v1255_v5 = vadd.f32 0.5, %v1253_v2 }
 0x1e5   :  { %v1263_v7 = vmul.f32 %v10058_v63, %v1251_v1  ;;  %v1250_v8 = vmul.f32 0.5, %v10060_v4  ;;  %v10062_v10 = vpop.eup %10061 }
 0x1e6   :  { %v1261_v11 = vmul.f32 %v1255_v5, %v11129_v21  ;;  %v1254_v13 = vmul.f32 0.5, %v10062_v10  ;;  %v10064_v14 = vpop.eup %10063  ;;  %v11981_v21 = vrot.slane %v31_v22, %v11104_v47 }
 0x1e7   :  { %v1252_v12 = vadd.f32 0.5, %v1250_v8 }
 0x1e8   :  { %v11969_v15 = vadd.f32 %v1263_v7, %v1261_v11  ;;  %v1256_v17 = vadd.f32 0.5, %v1254_v13  ;;  %18617 = vst [vmem:[#allocation13_spill] sm:$0xff] %v11981_v21 }
 0x1e9   :  { %v1264_v16 = vmul.f32 %v10064_v14, %v1252_v12 }
 0x1ea   :  { %v1262_v18 = vmul.f32 %v1256_v17, %v11132_v26 }
 0x1ec   :  { %v11972_v20 = vadd.f32 %v1264_v16, %v1262_v18 }
 0x213   :  { %v1136_v52 = vpop.f32.mrb[40].mxu0  ;;  %v1213_v3 = vpop.f32.mrb[40].mxu1 }
 0x214   :  { %v1271_v6 = vadd.f32 %v1136_v52, %v11978_v23  ;;  %v1138_v26 = vpop.f32.mrb[41].mxu0  ;;  %v1215_v27 = vpop.f32.mrb[41].mxu1  ;;  %v1273_v28 = vadd.f32 %v1213_v3, %v11981_v21  ;;  %v1323_v52 = vld [vmem:[%s18566_s4 + $0x20] sm:$0xff] }
 0x215   :  { %v1272_v29 = vadd.f32 %v1138_v26, %v11984_v24  ;;  %v1274_v39 = vadd.f32 %v1215_v27, %v11993_v37  ;;  %v1331_v3 = vld [vmem:[%s18566_s4 + $0x60] sm:$0xff]  ;;  %v1333_v26 = vld [vmem:[%s18566_s4 + $0x70] sm:$0xff]  ;;  %v1340_v27 = vld [vmem:[%s18566_s4 + $0xa8] sm:$0xff] }
 0x216   :  { %10065 = vtanh.f32 %v1271_v6  ;;  %v1325_v6 = vld [vmem:[%s18566_s4 + $0x30] sm:$0xff] }
 0x217   :  { %v1142_v30 = vpop.f32.mrb[42].mxu0  ;;  %v1219_v44 = vpop.f32.mrb[42].mxu1  ;;  %10067 = vtanh.f32 %v1272_v29 }
 0x218   :  { %v1275_v31 = vadd.f32 %v1142_v30, %v11978_v23  ;;  %v1144_v33 = vpop.f32.mrb[43].mxu0  ;;  %v1221_v34 = vpop.f32.mrb[43].mxu1  ;;  %10069 = vtanh.f32 %v1273_v28  ;;  %v1277_v36 = vadd.f32 %v1219_v44, %v11981_v21  ;;  %v1348_v44 = vld [vmem:[%s18566_s4 + $0xe8] sm:$0xff] }
 0x219   :  { %v1276_v35 = vadd.f32 %v1144_v33, %v11984_v24  ;;  %v1278_v59 = vadd.f32 %v1221_v34, %v11993_v37  ;;  %v1350_v33 = vld [vmem:[%s18566_s4 + $0xf8] sm:$0xff] }
 0x21a   :  { %10071 = vtanh.f32 %v1275_v31  ;;  %v1342_v31 = vld [vmem:[%s18566_s4 + $0xb8] sm:$0xff] }
 0x21b   :  { %10073 = vtanh.f32 %v1276_v35 }
 0x21c   :  { %10075 = vtanh.f32 %v1277_v36 }
 0x21d   :  { %10077 = vtanh.f32 %v1274_v39 }
 0x21e   :  { %10079 = vtanh.f32 %v9922_v41  ;;  %v7903_v41 = vpack.c.bf16 %v1333_v26, %v1325_v6  ;;  %v1374_v6 = vld [vmem:[%s18566_s4 + $0x1b8] sm:$0xff] }
 0x21f   :  { %10081 = vtanh.f32 %v1278_v59  ;;  %v1341_v59 = vld [vmem:[%s18566_s4 + $0xb0] sm:$0xff]  ;;  %v1382_v26 = vld [vmem:[%s18566_s4 + $0x1f8] sm:$0xff] }
 0x220   :  { %v10066_v40 = vpop.eup %10065  ;;  %10083 = vtanh.f32 %v9924_v61 }
 0x221   :  { %v1287_v45 = vmul.f32 0.5, %v10066_v40  ;;  %v10068_v51 = vpop.eup %10067  ;;  %10085 = vtanh.f32 %v11969_v15  ;;  %v7839_v40 = vpack.c.bf16 %v1331_v3, %v1323_v52  ;;  %v1380_v3 = vld [vmem:[%s18566_s4 + $0x1e8] sm:$0xff] }
 0x222   :  { %v10070_v53 = vpop.eup %10069  ;;  %v1291_v58 = vmul.f32 0.5, %v10068_v51 }
 0x223   :  { %v1289_v56 = vadd.f32 0.5, %v1287_v45  ;;  %v1339_v45 = vld [vmem:[%s18566_s4 + $0xa0] sm:$0xff] }
 0x224   :  { %v10072_v60 = vpop.eup %10071  ;;  %v1293_v62 = vadd.f32 0.5, %v1291_v58  ;;  %v1347_v58 = vld [vmem:[%s18566_s4 + $0xe0] sm:$0xff] }
 0x225   :  { %v1301_v63 = vmul.f32 %v10070_v53, %v1289_v56  ;;  %v1288_v1 = vmul.f32 0.5, %v10072_v60  ;;  %v10074_v2 = vpop.eup %10073  ;;  %v7841_v53 = vpack.c.bf16 %v1348_v44, %v1340_v27  ;;  %v7905_v56 = vpack.c.bf16 %v1350_v33, %v1342_v31  ;;  %v1349_v60 = vld [vmem:[%s18566_s4 + $0xf0] sm:$0xff]  ;;  %v1379_v44 = vld [vmem:[%s18566_s4 + $0x1e0] sm:$0xff] }
 0x226   :  { %v1299_v4 = vmul.f32 0.0, %v1293_v62  ;;  %v1292_v38 = vmul.f32 0.5, %v10074_v2  ;;  %v10076_v7 = vpop.eup %10075  ;;  %v7913_v33 = vpack.c.bf16 %v1382_v26, %v1374_v6  ;;  %v1420_v6 = vld [vmem:[%s18566_s4 + $0x328] sm:$0xff] }
 0x227   :  { %v1290_v5 = vadd.f32 0.5, %v1288_v1  ;;  %v10078_v54 = vpop.eup %10077  ;;  %v1428_v26 = vld [vmem:[%s18566_s4 + $0x368] sm:$0xff] }
 0x228   :  { %v12001_v8 = vadd.f32 %v1301_v63, %v1299_v4  ;;  %v1294_v10 = vadd.f32 0.5, %v1292_v38  ;;  %v10080_v14 = vpop.eup %10079  ;;  %v1295_v17 = vmul.f32 0.5, %v10078_v54  ;;  %v1356_v63 = vld [vmem:[%s18566_s4 + $0x128] sm:$0xff]  ;;  %v1366_v38 = vld [vmem:[%s18566_s4 + $0x178] sm:$0xff]  ;;  %v1363_v54 = vld [vmem:[%s18566_s4 + $0x160] sm:$0xff] }
 0x229   :  { %v1302_v11 = vmul.f32 %v10076_v7, %v1290_v5  ;;  %v10082_v16 = vpop.eup %10081  ;;  %v1257_v18 = vmul.f32 0.5, %v10080_v14  ;;  %v1364_v4 = vld [vmem:[%s18566_s4 + $0x168] sm:$0xff]  ;;  %v1358_v5 = vld [vmem:[%s18566_s4 + $0x138] sm:$0xff] }
 0x22a   :  { %10087 = vtanh.f32 %v12001_v8  ;;  %v1300_v12 = vmul.f32 0.0, %v1294_v10  ;;  %v10084_v22 = vpop.eup %10083  ;;  %v1297_v29 = vadd.f32 0.5, %v1295_v17  ;;  %v1296_v30 = vmul.f32 0.5, %v10082_v16  ;;  %v1357_v17 = vld [vmem:[%s18566_s4 + $0x130] sm:$0xff] }
 0x22b   :  { %10089 = vtanh.f32 %v11972_v20  ;;  %v10086_v28 = vpop.eup %10085  ;;  %v1259_v35 = vadd.f32 0.5, %v1257_v18  ;;  %v1258_v36 = vmul.f32 0.5, %v10084_v22  ;;  %v7843_v10 = vpack.c.bf16 %v1347_v58, %v1339_v45  ;;  %v1365_v16 = vld [vmem:[%s18566_s4 + $0x170] sm:$0xff]  ;;  %v1372_v18 = vld [vmem:[%s18566_s4 + $0x1a8] sm:$0xff]  ;;  %v1387_v58 = vld [vmem:[%s18566_s4 + $0x220] sm:$0xff] }
 0x22c   :  { %v12005_v13 = vadd.f32 %v1302_v11, %v1300_v12  ;;  %v1298_v62 = vadd.f32 0.5, %v1296_v30  ;;  %v7907_v11 = vpack.c.bf16 %v1349_v60, %v1341_v59  ;;  %v1355_v12 = vld [vmem:[%s18566_s4 + $0x120] sm:$0xff]  ;;  %v7845_v22 = vpack.c.bf16 %v1364_v4, %v1356_v63  ;;  %v1389_v63 = vld [vmem:[%s18566_s4 + $0x230] sm:$0xff]  ;;  %v1412_v4 = vld [vmem:[%s18566_s4 + $0x2e8] sm:$0xff] }
 0x22d   :  { %v12036_v51 = vmul.f32 %v10086_v28, %v1259_v35  ;;  %v1260_v2 = vadd.f32 0.5, %v1258_v36  ;;  %v7909_v52 = vpack.c.bf16 %v1366_v38, %v1358_v5  ;;  %v7847_v27 = vpack.c.bf16 %v1363_v54, %v1355_v12  ;;  %v1371_v30 = vld [vmem:[%s18566_s4 + $0x1a0] sm:$0xff]  ;;  %v1381_v35 = vld [vmem:[%s18566_s4 + $0x1f0] sm:$0xff]  ;;  %v1388_v36 = vld [vmem:[%s18566_s4 + $0x228] sm:$0xff] }
 0x22e   :  { %10091 = vtanh.f32 %v12005_v13  ;;  %v7911_v28 = vpack.c.bf16 %v1365_v16, %v1357_v17  ;;  %v7849_v31 = vpack.c.bf16 %v1380_v3, %v1372_v18  ;;  %v1395_v59 = vld [vmem:[%s18566_s4 + $0x260] sm:$0xff]  ;;  %v1406_v5 = vld [vmem:[%s18566_s4 + $0x2b8] sm:$0xff]  ;;  %v1413_v3 = vld [vmem:[%s18566_s4 + $0x2f0] sm:$0xff] }
 0x22f   :  { %v1414_v38 = vld [vmem:[%s18566_s4 + $0x2f8] sm:$0xff]  ;;  %v1403_v54 = vld [vmem:[%s18566_s4 + $0x2a0] sm:$0xff] }
 0x230   :  { %v1411_v17 = vld [vmem:[%s18566_s4 + $0x2e0] sm:$0xff] }
 0x234   :  { %v10088_v34 = vpop.eup %10087 }
 0x235   :  { %v1307_v39 = vmul.f32 %v10088_v34, %v1297_v29  ;;  %v10090_v61 = vpop.eup %10089  ;;  %v7443_v29 = vld [vmem:[%s18571_s6] ss:$0 sm:$0xff]  ;;  %v1373_v34 = vld [vmem:[%s18566_s4 + $0x1b0] sm:$0xff] }
 0x236   :  { %v12069_v14 = vmul.f32 %v10090_v61, %v1260_v2  ;;  %v1404_v2 = vld [vmem:[%s18566_s4 + $0x2a8] sm:$0xff] }
 0x237   :  { %1639 = vmatprep.mubr.f32.mxu0 %v1307_v39  ;;  %1716 = vmatprep.mubr.f32.mxu1 %v1307_v39  ;;  %10093 = vtanh.f32 %v1307_v39  ;;  %v7857_v18 = vpack.c.bf16 %v1412_v4, %v1404_v2  ;;  %v1460_v2 = vld [vmem:[%s18566_s4 + $0x468] sm:$0xff]  ;;  %v1454_v4 = vld [vmem:[%s18566_s4 + $0x438] sm:$0xff] }
 0x238   :  { %v10092_v1 = vpop.eup %10091  ;;  %1640 = vmatmul.mubr.f32.vlgmr.msra.gmra.mrb[8].mxu0 %v12036_v51  ;;  %1717 = vmatmul.mubr.f32.vlgmr.msra.gmra.mrb[8].mxu1 %v12036_v51 }
 0x239   :  { %v12061_v7 = vmul.f32 %v10092_v1, %v1298_v62  ;;  %7840 = vmatpush1.bf16.msra.mxu0 %v7839_v40  ;;  %7904 = vmatpush1.bf16.msra.mxu1 %v7903_v41  ;;  %v1390_v40 = vld [vmem:[%s18566_s4 + $0x238] sm:$0xff]  ;;  %v1397_v1 = vld [vmem:[%s18566_s4 + $0x270] sm:$0xff] }
 0x23a   :  { %7842 = vmatprep.subr.bf16.mxu0 %v7841_v53  ;;  %7906 = vmatprep.subr.bf16.mxu1 %v7905_v56  ;;  %v1398_v41 = vld [vmem:[%s18566_s4 + $0x278] sm:$0xff]  ;;  %v7851_v53 = vpack.c.bf16 %v1379_v44, %v1371_v30  ;;  %v7915_v56 = vpack.c.bf16 %v1381_v35, %v1373_v34  ;;  %v7919_v12 = vpack.c.bf16 %v1397_v1, %v1389_v63  ;;  %v1419_v44 = vld [vmem:[%s18566_s4 + $0x320] sm:$0xff]  ;;  %v1421_v35 = vld [vmem:[%s18566_s4 + $0x330] sm:$0xff] }
 0x23b   :  { %1645 = vmatprep.mubr.f32.mxu0 %v12061_v7  ;;  %1722 = vmatprep.mubr.f32.mxu1 %v12061_v7  ;;  %10095 = vtanh.f32 %v12061_v7  ;;  %v7917_v62 = vpack.c.bf16 %v1398_v41, %v1390_v40  ;;  %v1444_v40 = vld [vmem:[%s18566_s4 + $0x3e8] sm:$0xff]  ;;  %v1438_v41 = vld [vmem:[%s18566_s4 + $0x3b8] sm:$0xff]  ;;  %v1445_v63 = vld [vmem:[%s18566_s4 + $0x3f0] sm:$0xff] }
 0x23c   :  { %1646 = vmatmul.mubr.f32.gmra.mrb[10].mxu0 %v12069_v14  ;;  %1723 = vmatmul.mubr.f32.gmra.mrb[10].mxu1 %v12069_v14  ;;  %v1452_v1 = vld [vmem:[%s18566_s4 + $0x428] sm:$0xff] }
 0x23d   :  { %7844 = vmatpush1.bf16.msra.mxu0 %v7843_v10  ;;  %7908 = vmatpush1.bf16.msra.mxu1 %v7907_v11  ;;  %v7855_v11 = vpack.c.bf16 %v1395_v59, %v1387_v58  ;;  %v1435_v58 = vld [vmem:[%s18566_s4 + $0x3a0] sm:$0xff] }
 0x23e   :  { %1793 = vmatprep.mubr.f32.mxu0 %v1307_v39  ;;  %1870 = vmatprep.mubr.f32.mxu1 %v1307_v39  ;;  %v1396_v39 = vld [vmem:[%s18566_s4 + $0x268] sm:$0xff]  ;;  %v1443_v59 = vld [vmem:[%s18566_s4 + $0x3e0] sm:$0xff] }
 0x23f   :  { %7846 = vmatprep.subr.bf16.mxu0 %v7845_v22  ;;  %7910 = vmatprep.subr.bf16.mxu1 %v7909_v52  ;;  %v7853_v61 = vpack.c.bf16 %v1396_v39, %v1388_v36  ;;  %v7921_v22 = vpack.c.bf16 %v1414_v38, %v1406_v5  ;;  %v1405_v52 = vld [vmem:[%s18566_s4 + $0x2b0] sm:$0xff]  ;;  %v1436_v39 = vld [vmem:[%s18566_s4 + $0x3a8] sm:$0xff]  ;;  %v1462_v5 = vld [vmem:[%s18566_s4 + $0x478] sm:$0xff]  ;;  %v7867_v38 = vpack.c.bf16 %v1443_v59, %v1435_v58 }
 0x240   :  { %v7923_v30 = vpack.c.bf16 %v1413_v3, %v1405_v52  ;;  %v1429_v36 = vld [vmem:[%s18566_s4 + $0x370] sm:$0xff]  ;;  %v1476_v52 = vld [vmem:[%s18566_s4 + $0x4e8] sm:$0xff]  ;;  %v1470_v3 = vld [vmem:[%s18566_s4 + $0x4b8] sm:$0xff] }
 0x241   :  { %v10094_v45 = vpop.eup %10093  ;;  %7848 = vmatpush1.bf16.msra.mxu0 %v7847_v27  ;;  %7912 = vmatpush1.bf16.msra.mxu1 %v7911_v28  ;;  %v1422_v27 = vld [vmem:[%s18566_s4 + $0x338] sm:$0xff]  ;;  %v1485_v59 = vld [vmem:[%s18566_s4 + $0x530] sm:$0xff] }
 0x242   :  { %7850 = vmatprep.subr.bf16.mxu0 %v7849_v31  ;;  %7914 = vmatprep.subr.bf16.mxu1 %v7913_v33  ;;  %v6961_v60 = vmul.f32 %v10094_v45, %v7443_v29  ;;  %v1430_v28 = vld [vmem:[%s18566_s4 + $0x378] sm:$0xff]  ;;  %v1427_v31 = vld [vmem:[%s18566_s4 + $0x360] sm:$0xff]  ;;  %v7861_v33 = vpack.c.bf16 %v1428_v26, %v1420_v6 }
 0x243   :  { %v7925_v34 = vpack.c.bf16 %v1430_v28, %v1422_v27  ;;  %v1446_v45 = vld [vmem:[%s18566_s4 + $0x3f8] sm:$0xff]  ;;  %v1467_v28 = vld [vmem:[%s18566_s4 + $0x4a0] sm:$0xff] }
 0x244   :  { %6981 = vadd.xlane.f32.xlu0 %v6961_v60  ;;  %v7865_v60 = vpack.c.bf16 %v1444_v40, %v1436_v39  ;;  %v1478_v6 = vld [vmem:[%s18566_s4 + $0x4f8] sm:$0xff] }
 0x245   :  { %v10096_v10 = vpop.eup %10095  ;;  %7852 = vmatpush1.bf16.msra.mxu0 %v7851_v53  ;;  %7916 = vmatpush1.bf16.msra.mxu1 %v7915_v56  ;;  %v7863_v53 = vpack.c.bf16 %v1427_v31, %v1419_v44  ;;  %v7927_v56 = vpack.c.bf16 %v1429_v36, %v1421_v35  ;;  %v7937_v44 = vpack.c.bf16 %v1478_v6, %v1470_v3  ;;  %v1469_v31 = vld [vmem:[%s18566_s4 + $0x4b0] sm:$0xff]  ;;  %v1492_v35 = vld [vmem:[%s18566_s4 + $0x568] sm:$0xff]  ;;  %v1486_v36 = vld [vmem:[%s18566_s4 + $0x538] sm:$0xff] }
 0x246   :  { %7854 = vmatprep.subr.bf16.mxu0 %v7853_v61  ;;  %7918 = vmatprep.subr.bf16.mxu1 %v7917_v62  ;;  %v6962_v16 = vmul.f32 %v10096_v10, %v7443_v29  ;;  %v7859_v29 = vpack.c.bf16 %v1411_v17, %v1403_v54  ;;  %v7929_v61 = vpack.c.bf16 %v1446_v45, %v1438_v41  ;;  %v1437_v62 = vld [vmem:[%s18566_s4 + $0x3b0] sm:$0xff]  ;;  %v1494_v39 = vld [vmem:[%s18566_s4 + $0x578] sm:$0xff]  ;;  %v1483_v45 = vld [vmem:[%s18566_s4 + $0x520] sm:$0xff] }
 0x247   :  { %v7931_v10 = vpack.c.bf16 %v1445_v63, %v1437_v62  ;;  %v7869_v54 = vpack.c.bf16 %v1460_v2, %v1452_v1  ;;  %v7933_v17 = vpack.c.bf16 %v1462_v5, %v1454_v4  ;;  %v7941_v58 = vpack.c.bf16 %v1494_v39, %v1486_v36  ;;  %v1508_v62 = vld [vmem:[%s18566_s4 + $0x5e8] sm:$0xff]  ;;  %v1502_v63 = vld [vmem:[%s18566_s4 + $0x5b8] sm:$0xff]  ;;  %v1499_v5 = vld [vmem:[%s18566_s4 + $0x5a0] sm:$0xff] }
 0x248   :  { %6983 = vadd.xlane.f32.xlu0 %v6962_v16  ;;  %v1453_v16 = vld [vmem:[%s18566_s4 + $0x430] sm:$0xff]  ;;  %v1510_v1 = vld [vmem:[%s18566_s4 + $0x5f8] sm:$0xff]  ;;  %v1515_v6 = vld [vmem:[%s18566_s4 + $0x620] sm:$0xff] }
 0x249   :  { %7856 = vmatpush1.bf16.msra.mxu0 %v7855_v11  ;;  %7920 = vmatpush1.bf16.msra.mxu1 %v7919_v12  ;;  %v1451_v11 = vld [vmem:[%s18566_s4 + $0x420] sm:$0xff] }
 0x24a   :  { %7858 = vmatprep.subr.bf16.mxu0 %v7857_v18  ;;  %7922 = vmatprep.subr.bf16.mxu1 %v7921_v22  ;;  %v1459_v12 = vld [vmem:[%s18566_s4 + $0x460] sm:$0xff]  ;;  %v1461_v18 = vld [vmem:[%s18566_s4 + $0x470] sm:$0xff]  ;;  %v1468_v22 = vld [vmem:[%s18566_s4 + $0x4a8] sm:$0xff] }
 0x24b   :  { %v7871_v26 = vpack.c.bf16 %v1459_v12, %v1451_v11  ;;  %v7935_v27 = vpack.c.bf16 %v1461_v18, %v1453_v16  ;;  %v7945_v11 = vpack.c.bf16 %v1510_v1, %v1502_v63  ;;  %v1501_v12 = vld [vmem:[%s18566_s4 + $0x5b0] sm:$0xff]  ;;  %v1524_v16 = vld [vmem:[%s18566_s4 + $0x668] sm:$0xff]  ;;  %v1518_v18 = vld [vmem:[%s18566_s4 + $0x638] sm:$0xff] }
 0x24c   :  { %v1531_v39 = vld [vmem:[%s18566_s4 + $0x6a0] sm:$0xff] }
 0x24d   :  { %7860 = vmatpush1.bf16.msra.mxu0 %v7859_v29  ;;  %7924 = vmatpush1.bf16.msra.mxu1 %v7923_v30  ;;  %v1475_v29 = vld [vmem:[%s18566_s4 + $0x4e0] sm:$0xff]  ;;  %v7873_v30 = vpack.c.bf16 %v1476_v52, %v1468_v22  ;;  %v1526_v22 = vld [vmem:[%s18566_s4 + $0x678] sm:$0xff] }
 0x24e   :  { %7862 = vmatprep.subr.bf16.mxu0 %v7861_v33  ;;  %7926 = vmatprep.subr.bf16.mxu1 %v7925_v34  ;;  %v1477_v33 = vld [vmem:[%s18566_s4 + $0x4f0] sm:$0xff]  ;;  %v1484_v34 = vld [vmem:[%s18566_s4 + $0x528] sm:$0xff]  ;;  %v7875_v40 = vpack.c.bf16 %v1475_v29, %v1467_v28  ;;  %v7949_v28 = vpack.c.bf16 %v1526_v22, %v1518_v18  ;;  %v1547_v1 = vld [vmem:[%s18566_s4 + $0x720] sm:$0xff] }
 0x24f   :  { %v7939_v41 = vpack.c.bf16 %v1477_v33, %v1469_v31  ;;  %v1517_v29 = vld [vmem:[%s18566_s4 + $0x630] sm:$0xff]  ;;  %v1540_v31 = vld [vmem:[%s18566_s4 + $0x6e8] sm:$0xff]  ;;  %v1534_v33 = vld [vmem:[%s18566_s4 + $0x6b8] sm:$0xff] }
 0x250   :  { %v1563_v22 = vld [vmem:[%s18566_s4 + $0x7a0] sm:$0xff] }
 0x251   :  { %7864 = vmatpush1.bf16.msra.mxu0 %v7863_v53  ;;  %7928 = vmatpush1.bf16.msra.mxu1 %v7927_v56  ;;  %v1491_v53 = vld [vmem:[%s18566_s4 + $0x560] sm:$0xff]  ;;  %v7877_v56 = vpack.c.bf16 %v1492_v35, %v1484_v34  ;;  %v1542_v34 = vld [vmem:[%s18566_s4 + $0x6f8] sm:$0xff] }
 0x252   :  { %7866 = vmatprep.subr.bf16.mxu0 %v7865_v60  ;;  %7930 = vmatprep.subr.bf16.mxu1 %v7929_v61  ;;  %v1493_v60 = vld [vmem:[%s18566_s4 + $0x570] sm:$0xff]  ;;  %v1500_v61 = vld [vmem:[%s18566_s4 + $0x5a8] sm:$0xff]  ;;  %v7879_v2 = vpack.c.bf16 %v1491_v53, %v1483_v45  ;;  %v7953_v45 = vpack.c.bf16 %v1542_v34, %v1534_v33  ;;  %v1987_v33 = vld [vmem:[%s18566_s4 + $0x40] sm:$0xff] }
 0x253   :  { %v7943_v4 = vpack.c.bf16 %v1493_v60, %v1485_v59  ;;  %v1533_v53 = vld [vmem:[%s18566_s4 + $0x6b0] sm:$0xff]  ;;  %v1556_v59 = vld [vmem:[%s18566_s4 + $0x768] sm:$0xff]  ;;  %v1550_v60 = vld [vmem:[%s18566_s4 + $0x738] sm:$0xff] }
 0x255   :  { %7868 = vmatpush1.bf16.msra.mxu0 %v7867_v38  ;;  %7932 = vmatpush1.bf16.msra.mxu1 %v7931_v10  ;;  %v1507_v38 = vld [vmem:[%s18566_s4 + $0x5e0] sm:$0xff]  ;;  %v7881_v10 = vpack.c.bf16 %v1508_v62, %v1500_v61  ;;  %v1558_v61 = vld [vmem:[%s18566_s4 + $0x778] sm:$0xff] }
 0x256   :  { %7870 = vmatprep.subr.bf16.mxu0 %v7869_v54  ;;  %7934 = vmatprep.subr.bf16.mxu1 %v7933_v17  ;;  %v1509_v54 = vld [vmem:[%s18566_s4 + $0x5f0] sm:$0xff]  ;;  %v1516_v17 = vld [vmem:[%s18566_s4 + $0x628] sm:$0xff]  ;;  %v7883_v52 = vpack.c.bf16 %v1507_v38, %v1499_v5  ;;  %v7957_v5 = vpack.c.bf16 %v1558_v61, %v1550_v60  ;;  %v2006_v60 = vld [vmem:[%s18566_s4 + $0xd8] sm:$0xff] }
 0x257   :  { %v7947_v3 = vpack.c.bf16 %v1509_v54, %v1501_v12  ;;  %v1549_v38 = vld [vmem:[%s18566_s4 + $0x730] sm:$0xff]  ;;  %v1572_v12 = vld [vmem:[%s18566_s4 + $0x7e8] sm:$0xff]  ;;  %v1566_v54 = vld [vmem:[%s18566_s4 + $0x7b8] sm:$0xff] }
 0x258   :  { %v1995_v61 = vld [vmem:[%s18566_s4 + $0x80] sm:$0xff] }
 0x259   :  { %7872 = vmatpush1.bf16.msra.mxu0 %v7871_v26  ;;  %7936 = vmatpush1.bf16.msra.mxu1 %v7935_v27  ;;  %v1523_v26 = vld [vmem:[%s18566_s4 + $0x660] sm:$0xff]  ;;  %v7885_v27 = vpack.c.bf16 %v1524_v16, %v1516_v17  ;;  %v1574_v17 = vld [vmem:[%s18566_s4 + $0x7f8] sm:$0xff] }
 0x25a   :  { %7874 = vmatprep.subr.bf16.mxu0 %v7873_v30  ;;  %7938 = vmatprep.subr.bf16.mxu1 %v7937_v44  ;;  %v1525_v30 = vld [vmem:[%s18566_s4 + $0x670] sm:$0xff]  ;;  %v1532_v44 = vld [vmem:[%s18566_s4 + $0x6a8] sm:$0xff]  ;;  %v7887_v35 = vpack.c.bf16 %v1523_v26, %v1515_v6  ;;  %v1571_v6 = vld [vmem:[%s18566_s4 + $0x7e0] sm:$0xff] }
 0x25b   :  { %v7951_v36 = vpack.c.bf16 %v1525_v30, %v1517_v29  ;;  %v1565_v26 = vld [vmem:[%s18566_s4 + $0x7b0] sm:$0xff]  ;;  %v1980_v30 = vld [vmem:[%s18566_s4 + $0x8] sm:$0xff] }
 0x25d   :  { %7876 = vmatpush1.bf16.msra.mxu0 %v7875_v40  ;;  %7940 = vmatpush1.bf16.msra.mxu1 %v7939_v41  ;;  %v1539_v40 = vld [vmem:[%s18566_s4 + $0x6e0] sm:$0xff]  ;;  %v7889_v41 = vpack.c.bf16 %v1540_v31, %v1532_v44  ;;  %v1988_v44 = vld [vmem:[%s18566_s4 + $0x48] sm:$0xff] }
 0x25e   :  { %7878 = vmatprep.subr.bf16.mxu0 %v7877_v56  ;;  %7942 = vmatprep.subr.bf16.mxu1 %v7941_v58  ;;  %v1541_v56 = vld [vmem:[%s18566_s4 + $0x6f0] sm:$0xff]  ;;  %v1548_v58 = vld [vmem:[%s18566_s4 + $0x728] sm:$0xff]  ;;  %v7891_v62 = vpack.c.bf16 %v1539_v40, %v1531_v39  ;;  %v7965_v31 = vpack.c.bf16 %v1988_v44, %v1980_v30  ;;  %v2038_v30 = vld [vmem:[%s18566_s4 + $0x1d8] sm:$0xff] }
 0x25f   :  { %v7955_v63 = vpack.c.bf16 %v1541_v56, %v1533_v53  ;;  %v1981_v40 = vld [vmem:[%s18566_s4 + $0x10] sm:$0xff]  ;;  %v1996_v53 = vld [vmem:[%s18566_s4 + $0x88] sm:$0xff]  ;;  %v2027_v44 = vld [vmem:[%s18566_s4 + $0x180] sm:$0xff] }
 0x260   :  { %v2004_v56 = vld [vmem:[%s18566_s4 + $0xc8] sm:$0xff] }
 0x261   :  { %7880 = vmatpush1.bf16.msra.mxu0 %v7879_v2  ;;  %7944 = vmatpush1.bf16.msra.mxu1 %v7943_v4  ;;  %v1555_v2 = vld [vmem:[%s18566_s4 + $0x760] sm:$0xff]  ;;  %v7893_v4 = vpack.c.bf16 %v1556_v59, %v1548_v58  ;;  %v1998_v58 = vld [vmem:[%s18566_s4 + $0x98] sm:$0xff]  ;;  %v7969_v59 = vpack.c.bf16 %v2004_v56, %v1996_v53 }
 0x262   :  { %7882 = vmatprep.subr.bf16.mxu0 %v7881_v10  ;;  %7946 = vmatprep.subr.bf16.mxu1 %v7945_v11  ;;  %v1557_v10 = vld [vmem:[%s18566_s4 + $0x770] sm:$0xff]  ;;  %v1564_v11 = vld [vmem:[%s18566_s4 + $0x7a8] sm:$0xff]  ;;  %v7895_v16 = vpack.c.bf16 %v1555_v2, %v1547_v1  ;;  %v2051_v53 = vld [vmem:[%s18566_s4 + $0x240] sm:$0xff] }
 0x263   :  { %v7959_v18 = vpack.c.bf16 %v1557_v10, %v1549_v38  ;;  %v1997_v2 = vld [vmem:[%s18566_s4 + $0x90] sm:$0xff]  ;;  %v2020_v10 = vld [vmem:[%s18566_s4 + $0x148] sm:$0xff] }
 0x265   :  { %7884 = vmatpush1.bf16.msra.mxu0 %v7883_v52  ;;  %7948 = vmatpush1.bf16.msra.mxu1 %v7947_v3  ;;  %v7897_v52 = vpack.c.bf16 %v1572_v12, %v1564_v11  ;;  %v7961_v3 = vpack.c.bf16 %v1574_v17, %v1566_v54  ;;  %v2014_v11 = vld [vmem:[%s18566_s4 + $0x118] sm:$0xff] }
 0x266   :  { %7886 = vmatprep.subr.bf16.mxu0 %v7885_v27  ;;  %7950 = vmatprep.subr.bf16.mxu1 %v7949_v28  ;;  %v1573_v27 = vld [vmem:[%s18566_s4 + $0x7f0] sm:$0xff]  ;;  %v7899_v28 = vpack.c.bf16 %v1571_v6, %v1563_v22  ;;  %v2022_v12 = vld [vmem:[%s18566_s4 + $0x158] sm:$0xff]  ;;  %v2019_v22 = vld [vmem:[%s18566_s4 + $0x140] sm:$0xff] }
 0x267   :  { %v7963_v29 = vpack.c.bf16 %v1573_v27, %v1565_v26  ;;  %v8037_v17 = vpack.c.bf16 %v2022_v12, %v2014_v11  ;;  %v2021_v6 = vld [vmem:[%s18566_s4 + $0x150] sm:$0xff]  ;;  %v2036_v26 = vld [vmem:[%s18566_s4 + $0x1c8] sm:$0xff] }
 0x269   :  { %7888 = vmatpush1.bf16.msra.mxu0 %v7887_v35  ;;  %7952 = vmatpush1.bf16.msra.mxu1 %v7951_v36  ;;  %v12424_v35 = vld [vmem:[%s18569_s1] sm:$0xff] }
 0x26a   :  { %7890 = vmatprep.subr.bf16.mxu0 %v7889_v41  ;;  %7954 = vmatprep.subr.bf16.mxu1 %v7953_v45  ;;  %v7039_v36 = vrot.slane %v12424_v35, %v11101_v46  ;;  %v1989_v41 = vld [vmem:[%s18566_s4 + $0x50] sm:$0xff] }
 0x26b   :  { %v8031_v45 = vpack.c.bf16 %v1989_v41, %v1981_v40  ;;  %v2054_v41 = vld [vmem:[%s18566_s4 + $0x258] sm:$0xff] }
 0x26c   :  { %7041 = vbcast.lane.b32.xlu1 %v7039_v36, 256 }
 0x26d   :  { %7892 = vmatpush1.bf16.msra.mxu0 %v7891_v62  ;;  %7956 = vmatpush1.bf16.msra.mxu1 %v7955_v63  ;;  %v2003_v62 = vld [vmem:[%s18566_s4 + $0xc0] sm:$0xff]  ;;  %v8033_v63 = vpack.c.bf16 %v2006_v60, %v1998_v58  ;;  %v2053_v60 = vld [vmem:[%s18566_s4 + $0x250] sm:$0xff] }
 0x26e   :  { %7894 = vmatprep.subr.bf16.mxu0 %v7893_v4  ;;  %7958 = vmatprep.subr.bf16.mxu1 %v7957_v5  ;;  %v7971_v1 = vpack.c.bf16 %v2003_v62, %v1995_v61  ;;  %v2005_v4 = vld [vmem:[%s18566_s4 + $0xd0] sm:$0xff]  ;;  %v2012_v5 = vld [vmem:[%s18566_s4 + $0x108] sm:$0xff] }
 0x26f   :  { %v8035_v38 = vpack.c.bf16 %v2005_v4, %v1997_v2  ;;  %v7973_v54 = vpack.c.bf16 %v2020_v10, %v2012_v5  ;;  %v2060_v61 = vld [vmem:[%s18566_s4 + $0x288] sm:$0xff]  ;;  %v7061_v2 = vrot.slane %v12424_v35, %v11119_v57  ;;  %v2067_v10 = vld [vmem:[%s18566_s4 + $0x2c0] sm:$0xff]  ;;  %v2061_v57 = vld [vmem:[%s18566_s4 + $0x290] sm:$0xff] }
 0x270   :  { %7045 = vbcast.lane.b32.xlu1 %v7039_v36, 264  ;;  %v2046_v36 = vld [vmem:[%s18566_s4 + $0x218] sm:$0xff]  ;;  %v2068_v62 = vld [vmem:[%s18566_s4 + $0x2c8] sm:$0xff] }
 0x271   :  { %7896 = vmatpush1.bf16.msra.mxu0 %v7895_v16  ;;  %7960 = vmatpush1.bf16.msra.mxu1 %v7959_v18  ;;  %v7050_v16 = vrot.slane %v12424_v35, %v11104_v47  ;;  %v2011_v18 = vld [vmem:[%s18566_s4 + $0x100] sm:$0xff]  ;;  %v2028_v47 = vld [vmem:[%s18566_s4 + $0x188] sm:$0xff]  ;;  %v8045_v58 = vpack.c.bf16 %v2054_v41, %v2046_v36  ;;  %v7985_v11 = vpack.c.bf16 %v2068_v62, %v2060_v61  ;;  %v2069_v35 = vld [vmem:[%s18566_s4 + $0x2d0] sm:$0xff] }
 0x272   :  { %7898 = vmatprep.subr.bf16.mxu0 %v7897_v52  ;;  %7962 = vmatprep.subr.bf16.mxu1 %v7961_v3  ;;  %v2013_v52 = vld [vmem:[%s18566_s4 + $0x110] sm:$0xff]  ;;  %v7975_v3 = vpack.c.bf16 %v2019_v22, %v2011_v18  ;;  %v2086_v18 = vld [vmem:[%s18566_s4 + $0x358] sm:$0xff] }
 0x273   :  { %v8039_v27 = vpack.c.bf16 %v2021_v6, %v2013_v52  ;;  %v8051_v52 = vpack.c.bf16 %v2069_v35, %v2061_v57  ;;  %v2093_v36 = vld [vmem:[%s18566_s4 + $0x390] sm:$0xff] }
 0x274   :  { %7052 = vbcast.lane.b32.xlu1 %v7050_v16, 256 }
 0x275   :  { %7900 = vmatpush1.bf16.msra.mxu0 %v7899_v28  ;;  %7964 = vmatpush1.bf16.msra.mxu1 %v7963_v29  ;;  %v7977_v28 = vpack.c.bf16 %v2036_v26, %v2028_v47  ;;  %v2030_v29 = vld [vmem:[%s18566_s4 + $0x198] sm:$0xff]  ;;  %v2083_v26 = vld [vmem:[%s18566_s4 + $0x340] sm:$0xff] }
 0x276   :  { %7966 = vmatprep.subr.bf16.mxu0 %v7965_v31  ;;  %v2035_v31 = vld [vmem:[%s18566_s4 + $0x1c0] sm:$0xff] }
 0x278   :  { %1794 = vmatmul.mubr.f32.vlgmr.msra.gmra.mrb[44].mxu0 %v12036_v51  ;;  %1871 = vmatmul.mubr.f32.vlgmr.msra.gmra.mrb[44].mxu1 %v12036_v51  ;;  %v1982_v51 = vld [vmem:[%s18566_s4 + $0x18] sm:$0xff] }
 0x279   :  { %1799 = vmatprep.mubr.f32.mxu0 %v12061_v7  ;;  %1876 = vmatprep.mubr.f32.mxu1 %v12061_v7  ;;  %v1990_v7 = vld [vmem:[%s18566_s4 + $0x58] sm:$0xff] }
 0x27a   :  { %v8029_v34 = vpack.c.bf16 %v1990_v7, %v1982_v51  ;;  %v8041_v51 = vpack.c.bf16 %v2038_v30, %v2030_v29  ;;  %v2029_v7 = vld [vmem:[%s18566_s4 + $0x190] sm:$0xff]  ;;  %7056 = vbcast.lane.b32.xlu1 %v7050_v16, 264  ;;  %v2078_v16 = vld [vmem:[%s18566_s4 + $0x318] sm:$0xff] }
 0x27b   :  { %v8053_v47 = vpack.c.bf16 %v2086_v18, %v2078_v16  ;;  %v2140_v18 = vld [vmem:[%s18566_s4 + $0x508] sm:$0xff] }
 0x27c   :  { %1800 = vmatmul.mubr.f32.gmra.mrb[46].mxu0 %v12069_v14  ;;  %1877 = vmatmul.mubr.f32.gmra.mrb[46].mxu1 %v12069_v14  ;;  %v1979_v14 = vld [vmem:[%s18566_s4] sm:$0xff] }
 0x27d   :  { %v7967_v39 = vpack.c.bf16 %v1987_v33, %v1979_v14  ;;  %8030 = vmatprep.subr.bf16.mxu1 %v8029_v34  ;;  %v2037_v14 = vld [vmem:[%s18566_s4 + $0x1d0] sm:$0xff]  ;;  %v2044_v33 = vld [vmem:[%s18566_s4 + $0x208] sm:$0xff] }
 0x27e   :  { %8032 = vmatpush1.bf16.msra.mxu1 %v8031_v45  ;;  %v2052_v34 = vld [vmem:[%s18566_s4 + $0x248] sm:$0xff]  ;;  %v8043_v40 = vpack.c.bf16 %v2037_v14, %v2029_v7  ;;  %v2043_v45 = vld [vmem:[%s18566_s4 + $0x200] sm:$0xff]  ;;  %7063 = vbcast.lane.b32.xlu1 %v7061_v2, 256  ;;  %v2102_v14 = vld [vmem:[%s18566_s4 + $0x3d8] sm:$0xff] }
 0x27f   :  { %7968 = vmatpush1.bf16.msra.mxu0 %v7967_v39  ;;  %8034 = vmatprep.subr.bf16.mxu1 %v8033_v63  ;;  %v7979_v39 = vpack.c.bf16 %v2035_v31, %v2027_v44  ;;  %v7981_v56 = vpack.c.bf16 %v2052_v34, %v2044_v33  ;;  %v2062_v63 = vld [vmem:[%s18566_s4 + $0x298] sm:$0xff]  ;;  %v7983_v4 = vpack.c.bf16 %v2051_v53, %v2043_v45  ;;  %v2092_v44 = vld [vmem:[%s18566_s4 + $0x388] sm:$0xff]  ;;  %v2091_v33 = vld [vmem:[%s18566_s4 + $0x380] sm:$0xff] }
 0x280   :  { %7970 = vmatprep.subr.bf16.mxu0 %v7969_v59  ;;  %v2045_v59 = vld [vmem:[%s18566_s4 + $0x210] sm:$0xff]  ;;  %v2094_v31 = vld [vmem:[%s18566_s4 + $0x398] sm:$0xff]  ;;  %v2099_v34 = vld [vmem:[%s18566_s4 + $0x3c0] sm:$0xff] }
 0x281   :  { %v8047_v5 = vpack.c.bf16 %v2053_v60, %v2045_v59  ;;  %v2108_v45 = vld [vmem:[%s18566_s4 + $0x408] sm:$0xff]  ;;  %v2107_v59 = vld [vmem:[%s18566_s4 + $0x400] sm:$0xff] }
 0x282   :  { %8036 = vmatpush1.bf16.msra.mxu1 %v8035_v38  ;;  %v2059_v38 = vld [vmem:[%s18566_s4 + $0x280] sm:$0xff]  ;;  %7067 = vbcast.lane.b32.xlu1 %v7061_v2, 264  ;;  %v2116_v53 = vld [vmem:[%s18566_s4 + $0x448] sm:$0xff] }
 0x283   :  { %7972 = vmatpush1.bf16.msra.mxu0 %v7971_v1  ;;  %8038 = vmatprep.subr.bf16.mxu1 %v8037_v17  ;;  %v2070_v1 = vld [vmem:[%s18566_s4 + $0x2d8] sm:$0xff]  ;;  %v2084_v17 = vld [vmem:[%s18566_s4 + $0x348] sm:$0xff]  ;;  %v7987_v22 = vpack.c.bf16 %v2067_v10, %v2059_v38  ;;  %v2115_v60 = vld [vmem:[%s18566_s4 + $0x440] sm:$0xff] }
 0x284   :  { %7974 = vmatprep.subr.bf16.mxu0 %v7973_v54  ;;  %v8049_v12 = vpack.c.bf16 %v2070_v1, %v2062_v63  ;;  %v2076_v54 = vld [vmem:[%s18566_s4 + $0x308] sm:$0xff]  ;;  %v7999_v62 = vpack.c.bf16 %v2115_v60, %v2107_v59  ;;  %v2109_v63 = vld [vmem:[%s18566_s4 + $0x410] sm:$0xff]  ;;  %v2126_v38 = vld [vmem:[%s18566_s4 + $0x498] sm:$0xff] }
 0x285   :  { %v7989_v6 = vpack.c.bf16 %v2084_v17, %v2076_v54  ;;  %v2117_v1 = vld [vmem:[%s18566_s4 + $0x450] sm:$0xff]  ;;  %v2179_v59 = vld [vmem:[%s18566_s4 + $0x640] sm:$0xff] }
 0x286   :  { %8040 = vmatpush1.bf16.msra.mxu1 %v8039_v27  ;;  %v2077_v27 = vld [vmem:[%s18566_s4 + $0x310] sm:$0xff]  ;;  %7078 = vbcast.lane.b32.xlu1 %v11727_v19, 264  ;;  %v8057_v19 = vpack.c.bf16 %v2102_v14, %v2094_v31  ;;  %v8063_v2 = vpack.c.bf16 %v2117_v1, %v2109_v63  ;;  %v2158_v31 = vld [vmem:[%s18566_s4 + $0x598] sm:$0xff]  ;;  %v2155_v14 = vld [vmem:[%s18566_s4 + $0x580] sm:$0xff] }
 0x287   :  { %7976 = vmatpush1.bf16.msra.mxu0 %v7975_v3  ;;  %8042 = vmatprep.subr.bf16.mxu1 %v8041_v51  ;;  %v2075_v3 = vld [vmem:[%s18566_s4 + $0x300] sm:$0xff]  ;;  %v2100_v51 = vld [vmem:[%s18566_s4 + $0x3c8] sm:$0xff]  ;;  %v2125_v54 = vld [vmem:[%s18566_s4 + $0x490] sm:$0xff] }
 0x288   :  { %7978 = vmatprep.subr.bf16.mxu0 %v7977_v28  ;;  %v2085_v28 = vld [vmem:[%s18566_s4 + $0x350] sm:$0xff]  ;;  %v7991_v29 = vpack.c.bf16 %v2083_v26, %v2075_v3  ;;  %v7993_v7 = vpack.c.bf16 %v2100_v51, %v2092_v44  ;;  %v2156_v44 = vld [vmem:[%s18566_s4 + $0x588] sm:$0xff] }
 0x289   :  { %v8055_v30 = vpack.c.bf16 %v2085_v28, %v2077_v27  ;;  %v2133_v17 = vld [vmem:[%s18566_s4 + $0x4d0] sm:$0xff]  ;;  %v2164_v51 = vld [vmem:[%s18566_s4 + $0x5c8] sm:$0xff] }
 0x28a   :  { %8044 = vmatpush1.bf16.msra.mxu1 %v8043_v40  ;;  %v2101_v40 = vld [vmem:[%s18566_s4 + $0x3d0] sm:$0xff]  ;;  %7089 = vbcast.lane.b32.xlu1 %v11756_v32, 264  ;;  %v2118_v32 = vld [vmem:[%s18566_s4 + $0x458] sm:$0xff]  ;;  %v8067_v16 = vpack.c.bf16 %v2133_v17, %v2125_v54 }
 0x28b   :  { %7980 = vmatpush1.bf16.msra.mxu0 %v7979_v39  ;;  %8046 = vmatprep.subr.bf16.mxu1 %v8045_v58  ;;  %v7995_v39 = vpack.c.bf16 %v2099_v34, %v2091_v33  ;;  %v8059_v41 = vpack.c.bf16 %v2101_v40, %v2093_v36  ;;  %v7997_v58 = vpack.c.bf16 %v2116_v53, %v2108_v45  ;;  %v2141_v28 = vld [vmem:[%s18566_s4 + $0x510] sm:$0xff]  ;;  %v2180_v45 = vld [vmem:[%s18566_s4 + $0x648] sm:$0xff]  ;;  %v2174_v53 = vld [vmem:[%s18566_s4 + $0x618] sm:$0xff] }
 0x28c   :  { %7982 = vmatprep.subr.bf16.mxu0 %v7981_v56  ;;  %v2110_v56 = vld [vmem:[%s18566_s4 + $0x418] sm:$0xff]  ;;  %v2157_v36 = vld [vmem:[%s18566_s4 + $0x590] sm:$0xff] }
 0x28d   :  { %v8061_v61 = vpack.c.bf16 %v2118_v32, %v2110_v56  ;;  %v2171_v32 = vld [vmem:[%s18566_s4 + $0x600] sm:$0xff]  ;;  %v2181_v63 = vld [vmem:[%s18566_s4 + $0x650] sm:$0xff] }
 0x28e   :  { %8048 = vmatpush1.bf16.msra.mxu1 %v8047_v5  ;;  %7100 = vbcast.lane.b32.xlu1 %v11785_v55, 264  ;;  %v2132_v5 = vld [vmem:[%s18566_s4 + $0x4c8] sm:$0xff]  ;;  %v2134_v55 = vld [vmem:[%s18566_s4 + $0x4d8] sm:$0xff]  ;;  %v2197_v54 = vld [vmem:[%s18566_s4 + $0x6d0] sm:$0xff] }
 0x28f   :  { %7984 = vmatpush1.bf16.msra.mxu0 %v7983_v4  ;;  %8050 = vmatprep.subr.bf16.mxu1 %v8049_v12  ;;  %v2124_v4 = vld [vmem:[%s18566_s4 + $0x488] sm:$0xff]  ;;  %v2131_v12 = vld [vmem:[%s18566_s4 + $0x4c0] sm:$0xff]  ;;  %v8065_v57 = vpack.c.bf16 %v2134_v55, %v2126_v38 }
 0x290   :  { %7986 = vmatprep.subr.bf16.mxu0 %v7985_v11  ;;  %v8001_v10 = vpack.c.bf16 %v2132_v5, %v2124_v4  ;;  %v2123_v11 = vld [vmem:[%s18566_s4 + $0x480] sm:$0xff]  ;;  %v2196_v4 = vld [vmem:[%s18566_s4 + $0x6c8] sm:$0xff]  ;;  %v2190_v5 = vld [vmem:[%s18566_s4 + $0x698] sm:$0xff] }
 0x291   :  { %v8003_v35 = vpack.c.bf16 %v2131_v12, %v2123_v11  ;;  %v2187_v55 = vld [vmem:[%s18566_s4 + $0x680] sm:$0xff] }
 0x292   :  { %8052 = vmatpush1.bf16.msra.mxu1 %v8051_v52  ;;  %7111 = vbcast.lane.b32.xlu1 %v11814_v9, 264  ;;  %v2142_v52 = vld [vmem:[%s18566_s4 + $0x518] sm:$0xff]  ;;  %v2195_v11 = vld [vmem:[%s18566_s4 + $0x6c0] sm:$0xff] }
 0x293   :  { %7988 = vmatpush1.bf16.msra.mxu0 %v7987_v22  ;;  %8054 = vmatprep.subr.bf16.mxu1 %v8053_v47  ;;  %v2148_v22 = vld [vmem:[%s18566_s4 + $0x548] sm:$0xff]  ;;  %v2150_v9 = vld [vmem:[%s18566_s4 + $0x558] sm:$0xff]  ;;  %v2147_v47 = vld [vmem:[%s18566_s4 + $0x540] sm:$0xff] }
 0x294   :  { %7990 = vmatprep.subr.bf16.mxu0 %v7989_v6  ;;  %v8005_v3 = vpack.c.bf16 %v2148_v22, %v2140_v18  ;;  %v2139_v6 = vld [vmem:[%s18566_s4 + $0x500] sm:$0xff]  ;;  %v8069_v26 = vpack.c.bf16 %v2150_v9, %v2142_v52  ;;  %v2212_v18 = vld [vmem:[%s18566_s4 + $0x748] sm:$0xff]  ;;  %v2206_v22 = vld [vmem:[%s18566_s4 + $0x718] sm:$0xff] }
 0x295   :  { %v8007_v27 = vpack.c.bf16 %v2147_v47, %v2139_v6  ;;  %v2203_v9 = vld [vmem:[%s18566_s4 + $0x700] sm:$0xff] }
 0x296   :  { %8056 = vmatpush1.bf16.msra.mxu1 %v8055_v30  ;;  %7122 = vbcast.lane.b32.xlu1 %v11845_v25, 264  ;;  %v2166_v25 = vld [vmem:[%s18566_s4 + $0x5d8] sm:$0xff]  ;;  %v2211_v6 = vld [vmem:[%s18566_s4 + $0x740] sm:$0xff] }
 0x297   :  { %7992 = vmatpush1.bf16.msra.mxu0 %v7991_v29  ;;  %8058 = vmatprep.subr.bf16.mxu1 %v8057_v19  ;;  %v2149_v29 = vld [vmem:[%s18566_s4 + $0x550] sm:$0xff]  ;;  %v2163_v19 = vld [vmem:[%s18566_s4 + $0x5c0] sm:$0xff]  ;;  %v8073_v33 = vpack.c.bf16 %v2166_v25, %v2158_v31 }
 0x298   :  { %7994 = vmatprep.subr.bf16.mxu0 %v7993_v7  ;;  %v8071_v30 = vpack.c.bf16 %v2149_v29, %v2141_v28  ;;  %v8009_v7 = vpack.c.bf16 %v2164_v51, %v2156_v44  ;;  %v8011_v34 = vpack.c.bf16 %v2163_v19, %v2155_v14  ;;  %v2213_v28 = vld [vmem:[%s18566_s4 + $0x750] sm:$0xff]  ;;  %v2228_v44 = vld [vmem:[%s18566_s4 + $0x7c8] sm:$0xff]  ;;  %v2222_v51 = vld [vmem:[%s18566_s4 + $0x798] sm:$0xff] }
 0x299   :  { %v2219_v25 = vld [vmem:[%s18566_s4 + $0x780] sm:$0xff] }
 0x29a   :  { %8060 = vmatpush1.bf16.msra.mxu1 %v8059_v41  ;;  %v2172_v41 = vld [vmem:[%s18566_s4 + $0x608] sm:$0xff]  ;;  %v2227_v14 = vld [vmem:[%s18566_s4 + $0x7c0] sm:$0xff] }
 0x29b   :  { %7996 = vmatpush1.bf16.msra.mxu0 %v7995_v39  ;;  %8062 = vmatprep.subr.bf16.mxu1 %v8061_v61  ;;  %v2165_v39 = vld [vmem:[%s18566_s4 + $0x5d0] sm:$0xff]  ;;  %v8013_v56 = vpack.c.bf16 %v2180_v45, %v2172_v41  ;;  %v8015_v61 = vpack.c.bf16 %v2179_v59, %v2171_v32  ;;  %v1992_v41 = vld [vmem:[%s18566_s4 + $0x68] sm:$0xff]  ;;  %v1986_v45 = vld [vmem:[%s18566_s4 + $0x38] sm:$0xff] }
 0x29c   :  { %7998 = vmatprep.subr.bf16.mxu0 %v7997_v58  ;;  %v8075_v40 = vpack.c.bf16 %v2165_v39, %v2157_v36  ;;  %v2182_v58 = vld [vmem:[%s18566_s4 + $0x658] sm:$0xff]  ;;  %v2229_v36 = vld [vmem:[%s18566_s4 + $0x7d0] sm:$0xff] }
 0x29d   :  { %v8077_v60 = vpack.c.bf16 %v2182_v58, %v2174_v53 }
 0x29e   :  { %8064 = vmatpush1.bf16.msra.mxu1 %v8063_v2  ;;  %v2188_v2 = vld [vmem:[%s18566_s4 + $0x688] sm:$0xff] }
 0x29f   :  { %8000 = vmatpush1.bf16.msra.mxu0 %v7999_v62  ;;  %8066 = vmatprep.subr.bf16.mxu1 %v8065_v57  ;;  %v2173_v62 = vld [vmem:[%s18566_s4 + $0x610] sm:$0xff]  ;;  %v8017_v38 = vpack.c.bf16 %v2196_v4, %v2188_v2  ;;  %v8019_v57 = vpack.c.bf16 %v2195_v11, %v2187_v55 }
 0x2a0   :  { %8002 = vmatprep.subr.bf16.mxu0 %v8001_v10  ;;  %v8079_v1 = vpack.c.bf16 %v2181_v63, %v2173_v62  ;;  %v2198_v10 = vld [vmem:[%s18566_s4 + $0x6d8] sm:$0xff] }
 0x2a1   :  { %v8081_v12 = vpack.c.bf16 %v2198_v10, %v2190_v5 }
 0x2a2   :  { %8068 = vmatpush1.bf16.msra.mxu1 %v8067_v16  ;;  %v2204_v16 = vld [vmem:[%s18566_s4 + $0x708] sm:$0xff] }
 0x2a3   :  { %8004 = vmatpush1.bf16.msra.mxu0 %v8003_v35  ;;  %8070 = vmatprep.subr.bf16.mxu1 %v8069_v26  ;;  %v2189_v35 = vld [vmem:[%s18566_s4 + $0x690] sm:$0xff]  ;;  %v8021_v52 = vpack.c.bf16 %v2212_v18, %v2204_v16  ;;  %v8023_v26 = vpack.c.bf16 %v2211_v6, %v2203_v9 }
 0x2a4   :  { %8006 = vmatprep.subr.bf16.mxu0 %v8005_v3  ;;  %v8083_v17 = vpack.c.bf16 %v2197_v54, %v2189_v35  ;;  %v2214_v3 = vld [vmem:[%s18566_s4 + $0x758] sm:$0xff] }
 0x2a5   :  { %v8085_v47 = vpack.c.bf16 %v2214_v3, %v2206_v22 }
 0x2a6   :  { %8072 = vmatpush1.bf16.msra.mxu1 %v8071_v30  ;;  %v2220_v30 = vld [vmem:[%s18566_s4 + $0x788] sm:$0xff] }
 0x2a7   :  { %8008 = vmatpush1.bf16.msra.mxu0 %v8007_v27  ;;  %8074 = vmatprep.subr.bf16.mxu1 %v8073_v33  ;;  %v2205_v27 = vld [vmem:[%s18566_s4 + $0x710] sm:$0xff]  ;;  %v8025_v31 = vpack.c.bf16 %v2228_v44, %v2220_v30  ;;  %v8027_v33 = vpack.c.bf16 %v2227_v14, %v2219_v25 }
 0x2a8   :  { %8010 = vmatprep.subr.bf16.mxu0 %v8009_v7  ;;  %v8087_v29 = vpack.c.bf16 %v2213_v28, %v2205_v27  ;;  %v2230_v7 = vld [vmem:[%s18566_s4 + $0x7d8] sm:$0xff] }
 0x2a9   :  { %v8089_v19 = vpack.c.bf16 %v2230_v7, %v2222_v51 }
 0x2aa   :  { %8076 = vmatpush1.bf16.msra.mxu1 %v8075_v40  ;;  %v1984_v40 = vld [vmem:[%s18566_s4 + $0x28] sm:$0xff] }
 0x2ab   :  { %8012 = vmatpush1.bf16.msra.mxu0 %v8011_v34  ;;  %8078 = vmatprep.subr.bf16.mxu1 %v8077_v60  ;;  %v2221_v34 = vld [vmem:[%s18566_s4 + $0x790] sm:$0xff]  ;;  %v8093_v53 = vpack.c.bf16 %v1992_v41, %v1984_v40 }
 0x2ac   :  { %8014 = vmatprep.subr.bf16.mxu0 %v8013_v56  ;;  %v8091_v39 = vpack.c.bf16 %v2229_v36, %v2221_v34  ;;  %v1994_v56 = vld [vmem:[%s18566_s4 + $0x78] sm:$0xff] }
 0x2ad   :  { %v8157_v58 = vpack.c.bf16 %v1994_v56, %v1986_v45 }
 0x2ae   :  { %8080 = vmatpush1.bf16.msra.mxu1 %v8079_v1 }
 0x2af   :  { %8016 = vmatpush1.bf16.msra.mxu0 %v8015_v61  ;;  %8082 = vmatprep.subr.bf16.mxu1 %v8081_v12 }
 0x2b0   :  { %8018 = vmatprep.subr.bf16.mxu0 %v8017_v38 }
 0x2b2   :  { %8084 = vmatpush1.bf16.msra.mxu1 %v8083_v17 }
 0x2b3   :  { %8020 = vmatpush1.bf16.msra.mxu0 %v8019_v57  ;;  %8086 = vmatprep.subr.bf16.mxu1 %v8085_v47 }
 0x2b4   :  { %8022 = vmatprep.subr.bf16.mxu0 %v8021_v52 }
 0x2b6   :  { %8088 = vmatpush1.bf16.msra.mxu1 %v8087_v29 }
 0x2b7   :  { %8024 = vmatpush1.bf16.msra.mxu0 %v8023_v26  ;;  %8090 = vmatprep.subr.bf16.mxu1 %v8089_v19 }
 0x2b8   :  { %8026 = vmatprep.subr.bf16.mxu0 %v8025_v31 }
 0x2ba   :  { %8092 = vmatpush1.bf16.msra.mxu1 %v8091_v39 }
 0x2bb   :  { %8028 = vmatpush1.bf16.msra.mxu0 %v8027_v33  ;;  %8158 = vmatprep.subr.bf16.mxu1 %v8157_v58 }
 0x2bc   :  { %8094 = vmatprep.subr.bf16.mxu0 %v8093_v53 }
 0x30b   :  { %v1641_v32 = vpop.f32.mrb[8].mxu0  ;;  %v1718_v59 = vpop.f32.mrb[8].mxu1 }
 0x30c   :  { %v9889_v60 = vadd.f32 %v1641_v32, %v11107_v48  ;;  %v1643_v61 = vpop.f32.mrb[9].mxu0  ;;  %v1720_v62 = vpop.f32.mrb[9].mxu1  ;;  %v9925_v63 = vadd.f32 %v1718_v59, %v11113_v50 }
 0x30d   :  { %v9890_v1 = vadd.f32 %v1643_v61, %v11110_v49  ;;  %v9926_v58 = vadd.f32 %v1720_v62, %v11124_v0 }
 0x30e   :  { %10097 = vtanh.f32 %v9889_v60 }
 0x30f   :  { %v1647_v2 = vpop.f32.mrb[10].mxu0  ;;  %v1724_v4 = vpop.f32.mrb[10].mxu1  ;;  %10099 = vtanh.f32 %v9890_v1 }
 0x310   :  { %v9891_v5 = vadd.f32 %v1647_v2, %v11107_v48  ;;  %v1649_v38 = vpop.f32.mrb[11].mxu0  ;;  %v1726_v10 = vpop.f32.mrb[11].mxu1  ;;  %10101 = vtanh.f32 %v9925_v63  ;;  %v9927_v11 = vadd.f32 %v1724_v4, %v11113_v50 }
 0x311   :  { %v9892_v55 = vadd.f32 %v1649_v38, %v11110_v49  ;;  %v9928_v4 = vadd.f32 %v1726_v10, %v11124_v0 }
 0x312   :  { %10103 = vtanh.f32 %v9891_v5 }
 0x313   :  { %10105 = vtanh.f32 %v9892_v55 }
 0x314   :  { %10107 = vtanh.f32 %v9927_v11 }
 0x318   :  { %v10098_v12 = vpop.eup %10097 }
 0x319   :  { %v1908_v57 = vmul.f32 0.5, %v10098_v12  ;;  %v10100_v35 = vpop.eup %10099 }
 0x31a   :  { %v10102_v54 = vpop.eup %10101  ;;  %v1912_v16 = vmul.f32 0.5, %v10100_v35 }
 0x31b   :  { %v1910_v17 = vadd.f32 0.5, %v1908_v57 }
 0x31c   :  { %v10104_v18 = vpop.eup %10103  ;;  %v1914_v22 = vadd.f32 0.5, %v1912_v16 }
 0x31d   :  { %v1922_v52 = vmul.f32 %v10102_v54, %v1910_v17  ;;  %v1909_v3 = vmul.f32 0.5, %v10104_v18  ;;  %v10106_v9 = vpop.eup %10105 }
 0x31e   :  { %v1920_v6 = vmul.f32 %v1914_v22, %v11969_v15  ;;  %v1913_v26 = vmul.f32 0.5, %v10106_v9  ;;  %v10108_v27 = vpop.eup %10107 }
 0x31f   :  { %v1911_v47 = vadd.f32 0.5, %v1909_v3 }
 0x320   :  { %v12822_v28 = vadd.f32 %v1922_v52, %v1920_v6  ;;  %v1915_v29 = vadd.f32 0.5, %v1913_v26  ;;  %v1985_v26 = vld [vmem:[%s18566_s4 + $0x30] sm:$0xff] }
 0x321   :  { %v1923_v30 = vmul.f32 %v10108_v27, %v1911_v47  ;;  %v1983_v47 = vld [vmem:[%s18566_s4 + $0x20] sm:$0xff]  ;;  %v1993_v27 = vld [vmem:[%s18566_s4 + $0x70] sm:$0xff] }
 0x322   :  { %v1921_v44 = vmul.f32 %v1915_v29, %v11972_v20  ;;  %v2000_v29 = vld [vmem:[%s18566_s4 + $0xa8] sm:$0xff] }
 0x324   :  { %v12825_v51 = vadd.f32 %v1923_v30, %v1921_v44 }
 0x34b   :  { %v1795_v31 = vpop.f32.mrb[44].mxu0  ;;  %v1872_v7 = vpop.f32.mrb[44].mxu1 }
 0x34c   :  { %v1930_v25 = vadd.f32 %v1795_v31, %v11978_v23  ;;  %v1797_v14 = vpop.f32.mrb[45].mxu0  ;;  %v1874_v19 = vpop.f32.mrb[45].mxu1  ;;  %v1932_v33 = vadd.f32 %v1872_v7, %v11981_v21  ;;  %v2008_v7 = vld [vmem:[%s18566_s4 + $0xe8] sm:$0xff] }
 0x34d   :  { %v1931_v15 = vadd.f32 %v1797_v14, %v11984_v24  ;;  %v1933_v53 = vadd.f32 %v1874_v19, %v11993_v37  ;;  %v2010_v14 = vld [vmem:[%s18566_s4 + $0xf8] sm:$0xff] }
 0x34e   :  { %10109 = vtanh.f32 %v1930_v25  ;;  %v2002_v25 = vld [vmem:[%s18566_s4 + $0xb8] sm:$0xff] }
 0x34f   :  { %v1801_v34 = vpop.f32.mrb[46].mxu0  ;;  %v1878_v36 = vpop.f32.mrb[46].mxu1  ;;  %10111 = vtanh.f32 %v1931_v15 }
 0x350   :  { %v1934_v39 = vadd.f32 %v1801_v34, %v11978_v23  ;;  %v1803_v40 = vpop.f32.mrb[47].mxu0  ;;  %v1880_v20 = vpop.f32.mrb[47].mxu1  ;;  %10113 = vtanh.f32 %v1932_v33  ;;  %v1936_v45 = vadd.f32 %v1878_v36, %v11981_v21 }
 0x351   :  { %v1935_v41 = vadd.f32 %v1803_v40, %v11984_v24  ;;  %v1937_v1 = vadd.f32 %v1880_v20, %v11993_v37  ;;  %v1999_v40 = vld [vmem:[%s18566_s4 + $0xa0] sm:$0xff] }
 0x352   :  { %10115 = vtanh.f32 %v1934_v39  ;;  %v8159_v39 = vpack.c.bf16 %v1993_v27, %v1985_v26  ;;  %v2033_v27 = vld [vmem:[%s18566_s4 + $0x1b0] sm:$0xff] }
 0x353   :  { %10117 = vtanh.f32 %v1935_v41  ;;  %v8097_v41 = vpack.c.bf16 %v2008_v7, %v2000_v29  ;;  %v2041_v29 = vld [vmem:[%s18566_s4 + $0x1f0] sm:$0xff]  ;;  %v2058_v7 = vld [vmem:[%s18566_s4 + $0x278] sm:$0xff] }
 0x354   :  { %10119 = vtanh.f32 %v1936_v45  ;;  %v8161_v45 = vpack.c.bf16 %v2010_v14, %v2002_v25 }
 0x355   :  { %10121 = vtanh.f32 %v1933_v53  ;;  %v2007_v53 = vld [vmem:[%s18566_s4 + $0xe0] sm:$0xff] }
 0x356   :  { %10123 = vtanh.f32 %v9926_v58  ;;  %v2009_v58 = vld [vmem:[%s18566_s4 + $0xf0] sm:$0xff] }
 0x357   :  { %10125 = vtanh.f32 %v1937_v1  ;;  %v2024_v1 = vld [vmem:[%s18566_s4 + $0x168] sm:$0xff] }
 0x358   :  { %v10110_v56 = vpop.eup %10109  ;;  %10127 = vtanh.f32 %v9928_v4  ;;  %v2026_v4 = vld [vmem:[%s18566_s4 + $0x178] sm:$0xff] }
 0x359   :  { %v1946_v32 = vmul.f32 0.5, %v10110_v56  ;;  %v10112_v59 = vpop.eup %10111  ;;  %10129 = vtanh.f32 %v12822_v28  ;;  %v2001_v56 = vld [vmem:[%s18566_s4 + $0xb0] sm:$0xff] }
 0x35a   :  { %v10114_v60 = vpop.eup %10113  ;;  %v1950_v63 = vmul.f32 0.5, %v10112_v59 }
 0x35b   :  { %v1948_v61 = vadd.f32 0.5, %v1946_v32 }
 0x35c   :  { %v10116_v2 = vpop.eup %10115  ;;  %v1952_v5 = vadd.f32 0.5, %v1950_v63 }
 0x35d   :  { %v1960_v38 = vmul.f32 %v10114_v60, %v1948_v61  ;;  %v1947_v55 = vmul.f32 0.5, %v10116_v2  ;;  %v10118_v11 = vpop.eup %10117  ;;  %v2016_v60 = vld [vmem:[%s18566_s4 + $0x128] sm:$0xff]  ;;  %v2018_v2 = vld [vmem:[%s18566_s4 + $0x138] sm:$0xff] }
 0x35e   :  { %v1958_v12 = vmul.f32 %v1952_v5, %v12001_v8  ;;  %v1951_v62 = vmul.f32 0.5, %v10118_v11  ;;  %v10120_v35 = vpop.eup %10119  ;;  %v2015_v11 = vld [vmem:[%s18566_s4 + $0x120] sm:$0xff] }
 0x35f   :  { %v1949_v57 = vadd.f32 0.5, %v1947_v55  ;;  %v10122_v18 = vpop.eup %10121  ;;  %v8163_v55 = vpack.c.bf16 %v2009_v58, %v2001_v56  ;;  %v2072_v56 = vld [vmem:[%s18566_s4 + $0x2e8] sm:$0xff]  ;;  %v2066_v58 = vld [vmem:[%s18566_s4 + $0x2b8] sm:$0xff] }
 0x360   :  { %v12838_v54 = vadd.f32 %v1960_v38, %v1958_v12  ;;  %v1953_v17 = vadd.f32 0.5, %v1951_v62  ;;  %v10124_v52 = vpop.eup %10123  ;;  %v1954_v8 = vmul.f32 0.5, %v10122_v18  ;;  %v8099_v38 = vpack.c.bf16 %v2007_v53, %v1999_v40  ;;  %v2023_v12 = vld [vmem:[%s18566_s4 + $0x160] sm:$0xff]  ;;  %v2017_v62 = vld [vmem:[%s18566_s4 + $0x130] sm:$0xff]  ;;  %v2040_v18 = vld [vmem:[%s18566_s4 + $0x1e8] sm:$0xff] }
 0x361   :  { %v1961_v16 = vmul.f32 %v10120_v35, %v1949_v57  ;;  %v10126_v3 = vpop.eup %10125  ;;  %v1916_v9 = vmul.f32 0.5, %v10124_v52  ;;  %v2025_v35 = vld [vmem:[%s18566_s4 + $0x170] sm:$0xff]  ;;  %v2034_v52 = vld [vmem:[%s18566_s4 + $0x1b8] sm:$0xff]  ;;  %v2064_v53 = vld [vmem:[%s18566_s4 + $0x2a8] sm:$0xff] }
 0x362   :  { %10131 = vtanh.f32 %v12838_v54  ;;  %v1959_v10 = vmul.f32 %v1953_v17, %v12005_v13  ;;  %v10128_v6 = vpop.eup %10127  ;;  %v1991_v13 = vld [vmem:[%s18566_s4 + $0x60] sm:$0xff]  ;;  %v1956_v44 = vadd.f32 0.5, %v1954_v8  ;;  %v1955_v31 = vmul.f32 0.5, %v10126_v3  ;;  %v2032_v17 = vld [vmem:[%s18566_s4 + $0x1a8] sm:$0xff]  ;;  %v2042_v8 = vld [vmem:[%s18566_s4 + $0x1f8] sm:$0xff] }
 0x363   :  { %10133 = vtanh.f32 %v12825_v51  ;;  %v10130_v30 = vpop.eup %10129  ;;  %v1918_v33 = vadd.f32 0.5, %v1916_v9  ;;  %v1917_v15 = vmul.f32 0.5, %v10128_v6  ;;  %v8095_v36 = vpack.c.bf16 %v1991_v13, %v1983_v47  ;;  %v2031_v6 = vld [vmem:[%s18566_s4 + $0x1a0] sm:$0xff] }
 0x364   :  { %v12843_v22 = vadd.f32 %v1961_v16, %v1959_v10  ;;  %v1957_v59 = vadd.f32 0.5, %v1955_v31  ;;  %v8101_v16 = vpack.c.bf16 %v2024_v1, %v2016_v60  ;;  %v8165_v10 = vpack.c.bf16 %v2026_v4, %v2018_v2  ;;  %v2039_v47 = vld [vmem:[%s18566_s4 + $0x1e0] sm:$0xff]  ;;  %v2050_v31 = vld [vmem:[%s18566_s4 + $0x238] sm:$0xff] }
 0x365   :  { %v12874_v20 = vmul.f32 %v10130_v30, %v1918_v33  ;;  %v1919_v63 = vadd.f32 0.5, %v1917_v15  ;;  %v8103_v3 = vpack.c.bf16 %v2023_v12, %v2015_v11  ;;  %v8167_v9 = vpack.c.bf16 %v2025_v35, %v2017_v62  ;;  %v2048_v30 = vld [vmem:[%s18566_s4 + $0x228] sm:$0xff]  ;;  %v2047_v33 = vld [vmem:[%s18566_s4 + $0x220] sm:$0xff]  ;;  %v2073_v11 = vld [vmem:[%s18566_s4 + $0x2f0] sm:$0xff] }
 0x366   :  { %10135 = vtanh.f32 %v12843_v22  ;;  %v8105_v13 = vpack.c.bf16 %v2040_v18, %v2032_v17  ;;  %v8169_v26 = vpack.c.bf16 %v2042_v8, %v2034_v52  ;;  %v8107_v14 = vpack.c.bf16 %v2039_v47, %v2031_v6  ;;  %v2055_v15 = vld [vmem:[%s18566_s4 + $0x260] sm:$0xff]  ;;  %v2080_v12 = vld [vmem:[%s18566_s4 + $0x328] sm:$0xff]  ;;  %v2082_v35 = vld [vmem:[%s18566_s4 + $0x338] sm:$0xff] }
 0x367   :  { %v8173_v40 = vpack.c.bf16 %v2058_v7, %v2050_v31  ;;  %v8111_v60 = vpack.c.bf16 %v2055_v15, %v2047_v33  ;;  %v2071_v1 = vld [vmem:[%s18566_s4 + $0x2e0] sm:$0xff]  ;;  %v8113_v4 = vpack.c.bf16 %v2072_v56, %v2064_v53  ;;  %v2088_v62 = vld [vmem:[%s18566_s4 + $0x368] sm:$0xff]  ;;  %v2090_v17 = vld [vmem:[%s18566_s4 + $0x378] sm:$0xff] }
 0x368   :  { %v2079_v18 = vld [vmem:[%s18566_s4 + $0x320] sm:$0xff]  ;;  %v8117_v8 = vpack.c.bf16 %v2088_v62, %v2080_v12  ;;  %v2089_v6 = vld [vmem:[%s18566_s4 + $0x370] sm:$0xff]  ;;  %v2096_v47 = vld [vmem:[%s18566_s4 + $0x3a8] sm:$0xff] }
 0x369   :  { %v2087_v52 = vld [vmem:[%s18566_s4 + $0x360] sm:$0xff]  ;;  %v2112_v33 = vld [vmem:[%s18566_s4 + $0x428] sm:$0xff]  ;;  %v2129_v12 = vld [vmem:[%s18566_s4 + $0x4b0] sm:$0xff] }
 0x36a   :  { %v2103_v31 = vld [vmem:[%s18566_s4 + $0x3e0] sm:$0xff]  ;;  %v2120_v15 = vld [vmem:[%s18566_s4 + $0x468] sm:$0xff]  ;;  %v2137_v62 = vld [vmem:[%s18566_s4 + $0x4f0] sm:$0xff] }
 0x36b   :  { %v8125_v53 = vpack.c.bf16 %v2120_v15, %v2112_v33  ;;  %v2161_v33 = vld [vmem:[%s18566_s4 + $0x5b0] sm:$0xff] }
 0x36c   :  { %v10132_v19 = vpop.eup %10131  ;;  %v2169_v15 = vld [vmem:[%s18566_s4 + $0x5f0] sm:$0xff] }
 0x36d   :  { %v1966_v34 = vmul.f32 %v10132_v19, %v1956_v44  ;;  %v10134_v32 = vpop.eup %10133  ;;  %v2056_v44 = vld [vmem:[%s18566_s4 + $0x268] sm:$0xff]  ;;  %v8171_v19 = vpack.c.bf16 %v2041_v29, %v2033_v27  ;;  %v2106_v27 = vld [vmem:[%s18566_s4 + $0x3f8] sm:$0xff]  ;;  %v8119_v29 = vpack.c.bf16 %v2087_v52, %v2079_v18  ;;  %v8195_v52 = vpack.c.bf16 %v2137_v62, %v2129_v12 }
 0x36e   :  { %v12907_v57 = vmul.f32 %v10134_v32, %v1919_v63  ;;  %v2074_v32 = vld [vmem:[%s18566_s4 + $0x2f8] sm:$0xff]  ;;  %v2063_v63 = vld [vmem:[%s18566_s4 + $0x2a0] sm:$0xff] }
 0x36f   :  { %2299 = vmatprep.mubr.f32.mxu0 %v1966_v34  ;;  %2376 = vmatprep.mubr.f32.mxu1 %v1966_v34  ;;  %10137 = vtanh.f32 %v1966_v34 }
 0x370   :  { %v10136_v61 = vpop.eup %10135  ;;  %2300 = vmatmul.mubr.f32.vlgmr.msra.gmra.mrb[12].mxu0 %v12874_v20  ;;  %2377 = vmatmul.mubr.f32.vlgmr.msra.gmra.mrb[12].mxu1 %v12874_v20 }
 0x371   :  { %v12899_v5 = vmul.f32 %v10136_v61, %v1957_v59  ;;  %8096 = vmatpush1.bf16.msra.mxu0 %v8095_v36  ;;  %8160 = vmatpush1.bf16.msra.mxu1 %v8159_v39  ;;  %v8109_v39 = vpack.c.bf16 %v2056_v44, %v2048_v30  ;;  %v2095_v44 = vld [vmem:[%s18566_s4 + $0x3a0] sm:$0xff] }
 0x372   :  { %8098 = vmatprep.subr.bf16.mxu0 %v8097_v41  ;;  %8162 = vmatprep.subr.bf16.mxu1 %v8161_v45  ;;  %v2049_v41 = vld [vmem:[%s18566_s4 + $0x230] sm:$0xff] }
 0x373   :  { %2305 = vmatprep.mubr.f32.mxu0 %v12899_v5  ;;  %2382 = vmatprep.mubr.f32.mxu1 %v12899_v5  ;;  %10139 = vtanh.f32 %v12899_v5  ;;  %v2057_v45 = vld [vmem:[%s18566_s4 + $0x270] sm:$0xff] }
 0x374   :  { %2306 = vmatmul.mubr.f32.gmra.mrb[14].mxu0 %v12907_v57  ;;  %2383 = vmatmul.mubr.f32.gmra.mrb[14].mxu1 %v12907_v57  ;;  %v8175_v61 = vpack.c.bf16 %v2057_v45, %v2049_v41  ;;  %v2111_v41 = vld [vmem:[%s18566_s4 + $0x420] sm:$0xff] }
 0x375   :  { %8100 = vmatpush1.bf16.msra.mxu0 %v8099_v38  ;;  %8164 = vmatpush1.bf16.msra.mxu1 %v8163_v55  ;;  %v8177_v38 = vpack.c.bf16 %v2074_v32, %v2066_v58  ;;  %v2065_v55 = vld [vmem:[%s18566_s4 + $0x2b0] sm:$0xff]  ;;  %v2119_v45 = vld [vmem:[%s18566_s4 + $0x460] sm:$0xff] }
 0x376   :  { %2453 = vmatprep.mubr.f32.mxu0 %v1966_v34  ;;  %2530 = vmatprep.mubr.f32.mxu1 %v1966_v34  ;;  %v10474_v34 = vld [vmem:[%s18571_s6] ss:$0 sm:$0xff]  ;;  %v2113_v58 = vld [vmem:[%s18566_s4 + $0x430] sm:$0xff] }
 0x377   :  { %8102 = vmatprep.subr.bf16.mxu0 %v8101_v16  ;;  %8166 = vmatprep.subr.bf16.mxu1 %v8165_v10  ;;  %v8115_v16 = vpack.c.bf16 %v2071_v1, %v2063_v63  ;;  %v8179_v10 = vpack.c.bf16 %v2073_v11, %v2065_v55  ;;  %v2121_v32 = vld [vmem:[%s18566_s4 + $0x470] sm:$0xff]  ;;  %v2138_v63 = vld [vmem:[%s18566_s4 + $0x4f8] sm:$0xff]  ;;  %v8127_v1 = vpack.c.bf16 %v2119_v45, %v2111_v41 }
 0x378   :  { %v8203_v45 = vpack.c.bf16 %v2169_v15, %v2161_v33  ;;  %v2231_v15 = vld [vmem:[%s18566_s4 + $0x7e0] sm:$0xff] }
 0x379   :  { %v10138_v25 = vpop.eup %10137  ;;  %8104 = vmatpush1.bf16.msra.mxu0 %v8103_v3  ;;  %8168 = vmatpush1.bf16.msra.mxu1 %v8167_v9  ;;  %v8181_v3 = vpack.c.bf16 %v2090_v17, %v2082_v35  ;;  %v2081_v9 = vld [vmem:[%s18566_s4 + $0x330] sm:$0xff]  ;;  %v2144_v35 = vld [vmem:[%s18566_s4 + $0x528] sm:$0xff] }
 0x37a   :  { %8106 = vmatprep.subr.bf16.mxu0 %v8105_v13  ;;  %8170 = vmatprep.subr.bf16.mxu1 %v8169_v26  ;;  %v6963_v36 = vmul.f32 %v10474_v34, %v10138_v25  ;;  %v2104_v13 = vld [vmem:[%s18566_s4 + $0x3e8] sm:$0xff]  ;;  %v2098_v26 = vld [vmem:[%s18566_s4 + $0x3b8] sm:$0xff]  ;;  %v8183_v30 = vpack.c.bf16 %v2089_v6, %v2081_v9 }
 0x37b   :  { %v8121_v7 = vpack.c.bf16 %v2104_v13, %v2096_v47  ;;  %v8185_v25 = vpack.c.bf16 %v2106_v27, %v2098_v26  ;;  %v2152_v17 = vld [vmem:[%s18566_s4 + $0x568] sm:$0xff]  ;;  %v2145_v47 = vld [vmem:[%s18566_s4 + $0x530] sm:$0xff] }
 0x37c   :  { %6985 = vadd.xlane.f32.xlu1 %v6963_v36  ;;  %v2122_v36 = vld [vmem:[%s18566_s4 + $0x478] sm:$0xff]  ;;  %v8133_v9 = vpack.c.bf16 %v2152_v17, %v2144_v35  ;;  %v2153_v13 = vld [vmem:[%s18566_s4 + $0x570] sm:$0xff]  ;;  %v2160_v26 = vld [vmem:[%s18566_s4 + $0x5a8] sm:$0xff] }
 0x37d   :  { %v10140_v59 = vpop.eup %10139  ;;  %8108 = vmatpush1.bf16.msra.mxu0 %v8107_v14  ;;  %8172 = vmatpush1.bf16.msra.mxu1 %v8171_v19  ;;  %v2097_v14 = vld [vmem:[%s18566_s4 + $0x3b0] sm:$0xff]  ;;  %v2168_v27 = vld [vmem:[%s18566_s4 + $0x5e8] sm:$0xff] }
 0x37e   :  { %8110 = vmatprep.subr.bf16.mxu0 %v8109_v39  ;;  %8174 = vmatprep.subr.bf16.mxu1 %v8173_v40  ;;  %v6964_v2 = vmul.f32 %v10474_v34, %v10140_v59  ;;  %v2105_v19 = vld [vmem:[%s18566_s4 + $0x3f0] sm:$0xff]  ;;  %v2114_v34 = vld [vmem:[%s18566_s4 + $0x438] sm:$0xff]  ;;  %v8123_v39 = vpack.c.bf16 %v2103_v31, %v2095_v44  ;;  %v2128_v59 = vld [vmem:[%s18566_s4 + $0x4a8] sm:$0xff]  ;;  %v8199_v31 = vpack.c.bf16 %v2153_v13, %v2145_v47 }
 0x37f   :  { %v8187_v40 = vpack.c.bf16 %v2105_v19, %v2097_v14  ;;  %v8189_v56 = vpack.c.bf16 %v2122_v36, %v2114_v34  ;;  %v8137_v14 = vpack.c.bf16 %v2168_v27, %v2160_v26  ;;  %v2176_v34 = vld [vmem:[%s18566_s4 + $0x628] sm:$0xff]  ;;  %v2193_v35 = vld [vmem:[%s18566_s4 + $0x6b0] sm:$0xff] }
 0x380   :  { %6987 = vadd.xlane.f32.xlu1 %v6964_v2  ;;  %v8191_v2 = vpack.c.bf16 %v2121_v32, %v2113_v58  ;;  %v2184_v36 = vld [vmem:[%s18566_s4 + $0x668] sm:$0xff]  ;;  %v2201_v17 = vld [vmem:[%s18566_s4 + $0x6f0] sm:$0xff] }
 0x381   :  { %8112 = vmatpush1.bf16.msra.mxu0 %v8111_v60  ;;  %8176 = vmatpush1.bf16.msra.mxu1 %v8175_v61  ;;  %v2136_v60 = vld [vmem:[%s18566_s4 + $0x4e8] sm:$0xff]  ;;  %v2130_v61 = vld [vmem:[%s18566_s4 + $0x4b8] sm:$0xff]  ;;  %v8141_v58 = vpack.c.bf16 %v2184_v36, %v2176_v34  ;;  %v2209_v26 = vld [vmem:[%s18566_s4 + $0x730] sm:$0xff] }
 0x382   :  { %8114 = vmatprep.subr.bf16.mxu0 %v8113_v4  ;;  %8178 = vmatprep.subr.bf16.mxu1 %v8177_v38  ;;  %v2127_v4 = vld [vmem:[%s18566_s4 + $0x4a0] sm:$0xff]  ;;  %v8129_v55 = vpack.c.bf16 %v2136_v60, %v2128_v59  ;;  %v8193_v11 = vpack.c.bf16 %v2138_v63, %v2130_v61  ;;  %v2177_v59 = vld [vmem:[%s18566_s4 + $0x630] sm:$0xff]  ;;  %v2192_v61 = vld [vmem:[%s18566_s4 + $0x6a8] sm:$0xff] }
 0x383   :  { %v2135_v38 = vld [vmem:[%s18566_s4 + $0x4e0] sm:$0xff]  ;;  %v2185_v60 = vld [vmem:[%s18566_s4 + $0x670] sm:$0xff]  ;;  %v2200_v63 = vld [vmem:[%s18566_s4 + $0x6e8] sm:$0xff] }
 0x384   :  { %v8131_v18 = vpack.c.bf16 %v2135_v38, %v2127_v4  ;;  %v8207_v38 = vpack.c.bf16 %v2185_v60, %v2177_v59  ;;  %v8145_v12 = vpack.c.bf16 %v2200_v63, %v2192_v61  ;;  %v2217_v27 = vld [vmem:[%s18566_s4 + $0x770] sm:$0xff]  ;;  %v2656_v63 = vld [vmem:[%s18566_s4 + $0x88] sm:$0xff] }
 0x385   :  { %8116 = vmatpush1.bf16.msra.mxu0 %v8115_v16  ;;  %8180 = vmatpush1.bf16.msra.mxu1 %v8179_v10  ;;  %v2146_v16 = vld [vmem:[%s18566_s4 + $0x538] sm:$0xff]  ;;  %v2225_v34 = vld [vmem:[%s18566_s4 + $0x7b0] sm:$0xff] }
 0x386   :  { %8118 = vmatprep.subr.bf16.mxu0 %v8117_v8  ;;  %8182 = vmatprep.subr.bf16.mxu1 %v8181_v3  ;;  %v2154_v10 = vld [vmem:[%s18566_s4 + $0x578] sm:$0xff]  ;;  %v2143_v8 = vld [vmem:[%s18566_s4 + $0x520] sm:$0xff]  ;;  %v2233_v36 = vld [vmem:[%s18566_s4 + $0x7f0] sm:$0xff] }
 0x387   :  { %v2151_v3 = vld [vmem:[%s18566_s4 + $0x560] sm:$0xff]  ;;  %v8197_v6 = vpack.c.bf16 %v2154_v10, %v2146_v16  ;;  %v2208_v16 = vld [vmem:[%s18566_s4 + $0x728] sm:$0xff]  ;;  %v2641_v59 = vld [vmem:[%s18566_s4 + $0x10] sm:$0xff] }
 0x388   :  { %v8135_v44 = vpack.c.bf16 %v2151_v3, %v2143_v8  ;;  %v2216_v10 = vld [vmem:[%s18566_s4 + $0x768] sm:$0xff]  ;;  %v8211_v3 = vpack.c.bf16 %v2201_v17, %v2193_v35  ;;  %v2649_v60 = vld [vmem:[%s18566_s4 + $0x50] sm:$0xff] }
 0x389   :  { %8120 = vmatpush1.bf16.msra.mxu0 %v8119_v29  ;;  %8184 = vmatpush1.bf16.msra.mxu1 %v8183_v30  ;;  %v2162_v29 = vld [vmem:[%s18566_s4 + $0x5b8] sm:$0xff]  ;;  %v8149_v47 = vpack.c.bf16 %v2216_v10, %v2208_v16  ;;  %v8287_v61 = vpack.c.bf16 %v2649_v60, %v2641_v59  ;;  %v2657_v35 = vld [vmem:[%s18566_s4 + $0x90] sm:$0xff]  ;;  %v2672_v16 = vld [vmem:[%s18566_s4 + $0x108] sm:$0xff] }
 0x38a   :  { %8122 = vmatprep.subr.bf16.mxu0 %v8121_v7  ;;  %8186 = vmatprep.subr.bf16.mxu1 %v8185_v25  ;;  %v2170_v30 = vld [vmem:[%s18566_s4 + $0x5f8] sm:$0xff]  ;;  %v2159_v7 = vld [vmem:[%s18566_s4 + $0x5a0] sm:$0xff]  ;;  %v2665_v17 = vld [vmem:[%s18566_s4 + $0xd0] sm:$0xff] }
 0x38b   :  { %v2167_v25 = vld [vmem:[%s18566_s4 + $0x5e0] sm:$0xff]  ;;  %v8201_v19 = vpack.c.bf16 %v2170_v30, %v2162_v29  ;;  %v2224_v29 = vld [vmem:[%s18566_s4 + $0x7a8] sm:$0xff]  ;;  %v8291_v10 = vpack.c.bf16 %v2665_v17, %v2657_v35 }
 0x38c   :  { %v8139_v41 = vpack.c.bf16 %v2167_v25, %v2159_v7  ;;  %v2232_v30 = vld [vmem:[%s18566_s4 + $0x7e8] sm:$0xff]  ;;  %v8215_v25 = vpack.c.bf16 %v2217_v27, %v2209_v26  ;;  %v2681_v27 = vld [vmem:[%s18566_s4 + $0x150] sm:$0xff] }
 0x38d   :  { %8124 = vmatpush1.bf16.msra.mxu0 %v8123_v39  ;;  %8188 = vmatpush1.bf16.msra.mxu1 %v8187_v40  ;;  %v2178_v39 = vld [vmem:[%s18566_s4 + $0x638] sm:$0xff]  ;;  %v2720_v59 = vld [vmem:[%s18566_s4 + $0x288] sm:$0xff] }
 0x38e   :  { %8126 = vmatprep.subr.bf16.mxu0 %v8125_v53  ;;  %8190 = vmatprep.subr.bf16.mxu1 %v8189_v56  ;;  %v2186_v40 = vld [vmem:[%s18566_s4 + $0x678] sm:$0xff]  ;;  %v2175_v53 = vld [vmem:[%s18566_s4 + $0x620] sm:$0xff]  ;;  %v2728_v60 = vld [vmem:[%s18566_s4 + $0x2c8] sm:$0xff] }
 0x38f   :  { %v2183_v56 = vld [vmem:[%s18566_s4 + $0x660] sm:$0xff]  ;;  %v8205_v32 = vpack.c.bf16 %v2186_v40, %v2178_v39  ;;  %v8219_v40 = vpack.c.bf16 %v2233_v36, %v2225_v34  ;;  %v2697_v34 = vld [vmem:[%s18566_s4 + $0x1d0] sm:$0xff]  ;;  %v2736_v35 = vld [vmem:[%s18566_s4 + $0x308] sm:$0xff] }
 0x390   :  { %v8143_v4 = vpack.c.bf16 %v2183_v56, %v2175_v53  ;;  %v2647_v56 = vld [vmem:[%s18566_s4 + $0x40] sm:$0xff]  ;;  %v2744_v17 = vld [vmem:[%s18566_s4 + $0x348] sm:$0xff] }
 0x391   :  { %8128 = vmatpush1.bf16.msra.mxu0 %v8127_v1  ;;  %8192 = vmatpush1.bf16.msra.mxu1 %v8191_v2  ;;  %v2194_v1 = vld [vmem:[%s18566_s4 + $0x6b8] sm:$0xff] }
 0x392   :  { %8130 = vmatprep.subr.bf16.mxu0 %v8129_v55  ;;  %8194 = vmatprep.subr.bf16.mxu1 %v8193_v11  ;;  %v2202_v2 = vld [vmem:[%s18566_s4 + $0x6f8] sm:$0xff]  ;;  %v2191_v55 = vld [vmem:[%s18566_s4 + $0x6a0] sm:$0xff] }
 0x393   :  { %v2199_v11 = vld [vmem:[%s18566_s4 + $0x6e0] sm:$0xff]  ;;  %v8209_v62 = vpack.c.bf16 %v2202_v2, %v2194_v1  ;;  %v2664_v1 = vld [vmem:[%s18566_s4 + $0xc8] sm:$0xff]  ;;  %v2658_v2 = vld [vmem:[%s18566_s4 + $0x98] sm:$0xff] }
 0x394   :  { %v8147_v8 = vpack.c.bf16 %v2199_v11, %v2191_v55  ;;  %v2655_v55 = vld [vmem:[%s18566_s4 + $0x80] sm:$0xff] }
 0x395   :  { %8132 = vmatpush1.bf16.msra.mxu0 %v8131_v18  ;;  %8196 = vmatpush1.bf16.msra.mxu1 %v8195_v52  ;;  %v2210_v18 = vld [vmem:[%s18566_s4 + $0x738] sm:$0xff]  ;;  %v2663_v11 = vld [vmem:[%s18566_s4 + $0xc0] sm:$0xff] }
 0x396   :  { %8134 = vmatprep.subr.bf16.mxu0 %v8133_v9  ;;  %8198 = vmatprep.subr.bf16.mxu1 %v8197_v6  ;;  %v2218_v52 = vld [vmem:[%s18566_s4 + $0x778] sm:$0xff]  ;;  %v2207_v9 = vld [vmem:[%s18566_s4 + $0x720] sm:$0xff] }
 0x397   :  { %v2215_v6 = vld [vmem:[%s18566_s4 + $0x760] sm:$0xff]  ;;  %v8213_v13 = vpack.c.bf16 %v2218_v52, %v2210_v18  ;;  %v2680_v18 = vld [vmem:[%s18566_s4 + $0x148] sm:$0xff]  ;;  %v2674_v52 = vld [vmem:[%s18566_s4 + $0x118] sm:$0xff] }
 0x398   :  { %v8151_v7 = vpack.c.bf16 %v2215_v6, %v2207_v9  ;;  %v2671_v6 = vld [vmem:[%s18566_s4 + $0x100] sm:$0xff] }
 0x399   :  { %8136 = vmatpush1.bf16.msra.mxu0 %v8135_v44  ;;  %8200 = vmatpush1.bf16.msra.mxu1 %v8199_v31  ;;  %v2226_v44 = vld [vmem:[%s18566_s4 + $0x7b8] sm:$0xff] }
 0x39a   :  { %8138 = vmatprep.subr.bf16.mxu0 %v8137_v14  ;;  %8202 = vmatprep.subr.bf16.mxu1 %v8201_v19  ;;  %v2234_v31 = vld [vmem:[%s18566_s4 + $0x7f8] sm:$0xff]  ;;  %v2223_v14 = vld [vmem:[%s18566_s4 + $0x7a0] sm:$0xff]  ;;  %v8153_v19 = vpack.c.bf16 %v2232_v30, %v2224_v29  ;;  %v2688_v29 = vld [vmem:[%s18566_s4 + $0x188] sm:$0xff] }
 0x39b   :  { %v8217_v33 = vpack.c.bf16 %v2234_v31, %v2226_v44  ;;  %v8155_v39 = vpack.c.bf16 %v2231_v15, %v2223_v14  ;;  %v2696_v30 = vld [vmem:[%s18566_s4 + $0x1c8] sm:$0xff]  ;;  %v2687_v14 = vld [vmem:[%s18566_s4 + $0x180] sm:$0xff]  ;;  %v2689_v15 = vld [vmem:[%s18566_s4 + $0x190] sm:$0xff] }
 0x39c   :  { %v8233_v31 = vpack.c.bf16 %v2696_v30, %v2688_v29  ;;  %v2752_v29 = vld [vmem:[%s18566_s4 + $0x388] sm:$0xff] }
 0x39d   :  { %8140 = vmatpush1.bf16.msra.mxu0 %v8139_v41  ;;  %8204 = vmatpush1.bf16.msra.mxu1 %v8203_v45  ;;  %v2640_v41 = vld [vmem:[%s18566_s4 + $0x8] sm:$0xff] }
 0x39e   :  { %8142 = vmatprep.subr.bf16.mxu0 %v8141_v58  ;;  %8206 = vmatprep.subr.bf16.mxu1 %v8205_v32  ;;  %v2648_v45 = vld [vmem:[%s18566_s4 + $0x48] sm:$0xff] }
 0x39f   :  { %v8221_v53 = vpack.c.bf16 %v2648_v45, %v2640_v41  ;;  %v2706_v41 = vld [vmem:[%s18566_s4 + $0x218] sm:$0xff]  ;;  %v8299_v45 = vpack.c.bf16 %v2697_v34, %v2689_v15  ;;  %v2760_v30 = vld [vmem:[%s18566_s4 + $0x3c8] sm:$0xff]  ;;  %v2761_v34 = vld [vmem:[%s18566_s4 + $0x3d0] sm:$0xff] }
 0x3a1   :  { %8144 = vmatpush1.bf16.msra.mxu0 %v8143_v4  ;;  %8208 = vmatpush1.bf16.msra.mxu1 %v8207_v38  ;;  %v8225_v4 = vpack.c.bf16 %v2664_v1, %v2656_v63  ;;  %v2666_v38 = vld [vmem:[%s18566_s4 + $0xd8] sm:$0xff] }
 0x3a2   :  { %8146 = vmatprep.subr.bf16.mxu0 %v8145_v12  ;;  %8210 = vmatprep.subr.bf16.mxu1 %v8209_v62  ;;  %v8289_v12 = vpack.c.bf16 %v2666_v38, %v2658_v2  ;;  %v8227_v62 = vpack.c.bf16 %v2663_v11, %v2655_v55  ;;  %v2730_v63 = vld [vmem:[%s18566_s4 + $0x2d8] sm:$0xff]  ;;  %v2719_v38 = vld [vmem:[%s18566_s4 + $0x280] sm:$0xff]  ;;  %v2721_v11 = vld [vmem:[%s18566_s4 + $0x290] sm:$0xff] }
 0x3a3   :  { %v2727_v55 = vld [vmem:[%s18566_s4 + $0x2c0] sm:$0xff] }
 0x3a5   :  { %8148 = vmatpush1.bf16.msra.mxu0 %v8147_v8  ;;  %8212 = vmatpush1.bf16.msra.mxu1 %v8211_v3  ;;  %v2682_v8 = vld [vmem:[%s18566_s4 + $0x158] sm:$0xff]  ;;  %v8229_v3 = vpack.c.bf16 %v2680_v18, %v2672_v16  ;;  %v8243_v18 = vpack.c.bf16 %v2727_v55, %v2719_v38  ;;  %v2791_v38 = vld [vmem:[%s18566_s4 + $0x4c0] sm:$0xff] }
 0x3a6   :  { %8150 = vmatprep.subr.bf16.mxu0 %v8149_v47  ;;  %8214 = vmatprep.subr.bf16.mxu1 %v8213_v13  ;;  %v8293_v9 = vpack.c.bf16 %v2682_v8, %v2674_v52  ;;  %v2679_v47 = vld [vmem:[%s18566_s4 + $0x140] sm:$0xff]  ;;  %v2673_v13 = vld [vmem:[%s18566_s4 + $0x110] sm:$0xff]  ;;  %v2738_v16 = vld [vmem:[%s18566_s4 + $0x318] sm:$0xff]  ;;  %v8245_v8 = vpack.c.bf16 %v2744_v17, %v2736_v35 }
 0x3a7   :  { %v8231_v26 = vpack.c.bf16 %v2679_v47, %v2671_v6  ;;  %v8295_v44 = vpack.c.bf16 %v2681_v27, %v2673_v13  ;;  %v2737_v47 = vld [vmem:[%s18566_s4 + $0x310] sm:$0xff]  ;;  %v2800_v17 = vld [vmem:[%s18566_s4 + $0x508] sm:$0xff] }
 0x3a8   :  { %v2745_v13 = vld [vmem:[%s18566_s4 + $0x350] sm:$0xff] }
 0x3a9   :  { %8152 = vmatpush1.bf16.msra.mxu0 %v8151_v7  ;;  %8216 = vmatpush1.bf16.msra.mxu1 %v8215_v25  ;;  %v2690_v7 = vld [vmem:[%s18566_s4 + $0x198] sm:$0xff]  ;;  %v8311_v27 = vpack.c.bf16 %v2745_v13, %v2737_v47  ;;  %v2801_v47 = vld [vmem:[%s18566_s4 + $0x510] sm:$0xff] }
 0x3aa   :  { %8154 = vmatprep.subr.bf16.mxu0 %v8153_v19  ;;  %8218 = vmatprep.subr.bf16.mxu1 %v8217_v33  ;;  %v2698_v25 = vld [vmem:[%s18566_s4 + $0x1d8] sm:$0xff]  ;;  %v2695_v33 = vld [vmem:[%s18566_s4 + $0x1c0] sm:$0xff]  ;;  %v2809_v13 = vld [vmem:[%s18566_s4 + $0x550] sm:$0xff] }
 0x3ab   :  { %v8297_v19 = vpack.c.bf16 %v2698_v25, %v2690_v7  ;;  %v8235_v36 = vpack.c.bf16 %v2695_v33, %v2687_v14  ;;  %v2762_v7 = vld [vmem:[%s18566_s4 + $0x3d8] sm:$0xff]  ;;  %v2751_v14 = vld [vmem:[%s18566_s4 + $0x380] sm:$0xff]  ;;  %v2753_v33 = vld [vmem:[%s18566_s4 + $0x390] sm:$0xff] }
 0x3ad   :  { %8156 = vmatpush1.bf16.msra.mxu0 %v8155_v39  ;;  %8220 = vmatpush1.bf16.msra.mxu1 %v8219_v40  ;;  %v2704_v39 = vld [vmem:[%s18566_s4 + $0x208] sm:$0xff] }
 0x3ae   :  { %8222 = vmatprep.subr.bf16.mxu0 %v8221_v53  ;;  %v2712_v40 = vld [vmem:[%s18566_s4 + $0x248] sm:$0xff]  ;;  %v2714_v53 = vld [vmem:[%s18566_s4 + $0x258] sm:$0xff] }
 0x3b0   :  { %2454 = vmatmul.mubr.f32.vlgmr.msra.gmra.mrb[48].mxu0 %v12874_v20  ;;  %2531 = vmatmul.mubr.f32.vlgmr.msra.gmra.mrb[48].mxu1 %v12874_v20  ;;  %v2642_v20 = vld [vmem:[%s18566_s4 + $0x18] sm:$0xff] }
 0x3b1   :  { %2459 = vmatprep.mubr.f32.mxu0 %v12899_v5  ;;  %2536 = vmatprep.mubr.f32.mxu1 %v12899_v5  ;;  %v2650_v5 = vld [vmem:[%s18566_s4 + $0x58] sm:$0xff] }
 0x3b2   :  { %v8285_v58 = vpack.c.bf16 %v2650_v5, %v2642_v20  ;;  %v8237_v20 = vpack.c.bf16 %v2712_v40, %v2704_v39  ;;  %v2703_v5 = vld [vmem:[%s18566_s4 + $0x200] sm:$0xff]  ;;  %v2768_v39 = vld [vmem:[%s18566_s4 + $0x408] sm:$0xff] }
 0x3b3   :  { %v2776_v40 = vld [vmem:[%s18566_s4 + $0x448] sm:$0xff] }
 0x3b4   :  { %2460 = vmatmul.mubr.f32.gmra.mrb[50].mxu0 %v12907_v57  ;;  %2537 = vmatmul.mubr.f32.gmra.mrb[50].mxu1 %v12907_v57  ;;  %v2639_v57 = vld [vmem:[%s18566_s4] sm:$0xff] }
 0x3b5   :  { %v8223_v32 = vpack.c.bf16 %v2647_v56, %v2639_v57  ;;  %8286 = vmatprep.subr.bf16.mxu1 %v8285_v58  ;;  %v2711_v57 = vld [vmem:[%s18566_s4 + $0x240] sm:$0xff]  ;;  %v8301_v56 = vpack.c.bf16 %v2714_v53, %v2706_v41  ;;  %v2705_v58 = vld [vmem:[%s18566_s4 + $0x210] sm:$0xff]  ;;  %v2770_v41 = vld [vmem:[%s18566_s4 + $0x418] sm:$0xff] }
 0x3b6   :  { %8288 = vmatpush1.bf16.msra.mxu1 %v8287_v61  ;;  %v2722_v61 = vld [vmem:[%s18566_s4 + $0x298] sm:$0xff]  ;;  %v8239_v1 = vpack.c.bf16 %v2711_v57, %v2703_v5  ;;  %v2767_v53 = vld [vmem:[%s18566_s4 + $0x400] sm:$0xff] }
 0x3b7   :  { %8224 = vmatpush1.bf16.msra.mxu0 %v8223_v32  ;;  %8290 = vmatprep.subr.bf16.mxu1 %v8289_v12  ;;  %v2713_v32 = vld [vmem:[%s18566_s4 + $0x250] sm:$0xff]  ;;  %v8305_v12 = vpack.c.bf16 %v2730_v63, %v2722_v61  ;;  %v2775_v5 = vld [vmem:[%s18566_s4 + $0x440] sm:$0xff]  ;;  %v2792_v61 = vld [vmem:[%s18566_s4 + $0x4c8] sm:$0xff] }
 0x3b8   :  { %8226 = vmatprep.subr.bf16.mxu0 %v8225_v4  ;;  %v8303_v2 = vpack.c.bf16 %v2713_v32, %v2705_v58  ;;  %v8241_v4 = vpack.c.bf16 %v2728_v60, %v2720_v59  ;;  %v2769_v58 = vld [vmem:[%s18566_s4 + $0x410] sm:$0xff]  ;;  %v2784_v60 = vld [vmem:[%s18566_s4 + $0x488] sm:$0xff]  ;;  %v2786_v63 = vld [vmem:[%s18566_s4 + $0x498] sm:$0xff] }
 0x3b9   :  { %v2777_v32 = vld [vmem:[%s18566_s4 + $0x450] sm:$0xff] }
 0x3ba   :  { %8292 = vmatpush1.bf16.msra.mxu1 %v8291_v10  ;;  %v2746_v10 = vld [vmem:[%s18566_s4 + $0x358] sm:$0xff]  ;;  %v8319_v59 = vpack.c.bf16 %v2777_v32, %v2769_v58  ;;  %v2841_v58 = vld [vmem:[%s18566_s4 + $0x650] sm:$0xff] }
 0x3bb   :  { %8228 = vmatpush1.bf16.msra.mxu0 %v8227_v62  ;;  %8294 = vmatprep.subr.bf16.mxu1 %v8293_v9  ;;  %v2729_v62 = vld [vmem:[%s18566_s4 + $0x2d0] sm:$0xff]  ;;  %v2743_v9 = vld [vmem:[%s18566_s4 + $0x340] sm:$0xff]  ;;  %v8309_v6 = vpack.c.bf16 %v2746_v10, %v2738_v16  ;;  %v2808_v16 = vld [vmem:[%s18566_s4 + $0x548] sm:$0xff] }
 0x3bc   :  { %8230 = vmatprep.subr.bf16.mxu0 %v8229_v3  ;;  %v8307_v52 = vpack.c.bf16 %v2729_v62, %v2721_v11  ;;  %v2735_v3 = vld [vmem:[%s18566_s4 + $0x300] sm:$0xff]  ;;  %v2793_v62 = vld [vmem:[%s18566_s4 + $0x4d0] sm:$0xff]  ;;  %v2802_v10 = vld [vmem:[%s18566_s4 + $0x518] sm:$0xff] }
 0x3be   :  { %8296 = vmatpush1.bf16.msra.mxu1 %v8295_v44  ;;  %v2754_v44 = vld [vmem:[%s18566_s4 + $0x398] sm:$0xff] }
 0x3bf   :  { %8232 = vmatpush1.bf16.msra.mxu0 %v8231_v26  ;;  %8298 = vmatprep.subr.bf16.mxu1 %v8297_v19  ;;  %v8247_v26 = vpack.c.bf16 %v2743_v9, %v2735_v3  ;;  %v8313_v25 = vpack.c.bf16 %v2762_v7, %v2754_v44  ;;  %v2759_v19 = vld [vmem:[%s18566_s4 + $0x3c0] sm:$0xff] }
 0x3c0   :  { %8234 = vmatprep.subr.bf16.mxu0 %v8233_v31  ;;  %v8249_v31 = vpack.c.bf16 %v2760_v30, %v2752_v29  ;;  %v8251_v15 = vpack.c.bf16 %v2759_v19, %v2751_v14  ;;  %v2807_v3 = vld [vmem:[%s18566_s4 + $0x540] sm:$0xff]  ;;  %v2824_v29 = vld [vmem:[%s18566_s4 + $0x5c8] sm:$0xff]  ;;  %v2818_v30 = vld [vmem:[%s18566_s4 + $0x598] sm:$0xff] }
 0x3c1   :  { %v2815_v7 = vld [vmem:[%s18566_s4 + $0x580] sm:$0xff] }
 0x3c2   :  { %8300 = vmatpush1.bf16.msra.mxu1 %v8299_v45  ;;  %v8253_v45 = vpack.c.bf16 %v2776_v40, %v2768_v39  ;;  %v2840_v39 = vld [vmem:[%s18566_s4 + $0x648] sm:$0xff]  ;;  %v2834_v40 = vld [vmem:[%s18566_s4 + $0x618] sm:$0xff] }
 0x3c3   :  { %8236 = vmatpush1.bf16.msra.mxu0 %v8235_v36  ;;  %8302 = vmatprep.subr.bf16.mxu1 %v8301_v56  ;;  %v8315_v36 = vpack.c.bf16 %v2761_v34, %v2753_v33  ;;  %v8255_v56 = vpack.c.bf16 %v2775_v5, %v2767_v53  ;;  %v2817_v33 = vld [vmem:[%s18566_s4 + $0x590] sm:$0xff]  ;;  %v2839_v53 = vld [vmem:[%s18566_s4 + $0x640] sm:$0xff] }
 0x3c4   :  { %8238 = vmatprep.subr.bf16.mxu0 %v8237_v20  ;;  %v2778_v20 = vld [vmem:[%s18566_s4 + $0x458] sm:$0xff] }
 0x3c5   :  { %v8317_v57 = vpack.c.bf16 %v2778_v20, %v2770_v41  ;;  %v2831_v20 = vld [vmem:[%s18566_s4 + $0x600] sm:$0xff] }
 0x3c6   :  { %8304 = vmatpush1.bf16.msra.mxu1 %v8303_v2  ;;  %v2794_v2 = vld [vmem:[%s18566_s4 + $0x4d8] sm:$0xff] }
 0x3c7   :  { %8240 = vmatpush1.bf16.msra.mxu0 %v8239_v1  ;;  %8306 = vmatprep.subr.bf16.mxu1 %v8305_v12  ;;  %v8257_v1 = vpack.c.bf16 %v2792_v61, %v2784_v60  ;;  %v8321_v55 = vpack.c.bf16 %v2794_v2, %v2786_v63  ;;  %v2785_v12 = vld [vmem:[%s18566_s4 + $0x490] sm:$0xff]  ;;  %v2856_v60 = vld [vmem:[%s18566_s4 + $0x6c8] sm:$0xff]  ;;  %v2850_v61 = vld [vmem:[%s18566_s4 + $0x698] sm:$0xff] }
 0x3c8   :  { %8242 = vmatprep.subr.bf16.mxu0 %v8241_v4  ;;  %v2783_v4 = vld [vmem:[%s18566_s4 + $0x480] sm:$0xff]  ;;  %v8323_v35 = vpack.c.bf16 %v2793_v62, %v2785_v12  ;;  %v2857_v12 = vld [vmem:[%s18566_s4 + $0x6d0] sm:$0xff] }
 0x3c9   :  { %v8259_v11 = vpack.c.bf16 %v2791_v38, %v2783_v4  ;;  %v2847_v2 = vld [vmem:[%s18566_s4 + $0x680] sm:$0xff] }
 0x3ca   :  { %8308 = vmatpush1.bf16.msra.mxu1 %v8307_v52  ;;  %v2810_v52 = vld [vmem:[%s18566_s4 + $0x558] sm:$0xff]  ;;  %v2855_v4 = vld [vmem:[%s18566_s4 + $0x6c0] sm:$0xff] }
 0x3cb   :  { %8244 = vmatpush1.bf16.msra.mxu0 %v8243_v18  ;;  %8310 = vmatprep.subr.bf16.mxu1 %v8309_v6  ;;  %v8261_v18 = vpack.c.bf16 %v2808_v16, %v2800_v17  ;;  %v8325_v9 = vpack.c.bf16 %v2810_v52, %v2802_v10  ;;  %v2872_v17 = vld [vmem:[%s18566_s4 + $0x748] sm:$0xff]  ;;  %v2866_v16 = vld [vmem:[%s18566_s4 + $0x718] sm:$0xff]  ;;  %v2863_v52 = vld [vmem:[%s18566_s4 + $0x700] sm:$0xff] }
 0x3cc   :  { %8246 = vmatprep.subr.bf16.mxu0 %v8245_v8  ;;  %v2799_v8 = vld [vmem:[%s18566_s4 + $0x500] sm:$0xff] }
 0x3cd   :  { %v8263_v6 = vpack.c.bf16 %v2807_v3, %v2799_v8  ;;  %v2871_v8 = vld [vmem:[%s18566_s4 + $0x740] sm:$0xff] }
 0x3ce   :  { %8312 = vmatpush1.bf16.msra.mxu1 %v8311_v27  ;;  %v2816_v27 = vld [vmem:[%s18566_s4 + $0x588] sm:$0xff] }
 0x3cf   :  { %8248 = vmatpush1.bf16.msra.mxu0 %v8247_v26  ;;  %8314 = vmatprep.subr.bf16.mxu1 %v8313_v25  ;;  %v8327_v26 = vpack.c.bf16 %v2809_v13, %v2801_v47  ;;  %v8265_v44 = vpack.c.bf16 %v2824_v29, %v2816_v27  ;;  %v2823_v25 = vld [vmem:[%s18566_s4 + $0x5c0] sm:$0xff]  ;;  %v2873_v47 = vld [vmem:[%s18566_s4 + $0x750] sm:$0xff]  ;;  %v2888_v27 = vld [vmem:[%s18566_s4 + $0x7c8] sm:$0xff] }
 0x3d0   :  { %8250 = vmatprep.subr.bf16.mxu0 %v8249_v31  ;;  %v2826_v31 = vld [vmem:[%s18566_s4 + $0x5d8] sm:$0xff]  ;;  %v8267_v19 = vpack.c.bf16 %v2823_v25, %v2815_v7  ;;  %v2887_v7 = vld [vmem:[%s18566_s4 + $0x7c0] sm:$0xff] }
 0x3d1   :  { %v8329_v14 = vpack.c.bf16 %v2826_v31, %v2818_v30  ;;  %v2882_v29 = vld [vmem:[%s18566_s4 + $0x798] sm:$0xff]  ;;  %v2879_v31 = vld [vmem:[%s18566_s4 + $0x780] sm:$0xff] }
 0x3d2   :  { %8316 = vmatpush1.bf16.msra.mxu1 %v8315_v36  ;;  %v2832_v36 = vld [vmem:[%s18566_s4 + $0x608] sm:$0xff] }
 0x3d3   :  { %8252 = vmatpush1.bf16.msra.mxu0 %v8251_v15  ;;  %8318 = vmatprep.subr.bf16.mxu1 %v8317_v57  ;;  %v2825_v15 = vld [vmem:[%s18566_s4 + $0x5d0] sm:$0xff]  ;;  %v8269_v41 = vpack.c.bf16 %v2840_v39, %v2832_v36  ;;  %v8271_v57 = vpack.c.bf16 %v2839_v53, %v2831_v20  ;;  %v2652_v36 = vld [vmem:[%s18566_s4 + $0x68] sm:$0xff]  ;;  %v2646_v39 = vld [vmem:[%s18566_s4 + $0x38] sm:$0xff] }
 0x3d4   :  { %8254 = vmatprep.subr.bf16.mxu0 %v8253_v45  ;;  %v8331_v34 = vpack.c.bf16 %v2825_v15, %v2817_v33  ;;  %v2842_v45 = vld [vmem:[%s18566_s4 + $0x658] sm:$0xff]  ;;  %v2889_v33 = vld [vmem:[%s18566_s4 + $0x7d0] sm:$0xff] }
 0x3d5   :  { %v8333_v5 = vpack.c.bf16 %v2842_v45, %v2834_v40 }
 0x3d6   :  { %8320 = vmatpush1.bf16.msra.mxu1 %v8319_v59  ;;  %v2848_v59 = vld [vmem:[%s18566_s4 + $0x688] sm:$0xff] }
 0x3d7   :  { %8256 = vmatpush1.bf16.msra.mxu0 %v8255_v56  ;;  %8322 = vmatprep.subr.bf16.mxu1 %v8321_v55  ;;  %v2833_v56 = vld [vmem:[%s18566_s4 + $0x610] sm:$0xff]  ;;  %v8273_v63 = vpack.c.bf16 %v2856_v60, %v2848_v59  ;;  %v8275_v55 = vpack.c.bf16 %v2855_v4, %v2847_v2 }
 0x3d8   :  { %8258 = vmatprep.subr.bf16.mxu0 %v8257_v1  ;;  %v8335_v32 = vpack.c.bf16 %v2841_v58, %v2833_v56  ;;  %v2858_v1 = vld [vmem:[%s18566_s4 + $0x6d8] sm:$0xff] }
 0x3d9   :  { %v8337_v38 = vpack.c.bf16 %v2858_v1, %v2850_v61 }
 0x3da   :  { %8324 = vmatpush1.bf16.msra.mxu1 %v8323_v35  ;;  %v2864_v35 = vld [vmem:[%s18566_s4 + $0x708] sm:$0xff] }
 0x3db   :  { %8260 = vmatpush1.bf16.msra.mxu0 %v8259_v11  ;;  %8326 = vmatprep.subr.bf16.mxu1 %v8325_v9  ;;  %v2849_v11 = vld [vmem:[%s18566_s4 + $0x690] sm:$0xff]  ;;  %v8277_v10 = vpack.c.bf16 %v2872_v17, %v2864_v35  ;;  %v8279_v9 = vpack.c.bf16 %v2871_v8, %v2863_v52 }
 0x3dc   :  { %8262 = vmatprep.subr.bf16.mxu0 %v8261_v18  ;;  %v8339_v62 = vpack.c.bf16 %v2857_v12, %v2849_v11  ;;  %v2874_v18 = vld [vmem:[%s18566_s4 + $0x758] sm:$0xff] }
 0x3dd   :  { %v8341_v3 = vpack.c.bf16 %v2874_v18, %v2866_v16 }
 0x3de   :  { %8328 = vmatpush1.bf16.msra.mxu1 %v8327_v26  ;;  %v2880_v26 = vld [vmem:[%s18566_s4 + $0x788] sm:$0xff] }
 0x3df   :  { %8264 = vmatpush1.bf16.msra.mxu0 %v8263_v6  ;;  %8330 = vmatprep.subr.bf16.mxu1 %v8329_v14  ;;  %v2865_v6 = vld [vmem:[%s18566_s4 + $0x710] sm:$0xff]  ;;  %v8281_v30 = vpack.c.bf16 %v2888_v27, %v2880_v26  ;;  %v8283_v14 = vpack.c.bf16 %v2887_v7, %v2879_v31 }
 0x3e0   :  { %8266 = vmatprep.subr.bf16.mxu0 %v8265_v44  ;;  %v8343_v13 = vpack.c.bf16 %v2873_v47, %v2865_v6  ;;  %v2890_v44 = vld [vmem:[%s18566_s4 + $0x7d8] sm:$0xff] }
 0x3e1   :  { %v8345_v25 = vpack.c.bf16 %v2890_v44, %v2882_v29 }
 0x3e2   :  { %8332 = vmatpush1.bf16.msra.mxu1 %v8331_v34  ;;  %v2644_v34 = vld [vmem:[%s18566_s4 + $0x28] sm:$0xff] }
 0x3e3   :  { %8268 = vmatpush1.bf16.msra.mxu0 %v8267_v19  ;;  %8334 = vmatprep.subr.bf16.mxu1 %v8333_v5  ;;  %v2881_v19 = vld [vmem:[%s18566_s4 + $0x790] sm:$0xff]  ;;  %v8349_v40 = vpack.c.bf16 %v2652_v36, %v2644_v34 }
 0x3e4   :  { %8270 = vmatprep.subr.bf16.mxu0 %v8269_v41  ;;  %v8347_v15 = vpack.c.bf16 %v2889_v33, %v2881_v19  ;;  %v2654_v41 = vld [vmem:[%s18566_s4 + $0x78] sm:$0xff] }
 0x3e5   :  { %v8413_v45 = vpack.c.bf16 %v2654_v41, %v2646_v39 }
 0x3e6   :  { %8336 = vmatpush1.bf16.msra.mxu1 %v8335_v32 }
 0x3e7   :  { %8272 = vmatpush1.bf16.msra.mxu0 %v8271_v57  ;;  %8338 = vmatprep.subr.bf16.mxu1 %v8337_v38 }
 0x3e8   :  { %8274 = vmatprep.subr.bf16.mxu0 %v8273_v63 }
 0x3ea   :  { %8340 = vmatpush1.bf16.msra.mxu1 %v8339_v62 }
 0x3eb   :  { %8276 = vmatpush1.bf16.msra.mxu0 %v8275_v55  ;;  %8342 = vmatprep.subr.bf16.mxu1 %v8341_v3 }
 0x3ec   :  { %8278 = vmatprep.subr.bf16.mxu0 %v8277_v10 }
 0x3ee   :  { %8344 = vmatpush1.bf16.msra.mxu1 %v8343_v13 }
 0x3ef   :  { %8280 = vmatpush1.bf16.msra.mxu0 %v8279_v9  ;;  %8346 = vmatprep.subr.bf16.mxu1 %v8345_v25 }
 0x3f0   :  { %8282 = vmatprep.subr.bf16.mxu0 %v8281_v30 }
 0x3f2   :  { %8348 = vmatpush1.bf16.msra.mxu1 %v8347_v15 }
 0x3f3   :  { %8284 = vmatpush1.bf16.msra.mxu0 %v8283_v14  ;;  %8414 = vmatprep.subr.bf16.mxu1 %v8413_v45 }
 0x3f4   :  { %8350 = vmatprep.subr.bf16.mxu0 %v8349_v40 }
 0x443   :  { %v2301_v20 = vpop.f32.mrb[12].mxu0  ;;  %v2378_v53 = vpop.f32.mrb[12].mxu1 }
 0x444   :  { %v9893_v5 = vadd.f32 %v2301_v20, %v11107_v48  ;;  %v2303_v57 = vpop.f32.mrb[13].mxu0  ;;  %v2380_v56 = vpop.f32.mrb[13].mxu1  ;;  %v9929_v58 = vadd.f32 %v2378_v53, %v11113_v50 }
 0x445   :  { %v9894_v32 = vadd.f32 %v2303_v57, %v11110_v49  ;;  %v9930_v45 = vadd.f32 %v2380_v56, %v11124_v0 }
 0x446   :  { %10141 = vtanh.f32 %v9893_v5 }
 0x447   :  { %v2307_v59 = vpop.f32.mrb[14].mxu0  ;;  %v2384_v60 = vpop.f32.mrb[14].mxu1  ;;  %10143 = vtanh.f32 %v9894_v32 }
 0x448   :  { %v9895_v61 = vadd.f32 %v2307_v59, %v11107_v48  ;;  %v2309_v63 = vpop.f32.mrb[15].mxu0  ;;  %v2386_v1 = vpop.f32.mrb[15].mxu1  ;;  %10145 = vtanh.f32 %v9929_v58  ;;  %v9931_v4 = vadd.f32 %v2384_v60, %v11113_v50 }
 0x449   :  { %v9896_v2 = vadd.f32 %v2309_v63, %v11110_v49  ;;  %v9932_v60 = vadd.f32 %v2386_v1, %v11124_v0 }
 0x44a   :  { %10147 = vtanh.f32 %v9895_v61 }
 0x44b   :  { %10149 = vtanh.f32 %v9896_v2 }
 0x44c   :  { %10151 = vtanh.f32 %v9931_v4 }
 0x450   :  { %v10142_v38 = vpop.eup %10141 }
 0x451   :  { %v2568_v55 = vmul.f32 0.5, %v10142_v38  ;;  %v10144_v11 = vpop.eup %10143 }
 0x452   :  { %v10146_v12 = vpop.eup %10145  ;;  %v2572_v35 = vmul.f32 0.5, %v10144_v11 }
 0x453   :  { %v2570_v62 = vadd.f32 0.5, %v2568_v55 }
 0x454   :  { %v10148_v17 = vpop.eup %10147  ;;  %v2574_v16 = vadd.f32 0.5, %v2572_v35 }
 0x455   :  { %v2582_v10 = vmul.f32 %v10146_v12, %v2570_v62  ;;  %v2569_v18 = vmul.f32 0.5, %v10148_v17  ;;  %v10150_v52 = vpop.eup %10149 }
 0x456   :  { %v2580_v8 = vmul.f32 %v2574_v16, %v12822_v28  ;;  %v2573_v9 = vmul.f32 0.5, %v10150_v52  ;;  %v10152_v6 = vpop.eup %10151 }
 0x457   :  { %v2571_v3 = vadd.f32 0.5, %v2569_v18 }
 0x458   :  { %v13644_v47 = vadd.f32 %v2582_v10, %v2580_v8  ;;  %v2575_v13 = vadd.f32 0.5, %v2573_v9  ;;  %v2645_v9 = vld [vmem:[%s18566_s4 + $0x30] sm:$0xff] }
 0x459   :  { %v2583_v26 = vmul.f32 %v10152_v6, %v2571_v3  ;;  %v2643_v3 = vld [vmem:[%s18566_s4 + $0x20] sm:$0xff]  ;;  %v2653_v6 = vld [vmem:[%s18566_s4 + $0x70] sm:$0xff] }
 0x45a   :  { %v2581_v27 = vmul.f32 %v2575_v13, %v12825_v51  ;;  %v2660_v13 = vld [vmem:[%s18566_s4 + $0xa8] sm:$0xff] }
 0x45c   :  { %v13647_v29 = vadd.f32 %v2583_v26, %v2581_v27 }
 0x483   :  { %v2455_v30 = vpop.f32.mrb[48].mxu0  ;;  %v2532_v44 = vpop.f32.mrb[48].mxu1 }
 0x484   :  { %v2590_v31 = vadd.f32 %v2455_v30, %v11978_v23  ;;  %v2457_v7 = vpop.f32.mrb[49].mxu0  ;;  %v2534_v25 = vpop.f32.mrb[49].mxu1  ;;  %v2592_v14 = vadd.f32 %v2532_v44, %v11981_v21  ;;  %v2668_v44 = vld [vmem:[%s18566_s4 + $0xe8] sm:$0xff] }
 0x485   :  { %v2591_v28 = vadd.f32 %v2457_v7, %v11984_v24  ;;  %v2593_v40 = vadd.f32 %v2534_v25, %v11993_v37  ;;  %v2670_v7 = vld [vmem:[%s18566_s4 + $0xf8] sm:$0xff] }
 0x486   :  { %10153 = vtanh.f32 %v2590_v31  ;;  %v2662_v31 = vld [vmem:[%s18566_s4 + $0xb8] sm:$0xff] }
 0x487   :  { %v2461_v19 = vpop.f32.mrb[50].mxu0  ;;  %v2538_v33 = vpop.f32.mrb[50].mxu1  ;;  %10155 = vtanh.f32 %v2591_v28 }
 0x488   :  { %v2594_v15 = vadd.f32 %v2461_v19, %v11978_v23  ;;  %v2463_v34 = vpop.f32.mrb[51].mxu0  ;;  %v2540_v51 = vpop.f32.mrb[51].mxu1  ;;  %10157 = vtanh.f32 %v2592_v14  ;;  %v2596_v39 = vadd.f32 %v2538_v33, %v11981_v21 }
 0x489   :  { %v2595_v36 = vadd.f32 %v2463_v34, %v11984_v24  ;;  %v2597_v32 = vadd.f32 %v2540_v51, %v11993_v37  ;;  %v2659_v34 = vld [vmem:[%s18566_s4 + $0xa0] sm:$0xff] }
 0x48a   :  { %10159 = vtanh.f32 %v2594_v15  ;;  %v8415_v15 = vpack.c.bf16 %v2653_v6, %v2645_v9  ;;  %v2693_v6 = vld [vmem:[%s18566_s4 + $0x1b0] sm:$0xff] }
 0x48b   :  { %10161 = vtanh.f32 %v2595_v36  ;;  %v8353_v36 = vpack.c.bf16 %v2668_v44, %v2660_v13  ;;  %v2701_v13 = vld [vmem:[%s18566_s4 + $0x1f0] sm:$0xff]  ;;  %v2718_v44 = vld [vmem:[%s18566_s4 + $0x278] sm:$0xff] }
 0x48c   :  { %10163 = vtanh.f32 %v2596_v39  ;;  %v8417_v39 = vpack.c.bf16 %v2670_v7, %v2662_v31 }
 0x48d   :  { %10165 = vtanh.f32 %v2593_v40  ;;  %v2667_v40 = vld [vmem:[%s18566_s4 + $0xe0] sm:$0xff] }
 0x48e   :  { %10167 = vtanh.f32 %v9930_v45  ;;  %v2669_v45 = vld [vmem:[%s18566_s4 + $0xf0] sm:$0xff] }
 0x48f   :  { %10169 = vtanh.f32 %v2597_v32  ;;  %v2684_v32 = vld [vmem:[%s18566_s4 + $0x168] sm:$0xff] }
 0x490   :  { %v10154_v41 = vpop.eup %10153  ;;  %10171 = vtanh.f32 %v9932_v60  ;;  %v2686_v60 = vld [vmem:[%s18566_s4 + $0x178] sm:$0xff] }
 0x491   :  { %v2606_v20 = vmul.f32 0.5, %v10154_v41  ;;  %v10156_v53 = vpop.eup %10155  ;;  %10173 = vtanh.f32 %v13644_v47  ;;  %v2661_v41 = vld [vmem:[%s18566_s4 + $0xb0] sm:$0xff] }
 0x492   :  { %v10158_v5 = vpop.eup %10157  ;;  %v2610_v58 = vmul.f32 0.5, %v10156_v53 }
 0x493   :  { %v2608_v57 = vadd.f32 0.5, %v2606_v20 }
 0x494   :  { %v10160_v59 = vpop.eup %10159  ;;  %v2612_v61 = vadd.f32 0.5, %v2610_v58 }
 0x495   :  { %v2620_v63 = vmul.f32 %v10158_v5, %v2608_v57  ;;  %v2607_v2 = vmul.f32 0.5, %v10160_v59  ;;  %v10162_v4 = vpop.eup %10161  ;;  %v2676_v5 = vld [vmem:[%s18566_s4 + $0x128] sm:$0xff]  ;;  %v2678_v59 = vld [vmem:[%s18566_s4 + $0x138] sm:$0xff] }
 0x496   :  { %v2618_v38 = vmul.f32 %v2612_v61, %v12838_v54  ;;  %v2611_v56 = vmul.f32 0.5, %v10162_v4  ;;  %v10164_v11 = vpop.eup %10163  ;;  %v2675_v4 = vld [vmem:[%s18566_s4 + $0x120] sm:$0xff] }
 0x497   :  { %v2609_v55 = vadd.f32 0.5, %v2607_v2  ;;  %v10166_v17 = vpop.eup %10165  ;;  %v8419_v2 = vpack.c.bf16 %v2669_v45, %v2661_v41  ;;  %v2732_v41 = vld [vmem:[%s18566_s4 + $0x2e8] sm:$0xff]  ;;  %v2726_v45 = vld [vmem:[%s18566_s4 + $0x2b8] sm:$0xff] }
 0x498   :  { %v13660_v12 = vadd.f32 %v2620_v63, %v2618_v38  ;;  %v2613_v62 = vadd.f32 0.5, %v2611_v56  ;;  %v10168_v10 = vpop.eup %10167  ;;  %v2614_v54 = vmul.f32 0.5, %v10166_v17  ;;  %v8355_v63 = vpack.c.bf16 %v2667_v40, %v2659_v34  ;;  %v2683_v38 = vld [vmem:[%s18566_s4 + $0x160] sm:$0xff]  ;;  %v2677_v56 = vld [vmem:[%s18566_s4 + $0x130] sm:$0xff]  ;;  %v2700_v17 = vld [vmem:[%s18566_s4 + $0x1e8] sm:$0xff] }
 0x499   :  { %v2621_v35 = vmul.f32 %v10164_v11, %v2609_v55  ;;  %v10170_v18 = vpop.eup %10169  ;;  %v2576_v52 = vmul.f32 0.5, %v10168_v10  ;;  %v2685_v11 = vld [vmem:[%s18566_s4 + $0x170] sm:$0xff]  ;;  %v2694_v10 = vld [vmem:[%s18566_s4 + $0x1b8] sm:$0xff]  ;;  %v2724_v40 = vld [vmem:[%s18566_s4 + $0x2a8] sm:$0xff] }
 0x49a   :  { %10175 = vtanh.f32 %v13660_v12  ;;  %v2619_v1 = vmul.f32 %v2613_v62, %v12843_v22  ;;  %v10172_v8 = vpop.eup %10171  ;;  %v2651_v22 = vld [vmem:[%s18566_s4 + $0x60] sm:$0xff]  ;;  %v2616_v27 = vadd.f32 0.5, %v2614_v54  ;;  %v2615_v30 = vmul.f32 0.5, %v10170_v18  ;;  %v2692_v62 = vld [vmem:[%s18566_s4 + $0x1a8] sm:$0xff]  ;;  %v2702_v54 = vld [vmem:[%s18566_s4 + $0x1f8] sm:$0xff] }
 0x49b   :  { %10177 = vtanh.f32 %v13647_v29  ;;  %v10174_v26 = vpop.eup %10173  ;;  %v2578_v14 = vadd.f32 0.5, %v2576_v52  ;;  %v2577_v28 = vmul.f32 0.5, %v10172_v8  ;;  %v8351_v33 = vpack.c.bf16 %v2651_v22, %v2643_v3  ;;  %v2691_v8 = vld [vmem:[%s18566_s4 + $0x1a0] sm:$0xff] }
 0x49c   :  { %v13665_v16 = vadd.f32 %v2621_v35, %v2619_v1  ;;  %v2617_v53 = vadd.f32 0.5, %v2615_v30  ;;  %v8357_v35 = vpack.c.bf16 %v2684_v32, %v2676_v5  ;;  %v8421_v1 = vpack.c.bf16 %v2686_v60, %v2678_v59  ;;  %v2699_v3 = vld [vmem:[%s18566_s4 + $0x1e0] sm:$0xff]  ;;  %v2710_v30 = vld [vmem:[%s18566_s4 + $0x238] sm:$0xff] }
 0x49d   :  { %v13696_v51 = vmul.f32 %v10174_v26, %v2578_v14  ;;  %v2579_v58 = vadd.f32 0.5, %v2577_v28  ;;  %v8359_v18 = vpack.c.bf16 %v2683_v38, %v2675_v4  ;;  %v8423_v52 = vpack.c.bf16 %v2685_v11, %v2677_v56  ;;  %v2708_v26 = vld [vmem:[%s18566_s4 + $0x228] sm:$0xff]  ;;  %v2707_v14 = vld [vmem:[%s18566_s4 + $0x220] sm:$0xff]  ;;  %v2733_v4 = vld [vmem:[%s18566_s4 + $0x2f0] sm:$0xff] }
 0x49e   :  { %10179 = vtanh.f32 %v13665_v16  ;;  %v8361_v22 = vpack.c.bf16 %v2700_v17, %v2692_v62  ;;  %v8425_v9 = vpack.c.bf16 %v2702_v54, %v2694_v10  ;;  %v8363_v7 = vpack.c.bf16 %v2699_v3, %v2691_v8  ;;  %v2715_v28 = vld [vmem:[%s18566_s4 + $0x260] sm:$0xff]  ;;  %v2740_v38 = vld [vmem:[%s18566_s4 + $0x328] sm:$0xff]  ;;  %v2742_v11 = vld [vmem:[%s18566_s4 + $0x338] sm:$0xff] }
 0x49f   :  { %v8429_v34 = vpack.c.bf16 %v2718_v44, %v2710_v30  ;;  %v8367_v5 = vpack.c.bf16 %v2715_v28, %v2707_v14  ;;  %v2731_v32 = vld [vmem:[%s18566_s4 + $0x2e0] sm:$0xff]  ;;  %v8369_v60 = vpack.c.bf16 %v2732_v41, %v2724_v40  ;;  %v2748_v56 = vld [vmem:[%s18566_s4 + $0x368] sm:$0xff]  ;;  %v2750_v62 = vld [vmem:[%s18566_s4 + $0x378] sm:$0xff] }
 0x4a0   :  { %v2739_v17 = vld [vmem:[%s18566_s4 + $0x320] sm:$0xff]  ;;  %v8373_v54 = vpack.c.bf16 %v2748_v56, %v2740_v38  ;;  %v2749_v8 = vld [vmem:[%s18566_s4 + $0x370] sm:$0xff]  ;;  %v2756_v3 = vld [vmem:[%s18566_s4 + $0x3a8] sm:$0xff] }
 0x4a1   :  { %v2747_v10 = vld [vmem:[%s18566_s4 + $0x360] sm:$0xff]  ;;  %v2772_v14 = vld [vmem:[%s18566_s4 + $0x428] sm:$0xff]  ;;  %v2789_v38 = vld [vmem:[%s18566_s4 + $0x4b0] sm:$0xff] }
 0x4a2   :  { %v2763_v30 = vld [vmem:[%s18566_s4 + $0x3e0] sm:$0xff]  ;;  %v2780_v28 = vld [vmem:[%s18566_s4 + $0x468] sm:$0xff]  ;;  %v2797_v56 = vld [vmem:[%s18566_s4 + $0x4f0] sm:$0xff] }
 0x4a3   :  { %v8381_v40 = vpack.c.bf16 %v2780_v28, %v2772_v14  ;;  %v2821_v14 = vld [vmem:[%s18566_s4 + $0x5b0] sm:$0xff] }
 0x4a4   :  { %v10176_v25 = vpop.eup %10175  ;;  %v2829_v28 = vld [vmem:[%s18566_s4 + $0x5f0] sm:$0xff] }
 0x4a5   :  { %v2626_v19 = vmul.f32 %v10176_v25, %v2616_v27  ;;  %v10178_v20 = vpop.eup %10177  ;;  %v2716_v27 = vld [vmem:[%s18566_s4 + $0x268] sm:$0xff]  ;;  %v8427_v25 = vpack.c.bf16 %v2701_v13, %v2693_v6  ;;  %v2766_v6 = vld [vmem:[%s18566_s4 + $0x3f8] sm:$0xff]  ;;  %v8375_v13 = vpack.c.bf16 %v2747_v10, %v2739_v17  ;;  %v8451_v10 = vpack.c.bf16 %v2797_v56, %v2789_v38 }
 0x4a6   :  { %v13729_v55 = vmul.f32 %v10178_v20, %v2579_v58  ;;  %v2734_v20 = vld [vmem:[%s18566_s4 + $0x2f8] sm:$0xff]  ;;  %v2723_v58 = vld [vmem:[%s18566_s4 + $0x2a0] sm:$0xff] }
 0x4a7   :  { %2959 = vmatprep.mubr.f32.mxu0 %v2626_v19  ;;  %3036 = vmatprep.mubr.f32.mxu1 %v2626_v19  ;;  %10181 = vtanh.f32 %v2626_v19 }
 0x4a8   :  { %v10180_v57 = vpop.eup %10179  ;;  %2960 = vmatmul.mubr.f32.vlgmr.msra.gmra.mrb[16].mxu0 %v13696_v51  ;;  %3037 = vmatmul.mubr.f32.vlgmr.msra.gmra.mrb[16].mxu1 %v13696_v51 }
 0x4a9   :  { %v13721_v61 = vmul.f32 %v10180_v57, %v2617_v53  ;;  %8352 = vmatpush1.bf16.msra.mxu0 %v8351_v33  ;;  %8416 = vmatpush1.bf16.msra.mxu1 %v8415_v15  ;;  %v8365_v15 = vpack.c.bf16 %v2716_v27, %v2708_v26  ;;  %v2755_v27 = vld [vmem:[%s18566_s4 + $0x3a0] sm:$0xff] }
 0x4aa   :  { %8354 = vmatprep.subr.bf16.mxu0 %v8353_v36  ;;  %8418 = vmatprep.subr.bf16.mxu1 %v8417_v39  ;;  %v2709_v36 = vld [vmem:[%s18566_s4 + $0x230] sm:$0xff] }
 0x4ab   :  { %2965 = vmatprep.mubr.f32.mxu0 %v13721_v61  ;;  %3042 = vmatprep.mubr.f32.mxu1 %v13721_v61  ;;  %10183 = vtanh.f32 %v13721_v61  ;;  %v2717_v39 = vld [vmem:[%s18566_s4 + $0x270] sm:$0xff] }
 0x4ac   :  { %2966 = vmatmul.mubr.f32.gmra.mrb[18].mxu0 %v13729_v55  ;;  %3043 = vmatmul.mubr.f32.gmra.mrb[18].mxu1 %v13729_v55  ;;  %v8431_v57 = vpack.c.bf16 %v2717_v39, %v2709_v36  ;;  %v2771_v36 = vld [vmem:[%s18566_s4 + $0x420] sm:$0xff] }
 0x4ad   :  { %8356 = vmatpush1.bf16.msra.mxu0 %v8355_v63  ;;  %8420 = vmatpush1.bf16.msra.mxu1 %v8419_v2  ;;  %v8433_v63 = vpack.c.bf16 %v2734_v20, %v2726_v45  ;;  %v2725_v2 = vld [vmem:[%s18566_s4 + $0x2b0] sm:$0xff]  ;;  %v2779_v39 = vld [vmem:[%s18566_s4 + $0x460] sm:$0xff] }
 0x4ae   :  { %3113 = vmatprep.mubr.f32.mxu0 %v2626_v19  ;;  %3190 = vmatprep.mubr.f32.mxu1 %v2626_v19  ;;  %v10475_v19 = vld [vmem:[%s18571_s6] ss:$0 sm:$0xff]  ;;  %v2773_v45 = vld [vmem:[%s18566_s4 + $0x430] sm:$0xff] }
 0x4af   :  { %8358 = vmatprep.subr.bf16.mxu0 %v8357_v35  ;;  %8422 = vmatprep.subr.bf16.mxu1 %v8421_v1  ;;  %v8371_v35 = vpack.c.bf16 %v2731_v32, %v2723_v58  ;;  %v8435_v1 = vpack.c.bf16 %v2733_v4, %v2725_v2  ;;  %v2781_v20 = vld [vmem:[%s18566_s4 + $0x470] sm:$0xff]  ;;  %v2798_v58 = vld [vmem:[%s18566_s4 + $0x4f8] sm:$0xff]  ;;  %v8383_v32 = vpack.c.bf16 %v2779_v39, %v2771_v36 }
 0x4b0   :  { %v8459_v39 = vpack.c.bf16 %v2829_v28, %v2821_v14  ;;  %v2891_v28 = vld [vmem:[%s18566_s4 + $0x7e0] sm:$0xff] }
 0x4b1   :  { %v10182_v31 = vpop.eup %10181  ;;  %8360 = vmatpush1.bf16.msra.mxu0 %v8359_v18  ;;  %8424 = vmatpush1.bf16.msra.mxu1 %v8423_v52  ;;  %v8437_v18 = vpack.c.bf16 %v2750_v62, %v2742_v11  ;;  %v2741_v52 = vld [vmem:[%s18566_s4 + $0x330] sm:$0xff]  ;;  %v2804_v11 = vld [vmem:[%s18566_s4 + $0x528] sm:$0xff] }
 0x4b2   :  { %8362 = vmatprep.subr.bf16.mxu0 %v8361_v22  ;;  %8426 = vmatprep.subr.bf16.mxu1 %v8425_v9  ;;  %v6965_v33 = vmul.f32 %v10475_v19, %v10182_v31  ;;  %v2764_v22 = vld [vmem:[%s18566_s4 + $0x3e8] sm:$0xff]  ;;  %v2758_v9 = vld [vmem:[%s18566_s4 + $0x3b8] sm:$0xff]  ;;  %v8439_v26 = vpack.c.bf16 %v2749_v8, %v2741_v52 }
 0x4b3   :  { %v8377_v44 = vpack.c.bf16 %v2764_v22, %v2756_v3  ;;  %v8441_v31 = vpack.c.bf16 %v2766_v6, %v2758_v9  ;;  %v2812_v62 = vld [vmem:[%s18566_s4 + $0x568] sm:$0xff]  ;;  %v2805_v3 = vld [vmem:[%s18566_s4 + $0x530] sm:$0xff] }
 0x4b4   :  { %6989 = vadd.xlane.f32.xlu0 %v6965_v33  ;;  %v2782_v33 = vld [vmem:[%s18566_s4 + $0x478] sm:$0xff]  ;;  %v8389_v52 = vpack.c.bf16 %v2812_v62, %v2804_v11  ;;  %v2813_v22 = vld [vmem:[%s18566_s4 + $0x570] sm:$0xff]  ;;  %v2820_v9 = vld [vmem:[%s18566_s4 + $0x5a8] sm:$0xff] }
 0x4b5   :  { %v10184_v53 = vpop.eup %10183  ;;  %8364 = vmatpush1.bf16.msra.mxu0 %v8363_v7  ;;  %8428 = vmatpush1.bf16.msra.mxu1 %v8427_v25  ;;  %v2757_v7 = vld [vmem:[%s18566_s4 + $0x3b0] sm:$0xff]  ;;  %v2828_v6 = vld [vmem:[%s18566_s4 + $0x5e8] sm:$0xff] }
 0x4b6   :  { %8366 = vmatprep.subr.bf16.mxu0 %v8365_v15  ;;  %8430 = vmatprep.subr.bf16.mxu1 %v8429_v34  ;;  %v6966_v59 = vmul.f32 %v10475_v19, %v10184_v53  ;;  %v2765_v25 = vld [vmem:[%s18566_s4 + $0x3f0] sm:$0xff]  ;;  %v2774_v19 = vld [vmem:[%s18566_s4 + $0x438] sm:$0xff]  ;;  %v8379_v15 = vpack.c.bf16 %v2763_v30, %v2755_v27  ;;  %v2788_v53 = vld [vmem:[%s18566_s4 + $0x4a8] sm:$0xff]  ;;  %v8455_v30 = vpack.c.bf16 %v2813_v22, %v2805_v3 }
 0x4b7   :  { %v8443_v34 = vpack.c.bf16 %v2765_v25, %v2757_v7  ;;  %v8445_v41 = vpack.c.bf16 %v2782_v33, %v2774_v19  ;;  %v8393_v7 = vpack.c.bf16 %v2828_v6, %v2820_v9  ;;  %v2836_v19 = vld [vmem:[%s18566_s4 + $0x628] sm:$0xff]  ;;  %v2853_v11 = vld [vmem:[%s18566_s4 + $0x6b0] sm:$0xff] }
 0x4b8   :  { %6991 = vadd.xlane.f32.xlu1 %v6966_v59  ;;  %v8447_v59 = vpack.c.bf16 %v2781_v20, %v2773_v45  ;;  %v2844_v33 = vld [vmem:[%s18566_s4 + $0x668] sm:$0xff]  ;;  %v2861_v62 = vld [vmem:[%s18566_s4 + $0x6f0] sm:$0xff] }
 0x4b9   :  { %8368 = vmatpush1.bf16.msra.mxu0 %v8367_v5  ;;  %8432 = vmatpush1.bf16.msra.mxu1 %v8431_v57  ;;  %v2796_v5 = vld [vmem:[%s18566_s4 + $0x4e8] sm:$0xff]  ;;  %v2790_v57 = vld [vmem:[%s18566_s4 + $0x4b8] sm:$0xff]  ;;  %v8397_v45 = vpack.c.bf16 %v2844_v33, %v2836_v19  ;;  %v2869_v9 = vld [vmem:[%s18566_s4 + $0x730] sm:$0xff] }
 0x4ba   :  { %8370 = vmatprep.subr.bf16.mxu0 %v8369_v60  ;;  %8434 = vmatprep.subr.bf16.mxu1 %v8433_v63  ;;  %v2787_v60 = vld [vmem:[%s18566_s4 + $0x4a0] sm:$0xff]  ;;  %v8385_v2 = vpack.c.bf16 %v2796_v5, %v2788_v53  ;;  %v8449_v4 = vpack.c.bf16 %v2798_v58, %v2790_v57  ;;  %v2837_v53 = vld [vmem:[%s18566_s4 + $0x630] sm:$0xff]  ;;  %v2852_v57 = vld [vmem:[%s18566_s4 + $0x6a8] sm:$0xff] }
 0x4bb   :  { %v2795_v63 = vld [vmem:[%s18566_s4 + $0x4e0] sm:$0xff]  ;;  %v2845_v5 = vld [vmem:[%s18566_s4 + $0x670] sm:$0xff]  ;;  %v2860_v58 = vld [vmem:[%s18566_s4 + $0x6e8] sm:$0xff] }
 0x4bc   :  { %v8387_v17 = vpack.c.bf16 %v2795_v63, %v2787_v60  ;;  %v8463_v63 = vpack.c.bf16 %v2845_v5, %v2837_v53  ;;  %v8401_v38 = vpack.c.bf16 %v2860_v58, %v2852_v57  ;;  %v2877_v6 = vld [vmem:[%s18566_s4 + $0x770] sm:$0xff]  ;;  %v3316_v58 = vld [vmem:[%s18566_s4 + $0x88] sm:$0xff] }
 0x4bd   :  { %8372 = vmatpush1.bf16.msra.mxu0 %v8371_v35  ;;  %8436 = vmatpush1.bf16.msra.mxu1 %v8435_v1  ;;  %v2806_v35 = vld [vmem:[%s18566_s4 + $0x538] sm:$0xff]  ;;  %v2885_v19 = vld [vmem:[%s18566_s4 + $0x7b0] sm:$0xff] }
 0x4be   :  { %8374 = vmatprep.subr.bf16.mxu0 %v8373_v54  ;;  %8438 = vmatprep.subr.bf16.mxu1 %v8437_v18  ;;  %v2814_v1 = vld [vmem:[%s18566_s4 + $0x578] sm:$0xff]  ;;  %v2803_v54 = vld [vmem:[%s18566_s4 + $0x520] sm:$0xff]  ;;  %v2893_v33 = vld [vmem:[%s18566_s4 + $0x7f0] sm:$0xff] }
 0x4bf   :  { %v2811_v18 = vld [vmem:[%s18566_s4 + $0x560] sm:$0xff]  ;;  %v8453_v8 = vpack.c.bf16 %v2814_v1, %v2806_v35  ;;  %v2868_v35 = vld [vmem:[%s18566_s4 + $0x728] sm:$0xff]  ;;  %v3301_v53 = vld [vmem:[%s18566_s4 + $0x10] sm:$0xff] }
 0x4c0   :  { %v8391_v27 = vpack.c.bf16 %v2811_v18, %v2803_v54  ;;  %v2876_v1 = vld [vmem:[%s18566_s4 + $0x768] sm:$0xff]  ;;  %v8467_v18 = vpack.c.bf16 %v2861_v62, %v2853_v11  ;;  %v3309_v5 = vld [vmem:[%s18566_s4 + $0x50] sm:$0xff] }
 0x4c1   :  { %8376 = vmatpush1.bf16.msra.mxu0 %v8375_v13  ;;  %8440 = vmatpush1.bf16.msra.mxu1 %v8439_v26  ;;  %v2822_v13 = vld [vmem:[%s18566_s4 + $0x5b8] sm:$0xff]  ;;  %v8405_v3 = vpack.c.bf16 %v2876_v1, %v2868_v35  ;;  %v8543_v57 = vpack.c.bf16 %v3309_v5, %v3301_v53  ;;  %v3317_v11 = vld [vmem:[%s18566_s4 + $0x90] sm:$0xff]  ;;  %v3332_v35 = vld [vmem:[%s18566_s4 + $0x108] sm:$0xff] }
 0x4c2   :  { %8378 = vmatprep.subr.bf16.mxu0 %v8377_v44  ;;  %8442 = vmatprep.subr.bf16.mxu1 %v8441_v31  ;;  %v2830_v26 = vld [vmem:[%s18566_s4 + $0x5f8] sm:$0xff]  ;;  %v2819_v44 = vld [vmem:[%s18566_s4 + $0x5a0] sm:$0xff]  ;;  %v3325_v62 = vld [vmem:[%s18566_s4 + $0xd0] sm:$0xff] }
 0x4c3   :  { %v2827_v31 = vld [vmem:[%s18566_s4 + $0x5e0] sm:$0xff]  ;;  %v8457_v25 = vpack.c.bf16 %v2830_v26, %v2822_v13  ;;  %v2884_v13 = vld [vmem:[%s18566_s4 + $0x7a8] sm:$0xff]  ;;  %v8547_v1 = vpack.c.bf16 %v3325_v62, %v3317_v11 }
 0x4c4   :  { %v8395_v36 = vpack.c.bf16 %v2827_v31, %v2819_v44  ;;  %v2892_v26 = vld [vmem:[%s18566_s4 + $0x7e8] sm:$0xff]  ;;  %v8471_v31 = vpack.c.bf16 %v2877_v6, %v2869_v9  ;;  %v3341_v6 = vld [vmem:[%s18566_s4 + $0x150] sm:$0xff] }
 0x4c5   :  { %8380 = vmatpush1.bf16.msra.mxu0 %v8379_v15  ;;  %8444 = vmatpush1.bf16.msra.mxu1 %v8443_v34  ;;  %v2838_v15 = vld [vmem:[%s18566_s4 + $0x638] sm:$0xff]  ;;  %v3380_v53 = vld [vmem:[%s18566_s4 + $0x288] sm:$0xff] }
 0x4c6   :  { %8382 = vmatprep.subr.bf16.mxu0 %v8381_v40  ;;  %8446 = vmatprep.subr.bf16.mxu1 %v8445_v41  ;;  %v2846_v34 = vld [vmem:[%s18566_s4 + $0x678] sm:$0xff]  ;;  %v2835_v40 = vld [vmem:[%s18566_s4 + $0x620] sm:$0xff]  ;;  %v3388_v5 = vld [vmem:[%s18566_s4 + $0x2c8] sm:$0xff] }
 0x4c7   :  { %v2843_v41 = vld [vmem:[%s18566_s4 + $0x660] sm:$0xff]  ;;  %v8461_v20 = vpack.c.bf16 %v2846_v34, %v2838_v15  ;;  %v8475_v34 = vpack.c.bf16 %v2893_v33, %v2885_v19  ;;  %v3357_v19 = vld [vmem:[%s18566_s4 + $0x1d0] sm:$0xff]  ;;  %v3396_v11 = vld [vmem:[%s18566_s4 + $0x308] sm:$0xff] }
 0x4c8   :  { %v8399_v60 = vpack.c.bf16 %v2843_v41, %v2835_v40  ;;  %v3307_v41 = vld [vmem:[%s18566_s4 + $0x40] sm:$0xff]  ;;  %v3404_v62 = vld [vmem:[%s18566_s4 + $0x348] sm:$0xff] }
 0x4c9   :  { %8384 = vmatpush1.bf16.msra.mxu0 %v8383_v32  ;;  %8448 = vmatpush1.bf16.msra.mxu1 %v8447_v59  ;;  %v2854_v32 = vld [vmem:[%s18566_s4 + $0x6b8] sm:$0xff] }
 0x4ca   :  { %8386 = vmatprep.subr.bf16.mxu0 %v8385_v2  ;;  %8450 = vmatprep.subr.bf16.mxu1 %v8449_v4  ;;  %v2862_v59 = vld [vmem:[%s18566_s4 + $0x6f8] sm:$0xff]  ;;  %v2851_v2 = vld [vmem:[%s18566_s4 + $0x6a0] sm:$0xff] }
 0x4cb   :  { %v2859_v4 = vld [vmem:[%s18566_s4 + $0x6e0] sm:$0xff]  ;;  %v8465_v56 = vpack.c.bf16 %v2862_v59, %v2854_v32  ;;  %v3324_v32 = vld [vmem:[%s18566_s4 + $0xc8] sm:$0xff]  ;;  %v3318_v59 = vld [vmem:[%s18566_s4 + $0x98] sm:$0xff] }
 0x4cc   :  { %v8403_v54 = vpack.c.bf16 %v2859_v4, %v2851_v2  ;;  %v3315_v2 = vld [vmem:[%s18566_s4 + $0x80] sm:$0xff] }
 0x4cd   :  { %8388 = vmatpush1.bf16.msra.mxu0 %v8387_v17  ;;  %8452 = vmatpush1.bf16.msra.mxu1 %v8451_v10  ;;  %v2870_v17 = vld [vmem:[%s18566_s4 + $0x738] sm:$0xff]  ;;  %v3323_v4 = vld [vmem:[%s18566_s4 + $0xc0] sm:$0xff] }
 0x4ce   :  { %8390 = vmatprep.subr.bf16.mxu0 %v8389_v52  ;;  %8454 = vmatprep.subr.bf16.mxu1 %v8453_v8  ;;  %v2878_v10 = vld [vmem:[%s18566_s4 + $0x778] sm:$0xff]  ;;  %v2867_v52 = vld [vmem:[%s18566_s4 + $0x720] sm:$0xff] }
 0x4cf   :  { %v2875_v8 = vld [vmem:[%s18566_s4 + $0x760] sm:$0xff]  ;;  %v8469_v22 = vpack.c.bf16 %v2878_v10, %v2870_v17  ;;  %v3340_v17 = vld [vmem:[%s18566_s4 + $0x148] sm:$0xff]  ;;  %v3334_v10 = vld [vmem:[%s18566_s4 + $0x118] sm:$0xff] }
 0x4d0   :  { %v8407_v44 = vpack.c.bf16 %v2875_v8, %v2867_v52  ;;  %v3331_v8 = vld [vmem:[%s18566_s4 + $0x100] sm:$0xff] }
 0x4d1   :  { %8392 = vmatpush1.bf16.msra.mxu0 %v8391_v27  ;;  %8456 = vmatpush1.bf16.msra.mxu1 %v8455_v30  ;;  %v2886_v27 = vld [vmem:[%s18566_s4 + $0x7b8] sm:$0xff] }
 0x4d2   :  { %8394 = vmatprep.subr.bf16.mxu0 %v8393_v7  ;;  %8458 = vmatprep.subr.bf16.mxu1 %v8457_v25  ;;  %v2894_v30 = vld [vmem:[%s18566_s4 + $0x7f8] sm:$0xff]  ;;  %v2883_v7 = vld [vmem:[%s18566_s4 + $0x7a0] sm:$0xff]  ;;  %v8409_v25 = vpack.c.bf16 %v2892_v26, %v2884_v13  ;;  %v3348_v13 = vld [vmem:[%s18566_s4 + $0x188] sm:$0xff] }
 0x4d3   :  { %v8473_v14 = vpack.c.bf16 %v2894_v30, %v2886_v27  ;;  %v8411_v15 = vpack.c.bf16 %v2891_v28, %v2883_v7  ;;  %v3356_v26 = vld [vmem:[%s18566_s4 + $0x1c8] sm:$0xff]  ;;  %v3347_v7 = vld [vmem:[%s18566_s4 + $0x180] sm:$0xff]  ;;  %v3349_v28 = vld [vmem:[%s18566_s4 + $0x190] sm:$0xff] }
 0x4d4   :  { %v8489_v30 = vpack.c.bf16 %v3356_v26, %v3348_v13  ;;  %v3412_v13 = vld [vmem:[%s18566_s4 + $0x388] sm:$0xff] }
 0x4d5   :  { %8396 = vmatpush1.bf16.msra.mxu0 %v8395_v36  ;;  %8460 = vmatpush1.bf16.msra.mxu1 %v8459_v39  ;;  %v3300_v36 = vld [vmem:[%s18566_s4 + $0x8] sm:$0xff] }
 0x4d6   :  { %8398 = vmatprep.subr.bf16.mxu0 %v8397_v45  ;;  %8462 = vmatprep.subr.bf16.mxu1 %v8461_v20  ;;  %v3308_v39 = vld [vmem:[%s18566_s4 + $0x48] sm:$0xff] }
 0x4d7   :  { %v8477_v40 = vpack.c.bf16 %v3308_v39, %v3300_v36  ;;  %v3366_v36 = vld [vmem:[%s18566_s4 + $0x218] sm:$0xff]  ;;  %v8555_v39 = vpack.c.bf16 %v3357_v19, %v3349_v28  ;;  %v3420_v26 = vld [vmem:[%s18566_s4 + $0x3c8] sm:$0xff]  ;;  %v3421_v19 = vld [vmem:[%s18566_s4 + $0x3d0] sm:$0xff] }
 0x4d9   :  { %8400 = vmatpush1.bf16.msra.mxu0 %v8399_v60  ;;  %8464 = vmatpush1.bf16.msra.mxu1 %v8463_v63  ;;  %v8481_v60 = vpack.c.bf16 %v3324_v32, %v3316_v58  ;;  %v3326_v63 = vld [vmem:[%s18566_s4 + $0xd8] sm:$0xff] }
 0x4da   :  { %8402 = vmatprep.subr.bf16.mxu0 %v8401_v38  ;;  %8466 = vmatprep.subr.bf16.mxu1 %v8465_v56  ;;  %v8545_v38 = vpack.c.bf16 %v3326_v63, %v3318_v59  ;;  %v8483_v56 = vpack.c.bf16 %v3323_v4, %v3315_v2  ;;  %v3390_v58 = vld [vmem:[%s18566_s4 + $0x2d8] sm:$0xff]  ;;  %v3379_v63 = vld [vmem:[%s18566_s4 + $0x280] sm:$0xff]  ;;  %v3381_v4 = vld [vmem:[%s18566_s4 + $0x290] sm:$0xff] }
 0x4db   :  { %v3387_v2 = vld [vmem:[%s18566_s4 + $0x2c0] sm:$0xff] }
 0x4dd   :  { %8404 = vmatpush1.bf16.msra.mxu0 %v8403_v54  ;;  %8468 = vmatpush1.bf16.msra.mxu1 %v8467_v18  ;;  %v3342_v54 = vld [vmem:[%s18566_s4 + $0x158] sm:$0xff]  ;;  %v8485_v18 = vpack.c.bf16 %v3340_v17, %v3332_v35  ;;  %v8499_v17 = vpack.c.bf16 %v3387_v2, %v3379_v63  ;;  %v3451_v63 = vld [vmem:[%s18566_s4 + $0x4c0] sm:$0xff] }
 0x4de   :  { %8406 = vmatprep.subr.bf16.mxu0 %v8405_v3  ;;  %8470 = vmatprep.subr.bf16.mxu1 %v8469_v22  ;;  %v8549_v52 = vpack.c.bf16 %v3342_v54, %v3334_v10  ;;  %v3339_v3 = vld [vmem:[%s18566_s4 + $0x140] sm:$0xff]  ;;  %v3333_v22 = vld [vmem:[%s18566_s4 + $0x110] sm:$0xff]  ;;  %v3398_v35 = vld [vmem:[%s18566_s4 + $0x318] sm:$0xff]  ;;  %v8501_v54 = vpack.c.bf16 %v3404_v62, %v3396_v11 }
 0x4df   :  { %v8487_v9 = vpack.c.bf16 %v3339_v3, %v3331_v8  ;;  %v8551_v27 = vpack.c.bf16 %v3341_v6, %v3333_v22  ;;  %v3397_v3 = vld [vmem:[%s18566_s4 + $0x310] sm:$0xff]  ;;  %v3460_v62 = vld [vmem:[%s18566_s4 + $0x508] sm:$0xff] }
 0x4e0   :  { %v3405_v22 = vld [vmem:[%s18566_s4 + $0x350] sm:$0xff] }
 0x4e1   :  { %8408 = vmatpush1.bf16.msra.mxu0 %v8407_v44  ;;  %8472 = vmatpush1.bf16.msra.mxu1 %v8471_v31  ;;  %v3350_v44 = vld [vmem:[%s18566_s4 + $0x198] sm:$0xff]  ;;  %v8567_v6 = vpack.c.bf16 %v3405_v22, %v3397_v3  ;;  %v3461_v3 = vld [vmem:[%s18566_s4 + $0x510] sm:$0xff] }
 0x4e2   :  { %8410 = vmatprep.subr.bf16.mxu0 %v8409_v25  ;;  %8474 = vmatprep.subr.bf16.mxu1 %v8473_v14  ;;  %v3358_v31 = vld [vmem:[%s18566_s4 + $0x1d8] sm:$0xff]  ;;  %v3355_v14 = vld [vmem:[%s18566_s4 + $0x1c0] sm:$0xff]  ;;  %v3469_v22 = vld [vmem:[%s18566_s4 + $0x550] sm:$0xff] }
 0x4e3   :  { %v8553_v25 = vpack.c.bf16 %v3358_v31, %v3350_v44  ;;  %v8491_v33 = vpack.c.bf16 %v3355_v14, %v3347_v7  ;;  %v3422_v44 = vld [vmem:[%s18566_s4 + $0x3d8] sm:$0xff]  ;;  %v3411_v7 = vld [vmem:[%s18566_s4 + $0x380] sm:$0xff]  ;;  %v3413_v14 = vld [vmem:[%s18566_s4 + $0x390] sm:$0xff] }
 0x4e5   :  { %8412 = vmatpush1.bf16.msra.mxu0 %v8411_v15  ;;  %8476 = vmatpush1.bf16.msra.mxu1 %v8475_v34  ;;  %v3364_v15 = vld [vmem:[%s18566_s4 + $0x208] sm:$0xff] }
 0x4e6   :  { %8478 = vmatprep.subr.bf16.mxu0 %v8477_v40  ;;  %v3372_v34 = vld [vmem:[%s18566_s4 + $0x248] sm:$0xff]  ;;  %v3374_v40 = vld [vmem:[%s18566_s4 + $0x258] sm:$0xff] }
 0x4e8   :  { %3114 = vmatmul.mubr.f32.vlgmr.msra.gmra.mrb[52].mxu0 %v13696_v51  ;;  %3191 = vmatmul.mubr.f32.vlgmr.msra.gmra.mrb[52].mxu1 %v13696_v51  ;;  %v3302_v51 = vld [vmem:[%s18566_s4 + $0x18] sm:$0xff] }
 0x4e9   :  { %3119 = vmatprep.mubr.f32.mxu0 %v13721_v61  ;;  %3196 = vmatprep.mubr.f32.mxu1 %v13721_v61  ;;  %v3310_v61 = vld [vmem:[%s18566_s4 + $0x58] sm:$0xff] }
 0x4ea   :  { %v8541_v45 = vpack.c.bf16 %v3310_v61, %v3302_v51  ;;  %v8493_v51 = vpack.c.bf16 %v3372_v34, %v3364_v15  ;;  %v3363_v61 = vld [vmem:[%s18566_s4 + $0x200] sm:$0xff]  ;;  %v3428_v15 = vld [vmem:[%s18566_s4 + $0x408] sm:$0xff] }
 0x4eb   :  { %v3436_v34 = vld [vmem:[%s18566_s4 + $0x448] sm:$0xff] }
 0x4ec   :  { %3120 = vmatmul.mubr.f32.gmra.mrb[54].mxu0 %v13729_v55  ;;  %3197 = vmatmul.mubr.f32.gmra.mrb[54].mxu1 %v13729_v55  ;;  %v3299_v55 = vld [vmem:[%s18566_s4] sm:$0xff] }
 0x4ed   :  { %v8479_v20 = vpack.c.bf16 %v3307_v41, %v3299_v55  ;;  %8542 = vmatprep.subr.bf16.mxu1 %v8541_v45  ;;  %v3371_v55 = vld [vmem:[%s18566_s4 + $0x240] sm:$0xff]  ;;  %v8557_v41 = vpack.c.bf16 %v3374_v40, %v3366_v36  ;;  %v3365_v45 = vld [vmem:[%s18566_s4 + $0x210] sm:$0xff]  ;;  %v3430_v36 = vld [vmem:[%s18566_s4 + $0x418] sm:$0xff] }
 0x4ee   :  { %8544 = vmatpush1.bf16.msra.mxu1 %v8543_v57  ;;  %v3382_v57 = vld [vmem:[%s18566_s4 + $0x298] sm:$0xff]  ;;  %v8495_v32 = vpack.c.bf16 %v3371_v55, %v3363_v61  ;;  %v3427_v40 = vld [vmem:[%s18566_s4 + $0x400] sm:$0xff] }
 0x4ef   :  { %8480 = vmatpush1.bf16.msra.mxu0 %v8479_v20  ;;  %8546 = vmatprep.subr.bf16.mxu1 %v8545_v38  ;;  %v3373_v20 = vld [vmem:[%s18566_s4 + $0x250] sm:$0xff]  ;;  %v8561_v38 = vpack.c.bf16 %v3390_v58, %v3382_v57  ;;  %v3435_v61 = vld [vmem:[%s18566_s4 + $0x440] sm:$0xff]  ;;  %v3452_v57 = vld [vmem:[%s18566_s4 + $0x4c8] sm:$0xff] }
 0x4f0   :  { %8482 = vmatprep.subr.bf16.mxu0 %v8481_v60  ;;  %v8559_v59 = vpack.c.bf16 %v3373_v20, %v3365_v45  ;;  %v8497_v60 = vpack.c.bf16 %v3388_v5, %v3380_v53  ;;  %v3429_v45 = vld [vmem:[%s18566_s4 + $0x410] sm:$0xff]  ;;  %v3444_v5 = vld [vmem:[%s18566_s4 + $0x488] sm:$0xff]  ;;  %v3446_v58 = vld [vmem:[%s18566_s4 + $0x498] sm:$0xff] }
 0x4f1   :  { %v3437_v20 = vld [vmem:[%s18566_s4 + $0x450] sm:$0xff] }
 0x4f2   :  { %8548 = vmatpush1.bf16.msra.mxu1 %v8547_v1  ;;  %v3406_v1 = vld [vmem:[%s18566_s4 + $0x358] sm:$0xff]  ;;  %v8575_v53 = vpack.c.bf16 %v3437_v20, %v3429_v45  ;;  %v3501_v45 = vld [vmem:[%s18566_s4 + $0x650] sm:$0xff] }
 0x4f3   :  { %8484 = vmatpush1.bf16.msra.mxu0 %v8483_v56  ;;  %8550 = vmatprep.subr.bf16.mxu1 %v8549_v52  ;;  %v3389_v56 = vld [vmem:[%s18566_s4 + $0x2d0] sm:$0xff]  ;;  %v3403_v52 = vld [vmem:[%s18566_s4 + $0x340] sm:$0xff]  ;;  %v8565_v8 = vpack.c.bf16 %v3406_v1, %v3398_v35  ;;  %v3468_v35 = vld [vmem:[%s18566_s4 + $0x548] sm:$0xff] }
 0x4f4   :  { %8486 = vmatprep.subr.bf16.mxu0 %v8485_v18  ;;  %v8563_v10 = vpack.c.bf16 %v3389_v56, %v3381_v4  ;;  %v3395_v18 = vld [vmem:[%s18566_s4 + $0x300] sm:$0xff]  ;;  %v3453_v56 = vld [vmem:[%s18566_s4 + $0x4d0] sm:$0xff]  ;;  %v3462_v1 = vld [vmem:[%s18566_s4 + $0x518] sm:$0xff] }
 0x4f6   :  { %8552 = vmatpush1.bf16.msra.mxu1 %v8551_v27  ;;  %v3414_v27 = vld [vmem:[%s18566_s4 + $0x398] sm:$0xff] }
 0x4f7   :  { %8488 = vmatpush1.bf16.msra.mxu0 %v8487_v9  ;;  %8554 = vmatprep.subr.bf16.mxu1 %v8553_v25  ;;  %v8503_v9 = vpack.c.bf16 %v3403_v52, %v3395_v18  ;;  %v8569_v31 = vpack.c.bf16 %v3422_v44, %v3414_v27  ;;  %v3419_v25 = vld [vmem:[%s18566_s4 + $0x3c0] sm:$0xff] }
 0x4f8   :  { %8490 = vmatprep.subr.bf16.mxu0 %v8489_v30  ;;  %v8505_v30 = vpack.c.bf16 %v3420_v26, %v3412_v13  ;;  %v8507_v28 = vpack.c.bf16 %v3419_v25, %v3411_v7  ;;  %v3467_v18 = vld [vmem:[%s18566_s4 + $0x540] sm:$0xff]  ;;  %v3484_v13 = vld [vmem:[%s18566_s4 + $0x5c8] sm:$0xff]  ;;  %v3478_v26 = vld [vmem:[%s18566_s4 + $0x598] sm:$0xff] }
 0x4f9   :  { %v3475_v44 = vld [vmem:[%s18566_s4 + $0x580] sm:$0xff] }
 0x4fa   :  { %8556 = vmatpush1.bf16.msra.mxu1 %v8555_v39  ;;  %v8509_v39 = vpack.c.bf16 %v3436_v34, %v3428_v15  ;;  %v3500_v15 = vld [vmem:[%s18566_s4 + $0x648] sm:$0xff]  ;;  %v3494_v34 = vld [vmem:[%s18566_s4 + $0x618] sm:$0xff] }
 0x4fb   :  { %8492 = vmatpush1.bf16.msra.mxu0 %v8491_v33  ;;  %8558 = vmatprep.subr.bf16.mxu1 %v8557_v41  ;;  %v8571_v33 = vpack.c.bf16 %v3421_v19, %v3413_v14  ;;  %v8511_v41 = vpack.c.bf16 %v3435_v61, %v3427_v40  ;;  %v3477_v14 = vld [vmem:[%s18566_s4 + $0x590] sm:$0xff]  ;;  %v3499_v40 = vld [vmem:[%s18566_s4 + $0x640] sm:$0xff] }
 0x4fc   :  { %8494 = vmatprep.subr.bf16.mxu0 %v8493_v51  ;;  %v3438_v51 = vld [vmem:[%s18566_s4 + $0x458] sm:$0xff] }
 0x4fd   :  { %v8573_v55 = vpack.c.bf16 %v3438_v51, %v3430_v36  ;;  %v3491_v51 = vld [vmem:[%s18566_s4 + $0x600] sm:$0xff] }
 0x4fe   :  { %8560 = vmatpush1.bf16.msra.mxu1 %v8559_v59  ;;  %v3454_v59 = vld [vmem:[%s18566_s4 + $0x4d8] sm:$0xff] }
 0x4ff   :  { %8496 = vmatpush1.bf16.msra.mxu0 %v8495_v32  ;;  %8562 = vmatprep.subr.bf16.mxu1 %v8561_v38  ;;  %v8513_v32 = vpack.c.bf16 %v3452_v57, %v3444_v5  ;;  %v8577_v2 = vpack.c.bf16 %v3454_v59, %v3446_v58  ;;  %v3445_v38 = vld [vmem:[%s18566_s4 + $0x490] sm:$0xff]  ;;  %v3516_v5 = vld [vmem:[%s18566_s4 + $0x6c8] sm:$0xff]  ;;  %v3510_v57 = vld [vmem:[%s18566_s4 + $0x698] sm:$0xff] }
 0x500   :  { %8498 = vmatprep.subr.bf16.mxu0 %v8497_v60  ;;  %v3443_v60 = vld [vmem:[%s18566_s4 + $0x480] sm:$0xff]  ;;  %v8579_v11 = vpack.c.bf16 %v3453_v56, %v3445_v38  ;;  %v3517_v38 = vld [vmem:[%s18566_s4 + $0x6d0] sm:$0xff] }
 0x501   :  { %v8515_v4 = vpack.c.bf16 %v3451_v63, %v3443_v60  ;;  %v3507_v59 = vld [vmem:[%s18566_s4 + $0x680] sm:$0xff] }
 0x502   :  { %8564 = vmatpush1.bf16.msra.mxu1 %v8563_v10  ;;  %v3470_v10 = vld [vmem:[%s18566_s4 + $0x558] sm:$0xff]  ;;  %v3515_v60 = vld [vmem:[%s18566_s4 + $0x6c0] sm:$0xff] }
 0x503   :  { %8500 = vmatpush1.bf16.msra.mxu0 %v8499_v17  ;;  %8566 = vmatprep.subr.bf16.mxu1 %v8565_v8  ;;  %v8517_v17 = vpack.c.bf16 %v3468_v35, %v3460_v62  ;;  %v8581_v52 = vpack.c.bf16 %v3470_v10, %v3462_v1  ;;  %v3532_v62 = vld [vmem:[%s18566_s4 + $0x748] sm:$0xff]  ;;  %v3526_v35 = vld [vmem:[%s18566_s4 + $0x718] sm:$0xff]  ;;  %v3523_v10 = vld [vmem:[%s18566_s4 + $0x700] sm:$0xff] }
 0x504   :  { %8502 = vmatprep.subr.bf16.mxu0 %v8501_v54  ;;  %v3459_v54 = vld [vmem:[%s18566_s4 + $0x500] sm:$0xff] }
 0x505   :  { %v8519_v8 = vpack.c.bf16 %v3467_v18, %v3459_v54  ;;  %v3531_v54 = vld [vmem:[%s18566_s4 + $0x740] sm:$0xff] }
 0x506   :  { %8568 = vmatpush1.bf16.msra.mxu1 %v8567_v6  ;;  %v3476_v6 = vld [vmem:[%s18566_s4 + $0x588] sm:$0xff] }
 0x507   :  { %8504 = vmatpush1.bf16.msra.mxu0 %v8503_v9  ;;  %8570 = vmatprep.subr.bf16.mxu1 %v8569_v31  ;;  %v8583_v9 = vpack.c.bf16 %v3469_v22, %v3461_v3  ;;  %v8521_v27 = vpack.c.bf16 %v3484_v13, %v3476_v6  ;;  %v3483_v31 = vld [vmem:[%s18566_s4 + $0x5c0] sm:$0xff]  ;;  %v3533_v3 = vld [vmem:[%s18566_s4 + $0x750] sm:$0xff]  ;;  %v3548_v6 = vld [vmem:[%s18566_s4 + $0x7c8] sm:$0xff] }
 0x508   :  { %8506 = vmatprep.subr.bf16.mxu0 %v8505_v30  ;;  %v3486_v30 = vld [vmem:[%s18566_s4 + $0x5d8] sm:$0xff]  ;;  %v8523_v25 = vpack.c.bf16 %v3483_v31, %v3475_v44  ;;  %v3547_v44 = vld [vmem:[%s18566_s4 + $0x7c0] sm:$0xff] }
 0x509   :  { %v8585_v7 = vpack.c.bf16 %v3486_v30, %v3478_v26  ;;  %v3542_v13 = vld [vmem:[%s18566_s4 + $0x798] sm:$0xff]  ;;  %v3539_v30 = vld [vmem:[%s18566_s4 + $0x780] sm:$0xff] }
 0x50a   :  { %8572 = vmatpush1.bf16.msra.mxu1 %v8571_v33  ;;  %v3492_v33 = vld [vmem:[%s18566_s4 + $0x608] sm:$0xff] }
 0x50b   :  { %8508 = vmatpush1.bf16.msra.mxu0 %v8507_v28  ;;  %8574 = vmatprep.subr.bf16.mxu1 %v8573_v55  ;;  %v3485_v28 = vld [vmem:[%s18566_s4 + $0x5d0] sm:$0xff]  ;;  %v8525_v36 = vpack.c.bf16 %v3500_v15, %v3492_v33  ;;  %v8527_v55 = vpack.c.bf16 %v3499_v40, %v3491_v51  ;;  %v3312_v33 = vld [vmem:[%s18566_s4 + $0x68] sm:$0xff]  ;;  %v3306_v15 = vld [vmem:[%s18566_s4 + $0x38] sm:$0xff] }
 0x50c   :  { %8510 = vmatprep.subr.bf16.mxu0 %v8509_v39  ;;  %v8587_v19 = vpack.c.bf16 %v3485_v28, %v3477_v14  ;;  %v3502_v39 = vld [vmem:[%s18566_s4 + $0x658] sm:$0xff]  ;;  %v3549_v14 = vld [vmem:[%s18566_s4 + $0x7d0] sm:$0xff] }
 0x50d   :  { %v8589_v61 = vpack.c.bf16 %v3502_v39, %v3494_v34 }
 0x50e   :  { %8576 = vmatpush1.bf16.msra.mxu1 %v8575_v53  ;;  %v3508_v53 = vld [vmem:[%s18566_s4 + $0x688] sm:$0xff] }
 0x50f   :  { %8512 = vmatpush1.bf16.msra.mxu0 %v8511_v41  ;;  %8578 = vmatprep.subr.bf16.mxu1 %v8577_v2  ;;  %v3493_v41 = vld [vmem:[%s18566_s4 + $0x610] sm:$0xff]  ;;  %v8529_v58 = vpack.c.bf16 %v3516_v5, %v3508_v53  ;;  %v8531_v2 = vpack.c.bf16 %v3515_v60, %v3507_v59 }
 0x510   :  { %8514 = vmatprep.subr.bf16.mxu0 %v8513_v32  ;;  %v8591_v20 = vpack.c.bf16 %v3501_v45, %v3493_v41  ;;  %v3518_v32 = vld [vmem:[%s18566_s4 + $0x6d8] sm:$0xff] }
 0x511   :  { %v8593_v63 = vpack.c.bf16 %v3518_v32, %v3510_v57 }
 0x512   :  { %8580 = vmatpush1.bf16.msra.mxu1 %v8579_v11  ;;  %v3524_v11 = vld [vmem:[%s18566_s4 + $0x708] sm:$0xff] }
 0x513   :  { %8516 = vmatpush1.bf16.msra.mxu0 %v8515_v4  ;;  %8582 = vmatprep.subr.bf16.mxu1 %v8581_v52  ;;  %v3509_v4 = vld [vmem:[%s18566_s4 + $0x690] sm:$0xff]  ;;  %v8533_v1 = vpack.c.bf16 %v3532_v62, %v3524_v11  ;;  %v8535_v52 = vpack.c.bf16 %v3531_v54, %v3523_v10 }
 0x514   :  { %8518 = vmatprep.subr.bf16.mxu0 %v8517_v17  ;;  %v8595_v56 = vpack.c.bf16 %v3517_v38, %v3509_v4  ;;  %v3534_v17 = vld [vmem:[%s18566_s4 + $0x758] sm:$0xff] }
 0x515   :  { %v8597_v18 = vpack.c.bf16 %v3534_v17, %v3526_v35 }
 0x516   :  { %8584 = vmatpush1.bf16.msra.mxu1 %v8583_v9  ;;  %v3540_v9 = vld [vmem:[%s18566_s4 + $0x788] sm:$0xff] }
 0x517   :  { %8520 = vmatpush1.bf16.msra.mxu0 %v8519_v8  ;;  %8586 = vmatprep.subr.bf16.mxu1 %v8585_v7  ;;  %v3525_v8 = vld [vmem:[%s18566_s4 + $0x710] sm:$0xff]  ;;  %v8537_v26 = vpack.c.bf16 %v3548_v6, %v3540_v9  ;;  %v8539_v7 = vpack.c.bf16 %v3547_v44, %v3539_v30 }
 0x518   :  { %8522 = vmatprep.subr.bf16.mxu0 %v8521_v27  ;;  %v8599_v22 = vpack.c.bf16 %v3533_v3, %v3525_v8  ;;  %v3550_v27 = vld [vmem:[%s18566_s4 + $0x7d8] sm:$0xff] }
 0x519   :  { %v8601_v31 = vpack.c.bf16 %v3550_v27, %v3542_v13 }
 0x51a   :  { %8588 = vmatpush1.bf16.msra.mxu1 %v8587_v19  ;;  %v3304_v19 = vld [vmem:[%s18566_s4 + $0x28] sm:$0xff] }
 0x51b   :  { %8524 = vmatpush1.bf16.msra.mxu0 %v8523_v25  ;;  %8590 = vmatprep.subr.bf16.mxu1 %v8589_v61  ;;  %v3541_v25 = vld [vmem:[%s18566_s4 + $0x790] sm:$0xff]  ;;  %v8605_v34 = vpack.c.bf16 %v3312_v33, %v3304_v19 }
 0x51c   :  { %8526 = vmatprep.subr.bf16.mxu0 %v8525_v36  ;;  %v8603_v28 = vpack.c.bf16 %v3549_v14, %v3541_v25  ;;  %v3314_v36 = vld [vmem:[%s18566_s4 + $0x78] sm:$0xff] }
 0x51d   :  { %v8669_v39 = vpack.c.bf16 %v3314_v36, %v3306_v15 }
 0x51e   :  { %8592 = vmatpush1.bf16.msra.mxu1 %v8591_v20 }
 0x51f   :  { %8528 = vmatpush1.bf16.msra.mxu0 %v8527_v55  ;;  %8594 = vmatprep.subr.bf16.mxu1 %v8593_v63 }
 0x520   :  { %8530 = vmatprep.subr.bf16.mxu0 %v8529_v58 }
 0x522   :  { %8596 = vmatpush1.bf16.msra.mxu1 %v8595_v56 }
 0x523   :  { %8532 = vmatpush1.bf16.msra.mxu0 %v8531_v2  ;;  %8598 = vmatprep.subr.bf16.mxu1 %v8597_v18 }
 0x524   :  { %8534 = vmatprep.subr.bf16.mxu0 %v8533_v1 }
 0x526   :  { %8600 = vmatpush1.bf16.msra.mxu1 %v8599_v22 }
 0x527   :  { %8536 = vmatpush1.bf16.msra.mxu0 %v8535_v52  ;;  %8602 = vmatprep.subr.bf16.mxu1 %v8601_v31 }
 0x528   :  { %8538 = vmatprep.subr.bf16.mxu0 %v8537_v26 }
 0x52a   :  { %8604 = vmatpush1.bf16.msra.mxu1 %v8603_v28 }
 0x52b   :  { %8540 = vmatpush1.bf16.msra.mxu0 %v8539_v7  ;;  %8670 = vmatprep.subr.bf16.mxu1 %v8669_v39 }
 0x52c   :  { %8606 = vmatprep.subr.bf16.mxu0 %v8605_v34 }
 0x57b   :  { %v2961_v51 = vpop.f32.mrb[16].mxu0  ;;  %v3038_v40 = vpop.f32.mrb[16].mxu1 }
 0x57c   :  { %v9897_v61 = vadd.f32 %v2961_v51, %v11107_v48  ;;  %v2963_v55 = vpop.f32.mrb[17].mxu0  ;;  %v3040_v41 = vpop.f32.mrb[17].mxu1  ;;  %v9933_v45 = vadd.f32 %v3038_v40, %v11113_v50 }
 0x57d   :  { %v9898_v20 = vadd.f32 %v2963_v55, %v11110_v49  ;;  %v9934_v39 = vadd.f32 %v3040_v41, %v11124_v0 }
 0x57e   :  { %10185 = vtanh.f32 %v9897_v61 }
 0x57f   :  { %v2967_v53 = vpop.f32.mrb[18].mxu0  ;;  %v3044_v5 = vpop.f32.mrb[18].mxu1  ;;  %10187 = vtanh.f32 %v9898_v20 }
 0x580   :  { %v9899_v57 = vadd.f32 %v2967_v53, %v11107_v48  ;;  %v2969_v58 = vpop.f32.mrb[19].mxu0  ;;  %v3046_v32 = vpop.f32.mrb[19].mxu1  ;;  %10189 = vtanh.f32 %v9933_v45  ;;  %v9935_v60 = vadd.f32 %v3044_v5, %v11113_v50 }
 0x581   :  { %v9900_v59 = vadd.f32 %v2969_v58, %v11110_v49  ;;  %v9936_v5 = vadd.f32 %v3046_v32, %v11124_v0 }
 0x582   :  { %10191 = vtanh.f32 %v9899_v57 }
 0x583   :  { %10193 = vtanh.f32 %v9900_v59 }
 0x584   :  { %10195 = vtanh.f32 %v9935_v60 }
 0x588   :  { %v10186_v63 = vpop.eup %10185 }
 0x589   :  { %v3228_v2 = vmul.f32 0.5, %v10186_v63  ;;  %v10188_v4 = vpop.eup %10187 }
 0x58a   :  { %v10190_v38 = vpop.eup %10189  ;;  %v3232_v11 = vmul.f32 0.5, %v10188_v4 }
 0x58b   :  { %v3230_v56 = vadd.f32 0.5, %v3228_v2 }
 0x58c   :  { %v10192_v62 = vpop.eup %10191  ;;  %v3234_v35 = vadd.f32 0.5, %v3232_v11 }
 0x58d   :  { %v3242_v1 = vmul.f32 %v10190_v38, %v3230_v56  ;;  %v3229_v17 = vmul.f32 0.5, %v10192_v62  ;;  %v10194_v10 = vpop.eup %10193 }
 0x58e   :  { %v3240_v54 = vmul.f32 %v3234_v35, %v13644_v47  ;;  %v3233_v52 = vmul.f32 0.5, %v10194_v10  ;;  %v10196_v8 = vpop.eup %10195 }
 0x58f   :  { %v3231_v18 = vadd.f32 0.5, %v3229_v17 }
 0x590   :  { %v14466_v3 = vadd.f32 %v3242_v1, %v3240_v54  ;;  %v3235_v22 = vadd.f32 0.5, %v3233_v52  ;;  %v3305_v52 = vld [vmem:[%s18566_s4 + $0x30] sm:$0xff] }
 0x591   :  { %v3243_v9 = vmul.f32 %v10196_v8, %v3231_v18  ;;  %v3303_v18 = vld [vmem:[%s18566_s4 + $0x20] sm:$0xff]  ;;  %v3313_v8 = vld [vmem:[%s18566_s4 + $0x70] sm:$0xff] }
 0x592   :  { %v3241_v6 = vmul.f32 %v3235_v22, %v13647_v29  ;;  %v3320_v22 = vld [vmem:[%s18566_s4 + $0xa8] sm:$0xff] }
 0x594   :  { %v14469_v13 = vadd.f32 %v3243_v9, %v3241_v6 }
 0x5bb   :  { %v3115_v26 = vpop.f32.mrb[52].mxu0  ;;  %v3192_v27 = vpop.f32.mrb[52].mxu1 }
 0x5bc   :  { %v3250_v30 = vadd.f32 %v3115_v26, %v11978_v23  ;;  %v3117_v44 = vpop.f32.mrb[53].mxu0  ;;  %v3194_v31 = vpop.f32.mrb[53].mxu1  ;;  %v3252_v7 = vadd.f32 %v3192_v27, %v11981_v21  ;;  %v3328_v27 = vld [vmem:[%s18566_s4 + $0xe8] sm:$0xff] }
 0x5bd   :  { %v3251_v47 = vadd.f32 %v3117_v44, %v11984_v24  ;;  %v3253_v34 = vadd.f32 %v3194_v31, %v11993_v37  ;;  %v3330_v44 = vld [vmem:[%s18566_s4 + $0xf8] sm:$0xff] }
 0x5be   :  { %10197 = vtanh.f32 %v3250_v30  ;;  %v3322_v30 = vld [vmem:[%s18566_s4 + $0xb8] sm:$0xff] }
 0x5bf   :  { %v3121_v25 = vpop.f32.mrb[54].mxu0  ;;  %v3198_v14 = vpop.f32.mrb[54].mxu1  ;;  %10199 = vtanh.f32 %v3251_v47 }
 0x5c0   :  { %v3254_v28 = vadd.f32 %v3121_v25, %v11978_v23  ;;  %v3123_v19 = vpop.f32.mrb[55].mxu0  ;;  %v3200_v29 = vpop.f32.mrb[55].mxu1  ;;  %10201 = vtanh.f32 %v3252_v7  ;;  %v3256_v15 = vadd.f32 %v3198_v14, %v11981_v21 }
 0x5c1   :  { %v3255_v33 = vadd.f32 %v3123_v19, %v11984_v24  ;;  %v3257_v20 = vadd.f32 %v3200_v29, %v11993_v37  ;;  %v3319_v19 = vld [vmem:[%s18566_s4 + $0xa0] sm:$0xff] }
 0x5c2   :  { %10203 = vtanh.f32 %v3254_v28  ;;  %v8671_v28 = vpack.c.bf16 %v3313_v8, %v3305_v52  ;;  %v3353_v8 = vld [vmem:[%s18566_s4 + $0x1b0] sm:$0xff] }
 0x5c3   :  { %10205 = vtanh.f32 %v3255_v33  ;;  %v8609_v33 = vpack.c.bf16 %v3328_v27, %v3320_v22  ;;  %v3361_v22 = vld [vmem:[%s18566_s4 + $0x1f0] sm:$0xff]  ;;  %v3378_v27 = vld [vmem:[%s18566_s4 + $0x278] sm:$0xff] }
 0x5c4   :  { %10207 = vtanh.f32 %v3256_v15  ;;  %v8673_v15 = vpack.c.bf16 %v3330_v44, %v3322_v30 }
 0x5c5   :  { %10209 = vtanh.f32 %v3253_v34  ;;  %v3327_v34 = vld [vmem:[%s18566_s4 + $0xe0] sm:$0xff] }
 0x5c6   :  { %10211 = vtanh.f32 %v9934_v39  ;;  %v3329_v39 = vld [vmem:[%s18566_s4 + $0xf0] sm:$0xff] }
 0x5c7   :  { %10213 = vtanh.f32 %v3257_v20  ;;  %v3344_v20 = vld [vmem:[%s18566_s4 + $0x168] sm:$0xff] }
 0x5c8   :  { %v10198_v36 = vpop.eup %10197  ;;  %10215 = vtanh.f32 %v9936_v5  ;;  %v3346_v5 = vld [vmem:[%s18566_s4 + $0x178] sm:$0xff] }
 0x5c9   :  { %v3266_v51 = vmul.f32 0.5, %v10198_v36  ;;  %v10200_v40 = vpop.eup %10199  ;;  %10217 = vtanh.f32 %v14466_v3  ;;  %v3321_v36 = vld [vmem:[%s18566_s4 + $0xb0] sm:$0xff] }
 0x5ca   :  { %v10202_v61 = vpop.eup %10201  ;;  %v3270_v45 = vmul.f32 0.5, %v10200_v40 }
 0x5cb   :  { %v3268_v55 = vadd.f32 0.5, %v3266_v51 }
 0x5cc   :  { %v10204_v53 = vpop.eup %10203  ;;  %v3272_v57 = vadd.f32 0.5, %v3270_v45 }
 0x5cd   :  { %v3280_v58 = vmul.f32 %v10202_v61, %v3268_v55  ;;  %v3267_v59 = vmul.f32 0.5, %v10204_v53  ;;  %v10206_v60 = vpop.eup %10205  ;;  %v3336_v61 = vld [vmem:[%s18566_s4 + $0x128] sm:$0xff]  ;;  %v3338_v53 = vld [vmem:[%s18566_s4 + $0x138] sm:$0xff] }
 0x5ce   :  { %v3278_v63 = vmul.f32 %v3272_v57, %v13660_v12  ;;  %v3271_v41 = vmul.f32 0.5, %v10206_v60  ;;  %v10208_v4 = vpop.eup %10207  ;;  %v3335_v60 = vld [vmem:[%s18566_s4 + $0x120] sm:$0xff] }
 0x5cf   :  { %v3269_v2 = vadd.f32 0.5, %v3267_v59  ;;  %v10210_v62 = vpop.eup %10209  ;;  %v8675_v59 = vpack.c.bf16 %v3329_v39, %v3321_v36  ;;  %v3392_v36 = vld [vmem:[%s18566_s4 + $0x2e8] sm:$0xff]  ;;  %v3386_v39 = vld [vmem:[%s18566_s4 + $0x2b8] sm:$0xff] }
 0x5d0   :  { %v14482_v38 = vadd.f32 %v3280_v58, %v3278_v63  ;;  %v3273_v56 = vadd.f32 0.5, %v3271_v41  ;;  %v10212_v1 = vpop.eup %10211  ;;  %v3274_v12 = vmul.f32 0.5, %v10210_v62  ;;  %v8611_v58 = vpack.c.bf16 %v3327_v34, %v3319_v19  ;;  %v3343_v63 = vld [vmem:[%s18566_s4 + $0x160] sm:$0xff]  ;;  %v3337_v41 = vld [vmem:[%s18566_s4 + $0x130] sm:$0xff]  ;;  %v3360_v62 = vld [vmem:[%s18566_s4 + $0x1e8] sm:$0xff] }
 0x5d1   :  { %v3281_v11 = vmul.f32 %v10208_v4, %v3269_v2  ;;  %v10214_v17 = vpop.eup %10213  ;;  %v3236_v10 = vmul.f32 0.5, %v10212_v1  ;;  %v3345_v4 = vld [vmem:[%s18566_s4 + $0x170] sm:$0xff]  ;;  %v3354_v1 = vld [vmem:[%s18566_s4 + $0x1b8] sm:$0xff]  ;;  %v3384_v34 = vld [vmem:[%s18566_s4 + $0x2a8] sm:$0xff] }
 0x5d2   :  { %10219 = vtanh.f32 %v14482_v38  ;;  %v3279_v32 = vmul.f32 %v3273_v56, %v13665_v16  ;;  %v10216_v54 = vpop.eup %10215  ;;  %v3311_v16 = vld [vmem:[%s18566_s4 + $0x60] sm:$0xff]  ;;  %v3276_v6 = vadd.f32 0.5, %v3274_v12  ;;  %v3275_v26 = vmul.f32 0.5, %v10214_v17  ;;  %v3352_v56 = vld [vmem:[%s18566_s4 + $0x1a8] sm:$0xff]  ;;  %v3362_v12 = vld [vmem:[%s18566_s4 + $0x1f8] sm:$0xff] }
 0x5d3   :  { %10221 = vtanh.f32 %v14469_v13  ;;  %v10218_v9 = vpop.eup %10217  ;;  %v3238_v7 = vadd.f32 0.5, %v3236_v10  ;;  %v3237_v47 = vmul.f32 0.5, %v10216_v54  ;;  %v8607_v14 = vpack.c.bf16 %v3311_v16, %v3303_v18  ;;  %v3351_v54 = vld [vmem:[%s18566_s4 + $0x1a0] sm:$0xff] }
 0x5d4   :  { %v14487_v35 = vadd.f32 %v3281_v11, %v3279_v32  ;;  %v3277_v40 = vadd.f32 0.5, %v3275_v26  ;;  %v8613_v11 = vpack.c.bf16 %v3344_v20, %v3336_v61  ;;  %v8677_v32 = vpack.c.bf16 %v3346_v5, %v3338_v53  ;;  %v3359_v18 = vld [vmem:[%s18566_s4 + $0x1e0] sm:$0xff]  ;;  %v3370_v26 = vld [vmem:[%s18566_s4 + $0x238] sm:$0xff] }
 0x5d5   :  { %v14518_v29 = vmul.f32 %v10218_v9, %v3238_v7  ;;  %v3239_v45 = vadd.f32 0.5, %v3237_v47  ;;  %v8615_v17 = vpack.c.bf16 %v3343_v63, %v3335_v60  ;;  %v8679_v10 = vpack.c.bf16 %v3345_v4, %v3337_v41  ;;  %v3368_v9 = vld [vmem:[%s18566_s4 + $0x228] sm:$0xff]  ;;  %v3367_v7 = vld [vmem:[%s18566_s4 + $0x220] sm:$0xff]  ;;  %v3393_v60 = vld [vmem:[%s18566_s4 + $0x2f0] sm:$0xff] }
 0x5d6   :  { %10223 = vtanh.f32 %v14487_v35  ;;  %v8617_v16 = vpack.c.bf16 %v3360_v62, %v3352_v56  ;;  %v8681_v52 = vpack.c.bf16 %v3362_v12, %v3354_v1  ;;  %v8619_v44 = vpack.c.bf16 %v3359_v18, %v3351_v54  ;;  %v3375_v47 = vld [vmem:[%s18566_s4 + $0x260] sm:$0xff]  ;;  %v3400_v63 = vld [vmem:[%s18566_s4 + $0x328] sm:$0xff]  ;;  %v3402_v4 = vld [vmem:[%s18566_s4 + $0x338] sm:$0xff] }
 0x5d7   :  { %v8685_v19 = vpack.c.bf16 %v3378_v27, %v3370_v26  ;;  %v8623_v61 = vpack.c.bf16 %v3375_v47, %v3367_v7  ;;  %v3391_v20 = vld [vmem:[%s18566_s4 + $0x2e0] sm:$0xff]  ;;  %v8625_v5 = vpack.c.bf16 %v3392_v36, %v3384_v34  ;;  %v3408_v41 = vld [vmem:[%s18566_s4 + $0x368] sm:$0xff]  ;;  %v3410_v56 = vld [vmem:[%s18566_s4 + $0x378] sm:$0xff] }
 0x5d8   :  { %v3399_v62 = vld [vmem:[%s18566_s4 + $0x320] sm:$0xff]  ;;  %v8629_v12 = vpack.c.bf16 %v3408_v41, %v3400_v63  ;;  %v3409_v54 = vld [vmem:[%s18566_s4 + $0x370] sm:$0xff]  ;;  %v3416_v18 = vld [vmem:[%s18566_s4 + $0x3a8] sm:$0xff] }
 0x5d9   :  { %v3407_v1 = vld [vmem:[%s18566_s4 + $0x360] sm:$0xff]  ;;  %v3432_v7 = vld [vmem:[%s18566_s4 + $0x428] sm:$0xff]  ;;  %v3449_v63 = vld [vmem:[%s18566_s4 + $0x4b0] sm:$0xff] }
 0x5da   :  { %v3423_v26 = vld [vmem:[%s18566_s4 + $0x3e0] sm:$0xff]  ;;  %v3440_v47 = vld [vmem:[%s18566_s4 + $0x468] sm:$0xff]  ;;  %v3457_v41 = vld [vmem:[%s18566_s4 + $0x4f0] sm:$0xff] }
 0x5db   :  { %v8637_v34 = vpack.c.bf16 %v3440_v47, %v3432_v7  ;;  %v3481_v7 = vld [vmem:[%s18566_s4 + $0x5b0] sm:$0xff] }
 0x5dc   :  { %v10220_v31 = vpop.eup %10219  ;;  %v3489_v47 = vld [vmem:[%s18566_s4 + $0x5f0] sm:$0xff] }
 0x5dd   :  { %v3286_v25 = vmul.f32 %v10220_v31, %v3276_v6  ;;  %v10222_v51 = vpop.eup %10221  ;;  %v3376_v6 = vld [vmem:[%s18566_s4 + $0x268] sm:$0xff]  ;;  %v8683_v31 = vpack.c.bf16 %v3361_v22, %v3353_v8  ;;  %v3426_v8 = vld [vmem:[%s18566_s4 + $0x3f8] sm:$0xff]  ;;  %v8631_v22 = vpack.c.bf16 %v3407_v1, %v3399_v62  ;;  %v8707_v1 = vpack.c.bf16 %v3457_v41, %v3449_v63 }
 0x5de   :  { %v14551_v2 = vmul.f32 %v10222_v51, %v3239_v45  ;;  %v3394_v51 = vld [vmem:[%s18566_s4 + $0x2f8] sm:$0xff]  ;;  %v3383_v45 = vld [vmem:[%s18566_s4 + $0x2a0] sm:$0xff] }
 0x5df   :  { %3619 = vmatprep.mubr.f32.mxu0 %v3286_v25  ;;  %3696 = vmatprep.mubr.f32.mxu1 %v3286_v25  ;;  %10225 = vtanh.f32 %v3286_v25 }
 0x5e0   :  { %v10224_v55 = vpop.eup %10223  ;;  %3620 = vmatmul.mubr.f32.vlgmr.msra.gmra.mrb[20].mxu0 %v14518_v29  ;;  %3697 = vmatmul.mubr.f32.vlgmr.msra.gmra.mrb[20].mxu1 %v14518_v29 }
 0x5e1   :  { %v14543_v57 = vmul.f32 %v10224_v55, %v3277_v40  ;;  %8608 = vmatpush1.bf16.msra.mxu0 %v8607_v14  ;;  %8672 = vmatpush1.bf16.msra.mxu1 %v8671_v28  ;;  %v8621_v28 = vpack.c.bf16 %v3376_v6, %v3368_v9  ;;  %v3415_v6 = vld [vmem:[%s18566_s4 + $0x3a0] sm:$0xff] }
 0x5e2   :  { %8610 = vmatprep.subr.bf16.mxu0 %v8609_v33  ;;  %8674 = vmatprep.subr.bf16.mxu1 %v8673_v15  ;;  %v3369_v33 = vld [vmem:[%s18566_s4 + $0x230] sm:$0xff] }
 0x5e3   :  { %3625 = vmatprep.mubr.f32.mxu0 %v14543_v57  ;;  %3702 = vmatprep.mubr.f32.mxu1 %v14543_v57  ;;  %10227 = vtanh.f32 %v14543_v57  ;;  %v3377_v15 = vld [vmem:[%s18566_s4 + $0x270] sm:$0xff] }
 0x5e4   :  { %3626 = vmatmul.mubr.f32.gmra.mrb[22].mxu0 %v14551_v2  ;;  %3703 = vmatmul.mubr.f32.gmra.mrb[22].mxu1 %v14551_v2  ;;  %v8687_v55 = vpack.c.bf16 %v3377_v15, %v3369_v33  ;;  %v3431_v33 = vld [vmem:[%s18566_s4 + $0x420] sm:$0xff] }
 0x5e5   :  { %8612 = vmatpush1.bf16.msra.mxu0 %v8611_v58  ;;  %8676 = vmatpush1.bf16.msra.mxu1 %v8675_v59  ;;  %v8689_v58 = vpack.c.bf16 %v3394_v51, %v3386_v39  ;;  %v3385_v59 = vld [vmem:[%s18566_s4 + $0x2b0] sm:$0xff]  ;;  %v3439_v15 = vld [vmem:[%s18566_s4 + $0x460] sm:$0xff] }
 0x5e6   :  { %3773 = vmatprep.mubr.f32.mxu0 %v3286_v25  ;;  %3850 = vmatprep.mubr.f32.mxu1 %v3286_v25  ;;  %v10476_v25 = vld [vmem:[%s18571_s6] ss:$0 sm:$0xff]  ;;  %v3433_v39 = vld [vmem:[%s18566_s4 + $0x430] sm:$0xff] }
 0x5e7   :  { %8614 = vmatprep.subr.bf16.mxu0 %v8613_v11  ;;  %8678 = vmatprep.subr.bf16.mxu1 %v8677_v32  ;;  %v8627_v11 = vpack.c.bf16 %v3391_v20, %v3383_v45  ;;  %v8691_v32 = vpack.c.bf16 %v3393_v60, %v3385_v59  ;;  %v3441_v51 = vld [vmem:[%s18566_s4 + $0x470] sm:$0xff]  ;;  %v3458_v45 = vld [vmem:[%s18566_s4 + $0x4f8] sm:$0xff]  ;;  %v8639_v20 = vpack.c.bf16 %v3439_v15, %v3431_v33 }
 0x5e8   :  { %v8715_v15 = vpack.c.bf16 %v3489_v47, %v3481_v7  ;;  %v3551_v47 = vld [vmem:[%s18566_s4 + $0x7e0] sm:$0xff] }
 0x5e9   :  { %v10226_v30 = vpop.eup %10225  ;;  %8616 = vmatpush1.bf16.msra.mxu0 %v8615_v17  ;;  %8680 = vmatpush1.bf16.msra.mxu1 %v8679_v10  ;;  %v8693_v17 = vpack.c.bf16 %v3410_v56, %v3402_v4  ;;  %v3401_v10 = vld [vmem:[%s18566_s4 + $0x330] sm:$0xff]  ;;  %v3464_v4 = vld [vmem:[%s18566_s4 + $0x528] sm:$0xff] }
 0x5ea   :  { %8618 = vmatprep.subr.bf16.mxu0 %v8617_v16  ;;  %8682 = vmatprep.subr.bf16.mxu1 %v8681_v52  ;;  %v6967_v14 = vmul.f32 %v10476_v25, %v10226_v30  ;;  %v3424_v16 = vld [vmem:[%s18566_s4 + $0x3e8] sm:$0xff]  ;;  %v3418_v52 = vld [vmem:[%s18566_s4 + $0x3b8] sm:$0xff]  ;;  %v8695_v9 = vpack.c.bf16 %v3409_v54, %v3401_v10 }
 0x5eb   :  { %v8633_v27 = vpack.c.bf16 %v3424_v16, %v3416_v18  ;;  %v8697_v30 = vpack.c.bf16 %v3426_v8, %v3418_v52  ;;  %v3472_v56 = vld [vmem:[%s18566_s4 + $0x568] sm:$0xff]  ;;  %v3465_v18 = vld [vmem:[%s18566_s4 + $0x530] sm:$0xff] }
 0x5ec   :  { %6993 = vadd.xlane.f32.xlu0 %v6967_v14  ;;  %v3442_v14 = vld [vmem:[%s18566_s4 + $0x478] sm:$0xff]  ;;  %v8645_v10 = vpack.c.bf16 %v3472_v56, %v3464_v4  ;;  %v3473_v16 = vld [vmem:[%s18566_s4 + $0x570] sm:$0xff]  ;;  %v3480_v52 = vld [vmem:[%s18566_s4 + $0x5a8] sm:$0xff] }
 0x5ed   :  { %v10228_v40 = vpop.eup %10227  ;;  %8620 = vmatpush1.bf16.msra.mxu0 %v8619_v44  ;;  %8684 = vmatpush1.bf16.msra.mxu1 %v8683_v31  ;;  %v3417_v44 = vld [vmem:[%s18566_s4 + $0x3b0] sm:$0xff]  ;;  %v3488_v8 = vld [vmem:[%s18566_s4 + $0x5e8] sm:$0xff] }
 0x5ee   :  { %8622 = vmatprep.subr.bf16.mxu0 %v8621_v28  ;;  %8686 = vmatprep.subr.bf16.mxu1 %v8685_v19  ;;  %v6968_v53 = vmul.f32 %v10476_v25, %v10228_v40  ;;  %v3425_v31 = vld [vmem:[%s18566_s4 + $0x3f0] sm:$0xff]  ;;  %v3434_v25 = vld [vmem:[%s18566_s4 + $0x438] sm:$0xff]  ;;  %v8635_v28 = vpack.c.bf16 %v3423_v26, %v3415_v6  ;;  %v3448_v40 = vld [vmem:[%s18566_s4 + $0x4a8] sm:$0xff]  ;;  %v8711_v26 = vpack.c.bf16 %v3473_v16, %v3465_v18 }
 0x5ef   :  { %v8699_v19 = vpack.c.bf16 %v3425_v31, %v3417_v44  ;;  %v8701_v36 = vpack.c.bf16 %v3442_v14, %v3434_v25  ;;  %v8649_v44 = vpack.c.bf16 %v3488_v8, %v3480_v52  ;;  %v3496_v25 = vld [vmem:[%s18566_s4 + $0x628] sm:$0xff]  ;;  %v3513_v4 = vld [vmem:[%s18566_s4 + $0x6b0] sm:$0xff] }
 0x5f0   :  { %6995 = vadd.xlane.f32.xlu1 %v6968_v53  ;;  %v8703_v53 = vpack.c.bf16 %v3441_v51, %v3433_v39  ;;  %v3504_v14 = vld [vmem:[%s18566_s4 + $0x668] sm:$0xff]  ;;  %v3521_v56 = vld [vmem:[%s18566_s4 + $0x6f0] sm:$0xff] }
 0x5f1   :  { %8624 = vmatpush1.bf16.msra.mxu0 %v8623_v61  ;;  %8688 = vmatpush1.bf16.msra.mxu1 %v8687_v55  ;;  %v3456_v61 = vld [vmem:[%s18566_s4 + $0x4e8] sm:$0xff]  ;;  %v3450_v55 = vld [vmem:[%s18566_s4 + $0x4b8] sm:$0xff]  ;;  %v8653_v39 = vpack.c.bf16 %v3504_v14, %v3496_v25  ;;  %v3529_v52 = vld [vmem:[%s18566_s4 + $0x730] sm:$0xff] }
 0x5f2   :  { %8626 = vmatprep.subr.bf16.mxu0 %v8625_v5  ;;  %8690 = vmatprep.subr.bf16.mxu1 %v8689_v58  ;;  %v3447_v5 = vld [vmem:[%s18566_s4 + $0x4a0] sm:$0xff]  ;;  %v8641_v59 = vpack.c.bf16 %v3456_v61, %v3448_v40  ;;  %v8705_v60 = vpack.c.bf16 %v3458_v45, %v3450_v55  ;;  %v3497_v40 = vld [vmem:[%s18566_s4 + $0x630] sm:$0xff]  ;;  %v3512_v55 = vld [vmem:[%s18566_s4 + $0x6a8] sm:$0xff] }
 0x5f3   :  { %v3455_v58 = vld [vmem:[%s18566_s4 + $0x4e0] sm:$0xff]  ;;  %v3505_v61 = vld [vmem:[%s18566_s4 + $0x670] sm:$0xff]  ;;  %v3520_v45 = vld [vmem:[%s18566_s4 + $0x6e8] sm:$0xff] }
 0x5f4   :  { %v8643_v62 = vpack.c.bf16 %v3455_v58, %v3447_v5  ;;  %v8719_v58 = vpack.c.bf16 %v3505_v61, %v3497_v40  ;;  %v8657_v63 = vpack.c.bf16 %v3520_v45, %v3512_v55  ;;  %v3537_v8 = vld [vmem:[%s18566_s4 + $0x770] sm:$0xff]  ;;  %v3976_v45 = vld [vmem:[%s18566_s4 + $0x88] sm:$0xff] }
 0x5f5   :  { %8628 = vmatpush1.bf16.msra.mxu0 %v8627_v11  ;;  %8692 = vmatpush1.bf16.msra.mxu1 %v8691_v32  ;;  %v3466_v11 = vld [vmem:[%s18566_s4 + $0x538] sm:$0xff]  ;;  %v3545_v25 = vld [vmem:[%s18566_s4 + $0x7b0] sm:$0xff] }
 0x5f6   :  { %8630 = vmatprep.subr.bf16.mxu0 %v8629_v12  ;;  %8694 = vmatprep.subr.bf16.mxu1 %v8693_v17  ;;  %v3474_v32 = vld [vmem:[%s18566_s4 + $0x578] sm:$0xff]  ;;  %v3463_v12 = vld [vmem:[%s18566_s4 + $0x520] sm:$0xff]  ;;  %v3553_v14 = vld [vmem:[%s18566_s4 + $0x7f0] sm:$0xff] }
 0x5f7   :  { %v3471_v17 = vld [vmem:[%s18566_s4 + $0x560] sm:$0xff]  ;;  %v8709_v54 = vpack.c.bf16 %v3474_v32, %v3466_v11  ;;  %v3528_v11 = vld [vmem:[%s18566_s4 + $0x728] sm:$0xff]  ;;  %v3961_v40 = vld [vmem:[%s18566_s4 + $0x10] sm:$0xff] }
 0x5f8   :  { %v8647_v6 = vpack.c.bf16 %v3471_v17, %v3463_v12  ;;  %v3536_v32 = vld [vmem:[%s18566_s4 + $0x768] sm:$0xff]  ;;  %v8723_v17 = vpack.c.bf16 %v3521_v56, %v3513_v4  ;;  %v3969_v61 = vld [vmem:[%s18566_s4 + $0x50] sm:$0xff] }
 0x5f9   :  { %8632 = vmatpush1.bf16.msra.mxu0 %v8631_v22  ;;  %8696 = vmatpush1.bf16.msra.mxu1 %v8695_v9  ;;  %v3482_v22 = vld [vmem:[%s18566_s4 + $0x5b8] sm:$0xff]  ;;  %v8661_v18 = vpack.c.bf16 %v3536_v32, %v3528_v11  ;;  %v8799_v55 = vpack.c.bf16 %v3969_v61, %v3961_v40  ;;  %v3977_v4 = vld [vmem:[%s18566_s4 + $0x90] sm:$0xff]  ;;  %v3992_v11 = vld [vmem:[%s18566_s4 + $0x108] sm:$0xff] }
 0x5fa   :  { %8634 = vmatprep.subr.bf16.mxu0 %v8633_v27  ;;  %8698 = vmatprep.subr.bf16.mxu1 %v8697_v30  ;;  %v3490_v9 = vld [vmem:[%s18566_s4 + $0x5f8] sm:$0xff]  ;;  %v3479_v27 = vld [vmem:[%s18566_s4 + $0x5a0] sm:$0xff]  ;;  %v3985_v56 = vld [vmem:[%s18566_s4 + $0xd0] sm:$0xff] }
 0x5fb   :  { %v3487_v30 = vld [vmem:[%s18566_s4 + $0x5e0] sm:$0xff]  ;;  %v8713_v31 = vpack.c.bf16 %v3490_v9, %v3482_v22  ;;  %v3544_v22 = vld [vmem:[%s18566_s4 + $0x7a8] sm:$0xff]  ;;  %v8803_v32 = vpack.c.bf16 %v3985_v56, %v3977_v4 }
 0x5fc   :  { %v8651_v33 = vpack.c.bf16 %v3487_v30, %v3479_v27  ;;  %v3552_v9 = vld [vmem:[%s18566_s4 + $0x7e8] sm:$0xff]  ;;  %v8727_v30 = vpack.c.bf16 %v3537_v8, %v3529_v52  ;;  %v4001_v8 = vld [vmem:[%s18566_s4 + $0x150] sm:$0xff] }
 0x5fd   :  { %8636 = vmatpush1.bf16.msra.mxu0 %v8635_v28  ;;  %8700 = vmatpush1.bf16.msra.mxu1 %v8699_v19  ;;  %v3498_v28 = vld [vmem:[%s18566_s4 + $0x638] sm:$0xff]  ;;  %v4040_v40 = vld [vmem:[%s18566_s4 + $0x288] sm:$0xff] }
 0x5fe   :  { %8638 = vmatprep.subr.bf16.mxu0 %v8637_v34  ;;  %8702 = vmatprep.subr.bf16.mxu1 %v8701_v36  ;;  %v3506_v19 = vld [vmem:[%s18566_s4 + $0x678] sm:$0xff]  ;;  %v3495_v34 = vld [vmem:[%s18566_s4 + $0x620] sm:$0xff]  ;;  %v4048_v61 = vld [vmem:[%s18566_s4 + $0x2c8] sm:$0xff] }
 0x5ff   :  { %v3503_v36 = vld [vmem:[%s18566_s4 + $0x660] sm:$0xff]  ;;  %v8717_v51 = vpack.c.bf16 %v3506_v19, %v3498_v28  ;;  %v8731_v19 = vpack.c.bf16 %v3553_v14, %v3545_v25  ;;  %v4017_v25 = vld [vmem:[%s18566_s4 + $0x1d0] sm:$0xff]  ;;  %v4056_v4 = vld [vmem:[%s18566_s4 + $0x308] sm:$0xff] }
 0x600   :  { %v8655_v5 = vpack.c.bf16 %v3503_v36, %v3495_v34  ;;  %v3967_v36 = vld [vmem:[%s18566_s4 + $0x40] sm:$0xff]  ;;  %v4064_v56 = vld [vmem:[%s18566_s4 + $0x348] sm:$0xff] }
 0x601   :  { %8640 = vmatpush1.bf16.msra.mxu0 %v8639_v20  ;;  %8704 = vmatpush1.bf16.msra.mxu1 %v8703_v53  ;;  %v3514_v20 = vld [vmem:[%s18566_s4 + $0x6b8] sm:$0xff] }
 0x602   :  { %8642 = vmatprep.subr.bf16.mxu0 %v8641_v59  ;;  %8706 = vmatprep.subr.bf16.mxu1 %v8705_v60  ;;  %v3522_v53 = vld [vmem:[%s18566_s4 + $0x6f8] sm:$0xff]  ;;  %v3511_v59 = vld [vmem:[%s18566_s4 + $0x6a0] sm:$0xff] }
 0x603   :  { %v3519_v60 = vld [vmem:[%s18566_s4 + $0x6e0] sm:$0xff]  ;;  %v8721_v41 = vpack.c.bf16 %v3522_v53, %v3514_v20  ;;  %v3984_v20 = vld [vmem:[%s18566_s4 + $0xc8] sm:$0xff]  ;;  %v3978_v53 = vld [vmem:[%s18566_s4 + $0x98] sm:$0xff] }
 0x604   :  { %v8659_v12 = vpack.c.bf16 %v3519_v60, %v3511_v59  ;;  %v3975_v59 = vld [vmem:[%s18566_s4 + $0x80] sm:$0xff] }
 0x605   :  { %8644 = vmatpush1.bf16.msra.mxu0 %v8643_v62  ;;  %8708 = vmatpush1.bf16.msra.mxu1 %v8707_v1  ;;  %v3530_v62 = vld [vmem:[%s18566_s4 + $0x738] sm:$0xff]  ;;  %v3983_v60 = vld [vmem:[%s18566_s4 + $0xc0] sm:$0xff] }
 0x606   :  { %8646 = vmatprep.subr.bf16.mxu0 %v8645_v10  ;;  %8710 = vmatprep.subr.bf16.mxu1 %v8709_v54  ;;  %v3538_v1 = vld [vmem:[%s18566_s4 + $0x778] sm:$0xff]  ;;  %v3527_v10 = vld [vmem:[%s18566_s4 + $0x720] sm:$0xff] }
 0x607   :  { %v3535_v54 = vld [vmem:[%s18566_s4 + $0x760] sm:$0xff]  ;;  %v8725_v16 = vpack.c.bf16 %v3538_v1, %v3530_v62  ;;  %v4000_v62 = vld [vmem:[%s18566_s4 + $0x148] sm:$0xff]  ;;  %v3994_v1 = vld [vmem:[%s18566_s4 + $0x118] sm:$0xff] }
 0x608   :  { %v8663_v27 = vpack.c.bf16 %v3535_v54, %v3527_v10  ;;  %v3991_v54 = vld [vmem:[%s18566_s4 + $0x100] sm:$0xff] }
 0x609   :  { %8648 = vmatpush1.bf16.msra.mxu0 %v8647_v6  ;;  %8712 = vmatpush1.bf16.msra.mxu1 %v8711_v26  ;;  %v3546_v6 = vld [vmem:[%s18566_s4 + $0x7b8] sm:$0xff] }
 0x60a   :  { %8650 = vmatprep.subr.bf16.mxu0 %v8649_v44  ;;  %8714 = vmatprep.subr.bf16.mxu1 %v8713_v31  ;;  %v3554_v26 = vld [vmem:[%s18566_s4 + $0x7f8] sm:$0xff]  ;;  %v3543_v44 = vld [vmem:[%s18566_s4 + $0x7a0] sm:$0xff]  ;;  %v8665_v31 = vpack.c.bf16 %v3552_v9, %v3544_v22  ;;  %v4008_v22 = vld [vmem:[%s18566_s4 + $0x188] sm:$0xff] }
 0x60b   :  { %v8729_v7 = vpack.c.bf16 %v3554_v26, %v3546_v6  ;;  %v8667_v28 = vpack.c.bf16 %v3551_v47, %v3543_v44  ;;  %v4016_v9 = vld [vmem:[%s18566_s4 + $0x1c8] sm:$0xff]  ;;  %v4007_v44 = vld [vmem:[%s18566_s4 + $0x180] sm:$0xff]  ;;  %v4009_v47 = vld [vmem:[%s18566_s4 + $0x190] sm:$0xff] }
 0x60c   :  { %v8745_v26 = vpack.c.bf16 %v4016_v9, %v4008_v22  ;;  %v4072_v22 = vld [vmem:[%s18566_s4 + $0x388] sm:$0xff] }
 0x60d   :  { %8652 = vmatpush1.bf16.msra.mxu0 %v8651_v33  ;;  %8716 = vmatpush1.bf16.msra.mxu1 %v8715_v15  ;;  %v3960_v33 = vld [vmem:[%s18566_s4 + $0x8] sm:$0xff] }
 0x60e   :  { %8654 = vmatprep.subr.bf16.mxu0 %v8653_v39  ;;  %8718 = vmatprep.subr.bf16.mxu1 %v8717_v51  ;;  %v3968_v15 = vld [vmem:[%s18566_s4 + $0x48] sm:$0xff] }
 0x60f   :  { %v8733_v34 = vpack.c.bf16 %v3968_v15, %v3960_v33  ;;  %v4026_v33 = vld [vmem:[%s18566_s4 + $0x218] sm:$0xff]  ;;  %v8811_v15 = vpack.c.bf16 %v4017_v25, %v4009_v47  ;;  %v4080_v9 = vld [vmem:[%s18566_s4 + $0x3c8] sm:$0xff]  ;;  %v4081_v25 = vld [vmem:[%s18566_s4 + $0x3d0] sm:$0xff] }
 0x611   :  { %8656 = vmatpush1.bf16.msra.mxu0 %v8655_v5  ;;  %8720 = vmatpush1.bf16.msra.mxu1 %v8719_v58  ;;  %v8737_v5 = vpack.c.bf16 %v3984_v20, %v3976_v45  ;;  %v3986_v58 = vld [vmem:[%s18566_s4 + $0xd8] sm:$0xff] }
 0x612   :  { %8658 = vmatprep.subr.bf16.mxu0 %v8657_v63  ;;  %8722 = vmatprep.subr.bf16.mxu1 %v8721_v41  ;;  %v8801_v63 = vpack.c.bf16 %v3986_v58, %v3978_v53  ;;  %v8739_v41 = vpack.c.bf16 %v3983_v60, %v3975_v59  ;;  %v4050_v45 = vld [vmem:[%s18566_s4 + $0x2d8] sm:$0xff]  ;;  %v4039_v58 = vld [vmem:[%s18566_s4 + $0x280] sm:$0xff]  ;;  %v4041_v60 = vld [vmem:[%s18566_s4 + $0x290] sm:$0xff] }
 0x613   :  { %v4047_v59 = vld [vmem:[%s18566_s4 + $0x2c0] sm:$0xff] }
 0x615   :  { %8660 = vmatpush1.bf16.msra.mxu0 %v8659_v12  ;;  %8724 = vmatpush1.bf16.msra.mxu1 %v8723_v17  ;;  %v4002_v12 = vld [vmem:[%s18566_s4 + $0x158] sm:$0xff]  ;;  %v8741_v17 = vpack.c.bf16 %v4000_v62, %v3992_v11  ;;  %v8755_v62 = vpack.c.bf16 %v4047_v59, %v4039_v58  ;;  %v4111_v58 = vld [vmem:[%s18566_s4 + $0x4c0] sm:$0xff] }
 0x616   :  { %8662 = vmatprep.subr.bf16.mxu0 %v8661_v18  ;;  %8726 = vmatprep.subr.bf16.mxu1 %v8725_v16  ;;  %v8805_v10 = vpack.c.bf16 %v4002_v12, %v3994_v1  ;;  %v3999_v18 = vld [vmem:[%s18566_s4 + $0x140] sm:$0xff]  ;;  %v3993_v16 = vld [vmem:[%s18566_s4 + $0x110] sm:$0xff]  ;;  %v4058_v11 = vld [vmem:[%s18566_s4 + $0x318] sm:$0xff]  ;;  %v8757_v12 = vpack.c.bf16 %v4064_v56, %v4056_v4 }
 0x617   :  { %v8743_v52 = vpack.c.bf16 %v3999_v18, %v3991_v54  ;;  %v8807_v6 = vpack.c.bf16 %v4001_v8, %v3993_v16  ;;  %v4057_v18 = vld [vmem:[%s18566_s4 + $0x310] sm:$0xff]  ;;  %v4120_v56 = vld [vmem:[%s18566_s4 + $0x508] sm:$0xff] }
 0x618   :  { %v4065_v16 = vld [vmem:[%s18566_s4 + $0x350] sm:$0xff] }
 0x619   :  { %8664 = vmatpush1.bf16.msra.mxu0 %v8663_v27  ;;  %8728 = vmatpush1.bf16.msra.mxu1 %v8727_v30  ;;  %v4010_v27 = vld [vmem:[%s18566_s4 + $0x198] sm:$0xff]  ;;  %v8823_v8 = vpack.c.bf16 %v4065_v16, %v4057_v18  ;;  %v4121_v18 = vld [vmem:[%s18566_s4 + $0x510] sm:$0xff] }
 0x61a   :  { %8666 = vmatprep.subr.bf16.mxu0 %v8665_v31  ;;  %8730 = vmatprep.subr.bf16.mxu1 %v8729_v7  ;;  %v4018_v30 = vld [vmem:[%s18566_s4 + $0x1d8] sm:$0xff]  ;;  %v4015_v7 = vld [vmem:[%s18566_s4 + $0x1c0] sm:$0xff]  ;;  %v4129_v16 = vld [vmem:[%s18566_s4 + $0x550] sm:$0xff] }
 0x61b   :  { %v8809_v31 = vpack.c.bf16 %v4018_v30, %v4010_v27  ;;  %v8747_v14 = vpack.c.bf16 %v4015_v7, %v4007_v44  ;;  %v4082_v27 = vld [vmem:[%s18566_s4 + $0x3d8] sm:$0xff]  ;;  %v4071_v44 = vld [vmem:[%s18566_s4 + $0x380] sm:$0xff]  ;;  %v4073_v7 = vld [vmem:[%s18566_s4 + $0x390] sm:$0xff] }
 0x61d   :  { %8668 = vmatpush1.bf16.msra.mxu0 %v8667_v28  ;;  %8732 = vmatpush1.bf16.msra.mxu1 %v8731_v19  ;;  %v4024_v28 = vld [vmem:[%s18566_s4 + $0x208] sm:$0xff] }
 0x61e   :  { %8734 = vmatprep.subr.bf16.mxu0 %v8733_v34  ;;  %v4032_v19 = vld [vmem:[%s18566_s4 + $0x248] sm:$0xff]  ;;  %v4034_v34 = vld [vmem:[%s18566_s4 + $0x258] sm:$0xff] }
 0x620   :  { %3774 = vmatmul.mubr.f32.vlgmr.msra.gmra.mrb[56].mxu0 %v14518_v29  ;;  %3851 = vmatmul.mubr.f32.vlgmr.msra.gmra.mrb[56].mxu1 %v14518_v29  ;;  %v3962_v29 = vld [vmem:[%s18566_s4 + $0x18] sm:$0xff] }
 0x621   :  { %3779 = vmatprep.mubr.f32.mxu0 %v14543_v57  ;;  %3856 = vmatprep.mubr.f32.mxu1 %v14543_v57  ;;  %v3970_v57 = vld [vmem:[%s18566_s4 + $0x58] sm:$0xff] }
 0x622   :  { %v8797_v39 = vpack.c.bf16 %v3970_v57, %v3962_v29  ;;  %v8749_v29 = vpack.c.bf16 %v4032_v19, %v4024_v28  ;;  %v4023_v57 = vld [vmem:[%s18566_s4 + $0x200] sm:$0xff]  ;;  %v4088_v28 = vld [vmem:[%s18566_s4 + $0x408] sm:$0xff] }
 0x623   :  { %v4096_v19 = vld [vmem:[%s18566_s4 + $0x448] sm:$0xff] }
 0x624   :  { %3780 = vmatmul.mubr.f32.gmra.mrb[58].mxu0 %v14551_v2  ;;  %3857 = vmatmul.mubr.f32.gmra.mrb[58].mxu1 %v14551_v2  ;;  %v3959_v2 = vld [vmem:[%s18566_s4] sm:$0xff] }
 0x625   :  { %v8735_v51 = vpack.c.bf16 %v3967_v36, %v3959_v2  ;;  %8798 = vmatprep.subr.bf16.mxu1 %v8797_v39  ;;  %v4031_v2 = vld [vmem:[%s18566_s4 + $0x240] sm:$0xff]  ;;  %v8813_v36 = vpack.c.bf16 %v4034_v34, %v4026_v33  ;;  %v4025_v39 = vld [vmem:[%s18566_s4 + $0x210] sm:$0xff]  ;;  %v4090_v33 = vld [vmem:[%s18566_s4 + $0x418] sm:$0xff] }
 0x626   :  { %8800 = vmatpush1.bf16.msra.mxu1 %v8799_v55  ;;  %v4042_v55 = vld [vmem:[%s18566_s4 + $0x298] sm:$0xff]  ;;  %v8751_v20 = vpack.c.bf16 %v4031_v2, %v4023_v57  ;;  %v4087_v34 = vld [vmem:[%s18566_s4 + $0x400] sm:$0xff] }
 0x627   :  { %8736 = vmatpush1.bf16.msra.mxu0 %v8735_v51  ;;  %8802 = vmatprep.subr.bf16.mxu1 %v8801_v63  ;;  %v4033_v51 = vld [vmem:[%s18566_s4 + $0x250] sm:$0xff]  ;;  %v8817_v63 = vpack.c.bf16 %v4050_v45, %v4042_v55  ;;  %v4095_v57 = vld [vmem:[%s18566_s4 + $0x440] sm:$0xff]  ;;  %v4112_v55 = vld [vmem:[%s18566_s4 + $0x4c8] sm:$0xff] }
 0x628   :  { %8738 = vmatprep.subr.bf16.mxu0 %v8737_v5  ;;  %v8815_v53 = vpack.c.bf16 %v4033_v51, %v4025_v39  ;;  %v8753_v5 = vpack.c.bf16 %v4048_v61, %v4040_v40  ;;  %v4089_v39 = vld [vmem:[%s18566_s4 + $0x410] sm:$0xff]  ;;  %v4104_v61 = vld [vmem:[%s18566_s4 + $0x488] sm:$0xff]  ;;  %v4106_v45 = vld [vmem:[%s18566_s4 + $0x498] sm:$0xff] }
 0x629   :  { %v4097_v51 = vld [vmem:[%s18566_s4 + $0x450] sm:$0xff] }
 0x62a   :  { %8804 = vmatpush1.bf16.msra.mxu1 %v8803_v32  ;;  %v4066_v32 = vld [vmem:[%s18566_s4 + $0x358] sm:$0xff]  ;;  %v8831_v40 = vpack.c.bf16 %v4097_v51, %v4089_v39  ;;  %v4161_v39 = vld [vmem:[%s18566_s4 + $0x650] sm:$0xff] }
 0x62b   :  { %8740 = vmatpush1.bf16.msra.mxu0 %v8739_v41  ;;  %8806 = vmatprep.subr.bf16.mxu1 %v8805_v10  ;;  %v4049_v41 = vld [vmem:[%s18566_s4 + $0x2d0] sm:$0xff]  ;;  %v4063_v10 = vld [vmem:[%s18566_s4 + $0x340] sm:$0xff]  ;;  %v8821_v54 = vpack.c.bf16 %v4066_v32, %v4058_v11  ;;  %v4128_v11 = vld [vmem:[%s18566_s4 + $0x548] sm:$0xff] }
 0x62c   :  { %8742 = vmatprep.subr.bf16.mxu0 %v8741_v17  ;;  %v8819_v1 = vpack.c.bf16 %v4049_v41, %v4041_v60  ;;  %v4055_v17 = vld [vmem:[%s18566_s4 + $0x300] sm:$0xff]  ;;  %v4113_v41 = vld [vmem:[%s18566_s4 + $0x4d0] sm:$0xff]  ;;  %v4122_v32 = vld [vmem:[%s18566_s4 + $0x518] sm:$0xff] }
 0x62e   :  { %8808 = vmatpush1.bf16.msra.mxu1 %v8807_v6  ;;  %v4074_v6 = vld [vmem:[%s18566_s4 + $0x398] sm:$0xff] }
 0x62f   :  { %8744 = vmatpush1.bf16.msra.mxu0 %v8743_v52  ;;  %8810 = vmatprep.subr.bf16.mxu1 %v8809_v31  ;;  %v8759_v52 = vpack.c.bf16 %v4063_v10, %v4055_v17  ;;  %v8825_v30 = vpack.c.bf16 %v4082_v27, %v4074_v6  ;;  %v4079_v31 = vld [vmem:[%s18566_s4 + $0x3c0] sm:$0xff] }
 0x630   :  { %8746 = vmatprep.subr.bf16.mxu0 %v8745_v26  ;;  %v8761_v26 = vpack.c.bf16 %v4080_v9, %v4072_v22  ;;  %v8763_v47 = vpack.c.bf16 %v4079_v31, %v4071_v44  ;;  %v4127_v17 = vld [vmem:[%s18566_s4 + $0x540] sm:$0xff]  ;;  %v4144_v22 = vld [vmem:[%s18566_s4 + $0x5c8] sm:$0xff]  ;;  %v4138_v9 = vld [vmem:[%s18566_s4 + $0x598] sm:$0xff] }
 0x631   :  { %v4135_v27 = vld [vmem:[%s18566_s4 + $0x580] sm:$0xff] }
 0x632   :  { %8812 = vmatpush1.bf16.msra.mxu1 %v8811_v15  ;;  %v8765_v15 = vpack.c.bf16 %v4096_v19, %v4088_v28  ;;  %v4160_v28 = vld [vmem:[%s18566_s4 + $0x648] sm:$0xff]  ;;  %v4154_v19 = vld [vmem:[%s18566_s4 + $0x618] sm:$0xff] }
 0x633   :  { %8748 = vmatpush1.bf16.msra.mxu0 %v8747_v14  ;;  %8814 = vmatprep.subr.bf16.mxu1 %v8813_v36  ;;  %v8827_v14 = vpack.c.bf16 %v4081_v25, %v4073_v7  ;;  %v8767_v36 = vpack.c.bf16 %v4095_v57, %v4087_v34  ;;  %v4137_v7 = vld [vmem:[%s18566_s4 + $0x590] sm:$0xff]  ;;  %v4159_v34 = vld [vmem:[%s18566_s4 + $0x640] sm:$0xff] }
 0x634   :  { %8750 = vmatprep.subr.bf16.mxu0 %v8749_v29  ;;  %v4098_v29 = vld [vmem:[%s18566_s4 + $0x458] sm:$0xff] }
 0x635   :  { %v8829_v2 = vpack.c.bf16 %v4098_v29, %v4090_v33  ;;  %v4151_v29 = vld [vmem:[%s18566_s4 + $0x600] sm:$0xff] }
 0x636   :  { %8816 = vmatpush1.bf16.msra.mxu1 %v8815_v53  ;;  %v4114_v53 = vld [vmem:[%s18566_s4 + $0x4d8] sm:$0xff] }
 0x637   :  { %8752 = vmatpush1.bf16.msra.mxu0 %v8751_v20  ;;  %8818 = vmatprep.subr.bf16.mxu1 %v8817_v63  ;;  %v8769_v20 = vpack.c.bf16 %v4112_v55, %v4104_v61  ;;  %v8833_v59 = vpack.c.bf16 %v4114_v53, %v4106_v45  ;;  %v4105_v63 = vld [vmem:[%s18566_s4 + $0x490] sm:$0xff]  ;;  %v4176_v61 = vld [vmem:[%s18566_s4 + $0x6c8] sm:$0xff]  ;;  %v4170_v55 = vld [vmem:[%s18566_s4 + $0x698] sm:$0xff] }
 0x638   :  { %8754 = vmatprep.subr.bf16.mxu0 %v8753_v5  ;;  %v4103_v5 = vld [vmem:[%s18566_s4 + $0x480] sm:$0xff]  ;;  %v8835_v4 = vpack.c.bf16 %v4113_v41, %v4105_v63  ;;  %v4177_v63 = vld [vmem:[%s18566_s4 + $0x6d0] sm:$0xff] }
 0x639   :  { %v8771_v60 = vpack.c.bf16 %v4111_v58, %v4103_v5  ;;  %v4167_v53 = vld [vmem:[%s18566_s4 + $0x680] sm:$0xff] }
 0x63a   :  { %8820 = vmatpush1.bf16.msra.mxu1 %v8819_v1  ;;  %v4130_v1 = vld [vmem:[%s18566_s4 + $0x558] sm:$0xff]  ;;  %v4175_v5 = vld [vmem:[%s18566_s4 + $0x6c0] sm:$0xff] }
 0x63b   :  { %8756 = vmatpush1.bf16.msra.mxu0 %v8755_v62  ;;  %8822 = vmatprep.subr.bf16.mxu1 %v8821_v54  ;;  %v8773_v62 = vpack.c.bf16 %v4128_v11, %v4120_v56  ;;  %v8837_v10 = vpack.c.bf16 %v4130_v1, %v4122_v32  ;;  %v4192_v56 = vld [vmem:[%s18566_s4 + $0x748] sm:$0xff]  ;;  %v4186_v11 = vld [vmem:[%s18566_s4 + $0x718] sm:$0xff]  ;;  %v4183_v1 = vld [vmem:[%s18566_s4 + $0x700] sm:$0xff] }
 0x63c   :  { %8758 = vmatprep.subr.bf16.mxu0 %v8757_v12  ;;  %v4119_v12 = vld [vmem:[%s18566_s4 + $0x500] sm:$0xff] }
 0x63d   :  { %v8775_v54 = vpack.c.bf16 %v4127_v17, %v4119_v12  ;;  %v4191_v12 = vld [vmem:[%s18566_s4 + $0x740] sm:$0xff] }
 0x63e   :  { %8824 = vmatpush1.bf16.msra.mxu1 %v8823_v8  ;;  %v4136_v8 = vld [vmem:[%s18566_s4 + $0x588] sm:$0xff] }
 0x63f   :  { %8760 = vmatpush1.bf16.msra.mxu0 %v8759_v52  ;;  %8826 = vmatprep.subr.bf16.mxu1 %v8825_v30  ;;  %v8839_v52 = vpack.c.bf16 %v4129_v16, %v4121_v18  ;;  %v8777_v6 = vpack.c.bf16 %v4144_v22, %v4136_v8  ;;  %v4143_v30 = vld [vmem:[%s18566_s4 + $0x5c0] sm:$0xff]  ;;  %v4193_v18 = vld [vmem:[%s18566_s4 + $0x750] sm:$0xff]  ;;  %v4208_v8 = vld [vmem:[%s18566_s4 + $0x7c8] sm:$0xff] }
 0x640   :  { %8762 = vmatprep.subr.bf16.mxu0 %v8761_v26  ;;  %v4146_v26 = vld [vmem:[%s18566_s4 + $0x5d8] sm:$0xff]  ;;  %v8779_v31 = vpack.c.bf16 %v4143_v30, %v4135_v27  ;;  %v4207_v27 = vld [vmem:[%s18566_s4 + $0x7c0] sm:$0xff] }
 0x641   :  { %v8841_v44 = vpack.c.bf16 %v4146_v26, %v4138_v9  ;;  %v4202_v22 = vld [vmem:[%s18566_s4 + $0x798] sm:$0xff]  ;;  %v4199_v26 = vld [vmem:[%s18566_s4 + $0x780] sm:$0xff] }
 0x642   :  { %8828 = vmatpush1.bf16.msra.mxu1 %v8827_v14  ;;  %v4152_v14 = vld [vmem:[%s18566_s4 + $0x608] sm:$0xff] }
 0x643   :  { %8764 = vmatpush1.bf16.msra.mxu0 %v8763_v47  ;;  %8830 = vmatprep.subr.bf16.mxu1 %v8829_v2  ;;  %v4145_v47 = vld [vmem:[%s18566_s4 + $0x5d0] sm:$0xff]  ;;  %v8781_v33 = vpack.c.bf16 %v4160_v28, %v4152_v14  ;;  %v8783_v2 = vpack.c.bf16 %v4159_v34, %v4151_v29  ;;  %v3972_v14 = vld [vmem:[%s18566_s4 + $0x68] sm:$0xff]  ;;  %v3966_v28 = vld [vmem:[%s18566_s4 + $0x38] sm:$0xff] }
 0x644   :  { %8766 = vmatprep.subr.bf16.mxu0 %v8765_v15  ;;  %v8843_v25 = vpack.c.bf16 %v4145_v47, %v4137_v7  ;;  %v4162_v15 = vld [vmem:[%s18566_s4 + $0x658] sm:$0xff]  ;;  %v4209_v7 = vld [vmem:[%s18566_s4 + $0x7d0] sm:$0xff] }
 0x645   :  { %v8845_v57 = vpack.c.bf16 %v4162_v15, %v4154_v19 }
 0x646   :  { %8832 = vmatpush1.bf16.msra.mxu1 %v8831_v40  ;;  %v4168_v40 = vld [vmem:[%s18566_s4 + $0x688] sm:$0xff] }
 0x647   :  { %8768 = vmatpush1.bf16.msra.mxu0 %v8767_v36  ;;  %8834 = vmatprep.subr.bf16.mxu1 %v8833_v59  ;;  %v4153_v36 = vld [vmem:[%s18566_s4 + $0x610] sm:$0xff]  ;;  %v8785_v45 = vpack.c.bf16 %v4176_v61, %v4168_v40  ;;  %v8787_v59 = vpack.c.bf16 %v4175_v5, %v4167_v53 }
 0x648   :  { %8770 = vmatprep.subr.bf16.mxu0 %v8769_v20  ;;  %v8847_v51 = vpack.c.bf16 %v4161_v39, %v4153_v36  ;;  %v4178_v20 = vld [vmem:[%s18566_s4 + $0x6d8] sm:$0xff] }
 0x649   :  { %v8849_v58 = vpack.c.bf16 %v4178_v20, %v4170_v55 }
 0x64a   :  { %8836 = vmatpush1.bf16.msra.mxu1 %v8835_v4  ;;  %v4184_v4 = vld [vmem:[%s18566_s4 + $0x708] sm:$0xff] }
 0x64b   :  { %8772 = vmatpush1.bf16.msra.mxu0 %v8771_v60  ;;  %8838 = vmatprep.subr.bf16.mxu1 %v8837_v10  ;;  %v4169_v60 = vld [vmem:[%s18566_s4 + $0x690] sm:$0xff]  ;;  %v8789_v32 = vpack.c.bf16 %v4192_v56, %v4184_v4  ;;  %v8791_v10 = vpack.c.bf16 %v4191_v12, %v4183_v1 }
 0x64c   :  { %8774 = vmatprep.subr.bf16.mxu0 %v8773_v62  ;;  %v8851_v41 = vpack.c.bf16 %v4177_v63, %v4169_v60  ;;  %v4194_v62 = vld [vmem:[%s18566_s4 + $0x758] sm:$0xff] }
 0x64d   :  { %v8853_v17 = vpack.c.bf16 %v4194_v62, %v4186_v11 }
 0x64e   :  { %8840 = vmatpush1.bf16.msra.mxu1 %v8839_v52  ;;  %v4200_v52 = vld [vmem:[%s18566_s4 + $0x788] sm:$0xff] }
 0x64f   :  { %8776 = vmatpush1.bf16.msra.mxu0 %v8775_v54  ;;  %8842 = vmatprep.subr.bf16.mxu1 %v8841_v44  ;;  %v4185_v54 = vld [vmem:[%s18566_s4 + $0x710] sm:$0xff]  ;;  %v8793_v9 = vpack.c.bf16 %v4208_v8, %v4200_v52  ;;  %v8795_v44 = vpack.c.bf16 %v4207_v27, %v4199_v26 }
 0x650   :  { %8778 = vmatprep.subr.bf16.mxu0 %v8777_v6  ;;  %v8855_v16 = vpack.c.bf16 %v4193_v18, %v4185_v54  ;;  %v4210_v6 = vld [vmem:[%s18566_s4 + $0x7d8] sm:$0xff] }
 0x651   :  { %v8857_v30 = vpack.c.bf16 %v4210_v6, %v4202_v22 }
 0x652   :  { %8844 = vmatpush1.bf16.msra.mxu1 %v8843_v25  ;;  %v3964_v25 = vld [vmem:[%s18566_s4 + $0x28] sm:$0xff] }
 0x653   :  { %8780 = vmatpush1.bf16.msra.mxu0 %v8779_v31  ;;  %8846 = vmatprep.subr.bf16.mxu1 %v8845_v57  ;;  %v4201_v31 = vld [vmem:[%s18566_s4 + $0x790] sm:$0xff]  ;;  %v8861_v19 = vpack.c.bf16 %v3972_v14, %v3964_v25 }
 0x654   :  { %8782 = vmatprep.subr.bf16.mxu0 %v8781_v33  ;;  %v8859_v47 = vpack.c.bf16 %v4209_v7, %v4201_v31  ;;  %v3974_v33 = vld [vmem:[%s18566_s4 + $0x78] sm:$0xff] }
 0x655   :  { %v8925_v15 = vpack.c.bf16 %v3974_v33, %v3966_v28 }
 0x656   :  { %8848 = vmatpush1.bf16.msra.mxu1 %v8847_v51 }
 0x657   :  { %8784 = vmatpush1.bf16.msra.mxu0 %v8783_v2  ;;  %8850 = vmatprep.subr.bf16.mxu1 %v8849_v58 }
 0x658   :  { %8786 = vmatprep.subr.bf16.mxu0 %v8785_v45 }
 0x65a   :  { %8852 = vmatpush1.bf16.msra.mxu1 %v8851_v41 }
 0x65b   :  { %8788 = vmatpush1.bf16.msra.mxu0 %v8787_v59  ;;  %8854 = vmatprep.subr.bf16.mxu1 %v8853_v17 }
 0x65c   :  { %8790 = vmatprep.subr.bf16.mxu0 %v8789_v32 }
 0x65e   :  { %8856 = vmatpush1.bf16.msra.mxu1 %v8855_v16 }
 0x65f   :  { %8792 = vmatpush1.bf16.msra.mxu0 %v8791_v10  ;;  %8858 = vmatprep.subr.bf16.mxu1 %v8857_v30 }
 0x660   :  { %8794 = vmatprep.subr.bf16.mxu0 %v8793_v9 }
 0x662   :  { %8860 = vmatpush1.bf16.msra.mxu1 %v8859_v47 }
 0x663   :  { %8796 = vmatpush1.bf16.msra.mxu0 %v8795_v44  ;;  %8926 = vmatprep.subr.bf16.mxu1 %v8925_v15 }
 0x664   :  { %8862 = vmatprep.subr.bf16.mxu0 %v8861_v19 }
 0x6b3   :  { %v3621_v29 = vpop.f32.mrb[20].mxu0  ;;  %v3698_v34 = vpop.f32.mrb[20].mxu1 }
 0x6b4   :  { %v9901_v57 = vadd.f32 %v3621_v29, %v11107_v48  ;;  %v3623_v2 = vpop.f32.mrb[21].mxu0  ;;  %v3700_v36 = vpop.f32.mrb[21].mxu1  ;;  %v9937_v39 = vadd.f32 %v3698_v34, %v11113_v50 }
 0x6b5   :  { %v9902_v51 = vadd.f32 %v3623_v2, %v11110_v49  ;;  %v9938_v15 = vadd.f32 %v3700_v36, %v11124_v0 }
 0x6b6   :  { %10229 = vtanh.f32 %v9901_v57 }
 0x6b7   :  { %v3627_v40 = vpop.f32.mrb[22].mxu0  ;;  %v3704_v61 = vpop.f32.mrb[22].mxu1  ;;  %10231 = vtanh.f32 %v9902_v51 }
 0x6b8   :  { %v9903_v55 = vadd.f32 %v3627_v40, %v11107_v48  ;;  %v3629_v45 = vpop.f32.mrb[23].mxu0  ;;  %v3706_v20 = vpop.f32.mrb[23].mxu1  ;;  %10233 = vtanh.f32 %v9937_v39  ;;  %v9939_v5 = vadd.f32 %v3704_v61, %v11113_v50 }
 0x6b9   :  { %v9904_v53 = vadd.f32 %v3629_v45, %v11110_v49  ;;  %v9940_v61 = vadd.f32 %v3706_v20, %v11124_v0 }
 0x6ba   :  { %10235 = vtanh.f32 %v9903_v55 }
 0x6bb   :  { %10237 = vtanh.f32 %v9904_v53 }
 0x6bc   :  { %10239 = vtanh.f32 %v9939_v5 }
 0x6c0   :  { %v10230_v58 = vpop.eup %10229 }
 0x6c1   :  { %v3888_v59 = vmul.f32 0.5, %v10230_v58  ;;  %v10232_v60 = vpop.eup %10231 }
 0x6c2   :  { %v10234_v63 = vpop.eup %10233  ;;  %v3892_v4 = vmul.f32 0.5, %v10232_v60 }
 0x6c3   :  { %v3890_v41 = vadd.f32 0.5, %v3888_v59 }
 0x6c4   :  { %v10236_v56 = vpop.eup %10235  ;;  %v3894_v11 = vadd.f32 0.5, %v3892_v4 }
 0x6c5   :  { %v3902_v32 = vmul.f32 %v10234_v63, %v3890_v41  ;;  %v3889_v62 = vmul.f32 0.5, %v10236_v56  ;;  %v10238_v1 = vpop.eup %10237 }
 0x6c6   :  { %v3900_v12 = vmul.f32 %v3894_v11, %v14466_v3  ;;  %v3893_v10 = vmul.f32 0.5, %v10238_v1  ;;  %v10240_v54 = vpop.eup %10239 }
 0x6c7   :  { %v3891_v17 = vadd.f32 0.5, %v3889_v62 }
 0x6c8   :  { %v15288_v18 = vadd.f32 %v3902_v32, %v3900_v12  ;;  %v3895_v16 = vadd.f32 0.5, %v3893_v10  ;;  %v3965_v10 = vld [vmem:[%s18566_s4 + $0x30] sm:$0xff] }
 0x6c9   :  { %v3903_v52 = vmul.f32 %v10240_v54, %v3891_v17  ;;  %v3963_v17 = vld [vmem:[%s18566_s4 + $0x20] sm:$0xff]  ;;  %v3973_v54 = vld [vmem:[%s18566_s4 + $0x70] sm:$0xff] }
 0x6ca   :  { %v3901_v8 = vmul.f32 %v3895_v16, %v14469_v13  ;;  %v3980_v16 = vld [vmem:[%s18566_s4 + $0xa8] sm:$0xff] }
 0x6cc   :  { %v15291_v22 = vadd.f32 %v3903_v52, %v3901_v8 }
 0x6f3   :  { %v3775_v9 = vpop.f32.mrb[56].mxu0  ;;  %v3852_v6 = vpop.f32.mrb[56].mxu1 }
 0x6f4   :  { %v3910_v26 = vadd.f32 %v3775_v9, %v11978_v23  ;;  %v3777_v27 = vpop.f32.mrb[57].mxu0  ;;  %v3854_v30 = vpop.f32.mrb[57].mxu1  ;;  %v3912_v44 = vadd.f32 %v3852_v6, %v11981_v21  ;;  %v3988_v6 = vld [vmem:[%s18566_s4 + $0xe8] sm:$0xff] }
 0x6f5   :  { %v3911_v3 = vadd.f32 %v3777_v27, %v11984_v24  ;;  %v3913_v19 = vadd.f32 %v3854_v30, %v11993_v37  ;;  %v3990_v27 = vld [vmem:[%s18566_s4 + $0xf8] sm:$0xff] }
 0x6f6   :  { %10241 = vtanh.f32 %v3910_v26  ;;  %v3982_v26 = vld [vmem:[%s18566_s4 + $0xb8] sm:$0xff] }
 0x6f7   :  { %v3781_v31 = vpop.f32.mrb[58].mxu0  ;;  %v3858_v7 = vpop.f32.mrb[58].mxu1  ;;  %10243 = vtanh.f32 %v3911_v3 }
 0x6f8   :  { %v3914_v47 = vadd.f32 %v3781_v31, %v11978_v23  ;;  %v3783_v25 = vpop.f32.mrb[59].mxu0  ;;  %v3860_v13 = vpop.f32.mrb[59].mxu1  ;;  %10245 = vtanh.f32 %v3912_v44  ;;  %v3916_v28 = vadd.f32 %v3858_v7, %v11981_v21 }
 0x6f9   :  { %v3915_v14 = vadd.f32 %v3783_v25, %v11984_v24  ;;  %v3917_v51 = vadd.f32 %v3860_v13, %v11993_v37  ;;  %v3979_v25 = vld [vmem:[%s18566_s4 + $0xa0] sm:$0xff] }
 0x6fa   :  { %10247 = vtanh.f32 %v3914_v47  ;;  %v8927_v47 = vpack.c.bf16 %v3973_v54, %v3965_v10  ;;  %v4013_v54 = vld [vmem:[%s18566_s4 + $0x1b0] sm:$0xff] }
 0x6fb   :  { %10249 = vtanh.f32 %v3915_v14  ;;  %v8865_v14 = vpack.c.bf16 %v3988_v6, %v3980_v16  ;;  %v4021_v16 = vld [vmem:[%s18566_s4 + $0x1f0] sm:$0xff]  ;;  %v4038_v6 = vld [vmem:[%s18566_s4 + $0x278] sm:$0xff] }
 0x6fc   :  { %10251 = vtanh.f32 %v3916_v28  ;;  %v8929_v28 = vpack.c.bf16 %v3990_v27, %v3982_v26 }
 0x6fd   :  { %10253 = vtanh.f32 %v3913_v19  ;;  %v3987_v19 = vld [vmem:[%s18566_s4 + $0xe0] sm:$0xff] }
 0x6fe   :  { %10255 = vtanh.f32 %v9938_v15  ;;  %v3989_v15 = vld [vmem:[%s18566_s4 + $0xf0] sm:$0xff] }
 0x6ff   :  { %10257 = vtanh.f32 %v3917_v51  ;;  %v4004_v51 = vld [vmem:[%s18566_s4 + $0x168] sm:$0xff] }
 0x700   :  { %v10242_v33 = vpop.eup %10241  ;;  %10259 = vtanh.f32 %v9940_v61  ;;  %v4006_v61 = vld [vmem:[%s18566_s4 + $0x178] sm:$0xff] }
 0x701   :  { %v3926_v29 = vmul.f32 0.5, %v10242_v33  ;;  %v10244_v34 = vpop.eup %10243  ;;  %10261 = vtanh.f32 %v15288_v18  ;;  %v3981_v33 = vld [vmem:[%s18566_s4 + $0xb0] sm:$0xff] }
 0x702   :  { %v10246_v57 = vpop.eup %10245  ;;  %v3930_v39 = vmul.f32 0.5, %v10244_v34 }
 0x703   :  { %v3928_v2 = vadd.f32 0.5, %v3926_v29 }
 0x704   :  { %v10248_v40 = vpop.eup %10247  ;;  %v3932_v55 = vadd.f32 0.5, %v3930_v39 }
 0x705   :  { %v3940_v45 = vmul.f32 %v10246_v57, %v3928_v2  ;;  %v3927_v53 = vmul.f32 0.5, %v10248_v40  ;;  %v10250_v5 = vpop.eup %10249  ;;  %v3996_v57 = vld [vmem:[%s18566_s4 + $0x128] sm:$0xff]  ;;  %v3998_v40 = vld [vmem:[%s18566_s4 + $0x138] sm:$0xff] }
 0x706   :  { %v3938_v58 = vmul.f32 %v3932_v55, %v14482_v38  ;;  %v3931_v36 = vmul.f32 0.5, %v10250_v5  ;;  %v10252_v60 = vpop.eup %10251  ;;  %v3995_v5 = vld [vmem:[%s18566_s4 + $0x120] sm:$0xff] }
 0x707   :  { %v3929_v59 = vadd.f32 0.5, %v3927_v53  ;;  %v10254_v56 = vpop.eup %10253  ;;  %v8931_v53 = vpack.c.bf16 %v3989_v15, %v3981_v33  ;;  %v4052_v33 = vld [vmem:[%s18566_s4 + $0x2e8] sm:$0xff]  ;;  %v4046_v15 = vld [vmem:[%s18566_s4 + $0x2b8] sm:$0xff] }
 0x708   :  { %v15304_v63 = vadd.f32 %v3940_v45, %v3938_v58  ;;  %v3933_v41 = vadd.f32 0.5, %v3931_v36  ;;  %v10256_v32 = vpop.eup %10255  ;;  %v3934_v38 = vmul.f32 0.5, %v10254_v56  ;;  %v8867_v45 = vpack.c.bf16 %v3987_v19, %v3979_v25  ;;  %v4003_v58 = vld [vmem:[%s18566_s4 + $0x160] sm:$0xff]  ;;  %v3997_v36 = vld [vmem:[%s18566_s4 + $0x130] sm:$0xff]  ;;  %v4020_v56 = vld [vmem:[%s18566_s4 + $0x1e8] sm:$0xff] }
 0x709   :  { %v3941_v4 = vmul.f32 %v10252_v60, %v3929_v59  ;;  %v10258_v62 = vpop.eup %10257  ;;  %v3896_v1 = vmul.f32 0.5, %v10256_v32  ;;  %v4005_v60 = vld [vmem:[%s18566_s4 + $0x170] sm:$0xff]  ;;  %v4014_v32 = vld [vmem:[%s18566_s4 + $0x1b8] sm:$0xff]  ;;  %v4044_v19 = vld [vmem:[%s18566_s4 + $0x2a8] sm:$0xff] }
 0x70a   :  { %10263 = vtanh.f32 %v15304_v63  ;;  %v3939_v20 = vmul.f32 %v3933_v41, %v14487_v35  ;;  %v10260_v12 = vpop.eup %10259  ;;  %v3971_v35 = vld [vmem:[%s18566_s4 + $0x60] sm:$0xff]  ;;  %v3936_v8 = vadd.f32 0.5, %v3934_v38  ;;  %v3935_v9 = vmul.f32 0.5, %v10258_v62  ;;  %v4012_v41 = vld [vmem:[%s18566_s4 + $0x1a8] sm:$0xff]  ;;  %v4022_v38 = vld [vmem:[%s18566_s4 + $0x1f8] sm:$0xff] }
 0x70b   :  { %10265 = vtanh.f32 %v15291_v22  ;;  %v10262_v52 = vpop.eup %10261  ;;  %v3898_v44 = vadd.f32 0.5, %v3896_v1  ;;  %v3897_v3 = vmul.f32 0.5, %v10260_v12  ;;  %v8863_v7 = vpack.c.bf16 %v3971_v35, %v3963_v17  ;;  %v4011_v12 = vld [vmem:[%s18566_s4 + $0x1a0] sm:$0xff] }
 0x70c   :  { %v15309_v11 = vadd.f32 %v3941_v4, %v3939_v20  ;;  %v3937_v34 = vadd.f32 0.5, %v3935_v9  ;;  %v8869_v4 = vpack.c.bf16 %v4004_v51, %v3996_v57  ;;  %v8933_v20 = vpack.c.bf16 %v4006_v61, %v3998_v40  ;;  %v4019_v17 = vld [vmem:[%s18566_s4 + $0x1e0] sm:$0xff]  ;;  %v4030_v9 = vld [vmem:[%s18566_s4 + $0x238] sm:$0xff] }
 0x70d   :  { %v15340_v13 = vmul.f32 %v10262_v52, %v3898_v44  ;;  %v3899_v39 = vadd.f32 0.5, %v3897_v3  ;;  %v8871_v62 = vpack.c.bf16 %v4003_v58, %v3995_v5  ;;  %v8935_v1 = vpack.c.bf16 %v4005_v60, %v3997_v36  ;;  %v4028_v52 = vld [vmem:[%s18566_s4 + $0x228] sm:$0xff]  ;;  %v4027_v44 = vld [vmem:[%s18566_s4 + $0x220] sm:$0xff]  ;;  %v4053_v5 = vld [vmem:[%s18566_s4 + $0x2f0] sm:$0xff] }
 0x70e   :  { %10267 = vtanh.f32 %v15309_v11  ;;  %v8873_v35 = vpack.c.bf16 %v4020_v56, %v4012_v41  ;;  %v8937_v10 = vpack.c.bf16 %v4022_v38, %v4014_v32  ;;  %v8875_v27 = vpack.c.bf16 %v4019_v17, %v4011_v12  ;;  %v4035_v3 = vld [vmem:[%s18566_s4 + $0x260] sm:$0xff]  ;;  %v4060_v58 = vld [vmem:[%s18566_s4 + $0x328] sm:$0xff]  ;;  %v4062_v60 = vld [vmem:[%s18566_s4 + $0x338] sm:$0xff] }
 0x70f   :  { %v8941_v25 = vpack.c.bf16 %v4038_v6, %v4030_v9  ;;  %v8879_v57 = vpack.c.bf16 %v4035_v3, %v4027_v44  ;;  %v4051_v51 = vld [vmem:[%s18566_s4 + $0x2e0] sm:$0xff]  ;;  %v8881_v61 = vpack.c.bf16 %v4052_v33, %v4044_v19  ;;  %v4068_v36 = vld [vmem:[%s18566_s4 + $0x368] sm:$0xff]  ;;  %v4070_v41 = vld [vmem:[%s18566_s4 + $0x378] sm:$0xff] }
 0x710   :  { %v4059_v56 = vld [vmem:[%s18566_s4 + $0x320] sm:$0xff]  ;;  %v8885_v38 = vpack.c.bf16 %v4068_v36, %v4060_v58  ;;  %v4069_v12 = vld [vmem:[%s18566_s4 + $0x370] sm:$0xff]  ;;  %v4076_v17 = vld [vmem:[%s18566_s4 + $0x3a8] sm:$0xff] }
 0x711   :  { %v4067_v32 = vld [vmem:[%s18566_s4 + $0x360] sm:$0xff]  ;;  %v4092_v44 = vld [vmem:[%s18566_s4 + $0x428] sm:$0xff]  ;;  %v4109_v58 = vld [vmem:[%s18566_s4 + $0x4b0] sm:$0xff] }
 0x712   :  { %v4083_v9 = vld [vmem:[%s18566_s4 + $0x3e0] sm:$0xff]  ;;  %v4100_v3 = vld [vmem:[%s18566_s4 + $0x468] sm:$0xff]  ;;  %v4117_v36 = vld [vmem:[%s18566_s4 + $0x4f0] sm:$0xff] }
 0x713   :  { %v8893_v19 = vpack.c.bf16 %v4100_v3, %v4092_v44  ;;  %v4141_v44 = vld [vmem:[%s18566_s4 + $0x5b0] sm:$0xff] }
 0x714   :  { %v10264_v30 = vpop.eup %10263  ;;  %v4149_v3 = vld [vmem:[%s18566_s4 + $0x5f0] sm:$0xff] }
 0x715   :  { %v3946_v31 = vmul.f32 %v10264_v30, %v3936_v8  ;;  %v10266_v29 = vpop.eup %10265  ;;  %v4036_v8 = vld [vmem:[%s18566_s4 + $0x268] sm:$0xff]  ;;  %v8939_v30 = vpack.c.bf16 %v4021_v16, %v4013_v54  ;;  %v4086_v54 = vld [vmem:[%s18566_s4 + $0x3f8] sm:$0xff]  ;;  %v8887_v16 = vpack.c.bf16 %v4067_v32, %v4059_v56  ;;  %v8963_v32 = vpack.c.bf16 %v4117_v36, %v4109_v58 }
 0x716   :  { %v15373_v59 = vmul.f32 %v10266_v29, %v3899_v39  ;;  %v4054_v29 = vld [vmem:[%s18566_s4 + $0x2f8] sm:$0xff]  ;;  %v4043_v39 = vld [vmem:[%s18566_s4 + $0x2a0] sm:$0xff] }
 0x717   :  { %4279 = vmatprep.mubr.f32.mxu0 %v3946_v31  ;;  %4356 = vmatprep.mubr.f32.mxu1 %v3946_v31  ;;  %10269 = vtanh.f32 %v3946_v31 }
 0x718   :  { %v10268_v2 = vpop.eup %10267  ;;  %4280 = vmatmul.mubr.f32.vlgmr.msra.gmra.mrb[24].mxu0 %v15340_v13  ;;  %4357 = vmatmul.mubr.f32.vlgmr.msra.gmra.mrb[24].mxu1 %v15340_v13 }
 0x719   :  { %v15365_v55 = vmul.f32 %v10268_v2, %v3937_v34  ;;  %8864 = vmatpush1.bf16.msra.mxu0 %v8863_v7  ;;  %8928 = vmatpush1.bf16.msra.mxu1 %v8927_v47  ;;  %v8877_v47 = vpack.c.bf16 %v4036_v8, %v4028_v52  ;;  %v4075_v8 = vld [vmem:[%s18566_s4 + $0x3a0] sm:$0xff] }
 0x71a   :  { %8866 = vmatprep.subr.bf16.mxu0 %v8865_v14  ;;  %8930 = vmatprep.subr.bf16.mxu1 %v8929_v28  ;;  %v4029_v14 = vld [vmem:[%s18566_s4 + $0x230] sm:$0xff] }
 0x71b   :  { %4285 = vmatprep.mubr.f32.mxu0 %v15365_v55  ;;  %4362 = vmatprep.mubr.f32.mxu1 %v15365_v55  ;;  %10271 = vtanh.f32 %v15365_v55  ;;  %v4037_v28 = vld [vmem:[%s18566_s4 + $0x270] sm:$0xff] }
 0x71c   :  { %4286 = vmatmul.mubr.f32.gmra.mrb[26].mxu0 %v15373_v59  ;;  %4363 = vmatmul.mubr.f32.gmra.mrb[26].mxu1 %v15373_v59  ;;  %v8943_v2 = vpack.c.bf16 %v4037_v28, %v4029_v14  ;;  %v4091_v14 = vld [vmem:[%s18566_s4 + $0x420] sm:$0xff] }
 0x71d   :  { %8868 = vmatpush1.bf16.msra.mxu0 %v8867_v45  ;;  %8932 = vmatpush1.bf16.msra.mxu1 %v8931_v53  ;;  %v8945_v45 = vpack.c.bf16 %v4054_v29, %v4046_v15  ;;  %v4045_v53 = vld [vmem:[%s18566_s4 + $0x2b0] sm:$0xff]  ;;  %v4099_v28 = vld [vmem:[%s18566_s4 + $0x460] sm:$0xff] }
 0x71e   :  { %4433 = vmatprep.mubr.f32.mxu0 %v3946_v31  ;;  %4510 = vmatprep.mubr.f32.mxu1 %v3946_v31  ;;  %v10477_v31 = vld [vmem:[%s18571_s6] ss:$0 sm:$0xff]  ;;  %v4093_v15 = vld [vmem:[%s18566_s4 + $0x430] sm:$0xff] }
 0x71f   :  { %8870 = vmatprep.subr.bf16.mxu0 %v8869_v4  ;;  %8934 = vmatprep.subr.bf16.mxu1 %v8933_v20  ;;  %v8883_v4 = vpack.c.bf16 %v4051_v51, %v4043_v39  ;;  %v8947_v20 = vpack.c.bf16 %v4053_v5, %v4045_v53  ;;  %v4101_v29 = vld [vmem:[%s18566_s4 + $0x470] sm:$0xff]  ;;  %v4118_v39 = vld [vmem:[%s18566_s4 + $0x4f8] sm:$0xff]  ;;  %v8895_v51 = vpack.c.bf16 %v4099_v28, %v4091_v14 }
 0x720   :  { %v8971_v28 = vpack.c.bf16 %v4149_v3, %v4141_v44  ;;  %v4211_v3 = vld [vmem:[%s18566_s4 + $0x7e0] sm:$0xff] }
 0x721   :  { %v10270_v26 = vpop.eup %10269  ;;  %8872 = vmatpush1.bf16.msra.mxu0 %v8871_v62  ;;  %8936 = vmatpush1.bf16.msra.mxu1 %v8935_v1  ;;  %v8949_v62 = vpack.c.bf16 %v4070_v41, %v4062_v60  ;;  %v4061_v1 = vld [vmem:[%s18566_s4 + $0x330] sm:$0xff]  ;;  %v4124_v60 = vld [vmem:[%s18566_s4 + $0x528] sm:$0xff] }
 0x722   :  { %8874 = vmatprep.subr.bf16.mxu0 %v8873_v35  ;;  %8938 = vmatprep.subr.bf16.mxu1 %v8937_v10  ;;  %v6969_v7 = vmul.f32 %v10477_v31, %v10270_v26  ;;  %v4084_v35 = vld [vmem:[%s18566_s4 + $0x3e8] sm:$0xff]  ;;  %v4078_v10 = vld [vmem:[%s18566_s4 + $0x3b8] sm:$0xff]  ;;  %v8951_v52 = vpack.c.bf16 %v4069_v12, %v4061_v1 }
 0x723   :  { %v8889_v6 = vpack.c.bf16 %v4084_v35, %v4076_v17  ;;  %v8953_v26 = vpack.c.bf16 %v4086_v54, %v4078_v10  ;;  %v4132_v41 = vld [vmem:[%s18566_s4 + $0x568] sm:$0xff]  ;;  %v4125_v17 = vld [vmem:[%s18566_s4 + $0x530] sm:$0xff] }
 0x724   :  { %6997 = vadd.xlane.f32.xlu0 %v6969_v7  ;;  %v4102_v7 = vld [vmem:[%s18566_s4 + $0x478] sm:$0xff]  ;;  %v8901_v1 = vpack.c.bf16 %v4132_v41, %v4124_v60  ;;  %v4133_v35 = vld [vmem:[%s18566_s4 + $0x570] sm:$0xff]  ;;  %v4140_v10 = vld [vmem:[%s18566_s4 + $0x5a8] sm:$0xff] }
 0x725   :  { %v10272_v34 = vpop.eup %10271  ;;  %8876 = vmatpush1.bf16.msra.mxu0 %v8875_v27  ;;  %8940 = vmatpush1.bf16.msra.mxu1 %v8939_v30  ;;  %v4077_v27 = vld [vmem:[%s18566_s4 + $0x3b0] sm:$0xff]  ;;  %v4148_v54 = vld [vmem:[%s18566_s4 + $0x5e8] sm:$0xff] }
 0x726   :  { %8878 = vmatprep.subr.bf16.mxu0 %v8877_v47  ;;  %8942 = vmatprep.subr.bf16.mxu1 %v8941_v25  ;;  %v6970_v40 = vmul.f32 %v10477_v31, %v10272_v34  ;;  %v4085_v30 = vld [vmem:[%s18566_s4 + $0x3f0] sm:$0xff]  ;;  %v4094_v31 = vld [vmem:[%s18566_s4 + $0x438] sm:$0xff]  ;;  %v8891_v47 = vpack.c.bf16 %v4083_v9, %v4075_v8  ;;  %v4108_v34 = vld [vmem:[%s18566_s4 + $0x4a8] sm:$0xff]  ;;  %v8967_v9 = vpack.c.bf16 %v4133_v35, %v4125_v17 }
 0x727   :  { %v8955_v25 = vpack.c.bf16 %v4085_v30, %v4077_v27  ;;  %v8957_v33 = vpack.c.bf16 %v4102_v7, %v4094_v31  ;;  %v8905_v27 = vpack.c.bf16 %v4148_v54, %v4140_v10  ;;  %v4156_v31 = vld [vmem:[%s18566_s4 + $0x628] sm:$0xff]  ;;  %v4173_v60 = vld [vmem:[%s18566_s4 + $0x6b0] sm:$0xff] }
 0x728   :  { %6999 = vadd.xlane.f32.xlu1 %v6970_v40  ;;  %v8959_v40 = vpack.c.bf16 %v4101_v29, %v4093_v15  ;;  %v4164_v7 = vld [vmem:[%s18566_s4 + $0x668] sm:$0xff]  ;;  %v4181_v41 = vld [vmem:[%s18566_s4 + $0x6f0] sm:$0xff] }
 0x729   :  { %8880 = vmatpush1.bf16.msra.mxu0 %v8879_v57  ;;  %8944 = vmatpush1.bf16.msra.mxu1 %v8943_v2  ;;  %v4116_v57 = vld [vmem:[%s18566_s4 + $0x4e8] sm:$0xff]  ;;  %v4110_v2 = vld [vmem:[%s18566_s4 + $0x4b8] sm:$0xff]  ;;  %v8909_v15 = vpack.c.bf16 %v4164_v7, %v4156_v31  ;;  %v4189_v10 = vld [vmem:[%s18566_s4 + $0x730] sm:$0xff] }
 0x72a   :  { %8882 = vmatprep.subr.bf16.mxu0 %v8881_v61  ;;  %8946 = vmatprep.subr.bf16.mxu1 %v8945_v45  ;;  %v4107_v61 = vld [vmem:[%s18566_s4 + $0x4a0] sm:$0xff]  ;;  %v8897_v53 = vpack.c.bf16 %v4116_v57, %v4108_v34  ;;  %v8961_v5 = vpack.c.bf16 %v4118_v39, %v4110_v2  ;;  %v4157_v34 = vld [vmem:[%s18566_s4 + $0x630] sm:$0xff]  ;;  %v4172_v2 = vld [vmem:[%s18566_s4 + $0x6a8] sm:$0xff] }
 0x72b   :  { %v4115_v45 = vld [vmem:[%s18566_s4 + $0x4e0] sm:$0xff]  ;;  %v4165_v57 = vld [vmem:[%s18566_s4 + $0x670] sm:$0xff]  ;;  %v4180_v39 = vld [vmem:[%s18566_s4 + $0x6e8] sm:$0xff] }
 0x72c   :  { %v8899_v56 = vpack.c.bf16 %v4115_v45, %v4107_v61  ;;  %v8975_v45 = vpack.c.bf16 %v4165_v57, %v4157_v34  ;;  %v8913_v58 = vpack.c.bf16 %v4180_v39, %v4172_v2  ;;  %v4197_v54 = vld [vmem:[%s18566_s4 + $0x770] sm:$0xff]  ;;  %v4636_v39 = vld [vmem:[%s18566_s4 + $0x88] sm:$0xff] }
 0x72d   :  { %8884 = vmatpush1.bf16.msra.mxu0 %v8883_v4  ;;  %8948 = vmatpush1.bf16.msra.mxu1 %v8947_v20  ;;  %v4126_v4 = vld [vmem:[%s18566_s4 + $0x538] sm:$0xff]  ;;  %v4205_v31 = vld [vmem:[%s18566_s4 + $0x7b0] sm:$0xff] }
 0x72e   :  { %8886 = vmatprep.subr.bf16.mxu0 %v8885_v38  ;;  %8950 = vmatprep.subr.bf16.mxu1 %v8949_v62  ;;  %v4134_v20 = vld [vmem:[%s18566_s4 + $0x578] sm:$0xff]  ;;  %v4123_v38 = vld [vmem:[%s18566_s4 + $0x520] sm:$0xff]  ;;  %v4213_v7 = vld [vmem:[%s18566_s4 + $0x7f0] sm:$0xff] }
 0x72f   :  { %v4131_v62 = vld [vmem:[%s18566_s4 + $0x560] sm:$0xff]  ;;  %v8965_v12 = vpack.c.bf16 %v4134_v20, %v4126_v4  ;;  %v4188_v4 = vld [vmem:[%s18566_s4 + $0x728] sm:$0xff]  ;;  %v4621_v34 = vld [vmem:[%s18566_s4 + $0x10] sm:$0xff] }
 0x730   :  { %v8903_v8 = vpack.c.bf16 %v4131_v62, %v4123_v38  ;;  %v4196_v20 = vld [vmem:[%s18566_s4 + $0x768] sm:$0xff]  ;;  %v8979_v62 = vpack.c.bf16 %v4181_v41, %v4173_v60  ;;  %v4629_v57 = vld [vmem:[%s18566_s4 + $0x50] sm:$0xff] }
 0x731   :  { %8888 = vmatpush1.bf16.msra.mxu0 %v8887_v16  ;;  %8952 = vmatpush1.bf16.msra.mxu1 %v8951_v52  ;;  %v4142_v16 = vld [vmem:[%s18566_s4 + $0x5b8] sm:$0xff]  ;;  %v8917_v17 = vpack.c.bf16 %v4196_v20, %v4188_v4  ;;  %v9055_v2 = vpack.c.bf16 %v4629_v57, %v4621_v34  ;;  %v4637_v60 = vld [vmem:[%s18566_s4 + $0x90] sm:$0xff]  ;;  %v4652_v4 = vld [vmem:[%s18566_s4 + $0x108] sm:$0xff] }
 0x732   :  { %8890 = vmatprep.subr.bf16.mxu0 %v8889_v6  ;;  %8954 = vmatprep.subr.bf16.mxu1 %v8953_v26  ;;  %v4150_v52 = vld [vmem:[%s18566_s4 + $0x5f8] sm:$0xff]  ;;  %v4139_v6 = vld [vmem:[%s18566_s4 + $0x5a0] sm:$0xff]  ;;  %v4645_v41 = vld [vmem:[%s18566_s4 + $0xd0] sm:$0xff] }
 0x733   :  { %v4147_v26 = vld [vmem:[%s18566_s4 + $0x5e0] sm:$0xff]  ;;  %v8969_v30 = vpack.c.bf16 %v4150_v52, %v4142_v16  ;;  %v4204_v16 = vld [vmem:[%s18566_s4 + $0x7a8] sm:$0xff]  ;;  %v9059_v20 = vpack.c.bf16 %v4645_v41, %v4637_v60 }
 0x734   :  { %v8907_v14 = vpack.c.bf16 %v4147_v26, %v4139_v6  ;;  %v4212_v52 = vld [vmem:[%s18566_s4 + $0x7e8] sm:$0xff]  ;;  %v8983_v26 = vpack.c.bf16 %v4197_v54, %v4189_v10  ;;  %v4661_v54 = vld [vmem:[%s18566_s4 + $0x150] sm:$0xff] }
 0x735   :  { %8892 = vmatpush1.bf16.msra.mxu0 %v8891_v47  ;;  %8956 = vmatpush1.bf16.msra.mxu1 %v8955_v25  ;;  %v4158_v47 = vld [vmem:[%s18566_s4 + $0x638] sm:$0xff]  ;;  %v4700_v34 = vld [vmem:[%s18566_s4 + $0x288] sm:$0xff] }
 0x736   :  { %8894 = vmatprep.subr.bf16.mxu0 %v8893_v19  ;;  %8958 = vmatprep.subr.bf16.mxu1 %v8957_v33  ;;  %v4166_v25 = vld [vmem:[%s18566_s4 + $0x678] sm:$0xff]  ;;  %v4155_v19 = vld [vmem:[%s18566_s4 + $0x620] sm:$0xff]  ;;  %v4708_v57 = vld [vmem:[%s18566_s4 + $0x2c8] sm:$0xff] }
 0x737   :  { %v4163_v33 = vld [vmem:[%s18566_s4 + $0x660] sm:$0xff]  ;;  %v8973_v29 = vpack.c.bf16 %v4166_v25, %v4158_v47  ;;  %v8987_v25 = vpack.c.bf16 %v4213_v7, %v4205_v31  ;;  %v4677_v31 = vld [vmem:[%s18566_s4 + $0x1d0] sm:$0xff]  ;;  %v4716_v60 = vld [vmem:[%s18566_s4 + $0x308] sm:$0xff] }
 0x738   :  { %v8911_v61 = vpack.c.bf16 %v4163_v33, %v4155_v19  ;;  %v4627_v33 = vld [vmem:[%s18566_s4 + $0x40] sm:$0xff]  ;;  %v4724_v41 = vld [vmem:[%s18566_s4 + $0x348] sm:$0xff] }
 0x739   :  { %8896 = vmatpush1.bf16.msra.mxu0 %v8895_v51  ;;  %8960 = vmatpush1.bf16.msra.mxu1 %v8959_v40  ;;  %v4174_v51 = vld [vmem:[%s18566_s4 + $0x6b8] sm:$0xff] }
 0x73a   :  { %8898 = vmatprep.subr.bf16.mxu0 %v8897_v53  ;;  %8962 = vmatprep.subr.bf16.mxu1 %v8961_v5  ;;  %v4182_v40 = vld [vmem:[%s18566_s4 + $0x6f8] sm:$0xff]  ;;  %v4171_v53 = vld [vmem:[%s18566_s4 + $0x6a0] sm:$0xff] }
 0x73b   :  { %v4179_v5 = vld [vmem:[%s18566_s4 + $0x6e0] sm:$0xff]  ;;  %v8977_v36 = vpack.c.bf16 %v4182_v40, %v4174_v51  ;;  %v4644_v51 = vld [vmem:[%s18566_s4 + $0xc8] sm:$0xff]  ;;  %v4638_v40 = vld [vmem:[%s18566_s4 + $0x98] sm:$0xff] }
 0x73c   :  { %v8915_v38 = vpack.c.bf16 %v4179_v5, %v4171_v53  ;;  %v4635_v53 = vld [vmem:[%s18566_s4 + $0x80] sm:$0xff] }
 0x73d   :  { %8900 = vmatpush1.bf16.msra.mxu0 %v8899_v56  ;;  %8964 = vmatpush1.bf16.msra.mxu1 %v8963_v32  ;;  %v4190_v56 = vld [vmem:[%s18566_s4 + $0x738] sm:$0xff]  ;;  %v4643_v5 = vld [vmem:[%s18566_s4 + $0xc0] sm:$0xff] }
 0x73e   :  { %8902 = vmatprep.subr.bf16.mxu0 %v8901_v1  ;;  %8966 = vmatprep.subr.bf16.mxu1 %v8965_v12  ;;  %v4198_v32 = vld [vmem:[%s18566_s4 + $0x778] sm:$0xff]  ;;  %v4187_v1 = vld [vmem:[%s18566_s4 + $0x720] sm:$0xff] }
 0x73f   :  { %v4195_v12 = vld [vmem:[%s18566_s4 + $0x760] sm:$0xff]  ;;  %v8981_v35 = vpack.c.bf16 %v4198_v32, %v4190_v56  ;;  %v4660_v56 = vld [vmem:[%s18566_s4 + $0x148] sm:$0xff]  ;;  %v4654_v32 = vld [vmem:[%s18566_s4 + $0x118] sm:$0xff] }
 0x740   :  { %v8919_v6 = vpack.c.bf16 %v4195_v12, %v4187_v1  ;;  %v4651_v12 = vld [vmem:[%s18566_s4 + $0x100] sm:$0xff] }
 0x741   :  { %8904 = vmatpush1.bf16.msra.mxu0 %v8903_v8  ;;  %8968 = vmatpush1.bf16.msra.mxu1 %v8967_v9  ;;  %v4206_v8 = vld [vmem:[%s18566_s4 + $0x7b8] sm:$0xff] }
 0x742   :  { %8906 = vmatprep.subr.bf16.mxu0 %v8905_v27  ;;  %8970 = vmatprep.subr.bf16.mxu1 %v8969_v30  ;;  %v4214_v9 = vld [vmem:[%s18566_s4 + $0x7f8] sm:$0xff]  ;;  %v4203_v27 = vld [vmem:[%s18566_s4 + $0x7a0] sm:$0xff]  ;;  %v8921_v30 = vpack.c.bf16 %v4212_v52, %v4204_v16  ;;  %v4668_v16 = vld [vmem:[%s18566_s4 + $0x188] sm:$0xff] }
 0x743   :  { %v8985_v44 = vpack.c.bf16 %v4214_v9, %v4206_v8  ;;  %v8923_v47 = vpack.c.bf16 %v4211_v3, %v4203_v27  ;;  %v4676_v52 = vld [vmem:[%s18566_s4 + $0x1c8] sm:$0xff]  ;;  %v4667_v27 = vld [vmem:[%s18566_s4 + $0x180] sm:$0xff]  ;;  %v4669_v3 = vld [vmem:[%s18566_s4 + $0x190] sm:$0xff] }
 0x744   :  { %v9001_v9 = vpack.c.bf16 %v4676_v52, %v4668_v16  ;;  %v4732_v16 = vld [vmem:[%s18566_s4 + $0x388] sm:$0xff] }
 0x745   :  { %8908 = vmatpush1.bf16.msra.mxu0 %v8907_v14  ;;  %8972 = vmatpush1.bf16.msra.mxu1 %v8971_v28  ;;  %v4620_v14 = vld [vmem:[%s18566_s4 + $0x8] sm:$0xff] }
 0x746   :  { %8910 = vmatprep.subr.bf16.mxu0 %v8909_v15  ;;  %8974 = vmatprep.subr.bf16.mxu1 %v8973_v29  ;;  %v4628_v28 = vld [vmem:[%s18566_s4 + $0x48] sm:$0xff] }
 0x747   :  { %v8989_v19 = vpack.c.bf16 %v4628_v28, %v4620_v14  ;;  %v4686_v14 = vld [vmem:[%s18566_s4 + $0x218] sm:$0xff]  ;;  %v9067_v28 = vpack.c.bf16 %v4677_v31, %v4669_v3  ;;  %v4740_v52 = vld [vmem:[%s18566_s4 + $0x3c8] sm:$0xff]  ;;  %v4741_v31 = vld [vmem:[%s18566_s4 + $0x3d0] sm:$0xff] }
 0x749   :  { %8912 = vmatpush1.bf16.msra.mxu0 %v8911_v61  ;;  %8976 = vmatpush1.bf16.msra.mxu1 %v8975_v45  ;;  %v8993_v61 = vpack.c.bf16 %v4644_v51, %v4636_v39  ;;  %v4646_v45 = vld [vmem:[%s18566_s4 + $0xd8] sm:$0xff] }
 0x74a   :  { %8914 = vmatprep.subr.bf16.mxu0 %v8913_v58  ;;  %8978 = vmatprep.subr.bf16.mxu1 %v8977_v36  ;;  %v9057_v58 = vpack.c.bf16 %v4646_v45, %v4638_v40  ;;  %v8995_v36 = vpack.c.bf16 %v4643_v5, %v4635_v53  ;;  %v4710_v39 = vld [vmem:[%s18566_s4 + $0x2d8] sm:$0xff]  ;;  %v4699_v45 = vld [vmem:[%s18566_s4 + $0x280] sm:$0xff]  ;;  %v4701_v5 = vld [vmem:[%s18566_s4 + $0x290] sm:$0xff] }
 0x74b   :  { %v4707_v53 = vld [vmem:[%s18566_s4 + $0x2c0] sm:$0xff] }
 0x74d   :  { %8916 = vmatpush1.bf16.msra.mxu0 %v8915_v38  ;;  %8980 = vmatpush1.bf16.msra.mxu1 %v8979_v62  ;;  %v4662_v38 = vld [vmem:[%s18566_s4 + $0x158] sm:$0xff]  ;;  %v8997_v62 = vpack.c.bf16 %v4660_v56, %v4652_v4  ;;  %v9011_v56 = vpack.c.bf16 %v4707_v53, %v4699_v45  ;;  %v4771_v45 = vld [vmem:[%s18566_s4 + $0x4c0] sm:$0xff] }
 0x74e   :  { %8918 = vmatprep.subr.bf16.mxu0 %v8917_v17  ;;  %8982 = vmatprep.subr.bf16.mxu1 %v8981_v35  ;;  %v9061_v1 = vpack.c.bf16 %v4662_v38, %v4654_v32  ;;  %v4659_v17 = vld [vmem:[%s18566_s4 + $0x140] sm:$0xff]  ;;  %v4653_v35 = vld [vmem:[%s18566_s4 + $0x110] sm:$0xff]  ;;  %v4718_v4 = vld [vmem:[%s18566_s4 + $0x318] sm:$0xff]  ;;  %v9013_v38 = vpack.c.bf16 %v4724_v41, %v4716_v60 }
 0x74f   :  { %v8999_v10 = vpack.c.bf16 %v4659_v17, %v4651_v12  ;;  %v9063_v8 = vpack.c.bf16 %v4661_v54, %v4653_v35  ;;  %v4717_v17 = vld [vmem:[%s18566_s4 + $0x310] sm:$0xff]  ;;  %v4780_v41 = vld [vmem:[%s18566_s4 + $0x508] sm:$0xff] }
 0x750   :  { %v4725_v35 = vld [vmem:[%s18566_s4 + $0x350] sm:$0xff] }
 0x751   :  { %8920 = vmatpush1.bf16.msra.mxu0 %v8919_v6  ;;  %8984 = vmatpush1.bf16.msra.mxu1 %v8983_v26  ;;  %v4670_v6 = vld [vmem:[%s18566_s4 + $0x198] sm:$0xff]  ;;  %v9079_v54 = vpack.c.bf16 %v4725_v35, %v4717_v17  ;;  %v4781_v17 = vld [vmem:[%s18566_s4 + $0x510] sm:$0xff] }
 0x752   :  { %8922 = vmatprep.subr.bf16.mxu0 %v8921_v30  ;;  %8986 = vmatprep.subr.bf16.mxu1 %v8985_v44  ;;  %v4678_v26 = vld [vmem:[%s18566_s4 + $0x1d8] sm:$0xff]  ;;  %v4675_v44 = vld [vmem:[%s18566_s4 + $0x1c0] sm:$0xff]  ;;  %v4789_v35 = vld [vmem:[%s18566_s4 + $0x550] sm:$0xff] }
 0x753   :  { %v9065_v30 = vpack.c.bf16 %v4678_v26, %v4670_v6  ;;  %v9003_v7 = vpack.c.bf16 %v4675_v44, %v4667_v27  ;;  %v4742_v6 = vld [vmem:[%s18566_s4 + $0x3d8] sm:$0xff]  ;;  %v4731_v27 = vld [vmem:[%s18566_s4 + $0x380] sm:$0xff]  ;;  %v4733_v44 = vld [vmem:[%s18566_s4 + $0x390] sm:$0xff] }
 0x755   :  { %8924 = vmatpush1.bf16.msra.mxu0 %v8923_v47  ;;  %8988 = vmatpush1.bf16.msra.mxu1 %v8987_v25  ;;  %v4684_v47 = vld [vmem:[%s18566_s4 + $0x208] sm:$0xff] }
 0x756   :  { %8990 = vmatprep.subr.bf16.mxu0 %v8989_v19  ;;  %v4692_v25 = vld [vmem:[%s18566_s4 + $0x248] sm:$0xff]  ;;  %v4694_v19 = vld [vmem:[%s18566_s4 + $0x258] sm:$0xff] }
 0x758   :  { %4434 = vmatmul.mubr.f32.vlgmr.msra.gmra.mrb[60].mxu0 %v15340_v13  ;;  %4511 = vmatmul.mubr.f32.vlgmr.msra.gmra.mrb[60].mxu1 %v15340_v13  ;;  %v4622_v13 = vld [vmem:[%s18566_s4 + $0x18] sm:$0xff] }
 0x759   :  { %4439 = vmatprep.mubr.f32.mxu0 %v15365_v55  ;;  %4516 = vmatprep.mubr.f32.mxu1 %v15365_v55  ;;  %v4630_v55 = vld [vmem:[%s18566_s4 + $0x58] sm:$0xff] }
 0x75a   :  { %v9053_v15 = vpack.c.bf16 %v4630_v55, %v4622_v13  ;;  %v9005_v13 = vpack.c.bf16 %v4692_v25, %v4684_v47  ;;  %v4683_v55 = vld [vmem:[%s18566_s4 + $0x200] sm:$0xff]  ;;  %v4748_v47 = vld [vmem:[%s18566_s4 + $0x408] sm:$0xff] }
 0x75b   :  { %v4756_v25 = vld [vmem:[%s18566_s4 + $0x448] sm:$0xff] }
 0x75c   :  { %4440 = vmatmul.mubr.f32.gmra.mrb[62].mxu0 %v15373_v59  ;;  %4517 = vmatmul.mubr.f32.gmra.mrb[62].mxu1 %v15373_v59  ;;  %v4619_v59 = vld [vmem:[%s18566_s4] sm:$0xff] }
 0x75d   :  { %v8991_v29 = vpack.c.bf16 %v4627_v33, %v4619_v59  ;;  %9054 = vmatprep.subr.bf16.mxu1 %v9053_v15  ;;  %v4691_v59 = vld [vmem:[%s18566_s4 + $0x240] sm:$0xff]  ;;  %v9069_v33 = vpack.c.bf16 %v4694_v19, %v4686_v14  ;;  %v4685_v15 = vld [vmem:[%s18566_s4 + $0x210] sm:$0xff]  ;;  %v4750_v14 = vld [vmem:[%s18566_s4 + $0x418] sm:$0xff] }
 0x75e   :  { %9056 = vmatpush1.bf16.msra.mxu1 %v9055_v2  ;;  %v4702_v2 = vld [vmem:[%s18566_s4 + $0x298] sm:$0xff]  ;;  %v9007_v51 = vpack.c.bf16 %v4691_v59, %v4683_v55  ;;  %v4747_v19 = vld [vmem:[%s18566_s4 + $0x400] sm:$0xff] }
 0x75f   :  { %8992 = vmatpush1.bf16.msra.mxu0 %v8991_v29  ;;  %9058 = vmatprep.subr.bf16.mxu1 %v9057_v58  ;;  %v4693_v29 = vld [vmem:[%s18566_s4 + $0x250] sm:$0xff]  ;;  %v9073_v58 = vpack.c.bf16 %v4710_v39, %v4702_v2  ;;  %v4755_v55 = vld [vmem:[%s18566_s4 + $0x440] sm:$0xff]  ;;  %v4772_v2 = vld [vmem:[%s18566_s4 + $0x4c8] sm:$0xff] }
 0x760   :  { %8994 = vmatprep.subr.bf16.mxu0 %v8993_v61  ;;  %v9071_v40 = vpack.c.bf16 %v4693_v29, %v4685_v15  ;;  %v9009_v61 = vpack.c.bf16 %v4708_v57, %v4700_v34  ;;  %v4749_v15 = vld [vmem:[%s18566_s4 + $0x410] sm:$0xff]  ;;  %v4764_v57 = vld [vmem:[%s18566_s4 + $0x488] sm:$0xff]  ;;  %v4766_v39 = vld [vmem:[%s18566_s4 + $0x498] sm:$0xff] }
 0x761   :  { %v4757_v29 = vld [vmem:[%s18566_s4 + $0x450] sm:$0xff] }
 0x762   :  { %9060 = vmatpush1.bf16.msra.mxu1 %v9059_v20  ;;  %v4726_v20 = vld [vmem:[%s18566_s4 + $0x358] sm:$0xff]  ;;  %v9087_v34 = vpack.c.bf16 %v4757_v29, %v4749_v15  ;;  %v4821_v15 = vld [vmem:[%s18566_s4 + $0x650] sm:$0xff] }
 0x763   :  { %8996 = vmatpush1.bf16.msra.mxu0 %v8995_v36  ;;  %9062 = vmatprep.subr.bf16.mxu1 %v9061_v1  ;;  %v4709_v36 = vld [vmem:[%s18566_s4 + $0x2d0] sm:$0xff]  ;;  %v4723_v1 = vld [vmem:[%s18566_s4 + $0x340] sm:$0xff]  ;;  %v9077_v12 = vpack.c.bf16 %v4726_v20, %v4718_v4  ;;  %v4788_v4 = vld [vmem:[%s18566_s4 + $0x548] sm:$0xff] }
 0x764   :  { %8998 = vmatprep.subr.bf16.mxu0 %v8997_v62  ;;  %v9075_v32 = vpack.c.bf16 %v4709_v36, %v4701_v5  ;;  %v4715_v62 = vld [vmem:[%s18566_s4 + $0x300] sm:$0xff]  ;;  %v4773_v36 = vld [vmem:[%s18566_s4 + $0x4d0] sm:$0xff]  ;;  %v4782_v20 = vld [vmem:[%s18566_s4 + $0x518] sm:$0xff] }
 0x766   :  { %9064 = vmatpush1.bf16.msra.mxu1 %v9063_v8  ;;  %v4734_v8 = vld [vmem:[%s18566_s4 + $0x398] sm:$0xff] }
 0x767   :  { %9000 = vmatpush1.bf16.msra.mxu0 %v8999_v10  ;;  %9066 = vmatprep.subr.bf16.mxu1 %v9065_v30  ;;  %v9015_v10 = vpack.c.bf16 %v4723_v1, %v4715_v62  ;;  %v9081_v26 = vpack.c.bf16 %v4742_v6, %v4734_v8  ;;  %v4739_v30 = vld [vmem:[%s18566_s4 + $0x3c0] sm:$0xff] }
 0x768   :  { %9002 = vmatprep.subr.bf16.mxu0 %v9001_v9  ;;  %v9017_v9 = vpack.c.bf16 %v4740_v52, %v4732_v16  ;;  %v9019_v3 = vpack.c.bf16 %v4739_v30, %v4731_v27  ;;  %v4787_v62 = vld [vmem:[%s18566_s4 + $0x540] sm:$0xff]  ;;  %v4804_v16 = vld [vmem:[%s18566_s4 + $0x5c8] sm:$0xff]  ;;  %v4798_v52 = vld [vmem:[%s18566_s4 + $0x598] sm:$0xff] }
 0x769   :  { %v4795_v6 = vld [vmem:[%s18566_s4 + $0x580] sm:$0xff] }
 0x76a   :  { %9068 = vmatpush1.bf16.msra.mxu1 %v9067_v28  ;;  %v9021_v28 = vpack.c.bf16 %v4756_v25, %v4748_v47  ;;  %v4820_v47 = vld [vmem:[%s18566_s4 + $0x648] sm:$0xff]  ;;  %v4814_v25 = vld [vmem:[%s18566_s4 + $0x618] sm:$0xff] }
 0x76b   :  { %9004 = vmatpush1.bf16.msra.mxu0 %v9003_v7  ;;  %9070 = vmatprep.subr.bf16.mxu1 %v9069_v33  ;;  %v9083_v7 = vpack.c.bf16 %v4741_v31, %v4733_v44  ;;  %v9023_v33 = vpack.c.bf16 %v4755_v55, %v4747_v19  ;;  %v4797_v44 = vld [vmem:[%s18566_s4 + $0x590] sm:$0xff]  ;;  %v4819_v19 = vld [vmem:[%s18566_s4 + $0x640] sm:$0xff] }
 0x76c   :  { %9006 = vmatprep.subr.bf16.mxu0 %v9005_v13  ;;  %v4758_v13 = vld [vmem:[%s18566_s4 + $0x458] sm:$0xff] }
 0x76d   :  { %v9085_v59 = vpack.c.bf16 %v4758_v13, %v4750_v14  ;;  %v4811_v13 = vld [vmem:[%s18566_s4 + $0x600] sm:$0xff] }
 0x76e   :  { %9072 = vmatpush1.bf16.msra.mxu1 %v9071_v40  ;;  %v4774_v40 = vld [vmem:[%s18566_s4 + $0x4d8] sm:$0xff] }
 0x76f   :  { %9008 = vmatpush1.bf16.msra.mxu0 %v9007_v51  ;;  %9074 = vmatprep.subr.bf16.mxu1 %v9073_v58  ;;  %v9025_v51 = vpack.c.bf16 %v4772_v2, %v4764_v57  ;;  %v9089_v53 = vpack.c.bf16 %v4774_v40, %v4766_v39  ;;  %v4765_v58 = vld [vmem:[%s18566_s4 + $0x490] sm:$0xff]  ;;  %v4836_v57 = vld [vmem:[%s18566_s4 + $0x6c8] sm:$0xff]  ;;  %v4830_v2 = vld [vmem:[%s18566_s4 + $0x698] sm:$0xff] }
 0x770   :  { %9010 = vmatprep.subr.bf16.mxu0 %v9009_v61  ;;  %v4763_v61 = vld [vmem:[%s18566_s4 + $0x480] sm:$0xff]  ;;  %v9091_v60 = vpack.c.bf16 %v4773_v36, %v4765_v58  ;;  %v4837_v58 = vld [vmem:[%s18566_s4 + $0x6d0] sm:$0xff] }
 0x771   :  { %v9027_v5 = vpack.c.bf16 %v4771_v45, %v4763_v61  ;;  %v4827_v40 = vld [vmem:[%s18566_s4 + $0x680] sm:$0xff] }
 0x772   :  { %9076 = vmatpush1.bf16.msra.mxu1 %v9075_v32  ;;  %v4790_v32 = vld [vmem:[%s18566_s4 + $0x558] sm:$0xff]  ;;  %v4835_v61 = vld [vmem:[%s18566_s4 + $0x6c0] sm:$0xff] }
 0x773   :  { %9012 = vmatpush1.bf16.msra.mxu0 %v9011_v56  ;;  %9078 = vmatprep.subr.bf16.mxu1 %v9077_v12  ;;  %v9029_v56 = vpack.c.bf16 %v4788_v4, %v4780_v41  ;;  %v9093_v1 = vpack.c.bf16 %v4790_v32, %v4782_v20  ;;  %v4852_v41 = vld [vmem:[%s18566_s4 + $0x748] sm:$0xff]  ;;  %v4846_v4 = vld [vmem:[%s18566_s4 + $0x718] sm:$0xff]  ;;  %v4843_v32 = vld [vmem:[%s18566_s4 + $0x700] sm:$0xff] }
 0x774   :  { %9014 = vmatprep.subr.bf16.mxu0 %v9013_v38  ;;  %v4779_v38 = vld [vmem:[%s18566_s4 + $0x500] sm:$0xff] }
 0x775   :  { %v9031_v12 = vpack.c.bf16 %v4787_v62, %v4779_v38  ;;  %v4851_v38 = vld [vmem:[%s18566_s4 + $0x740] sm:$0xff] }
 0x776   :  { %9080 = vmatpush1.bf16.msra.mxu1 %v9079_v54  ;;  %v4796_v54 = vld [vmem:[%s18566_s4 + $0x588] sm:$0xff] }
 0x777   :  { %9016 = vmatpush1.bf16.msra.mxu0 %v9015_v10  ;;  %9082 = vmatprep.subr.bf16.mxu1 %v9081_v26  ;;  %v9095_v10 = vpack.c.bf16 %v4789_v35, %v4781_v17  ;;  %v9033_v8 = vpack.c.bf16 %v4804_v16, %v4796_v54  ;;  %v4803_v26 = vld [vmem:[%s18566_s4 + $0x5c0] sm:$0xff]  ;;  %v4853_v17 = vld [vmem:[%s18566_s4 + $0x750] sm:$0xff]  ;;  %v4868_v54 = vld [vmem:[%s18566_s4 + $0x7c8] sm:$0xff] }
 0x778   :  { %9018 = vmatprep.subr.bf16.mxu0 %v9017_v9  ;;  %v4806_v9 = vld [vmem:[%s18566_s4 + $0x5d8] sm:$0xff]  ;;  %v9035_v30 = vpack.c.bf16 %v4803_v26, %v4795_v6  ;;  %v4867_v6 = vld [vmem:[%s18566_s4 + $0x7c0] sm:$0xff] }
 0x779   :  { %v9097_v27 = vpack.c.bf16 %v4806_v9, %v4798_v52  ;;  %v4862_v16 = vld [vmem:[%s18566_s4 + $0x798] sm:$0xff]  ;;  %v4859_v9 = vld [vmem:[%s18566_s4 + $0x780] sm:$0xff] }
 0x77a   :  { %9084 = vmatpush1.bf16.msra.mxu1 %v9083_v7  ;;  %v4812_v7 = vld [vmem:[%s18566_s4 + $0x608] sm:$0xff] }
 0x77b   :  { %9020 = vmatpush1.bf16.msra.mxu0 %v9019_v3  ;;  %9086 = vmatprep.subr.bf16.mxu1 %v9085_v59  ;;  %v4805_v3 = vld [vmem:[%s18566_s4 + $0x5d0] sm:$0xff]  ;;  %v9037_v14 = vpack.c.bf16 %v4820_v47, %v4812_v7  ;;  %v9039_v59 = vpack.c.bf16 %v4819_v19, %v4811_v13  ;;  %v4632_v7 = vld [vmem:[%s18566_s4 + $0x68] sm:$0xff]  ;;  %v4626_v47 = vld [vmem:[%s18566_s4 + $0x38] sm:$0xff] }
 0x77c   :  { %9022 = vmatprep.subr.bf16.mxu0 %v9021_v28  ;;  %v9099_v31 = vpack.c.bf16 %v4805_v3, %v4797_v44  ;;  %v4822_v28 = vld [vmem:[%s18566_s4 + $0x658] sm:$0xff]  ;;  %v4869_v44 = vld [vmem:[%s18566_s4 + $0x7d0] sm:$0xff] }
 0x77d   :  { %v9101_v55 = vpack.c.bf16 %v4822_v28, %v4814_v25 }
 0x77e   :  { %9088 = vmatpush1.bf16.msra.mxu1 %v9087_v34  ;;  %v4828_v34 = vld [vmem:[%s18566_s4 + $0x688] sm:$0xff] }
 0x77f   :  { %9024 = vmatpush1.bf16.msra.mxu0 %v9023_v33  ;;  %9090 = vmatprep.subr.bf16.mxu1 %v9089_v53  ;;  %v4813_v33 = vld [vmem:[%s18566_s4 + $0x610] sm:$0xff]  ;;  %v9041_v39 = vpack.c.bf16 %v4836_v57, %v4828_v34  ;;  %v9043_v53 = vpack.c.bf16 %v4835_v61, %v4827_v40 }
 0x780   :  { %9026 = vmatprep.subr.bf16.mxu0 %v9025_v51  ;;  %v9103_v29 = vpack.c.bf16 %v4821_v15, %v4813_v33  ;;  %v4838_v51 = vld [vmem:[%s18566_s4 + $0x6d8] sm:$0xff] }
 0x781   :  { %v9105_v45 = vpack.c.bf16 %v4838_v51, %v4830_v2 }
 0x782   :  { %9092 = vmatpush1.bf16.msra.mxu1 %v9091_v60  ;;  %v4844_v60 = vld [vmem:[%s18566_s4 + $0x708] sm:$0xff] }
 0x783   :  { %9028 = vmatpush1.bf16.msra.mxu0 %v9027_v5  ;;  %9094 = vmatprep.subr.bf16.mxu1 %v9093_v1  ;;  %v4829_v5 = vld [vmem:[%s18566_s4 + $0x690] sm:$0xff]  ;;  %v9045_v20 = vpack.c.bf16 %v4852_v41, %v4844_v60  ;;  %v9047_v1 = vpack.c.bf16 %v4851_v38, %v4843_v32 }
 0x784   :  { %9030 = vmatprep.subr.bf16.mxu0 %v9029_v56  ;;  %v9107_v36 = vpack.c.bf16 %v4837_v58, %v4829_v5  ;;  %v4854_v56 = vld [vmem:[%s18566_s4 + $0x758] sm:$0xff] }
 0x785   :  { %v9109_v62 = vpack.c.bf16 %v4854_v56, %v4846_v4 }
 0x786   :  { %9096 = vmatpush1.bf16.msra.mxu1 %v9095_v10  ;;  %v4860_v10 = vld [vmem:[%s18566_s4 + $0x788] sm:$0xff] }
 0x787   :  { %9032 = vmatpush1.bf16.msra.mxu0 %v9031_v12  ;;  %9098 = vmatprep.subr.bf16.mxu1 %v9097_v27  ;;  %v4845_v12 = vld [vmem:[%s18566_s4 + $0x710] sm:$0xff]  ;;  %v9049_v52 = vpack.c.bf16 %v4868_v54, %v4860_v10  ;;  %v9051_v27 = vpack.c.bf16 %v4867_v6, %v4859_v9 }
 0x788   :  { %9034 = vmatprep.subr.bf16.mxu0 %v9033_v8  ;;  %v9111_v35 = vpack.c.bf16 %v4853_v17, %v4845_v12  ;;  %v4870_v8 = vld [vmem:[%s18566_s4 + $0x7d8] sm:$0xff] }
 0x789   :  { %v9113_v26 = vpack.c.bf16 %v4870_v8, %v4862_v16 }
 0x78a   :  { %9100 = vmatpush1.bf16.msra.mxu1 %v9099_v31  ;;  %v4624_v31 = vld [vmem:[%s18566_s4 + $0x28] sm:$0xff] }
 0x78b   :  { %9036 = vmatpush1.bf16.msra.mxu0 %v9035_v30  ;;  %9102 = vmatprep.subr.bf16.mxu1 %v9101_v55  ;;  %v4861_v30 = vld [vmem:[%s18566_s4 + $0x790] sm:$0xff]  ;;  %v9117_v25 = vpack.c.bf16 %v4632_v7, %v4624_v31 }
 0x78c   :  { %9038 = vmatprep.subr.bf16.mxu0 %v9037_v14  ;;  %v9115_v3 = vpack.c.bf16 %v4869_v44, %v4861_v30  ;;  %v4634_v14 = vld [vmem:[%s18566_s4 + $0x78] sm:$0xff] }
 0x78d   :  { %v9181_v28 = vpack.c.bf16 %v4634_v14, %v4626_v47 }
 0x78e   :  { %9104 = vmatpush1.bf16.msra.mxu1 %v9103_v29 }
 0x78f   :  { %9040 = vmatpush1.bf16.msra.mxu0 %v9039_v59  ;;  %9106 = vmatprep.subr.bf16.mxu1 %v9105_v45 }
 0x790   :  { %9042 = vmatprep.subr.bf16.mxu0 %v9041_v39 }
 0x792   :  { %9108 = vmatpush1.bf16.msra.mxu1 %v9107_v36 }
 0x793   :  { %9044 = vmatpush1.bf16.msra.mxu0 %v9043_v53  ;;  %9110 = vmatprep.subr.bf16.mxu1 %v9109_v62 }
 0x794   :  { %9046 = vmatprep.subr.bf16.mxu0 %v9045_v20 }
 0x796   :  { %9112 = vmatpush1.bf16.msra.mxu1 %v9111_v35 }
 0x797   :  { %9048 = vmatpush1.bf16.msra.mxu0 %v9047_v1  ;;  %9114 = vmatprep.subr.bf16.mxu1 %v9113_v26 }
 0x798   :  { %9050 = vmatprep.subr.bf16.mxu0 %v9049_v52 }
 0x79a   :  { %9116 = vmatpush1.bf16.msra.mxu1 %v9115_v3 }
 0x79b   :  { %9052 = vmatpush1.bf16.msra.mxu0 %v9051_v27  ;;  %9182 = vmatprep.subr.bf16.mxu1 %v9181_v28 }
 0x79c   :  { %9118 = vmatprep.subr.bf16.mxu0 %v9117_v25 }
 0x7eb   :  { %v4281_v13 = vpop.f32.mrb[24].mxu0  ;;  %v4358_v19 = vpop.f32.mrb[24].mxu1 }
 0x7ec   :  { %v9905_v55 = vadd.f32 %v4281_v13, %v11107_v48  ;;  %v4283_v59 = vpop.f32.mrb[25].mxu0  ;;  %v4360_v33 = vpop.f32.mrb[25].mxu1  ;;  %v9941_v15 = vadd.f32 %v4358_v19, %v11113_v50 }
 0x7ed   :  { %v9906_v29 = vadd.f32 %v4283_v59, %v11110_v49  ;;  %v9942_v28 = vadd.f32 %v4360_v33, %v11124_v0 }
 0x7ee   :  { %10273 = vtanh.f32 %v9905_v55 }
 0x7ef   :  { %v4287_v34 = vpop.f32.mrb[26].mxu0  ;;  %v4364_v57 = vpop.f32.mrb[26].mxu1  ;;  %10275 = vtanh.f32 %v9906_v29 }
 0x7f0   :  { %v9907_v2 = vadd.f32 %v4287_v34, %v11107_v48  ;;  %v4289_v39 = vpop.f32.mrb[27].mxu0  ;;  %v4366_v51 = vpop.f32.mrb[27].mxu1  ;;  %10277 = vtanh.f32 %v9941_v15  ;;  %v9943_v61 = vadd.f32 %v4364_v57, %v11113_v50 }
 0x7f1   :  { %v9908_v40 = vadd.f32 %v4289_v39, %v11110_v49  ;;  %v9944_v57 = vadd.f32 %v4366_v51, %v11124_v0 }
 0x7f2   :  { %10279 = vtanh.f32 %v9907_v2 }
 0x7f3   :  { %10281 = vtanh.f32 %v9908_v40 }
 0x7f4   :  { %10283 = vtanh.f32 %v9943_v61 }
 0x7f8   :  { %v10274_v45 = vpop.eup %10273 }
 0x7f9   :  { %v4548_v53 = vmul.f32 0.5, %v10274_v45  ;;  %v10276_v5 = vpop.eup %10275 }
 0x7fa   :  { %v10278_v58 = vpop.eup %10277  ;;  %v4552_v60 = vmul.f32 0.5, %v10276_v5 }
 0x7fb   :  { %v4550_v36 = vadd.f32 0.5, %v4548_v53 }
 0x7fc   :  { %v10280_v41 = vpop.eup %10279  ;;  %v4554_v4 = vadd.f32 0.5, %v4552_v60 }
 0x7fd   :  { %v4562_v20 = vmul.f32 %v10278_v58, %v4550_v36  ;;  %v4549_v56 = vmul.f32 0.5, %v10280_v41  ;;  %v10282_v32 = vpop.eup %10281 }
 0x7fe   :  { %v4560_v38 = vmul.f32 %v4554_v4, %v15288_v18  ;;  %v4553_v1 = vmul.f32 0.5, %v10282_v32  ;;  %v10284_v12 = vpop.eup %10283 }
 0x7ff   :  { %v4551_v62 = vadd.f32 0.5, %v4549_v56 }
 0x800   :  { %v16110_v17 = vadd.f32 %v4562_v20, %v4560_v38  ;;  %v4555_v35 = vadd.f32 0.5, %v4553_v1  ;;  %v4625_v1 = vld [vmem:[%s18566_s4 + $0x30] sm:$0xff] }
 0x801   :  { %v4563_v10 = vmul.f32 %v10284_v12, %v4551_v62  ;;  %v4623_v62 = vld [vmem:[%s18566_s4 + $0x20] sm:$0xff]  ;;  %v4633_v12 = vld [vmem:[%s18566_s4 + $0x70] sm:$0xff] }
 0x802   :  { %v4561_v54 = vmul.f32 %v4555_v35, %v15291_v22  ;;  %v4640_v35 = vld [vmem:[%s18566_s4 + $0xa8] sm:$0xff] }
 0x804   :  { %v16113_v16 = vadd.f32 %v4563_v10, %v4561_v54 }
 0x82b   :  { %v4435_v52 = vpop.f32.mrb[60].mxu0  ;;  %v4512_v8 = vpop.f32.mrb[60].mxu1 }
 0x82c   :  { %v4570_v9 = vadd.f32 %v4435_v52, %v11978_v23  ;;  %v4437_v6 = vpop.f32.mrb[61].mxu0  ;;  %v4514_v26 = vpop.f32.mrb[61].mxu1  ;;  %v4572_v27 = vadd.f32 %v4512_v8, %v11981_v21  ;;  %v4648_v8 = vld [vmem:[%s18566_s4 + $0xe8] sm:$0xff] }
 0x82d   :  { %v4571_v18 = vadd.f32 %v4437_v6, %v11984_v24  ;;  %v4573_v25 = vadd.f32 %v4514_v26, %v11993_v37  ;;  %v4650_v6 = vld [vmem:[%s18566_s4 + $0xf8] sm:$0xff] }
 0x82e   :  { %10285 = vtanh.f32 %v4570_v9  ;;  %v4642_v9 = vld [vmem:[%s18566_s4 + $0xb8] sm:$0xff] }
 0x82f   :  { %v4441_v30 = vpop.f32.mrb[62].mxu0  ;;  %v4518_v44 = vpop.f32.mrb[62].mxu1  ;;  %10287 = vtanh.f32 %v4571_v18 }
 0x830   :  { %v4574_v3 = vadd.f32 %v4441_v30, %v11978_v23  ;;  %v4443_v31 = vpop.f32.mrb[63].mxu0  ;;  %v4520_v22 = vpop.f32.mrb[63].mxu1  ;;  %10289 = vtanh.f32 %v4572_v27  ;;  %v4576_v47 = vadd.f32 %v4518_v44, %v11981_v21 }
 0x831   :  { %v4575_v7 = vadd.f32 %v4443_v31, %v11984_v24  ;;  %v4577_v29 = vadd.f32 %v4520_v22, %v11993_v37  ;;  %v4639_v31 = vld [vmem:[%s18566_s4 + $0xa0] sm:$0xff] }
 0x832   :  { %10291 = vtanh.f32 %v4574_v3  ;;  %v9183_v3 = vpack.c.bf16 %v4633_v12, %v4625_v1  ;;  %v4673_v12 = vld [vmem:[%s18566_s4 + $0x1b0] sm:$0xff] }
 0x833   :  { %10293 = vtanh.f32 %v4575_v7  ;;  %v9121_v7 = vpack.c.bf16 %v4648_v8, %v4640_v35  ;;  %v4681_v35 = vld [vmem:[%s18566_s4 + $0x1f0] sm:$0xff]  ;;  %v4698_v8 = vld [vmem:[%s18566_s4 + $0x278] sm:$0xff] }
 0x834   :  { %10295 = vtanh.f32 %v4576_v47  ;;  %v9185_v47 = vpack.c.bf16 %v4650_v6, %v4642_v9 }
 0x835   :  { %10297 = vtanh.f32 %v4573_v25  ;;  %v4647_v25 = vld [vmem:[%s18566_s4 + $0xe0] sm:$0xff] }
 0x836   :  { %10299 = vtanh.f32 %v9942_v28  ;;  %v4649_v28 = vld [vmem:[%s18566_s4 + $0xf0] sm:$0xff] }
 0x837   :  { %10301 = vtanh.f32 %v4577_v29  ;;  %v4664_v29 = vld [vmem:[%s18566_s4 + $0x168] sm:$0xff] }
 0x838   :  { %v10286_v14 = vpop.eup %10285  ;;  %10303 = vtanh.f32 %v9944_v57  ;;  %v4666_v57 = vld [vmem:[%s18566_s4 + $0x178] sm:$0xff] }
 0x839   :  { %v4586_v13 = vmul.f32 0.5, %v10286_v14  ;;  %v10288_v19 = vpop.eup %10287  ;;  %10305 = vtanh.f32 %v16110_v17  ;;  %v4641_v14 = vld [vmem:[%s18566_s4 + $0xb0] sm:$0xff] }
 0x83a   :  { %v10290_v55 = vpop.eup %10289  ;;  %v4590_v15 = vmul.f32 0.5, %v10288_v19 }
 0x83b   :  { %v4588_v59 = vadd.f32 0.5, %v4586_v13 }
 0x83c   :  { %v10292_v34 = vpop.eup %10291  ;;  %v4592_v2 = vadd.f32 0.5, %v4590_v15 }
 0x83d   :  { %v4600_v39 = vmul.f32 %v10290_v55, %v4588_v59  ;;  %v4587_v40 = vmul.f32 0.5, %v10292_v34  ;;  %v10294_v61 = vpop.eup %10293  ;;  %v4656_v55 = vld [vmem:[%s18566_s4 + $0x128] sm:$0xff]  ;;  %v4658_v34 = vld [vmem:[%s18566_s4 + $0x138] sm:$0xff] }
 0x83e   :  { %v4598_v45 = vmul.f32 %v4592_v2, %v15304_v63  ;;  %v4591_v33 = vmul.f32 0.5, %v10294_v61  ;;  %v10296_v5 = vpop.eup %10295  ;;  %v4655_v61 = vld [vmem:[%s18566_s4 + $0x120] sm:$0xff] }
 0x83f   :  { %v4589_v53 = vadd.f32 0.5, %v4587_v40  ;;  %v10298_v41 = vpop.eup %10297  ;;  %v9187_v40 = vpack.c.bf16 %v4649_v28, %v4641_v14  ;;  %v4712_v14 = vld [vmem:[%s18566_s4 + $0x2e8] sm:$0xff]  ;;  %v4706_v28 = vld [vmem:[%s18566_s4 + $0x2b8] sm:$0xff] }
 0x840   :  { %v16126_v58 = vadd.f32 %v4600_v39, %v4598_v45  ;;  %v4593_v36 = vadd.f32 0.5, %v4591_v33  ;;  %v10300_v20 = vpop.eup %10299  ;;  %v4594_v63 = vmul.f32 0.5, %v10298_v41  ;;  %v9123_v39 = vpack.c.bf16 %v4647_v25, %v4639_v31  ;;  %v4663_v45 = vld [vmem:[%s18566_s4 + $0x160] sm:$0xff]  ;;  %v4657_v33 = vld [vmem:[%s18566_s4 + $0x130] sm:$0xff]  ;;  %v4680_v41 = vld [vmem:[%s18566_s4 + $0x1e8] sm:$0xff] }
 0x841   :  { %v4601_v60 = vmul.f32 %v10296_v5, %v4589_v53  ;;  %v10302_v56 = vpop.eup %10301  ;;  %v4556_v32 = vmul.f32 0.5, %v10300_v20  ;;  %v4665_v5 = vld [vmem:[%s18566_s4 + $0x170] sm:$0xff]  ;;  %v4674_v20 = vld [vmem:[%s18566_s4 + $0x1b8] sm:$0xff]  ;;  %v4704_v25 = vld [vmem:[%s18566_s4 + $0x2a8] sm:$0xff] }
 0x842   :  { %10307 = vtanh.f32 %v16126_v58  ;;  %v4599_v51 = vmul.f32 %v4593_v36, %v15309_v11  ;;  %v10304_v38 = vpop.eup %10303  ;;  %v4631_v11 = vld [vmem:[%s18566_s4 + $0x60] sm:$0xff]  ;;  %v4596_v54 = vadd.f32 0.5, %v4594_v63  ;;  %v4595_v52 = vmul.f32 0.5, %v10302_v56  ;;  %v4672_v36 = vld [vmem:[%s18566_s4 + $0x1a8] sm:$0xff]  ;;  %v4682_v63 = vld [vmem:[%s18566_s4 + $0x1f8] sm:$0xff] }
 0x843   :  { %10309 = vtanh.f32 %v16113_v16  ;;  %v10306_v10 = vpop.eup %10305  ;;  %v4558_v27 = vadd.f32 0.5, %v4556_v32  ;;  %v4557_v18 = vmul.f32 0.5, %v10304_v38  ;;  %v9119_v44 = vpack.c.bf16 %v4631_v11, %v4623_v62  ;;  %v4671_v38 = vld [vmem:[%s18566_s4 + $0x1a0] sm:$0xff] }
 0x844   :  { %v16131_v4 = vadd.f32 %v4601_v60, %v4599_v51  ;;  %v4597_v19 = vadd.f32 0.5, %v4595_v52  ;;  %v9125_v60 = vpack.c.bf16 %v4664_v29, %v4656_v55  ;;  %v9189_v51 = vpack.c.bf16 %v4666_v57, %v4658_v34  ;;  %v4679_v62 = vld [vmem:[%s18566_s4 + $0x1e0] sm:$0xff]  ;;  %v4690_v52 = vld [vmem:[%s18566_s4 + $0x238] sm:$0xff] }
 0x845   :  { %v16162_v22 = vmul.f32 %v10306_v10, %v4558_v27  ;;  %v4559_v15 = vadd.f32 0.5, %v4557_v18  ;;  %v9127_v56 = vpack.c.bf16 %v4663_v45, %v4655_v61  ;;  %v9191_v32 = vpack.c.bf16 %v4665_v5, %v4657_v33  ;;  %v4688_v10 = vld [vmem:[%s18566_s4 + $0x228] sm:$0xff]  ;;  %v4687_v27 = vld [vmem:[%s18566_s4 + $0x220] sm:$0xff]  ;;  %v4713_v61 = vld [vmem:[%s18566_s4 + $0x2f0] sm:$0xff] }
 0x846   :  { %10311 = vtanh.f32 %v16131_v4  ;;  %v9129_v11 = vpack.c.bf16 %v4680_v41, %v4672_v36  ;;  %v9193_v1 = vpack.c.bf16 %v4682_v63, %v4674_v20  ;;  %v9131_v6 = vpack.c.bf16 %v4679_v62, %v4671_v38  ;;  %v4695_v18 = vld [vmem:[%s18566_s4 + $0x260] sm:$0xff]  ;;  %v4720_v45 = vld [vmem:[%s18566_s4 + $0x328] sm:$0xff]  ;;  %v4722_v5 = vld [vmem:[%s18566_s4 + $0x338] sm:$0xff] }
 0x847   :  { %v9197_v31 = vpack.c.bf16 %v4698_v8, %v4690_v52  ;;  %v9135_v55 = vpack.c.bf16 %v4695_v18, %v4687_v27  ;;  %v4711_v29 = vld [vmem:[%s18566_s4 + $0x2e0] sm:$0xff]  ;;  %v9137_v57 = vpack.c.bf16 %v4712_v14, %v4704_v25  ;;  %v4728_v33 = vld [vmem:[%s18566_s4 + $0x368] sm:$0xff]  ;;  %v4730_v36 = vld [vmem:[%s18566_s4 + $0x378] sm:$0xff] }
 0x848   :  { %v4719_v41 = vld [vmem:[%s18566_s4 + $0x320] sm:$0xff]  ;;  %v9141_v63 = vpack.c.bf16 %v4728_v33, %v4720_v45  ;;  %v4729_v38 = vld [vmem:[%s18566_s4 + $0x370] sm:$0xff]  ;;  %v4736_v62 = vld [vmem:[%s18566_s4 + $0x3a8] sm:$0xff] }
 0x849   :  { %v4727_v20 = vld [vmem:[%s18566_s4 + $0x360] sm:$0xff]  ;;  %v4752_v27 = vld [vmem:[%s18566_s4 + $0x428] sm:$0xff]  ;;  %v4769_v45 = vld [vmem:[%s18566_s4 + $0x4b0] sm:$0xff] }
 0x84a   :  { %v4743_v52 = vld [vmem:[%s18566_s4 + $0x3e0] sm:$0xff]  ;;  %v4760_v18 = vld [vmem:[%s18566_s4 + $0x468] sm:$0xff]  ;;  %v4777_v33 = vld [vmem:[%s18566_s4 + $0x4f0] sm:$0xff] }
 0x84b   :  { %v9149_v25 = vpack.c.bf16 %v4760_v18, %v4752_v27  ;;  %v4801_v27 = vld [vmem:[%s18566_s4 + $0x5b0] sm:$0xff] }
 0x84c   :  { %v10308_v26 = vpop.eup %10307  ;;  %v4809_v18 = vld [vmem:[%s18566_s4 + $0x5f0] sm:$0xff] }
 0x84d   :  { %v4606_v30 = vmul.f32 %v10308_v26, %v4596_v54  ;;  %v10310_v13 = vpop.eup %10309  ;;  %v4696_v54 = vld [vmem:[%s18566_s4 + $0x268] sm:$0xff]  ;;  %v9195_v26 = vpack.c.bf16 %v4681_v35, %v4673_v12  ;;  %v4746_v12 = vld [vmem:[%s18566_s4 + $0x3f8] sm:$0xff]  ;;  %v9143_v35 = vpack.c.bf16 %v4727_v20, %v4719_v41  ;;  %v9219_v20 = vpack.c.bf16 %v4777_v33, %v4769_v45 }
 0x84e   :  { %v16195_v53 = vmul.f32 %v10310_v13, %v4559_v15  ;;  %v4714_v13 = vld [vmem:[%s18566_s4 + $0x2f8] sm:$0xff]  ;;  %v4703_v15 = vld [vmem:[%s18566_s4 + $0x2a0] sm:$0xff] }
 0x84f   :  { %4939 = vmatprep.mubr.f32.mxu0 %v4606_v30  ;;  %5016 = vmatprep.mubr.f32.mxu1 %v4606_v30  ;;  %10313 = vtanh.f32 %v4606_v30 }
 0x850   :  { %v10312_v59 = vpop.eup %10311  ;;  %4940 = vmatmul.mubr.f32.vlgmr.msra.gmra.mrb[28].mxu0 %v16162_v22  ;;  %5017 = vmatmul.mubr.f32.vlgmr.msra.gmra.mrb[28].mxu1 %v16162_v22 }
 0x851   :  { %v16187_v2 = vmul.f32 %v10312_v59, %v4597_v19  ;;  %9120 = vmatpush1.bf16.msra.mxu0 %v9119_v44  ;;  %9184 = vmatpush1.bf16.msra.mxu1 %v9183_v3  ;;  %v9133_v3 = vpack.c.bf16 %v4696_v54, %v4688_v10  ;;  %v4735_v54 = vld [vmem:[%s18566_s4 + $0x3a0] sm:$0xff] }
 0x852   :  { %9122 = vmatprep.subr.bf16.mxu0 %v9121_v7  ;;  %9186 = vmatprep.subr.bf16.mxu1 %v9185_v47  ;;  %v4689_v7 = vld [vmem:[%s18566_s4 + $0x230] sm:$0xff] }
 0x853   :  { %4945 = vmatprep.mubr.f32.mxu0 %v16187_v2  ;;  %5022 = vmatprep.mubr.f32.mxu1 %v16187_v2  ;;  %10315 = vtanh.f32 %v16187_v2  ;;  %v4697_v47 = vld [vmem:[%s18566_s4 + $0x270] sm:$0xff] }
 0x854   :  { %4946 = vmatmul.mubr.f32.gmra.mrb[30].mxu0 %v16195_v53  ;;  %5023 = vmatmul.mubr.f32.gmra.mrb[30].mxu1 %v16195_v53  ;;  %v9199_v59 = vpack.c.bf16 %v4697_v47, %v4689_v7  ;;  %v4751_v7 = vld [vmem:[%s18566_s4 + $0x420] sm:$0xff] }
 0x855   :  { %9124 = vmatpush1.bf16.msra.mxu0 %v9123_v39  ;;  %9188 = vmatpush1.bf16.msra.mxu1 %v9187_v40  ;;  %v9201_v39 = vpack.c.bf16 %v4714_v13, %v4706_v28  ;;  %v4705_v40 = vld [vmem:[%s18566_s4 + $0x2b0] sm:$0xff]  ;;  %v4759_v47 = vld [vmem:[%s18566_s4 + $0x460] sm:$0xff] }
 0x856   :  { %5093 = vmatprep.mubr.f32.mxu0 %v4606_v30  ;;  %5170 = vmatprep.mubr.f32.mxu1 %v4606_v30  ;;  %v10478_v30 = vld [vmem:[%s18571_s6] ss:$0 sm:$0xff]  ;;  %v4753_v28 = vld [vmem:[%s18566_s4 + $0x430] sm:$0xff] }
 0x857   :  { %9126 = vmatprep.subr.bf16.mxu0 %v9125_v60  ;;  %9190 = vmatprep.subr.bf16.mxu1 %v9189_v51  ;;  %v9139_v60 = vpack.c.bf16 %v4711_v29, %v4703_v15  ;;  %v9203_v51 = vpack.c.bf16 %v4713_v61, %v4705_v40  ;;  %v4761_v13 = vld [vmem:[%s18566_s4 + $0x470] sm:$0xff]  ;;  %v4778_v15 = vld [vmem:[%s18566_s4 + $0x4f8] sm:$0xff]  ;;  %v9151_v29 = vpack.c.bf16 %v4759_v47, %v4751_v7 }
 0x858   :  { %v9227_v47 = vpack.c.bf16 %v4809_v18, %v4801_v27  ;;  %v4871_v18 = vld [vmem:[%s18566_s4 + $0x7e0] sm:$0xff] }
 0x859   :  { %v10314_v9 = vpop.eup %10313  ;;  %9128 = vmatpush1.bf16.msra.mxu0 %v9127_v56  ;;  %9192 = vmatpush1.bf16.msra.mxu1 %v9191_v32  ;;  %v9205_v56 = vpack.c.bf16 %v4730_v36, %v4722_v5  ;;  %v4721_v32 = vld [vmem:[%s18566_s4 + $0x330] sm:$0xff]  ;;  %v4784_v5 = vld [vmem:[%s18566_s4 + $0x528] sm:$0xff] }
 0x85a   :  { %9130 = vmatprep.subr.bf16.mxu0 %v9129_v11  ;;  %9194 = vmatprep.subr.bf16.mxu1 %v9193_v1  ;;  %v6971_v44 = vmul.f32 %v10478_v30, %v10314_v9  ;;  %v4744_v11 = vld [vmem:[%s18566_s4 + $0x3e8] sm:$0xff]  ;;  %v4738_v1 = vld [vmem:[%s18566_s4 + $0x3b8] sm:$0xff]  ;;  %v9207_v10 = vpack.c.bf16 %v4729_v38, %v4721_v32 }
 0x85b   :  { %v9145_v8 = vpack.c.bf16 %v4744_v11, %v4736_v62  ;;  %v9209_v9 = vpack.c.bf16 %v4746_v12, %v4738_v1  ;;  %v4792_v36 = vld [vmem:[%s18566_s4 + $0x568] sm:$0xff]  ;;  %v4785_v62 = vld [vmem:[%s18566_s4 + $0x530] sm:$0xff] }
 0x85c   :  { %7001 = vadd.xlane.f32.xlu0 %v6971_v44  ;;  %v4762_v44 = vld [vmem:[%s18566_s4 + $0x478] sm:$0xff]  ;;  %v9157_v32 = vpack.c.bf16 %v4792_v36, %v4784_v5  ;;  %v4793_v11 = vld [vmem:[%s18566_s4 + $0x570] sm:$0xff]  ;;  %v4800_v1 = vld [vmem:[%s18566_s4 + $0x5a8] sm:$0xff] }
 0x85d   :  { %v10316_v19 = vpop.eup %10315  ;;  %9132 = vmatpush1.bf16.msra.mxu0 %v9131_v6  ;;  %9196 = vmatpush1.bf16.msra.mxu1 %v9195_v26  ;;  %v4737_v6 = vld [vmem:[%s18566_s4 + $0x3b0] sm:$0xff]  ;;  %v4808_v12 = vld [vmem:[%s18566_s4 + $0x5e8] sm:$0xff] }
 0x85e   :  { %9134 = vmatprep.subr.bf16.mxu0 %v9133_v3  ;;  %9198 = vmatprep.subr.bf16.mxu1 %v9197_v31  ;;  %v6972_v34 = vmul.f32 %v10478_v30, %v10316_v19  ;;  %v4745_v26 = vld [vmem:[%s18566_s4 + $0x3f0] sm:$0xff]  ;;  %v4754_v30 = vld [vmem:[%s18566_s4 + $0x438] sm:$0xff]  ;;  %v9147_v3 = vpack.c.bf16 %v4743_v52, %v4735_v54  ;;  %v4768_v19 = vld [vmem:[%s18566_s4 + $0x4a8] sm:$0xff]  ;;  %v9223_v52 = vpack.c.bf16 %v4793_v11, %v4785_v62 }
 0x85f   :  { %v9211_v31 = vpack.c.bf16 %v4745_v26, %v4737_v6  ;;  %v9213_v14 = vpack.c.bf16 %v4762_v44, %v4754_v30  ;;  %v9161_v6 = vpack.c.bf16 %v4808_v12, %v4800_v1  ;;  %v4816_v30 = vld [vmem:[%s18566_s4 + $0x628] sm:$0xff]  ;;  %v4833_v5 = vld [vmem:[%s18566_s4 + $0x6b0] sm:$0xff] }
 0x860   :  { %7003 = vadd.xlane.f32.xlu1 %v6972_v34  ;;  %v9215_v34 = vpack.c.bf16 %v4761_v13, %v4753_v28  ;;  %v4824_v44 = vld [vmem:[%s18566_s4 + $0x668] sm:$0xff]  ;;  %v4841_v36 = vld [vmem:[%s18566_s4 + $0x6f0] sm:$0xff] }
 0x861   :  { %9136 = vmatpush1.bf16.msra.mxu0 %v9135_v55  ;;  %9200 = vmatpush1.bf16.msra.mxu1 %v9199_v59  ;;  %v4776_v55 = vld [vmem:[%s18566_s4 + $0x4e8] sm:$0xff]  ;;  %v4770_v59 = vld [vmem:[%s18566_s4 + $0x4b8] sm:$0xff]  ;;  %v9165_v28 = vpack.c.bf16 %v4824_v44, %v4816_v30  ;;  %v4849_v1 = vld [vmem:[%s18566_s4 + $0x730] sm:$0xff] }
 0x862   :  { %9138 = vmatprep.subr.bf16.mxu0 %v9137_v57  ;;  %9202 = vmatprep.subr.bf16.mxu1 %v9201_v39  ;;  %v4767_v57 = vld [vmem:[%s18566_s4 + $0x4a0] sm:$0xff]  ;;  %v9153_v40 = vpack.c.bf16 %v4776_v55, %v4768_v19  ;;  %v9217_v61 = vpack.c.bf16 %v4778_v15, %v4770_v59  ;;  %v4817_v19 = vld [vmem:[%s18566_s4 + $0x630] sm:$0xff]  ;;  %v4832_v59 = vld [vmem:[%s18566_s4 + $0x6a8] sm:$0xff] }
 0x863   :  { %v4775_v39 = vld [vmem:[%s18566_s4 + $0x4e0] sm:$0xff]  ;;  %v4825_v55 = vld [vmem:[%s18566_s4 + $0x670] sm:$0xff]  ;;  %v4840_v15 = vld [vmem:[%s18566_s4 + $0x6e8] sm:$0xff] }
 0x864   :  { %v9155_v41 = vpack.c.bf16 %v4775_v39, %v4767_v57  ;;  %v9231_v39 = vpack.c.bf16 %v4825_v55, %v4817_v19  ;;  %v9169_v45 = vpack.c.bf16 %v4840_v15, %v4832_v59  ;;  %v4857_v12 = vld [vmem:[%s18566_s4 + $0x770] sm:$0xff]  ;;  %v5296_v15 = vld [vmem:[%s18566_s4 + $0x88] sm:$0xff] }
 0x865   :  { %9140 = vmatpush1.bf16.msra.mxu0 %v9139_v60  ;;  %9204 = vmatpush1.bf16.msra.mxu1 %v9203_v51  ;;  %v4786_v60 = vld [vmem:[%s18566_s4 + $0x538] sm:$0xff]  ;;  %v4865_v30 = vld [vmem:[%s18566_s4 + $0x7b0] sm:$0xff] }
 0x866   :  { %9142 = vmatprep.subr.bf16.mxu0 %v9141_v63  ;;  %9206 = vmatprep.subr.bf16.mxu1 %v9205_v56  ;;  %v4794_v51 = vld [vmem:[%s18566_s4 + $0x578] sm:$0xff]  ;;  %v4783_v63 = vld [vmem:[%s18566_s4 + $0x520] sm:$0xff]  ;;  %v4873_v44 = vld [vmem:[%s18566_s4 + $0x7f0] sm:$0xff] }
 0x867   :  { %v4791_v56 = vld [vmem:[%s18566_s4 + $0x560] sm:$0xff]  ;;  %v9221_v38 = vpack.c.bf16 %v4794_v51, %v4786_v60  ;;  %v4848_v60 = vld [vmem:[%s18566_s4 + $0x728] sm:$0xff]  ;;  %v5281_v19 = vld [vmem:[%s18566_s4 + $0x10] sm:$0xff] }
 0x868   :  { %v9159_v54 = vpack.c.bf16 %v4791_v56, %v4783_v63  ;;  %v4856_v51 = vld [vmem:[%s18566_s4 + $0x768] sm:$0xff]  ;;  %v9235_v56 = vpack.c.bf16 %v4841_v36, %v4833_v5  ;;  %v5289_v55 = vld [vmem:[%s18566_s4 + $0x50] sm:$0xff] }
 0x869   :  { %9144 = vmatpush1.bf16.msra.mxu0 %v9143_v35  ;;  %9208 = vmatpush1.bf16.msra.mxu1 %v9207_v10  ;;  %v4802_v35 = vld [vmem:[%s18566_s4 + $0x5b8] sm:$0xff]  ;;  %v9173_v62 = vpack.c.bf16 %v4856_v51, %v4848_v60  ;;  %v9311_v59 = vpack.c.bf16 %v5289_v55, %v5281_v19  ;;  %v5297_v5 = vld [vmem:[%s18566_s4 + $0x90] sm:$0xff]  ;;  %v5312_v60 = vld [vmem:[%s18566_s4 + $0x108] sm:$0xff] }
 0x86a   :  { %9146 = vmatprep.subr.bf16.mxu0 %v9145_v8  ;;  %9210 = vmatprep.subr.bf16.mxu1 %v9209_v9  ;;  %v4810_v10 = vld [vmem:[%s18566_s4 + $0x5f8] sm:$0xff]  ;;  %v4799_v8 = vld [vmem:[%s18566_s4 + $0x5a0] sm:$0xff]  ;;  %v5305_v36 = vld [vmem:[%s18566_s4 + $0xd0] sm:$0xff] }
 0x86b   :  { %v4807_v9 = vld [vmem:[%s18566_s4 + $0x5e0] sm:$0xff]  ;;  %v9225_v26 = vpack.c.bf16 %v4810_v10, %v4802_v35  ;;  %v4864_v35 = vld [vmem:[%s18566_s4 + $0x7a8] sm:$0xff]  ;;  %v9315_v51 = vpack.c.bf16 %v5305_v36, %v5297_v5 }
 0x86c   :  { %v9163_v7 = vpack.c.bf16 %v4807_v9, %v4799_v8  ;;  %v4872_v10 = vld [vmem:[%s18566_s4 + $0x7e8] sm:$0xff]  ;;  %v9239_v9 = vpack.c.bf16 %v4857_v12, %v4849_v1  ;;  %v5321_v12 = vld [vmem:[%s18566_s4 + $0x150] sm:$0xff] }
 0x86d   :  { %9148 = vmatpush1.bf16.msra.mxu0 %v9147_v3  ;;  %9212 = vmatpush1.bf16.msra.mxu1 %v9211_v31  ;;  %v4818_v3 = vld [vmem:[%s18566_s4 + $0x638] sm:$0xff]  ;;  %v5360_v19 = vld [vmem:[%s18566_s4 + $0x288] sm:$0xff] }
 0x86e   :  { %9150 = vmatprep.subr.bf16.mxu0 %v9149_v25  ;;  %9214 = vmatprep.subr.bf16.mxu1 %v9213_v14  ;;  %v4826_v31 = vld [vmem:[%s18566_s4 + $0x678] sm:$0xff]  ;;  %v4815_v25 = vld [vmem:[%s18566_s4 + $0x620] sm:$0xff]  ;;  %v5368_v55 = vld [vmem:[%s18566_s4 + $0x2c8] sm:$0xff] }
 0x86f   :  { %v4823_v14 = vld [vmem:[%s18566_s4 + $0x660] sm:$0xff]  ;;  %v9229_v13 = vpack.c.bf16 %v4826_v31, %v4818_v3  ;;  %v9243_v31 = vpack.c.bf16 %v4873_v44, %v4865_v30  ;;  %v5337_v30 = vld [vmem:[%s18566_s4 + $0x1d0] sm:$0xff]  ;;  %v5376_v5 = vld [vmem:[%s18566_s4 + $0x308] sm:$0xff] }
 0x870   :  { %v9167_v57 = vpack.c.bf16 %v4823_v14, %v4815_v25  ;;  %v5287_v14 = vld [vmem:[%s18566_s4 + $0x40] sm:$0xff]  ;;  %v5384_v36 = vld [vmem:[%s18566_s4 + $0x348] sm:$0xff] }
 0x871   :  { %9152 = vmatpush1.bf16.msra.mxu0 %v9151_v29  ;;  %9216 = vmatpush1.bf16.msra.mxu1 %v9215_v34  ;;  %v4834_v29 = vld [vmem:[%s18566_s4 + $0x6b8] sm:$0xff] }
 0x872   :  { %9154 = vmatprep.subr.bf16.mxu0 %v9153_v40  ;;  %9218 = vmatprep.subr.bf16.mxu1 %v9217_v61  ;;  %v4842_v34 = vld [vmem:[%s18566_s4 + $0x6f8] sm:$0xff]  ;;  %v4831_v40 = vld [vmem:[%s18566_s4 + $0x6a0] sm:$0xff] }
 0x873   :  { %v4839_v61 = vld [vmem:[%s18566_s4 + $0x6e0] sm:$0xff]  ;;  %v9233_v33 = vpack.c.bf16 %v4842_v34, %v4834_v29  ;;  %v5304_v29 = vld [vmem:[%s18566_s4 + $0xc8] sm:$0xff]  ;;  %v5298_v34 = vld [vmem:[%s18566_s4 + $0x98] sm:$0xff] }
 0x874   :  { %v9171_v63 = vpack.c.bf16 %v4839_v61, %v4831_v40  ;;  %v5295_v40 = vld [vmem:[%s18566_s4 + $0x80] sm:$0xff] }
 0x875   :  { %9156 = vmatpush1.bf16.msra.mxu0 %v9155_v41  ;;  %9220 = vmatpush1.bf16.msra.mxu1 %v9219_v20  ;;  %v4850_v41 = vld [vmem:[%s18566_s4 + $0x738] sm:$0xff]  ;;  %v5303_v61 = vld [vmem:[%s18566_s4 + $0xc0] sm:$0xff] }
 0x876   :  { %9158 = vmatprep.subr.bf16.mxu0 %v9157_v32  ;;  %9222 = vmatprep.subr.bf16.mxu1 %v9221_v38  ;;  %v4858_v20 = vld [vmem:[%s18566_s4 + $0x778] sm:$0xff]  ;;  %v4847_v32 = vld [vmem:[%s18566_s4 + $0x720] sm:$0xff] }
 0x877   :  { %v4855_v38 = vld [vmem:[%s18566_s4 + $0x760] sm:$0xff]  ;;  %v9237_v11 = vpack.c.bf16 %v4858_v20, %v4850_v41  ;;  %v5320_v41 = vld [vmem:[%s18566_s4 + $0x148] sm:$0xff]  ;;  %v5314_v20 = vld [vmem:[%s18566_s4 + $0x118] sm:$0xff] }
 0x878   :  { %v9175_v8 = vpack.c.bf16 %v4855_v38, %v4847_v32  ;;  %v5311_v38 = vld [vmem:[%s18566_s4 + $0x100] sm:$0xff] }
 0x879   :  { %9160 = vmatpush1.bf16.msra.mxu0 %v9159_v54  ;;  %9224 = vmatpush1.bf16.msra.mxu1 %v9223_v52  ;;  %v4866_v54 = vld [vmem:[%s18566_s4 + $0x7b8] sm:$0xff] }
 0x87a   :  { %9162 = vmatprep.subr.bf16.mxu0 %v9161_v6  ;;  %9226 = vmatprep.subr.bf16.mxu1 %v9225_v26  ;;  %v4874_v52 = vld [vmem:[%s18566_s4 + $0x7f8] sm:$0xff]  ;;  %v4863_v6 = vld [vmem:[%s18566_s4 + $0x7a0] sm:$0xff]  ;;  %v9177_v26 = vpack.c.bf16 %v4872_v10, %v4864_v35  ;;  %v5328_v35 = vld [vmem:[%s18566_s4 + $0x188] sm:$0xff] }
 0x87b   :  { %v9241_v27 = vpack.c.bf16 %v4874_v52, %v4866_v54  ;;  %v9179_v3 = vpack.c.bf16 %v4871_v18, %v4863_v6  ;;  %v5336_v10 = vld [vmem:[%s18566_s4 + $0x1c8] sm:$0xff]  ;;  %v5327_v6 = vld [vmem:[%s18566_s4 + $0x180] sm:$0xff]  ;;  %v5329_v18 = vld [vmem:[%s18566_s4 + $0x190] sm:$0xff] }
 0x87c   :  { %v9257_v52 = vpack.c.bf16 %v5336_v10, %v5328_v35  ;;  %v5392_v35 = vld [vmem:[%s18566_s4 + $0x388] sm:$0xff] }
 0x87d   :  { %9164 = vmatpush1.bf16.msra.mxu0 %v9163_v7  ;;  %9228 = vmatpush1.bf16.msra.mxu1 %v9227_v47  ;;  %v5280_v7 = vld [vmem:[%s18566_s4 + $0x8] sm:$0xff] }
 0x87e   :  { %9166 = vmatprep.subr.bf16.mxu0 %v9165_v28  ;;  %9230 = vmatprep.subr.bf16.mxu1 %v9229_v13  ;;  %v5288_v47 = vld [vmem:[%s18566_s4 + $0x48] sm:$0xff] }
 0x87f   :  { %v9245_v25 = vpack.c.bf16 %v5288_v47, %v5280_v7  ;;  %v5346_v7 = vld [vmem:[%s18566_s4 + $0x218] sm:$0xff]  ;;  %v9323_v47 = vpack.c.bf16 %v5337_v30, %v5329_v18  ;;  %v5400_v10 = vld [vmem:[%s18566_s4 + $0x3c8] sm:$0xff]  ;;  %v5401_v30 = vld [vmem:[%s18566_s4 + $0x3d0] sm:$0xff] }
 0x881   :  { %9168 = vmatpush1.bf16.msra.mxu0 %v9167_v57  ;;  %9232 = vmatpush1.bf16.msra.mxu1 %v9231_v39  ;;  %v9249_v57 = vpack.c.bf16 %v5304_v29, %v5296_v15  ;;  %v5306_v39 = vld [vmem:[%s18566_s4 + $0xd8] sm:$0xff] }
 0x882   :  { %9170 = vmatprep.subr.bf16.mxu0 %v9169_v45  ;;  %9234 = vmatprep.subr.bf16.mxu1 %v9233_v33  ;;  %v9313_v45 = vpack.c.bf16 %v5306_v39, %v5298_v34  ;;  %v9251_v33 = vpack.c.bf16 %v5303_v61, %v5295_v40  ;;  %v5370_v15 = vld [vmem:[%s18566_s4 + $0x2d8] sm:$0xff]  ;;  %v5359_v39 = vld [vmem:[%s18566_s4 + $0x280] sm:$0xff]  ;;  %v5361_v61 = vld [vmem:[%s18566_s4 + $0x290] sm:$0xff] }
 0x883   :  { %v5367_v40 = vld [vmem:[%s18566_s4 + $0x2c0] sm:$0xff] }
 0x885   :  { %9172 = vmatpush1.bf16.msra.mxu0 %v9171_v63  ;;  %9236 = vmatpush1.bf16.msra.mxu1 %v9235_v56  ;;  %v5322_v63 = vld [vmem:[%s18566_s4 + $0x158] sm:$0xff]  ;;  %v9253_v56 = vpack.c.bf16 %v5320_v41, %v5312_v60  ;;  %v9267_v41 = vpack.c.bf16 %v5367_v40, %v5359_v39  ;;  %v5431_v39 = vld [vmem:[%s18566_s4 + $0x4c0] sm:$0xff] }
 0x886   :  { %9174 = vmatprep.subr.bf16.mxu0 %v9173_v62  ;;  %9238 = vmatprep.subr.bf16.mxu1 %v9237_v11  ;;  %v9317_v32 = vpack.c.bf16 %v5322_v63, %v5314_v20  ;;  %v5319_v62 = vld [vmem:[%s18566_s4 + $0x140] sm:$0xff]  ;;  %v5313_v11 = vld [vmem:[%s18566_s4 + $0x110] sm:$0xff]  ;;  %v5378_v60 = vld [vmem:[%s18566_s4 + $0x318] sm:$0xff]  ;;  %v9269_v63 = vpack.c.bf16 %v5384_v36, %v5376_v5 }
 0x887   :  { %v9255_v1 = vpack.c.bf16 %v5319_v62, %v5311_v38  ;;  %v9319_v54 = vpack.c.bf16 %v5321_v12, %v5313_v11  ;;  %v5377_v62 = vld [vmem:[%s18566_s4 + $0x310] sm:$0xff]  ;;  %v5440_v36 = vld [vmem:[%s18566_s4 + $0x508] sm:$0xff] }
 0x888   :  { %v5385_v11 = vld [vmem:[%s18566_s4 + $0x350] sm:$0xff] }
 0x889   :  { %9176 = vmatpush1.bf16.msra.mxu0 %v9175_v8  ;;  %9240 = vmatpush1.bf16.msra.mxu1 %v9239_v9  ;;  %v5330_v8 = vld [vmem:[%s18566_s4 + $0x198] sm:$0xff]  ;;  %v9335_v12 = vpack.c.bf16 %v5385_v11, %v5377_v62  ;;  %v5441_v62 = vld [vmem:[%s18566_s4 + $0x510] sm:$0xff] }
 0x88a   :  { %9178 = vmatprep.subr.bf16.mxu0 %v9177_v26  ;;  %9242 = vmatprep.subr.bf16.mxu1 %v9241_v27  ;;  %v5338_v9 = vld [vmem:[%s18566_s4 + $0x1d8] sm:$0xff]  ;;  %v5335_v27 = vld [vmem:[%s18566_s4 + $0x1c0] sm:$0xff]  ;;  %v5449_v11 = vld [vmem:[%s18566_s4 + $0x550] sm:$0xff] }
 0x88b   :  { %v9321_v26 = vpack.c.bf16 %v5338_v9, %v5330_v8  ;;  %v9259_v44 = vpack.c.bf16 %v5335_v27, %v5327_v6  ;;  %v5402_v8 = vld [vmem:[%s18566_s4 + $0x3d8] sm:$0xff]  ;;  %v5391_v6 = vld [vmem:[%s18566_s4 + $0x380] sm:$0xff]  ;;  %v5393_v27 = vld [vmem:[%s18566_s4 + $0x390] sm:$0xff] }
 0x88d   :  { %9180 = vmatpush1.bf16.msra.mxu0 %v9179_v3  ;;  %9244 = vmatpush1.bf16.msra.mxu1 %v9243_v31  ;;  %v5344_v3 = vld [vmem:[%s18566_s4 + $0x208] sm:$0xff] }
 0x88e   :  { %9246 = vmatprep.subr.bf16.mxu0 %v9245_v25  ;;  %v5352_v31 = vld [vmem:[%s18566_s4 + $0x248] sm:$0xff]  ;;  %v5354_v25 = vld [vmem:[%s18566_s4 + $0x258] sm:$0xff] }
 0x890   :  { %5094 = vmatmul.mubr.f32.vlgmr.msra.gmra.mrb[64].mxu0 %v16162_v22  ;;  %5171 = vmatmul.mubr.f32.vlgmr.msra.gmra.mrb[64].mxu1 %v16162_v22  ;;  %v5282_v22 = vld [vmem:[%s18566_s4 + $0x18] sm:$0xff] }
 0x891   :  { %5099 = vmatprep.mubr.f32.mxu0 %v16187_v2  ;;  %5176 = vmatprep.mubr.f32.mxu1 %v16187_v2  ;;  %v5290_v2 = vld [vmem:[%s18566_s4 + $0x58] sm:$0xff] }
 0x892   :  { %v9309_v28 = vpack.c.bf16 %v5290_v2, %v5282_v22  ;;  %v9261_v22 = vpack.c.bf16 %v5352_v31, %v5344_v3  ;;  %v5343_v2 = vld [vmem:[%s18566_s4 + $0x200] sm:$0xff]  ;;  %v5408_v3 = vld [vmem:[%s18566_s4 + $0x408] sm:$0xff] }
 0x893   :  { %v5416_v31 = vld [vmem:[%s18566_s4 + $0x448] sm:$0xff] }
 0x894   :  { %5100 = vmatmul.mubr.f32.gmra.mrb[66].mxu0 %v16195_v53  ;;  %5177 = vmatmul.mubr.f32.gmra.mrb[66].mxu1 %v16195_v53  ;;  %v5279_v53 = vld [vmem:[%s18566_s4] sm:$0xff] }
 0x895   :  { %v9247_v13 = vpack.c.bf16 %v5287_v14, %v5279_v53  ;;  %9310 = vmatprep.subr.bf16.mxu1 %v9309_v28  ;;  %v5351_v53 = vld [vmem:[%s18566_s4 + $0x240] sm:$0xff]  ;;  %v9325_v14 = vpack.c.bf16 %v5354_v25, %v5346_v7  ;;  %v5345_v28 = vld [vmem:[%s18566_s4 + $0x210] sm:$0xff]  ;;  %v5410_v7 = vld [vmem:[%s18566_s4 + $0x418] sm:$0xff] }
 0x896   :  { %9312 = vmatpush1.bf16.msra.mxu1 %v9311_v59  ;;  %v5362_v59 = vld [vmem:[%s18566_s4 + $0x298] sm:$0xff]  ;;  %v9263_v29 = vpack.c.bf16 %v5351_v53, %v5343_v2  ;;  %v5407_v25 = vld [vmem:[%s18566_s4 + $0x400] sm:$0xff] }
 0x897   :  { %9248 = vmatpush1.bf16.msra.mxu0 %v9247_v13  ;;  %9314 = vmatprep.subr.bf16.mxu1 %v9313_v45  ;;  %v5353_v13 = vld [vmem:[%s18566_s4 + $0x250] sm:$0xff]  ;;  %v9329_v45 = vpack.c.bf16 %v5370_v15, %v5362_v59  ;;  %v5415_v2 = vld [vmem:[%s18566_s4 + $0x440] sm:$0xff]  ;;  %v5432_v59 = vld [vmem:[%s18566_s4 + $0x4c8] sm:$0xff] }
 0x898   :  { %9250 = vmatprep.subr.bf16.mxu0 %v9249_v57  ;;  %v9327_v34 = vpack.c.bf16 %v5353_v13, %v5345_v28  ;;  %v9265_v57 = vpack.c.bf16 %v5368_v55, %v5360_v19  ;;  %v5409_v28 = vld [vmem:[%s18566_s4 + $0x410] sm:$0xff]  ;;  %v5424_v55 = vld [vmem:[%s18566_s4 + $0x488] sm:$0xff]  ;;  %v5426_v15 = vld [vmem:[%s18566_s4 + $0x498] sm:$0xff] }
 0x899   :  { %v5417_v13 = vld [vmem:[%s18566_s4 + $0x450] sm:$0xff] }
 0x89a   :  { %9316 = vmatpush1.bf16.msra.mxu1 %v9315_v51  ;;  %v5386_v51 = vld [vmem:[%s18566_s4 + $0x358] sm:$0xff]  ;;  %v9343_v19 = vpack.c.bf16 %v5417_v13, %v5409_v28  ;;  %v5481_v28 = vld [vmem:[%s18566_s4 + $0x650] sm:$0xff] }
 0x89b   :  { %9252 = vmatpush1.bf16.msra.mxu0 %v9251_v33  ;;  %9318 = vmatprep.subr.bf16.mxu1 %v9317_v32  ;;  %v5369_v33 = vld [vmem:[%s18566_s4 + $0x2d0] sm:$0xff]  ;;  %v5383_v32 = vld [vmem:[%s18566_s4 + $0x340] sm:$0xff]  ;;  %v9333_v38 = vpack.c.bf16 %v5386_v51, %v5378_v60  ;;  %v5448_v60 = vld [vmem:[%s18566_s4 + $0x548] sm:$0xff] }
 0x89c   :  { %9254 = vmatprep.subr.bf16.mxu0 %v9253_v56  ;;  %v9331_v20 = vpack.c.bf16 %v5369_v33, %v5361_v61  ;;  %v5375_v56 = vld [vmem:[%s18566_s4 + $0x300] sm:$0xff]  ;;  %v5433_v33 = vld [vmem:[%s18566_s4 + $0x4d0] sm:$0xff]  ;;  %v5442_v51 = vld [vmem:[%s18566_s4 + $0x518] sm:$0xff] }
 0x89e   :  { %9320 = vmatpush1.bf16.msra.mxu1 %v9319_v54  ;;  %v5394_v54 = vld [vmem:[%s18566_s4 + $0x398] sm:$0xff] }
 0x89f   :  { %9256 = vmatpush1.bf16.msra.mxu0 %v9255_v1  ;;  %9322 = vmatprep.subr.bf16.mxu1 %v9321_v26  ;;  %v9271_v1 = vpack.c.bf16 %v5383_v32, %v5375_v56  ;;  %v9337_v9 = vpack.c.bf16 %v5402_v8, %v5394_v54  ;;  %v5399_v26 = vld [vmem:[%s18566_s4 + $0x3c0] sm:$0xff] }
 0x8a0   :  { %9258 = vmatprep.subr.bf16.mxu0 %v9257_v52  ;;  %v9273_v52 = vpack.c.bf16 %v5400_v10, %v5392_v35  ;;  %v9275_v18 = vpack.c.bf16 %v5399_v26, %v5391_v6  ;;  %v5447_v56 = vld [vmem:[%s18566_s4 + $0x540] sm:$0xff]  ;;  %v5464_v35 = vld [vmem:[%s18566_s4 + $0x5c8] sm:$0xff]  ;;  %v5458_v10 = vld [vmem:[%s18566_s4 + $0x598] sm:$0xff] }
 0x8a1   :  { %v5455_v8 = vld [vmem:[%s18566_s4 + $0x580] sm:$0xff] }
 0x8a2   :  { %9324 = vmatpush1.bf16.msra.mxu1 %v9323_v47  ;;  %v9277_v47 = vpack.c.bf16 %v5416_v31, %v5408_v3  ;;  %v5480_v3 = vld [vmem:[%s18566_s4 + $0x648] sm:$0xff]  ;;  %v5474_v31 = vld [vmem:[%s18566_s4 + $0x618] sm:$0xff] }
 0x8a3   :  { %9260 = vmatpush1.bf16.msra.mxu0 %v9259_v44  ;;  %9326 = vmatprep.subr.bf16.mxu1 %v9325_v14  ;;  %v9339_v44 = vpack.c.bf16 %v5401_v30, %v5393_v27  ;;  %v9279_v14 = vpack.c.bf16 %v5415_v2, %v5407_v25  ;;  %v5457_v27 = vld [vmem:[%s18566_s4 + $0x590] sm:$0xff]  ;;  %v5479_v25 = vld [vmem:[%s18566_s4 + $0x640] sm:$0xff] }
 0x8a4   :  { %9262 = vmatprep.subr.bf16.mxu0 %v9261_v22  ;;  %v5418_v22 = vld [vmem:[%s18566_s4 + $0x458] sm:$0xff] }
 0x8a5   :  { %v9341_v53 = vpack.c.bf16 %v5418_v22, %v5410_v7  ;;  %v5471_v22 = vld [vmem:[%s18566_s4 + $0x600] sm:$0xff] }
 0x8a6   :  { %9328 = vmatpush1.bf16.msra.mxu1 %v9327_v34  ;;  %v5434_v34 = vld [vmem:[%s18566_s4 + $0x4d8] sm:$0xff] }
 0x8a7   :  { %9264 = vmatpush1.bf16.msra.mxu0 %v9263_v29  ;;  %9330 = vmatprep.subr.bf16.mxu1 %v9329_v45  ;;  %v9281_v29 = vpack.c.bf16 %v5432_v59, %v5424_v55  ;;  %v9345_v40 = vpack.c.bf16 %v5434_v34, %v5426_v15  ;;  %v5425_v45 = vld [vmem:[%s18566_s4 + $0x490] sm:$0xff]  ;;  %v5496_v55 = vld [vmem:[%s18566_s4 + $0x6c8] sm:$0xff]  ;;  %v5490_v59 = vld [vmem:[%s18566_s4 + $0x698] sm:$0xff] }
 0x8a8   :  { %9266 = vmatprep.subr.bf16.mxu0 %v9265_v57  ;;  %v5423_v57 = vld [vmem:[%s18566_s4 + $0x480] sm:$0xff]  ;;  %v9347_v5 = vpack.c.bf16 %v5433_v33, %v5425_v45  ;;  %v5497_v45 = vld [vmem:[%s18566_s4 + $0x6d0] sm:$0xff] }
 0x8a9   :  { %v9283_v61 = vpack.c.bf16 %v5431_v39, %v5423_v57  ;;  %v5487_v34 = vld [vmem:[%s18566_s4 + $0x680] sm:$0xff] }
 0x8aa   :  { %9332 = vmatpush1.bf16.msra.mxu1 %v9331_v20  ;;  %v5450_v20 = vld [vmem:[%s18566_s4 + $0x558] sm:$0xff]  ;;  %v5495_v57 = vld [vmem:[%s18566_s4 + $0x6c0] sm:$0xff] }
 0x8ab   :  { %9268 = vmatpush1.bf16.msra.mxu0 %v9267_v41  ;;  %9334 = vmatprep.subr.bf16.mxu1 %v9333_v38  ;;  %v9285_v41 = vpack.c.bf16 %v5448_v60, %v5440_v36  ;;  %v9349_v32 = vpack.c.bf16 %v5450_v20, %v5442_v51  ;;  %v5512_v36 = vld [vmem:[%s18566_s4 + $0x748] sm:$0xff]  ;;  %v5506_v60 = vld [vmem:[%s18566_s4 + $0x718] sm:$0xff]  ;;  %v5503_v20 = vld [vmem:[%s18566_s4 + $0x700] sm:$0xff] }
 0x8ac   :  { %9270 = vmatprep.subr.bf16.mxu0 %v9269_v63  ;;  %v5439_v63 = vld [vmem:[%s18566_s4 + $0x500] sm:$0xff] }
 0x8ad   :  { %v9287_v38 = vpack.c.bf16 %v5447_v56, %v5439_v63  ;;  %v5511_v63 = vld [vmem:[%s18566_s4 + $0x740] sm:$0xff] }
 0x8ae   :  { %9336 = vmatpush1.bf16.msra.mxu1 %v9335_v12  ;;  %v5456_v12 = vld [vmem:[%s18566_s4 + $0x588] sm:$0xff] }
 0x8af   :  { %9272 = vmatpush1.bf16.msra.mxu0 %v9271_v1  ;;  %9338 = vmatprep.subr.bf16.mxu1 %v9337_v9  ;;  %v9351_v1 = vpack.c.bf16 %v5449_v11, %v5441_v62  ;;  %v9289_v54 = vpack.c.bf16 %v5464_v35, %v5456_v12  ;;  %v5463_v9 = vld [vmem:[%s18566_s4 + $0x5c0] sm:$0xff]  ;;  %v5513_v62 = vld [vmem:[%s18566_s4 + $0x750] sm:$0xff]  ;;  %v5528_v12 = vld [vmem:[%s18566_s4 + $0x7c8] sm:$0xff] }
 0x8b0   :  { %9274 = vmatprep.subr.bf16.mxu0 %v9273_v52  ;;  %v5466_v52 = vld [vmem:[%s18566_s4 + $0x5d8] sm:$0xff]  ;;  %v9291_v26 = vpack.c.bf16 %v5463_v9, %v5455_v8  ;;  %v5527_v8 = vld [vmem:[%s18566_s4 + $0x7c0] sm:$0xff] }
 0x8b1   :  { %v9353_v6 = vpack.c.bf16 %v5466_v52, %v5458_v10  ;;  %v5522_v35 = vld [vmem:[%s18566_s4 + $0x798] sm:$0xff]  ;;  %v5519_v52 = vld [vmem:[%s18566_s4 + $0x780] sm:$0xff] }
 0x8b2   :  { %9340 = vmatpush1.bf16.msra.mxu1 %v9339_v44  ;;  %v5472_v44 = vld [vmem:[%s18566_s4 + $0x608] sm:$0xff] }
 0x8b3   :  { %9276 = vmatpush1.bf16.msra.mxu0 %v9275_v18  ;;  %9342 = vmatprep.subr.bf16.mxu1 %v9341_v53  ;;  %v5465_v18 = vld [vmem:[%s18566_s4 + $0x5d0] sm:$0xff]  ;;  %v9293_v7 = vpack.c.bf16 %v5480_v3, %v5472_v44  ;;  %v9295_v53 = vpack.c.bf16 %v5479_v25, %v5471_v22  ;;  %v5292_v44 = vld [vmem:[%s18566_s4 + $0x68] sm:$0xff]  ;;  %v5286_v3 = vld [vmem:[%s18566_s4 + $0x38] sm:$0xff] }
 0x8b4   :  { %9278 = vmatprep.subr.bf16.mxu0 %v9277_v47  ;;  %v9355_v30 = vpack.c.bf16 %v5465_v18, %v5457_v27  ;;  %v5482_v47 = vld [vmem:[%s18566_s4 + $0x658] sm:$0xff]  ;;  %v5529_v27 = vld [vmem:[%s18566_s4 + $0x7d0] sm:$0xff] }
 0x8b5   :  { %v9357_v2 = vpack.c.bf16 %v5482_v47, %v5474_v31 }
 0x8b6   :  { %9344 = vmatpush1.bf16.msra.mxu1 %v9343_v19  ;;  %v5488_v19 = vld [vmem:[%s18566_s4 + $0x688] sm:$0xff] }
 0x8b7   :  { %9280 = vmatpush1.bf16.msra.mxu0 %v9279_v14  ;;  %9346 = vmatprep.subr.bf16.mxu1 %v9345_v40  ;;  %v5473_v14 = vld [vmem:[%s18566_s4 + $0x610] sm:$0xff]  ;;  %v9297_v15 = vpack.c.bf16 %v5496_v55, %v5488_v19  ;;  %v9299_v40 = vpack.c.bf16 %v5495_v57, %v5487_v34 }
 0x8b8   :  { %9282 = vmatprep.subr.bf16.mxu0 %v9281_v29  ;;  %v9359_v13 = vpack.c.bf16 %v5481_v28, %v5473_v14  ;;  %v5498_v29 = vld [vmem:[%s18566_s4 + $0x6d8] sm:$0xff] }
 0x8b9   :  { %v9361_v39 = vpack.c.bf16 %v5498_v29, %v5490_v59 }
 0x8ba   :  { %9348 = vmatpush1.bf16.msra.mxu1 %v9347_v5  ;;  %v5504_v5 = vld [vmem:[%s18566_s4 + $0x708] sm:$0xff] }
 0x8bb   :  { %9284 = vmatpush1.bf16.msra.mxu0 %v9283_v61  ;;  %9350 = vmatprep.subr.bf16.mxu1 %v9349_v32  ;;  %v5489_v61 = vld [vmem:[%s18566_s4 + $0x690] sm:$0xff]  ;;  %v9301_v51 = vpack.c.bf16 %v5512_v36, %v5504_v5  ;;  %v9303_v32 = vpack.c.bf16 %v5511_v63, %v5503_v20 }
 0x8bc   :  { %9286 = vmatprep.subr.bf16.mxu0 %v9285_v41  ;;  %v9363_v33 = vpack.c.bf16 %v5497_v45, %v5489_v61  ;;  %v5514_v41 = vld [vmem:[%s18566_s4 + $0x758] sm:$0xff] }
 0x8bd   :  { %v9365_v56 = vpack.c.bf16 %v5514_v41, %v5506_v60 }
 0x8be   :  { %9352 = vmatpush1.bf16.msra.mxu1 %v9351_v1  ;;  %v5520_v1 = vld [vmem:[%s18566_s4 + $0x788] sm:$0xff] }
 0x8bf   :  { %9288 = vmatpush1.bf16.msra.mxu0 %v9287_v38  ;;  %9354 = vmatprep.subr.bf16.mxu1 %v9353_v6  ;;  %v5505_v38 = vld [vmem:[%s18566_s4 + $0x710] sm:$0xff]  ;;  %v9305_v10 = vpack.c.bf16 %v5528_v12, %v5520_v1  ;;  %v9307_v6 = vpack.c.bf16 %v5527_v8, %v5519_v52 }
 0x8c0   :  { %9290 = vmatprep.subr.bf16.mxu0 %v9289_v54  ;;  %v9367_v11 = vpack.c.bf16 %v5513_v62, %v5505_v38  ;;  %v5530_v54 = vld [vmem:[%s18566_s4 + $0x7d8] sm:$0xff] }
 0x8c1   :  { %v9369_v9 = vpack.c.bf16 %v5530_v54, %v5522_v35 }
 0x8c2   :  { %9356 = vmatpush1.bf16.msra.mxu1 %v9355_v30  ;;  %v5284_v30 = vld [vmem:[%s18566_s4 + $0x28] sm:$0xff] }
 0x8c3   :  { %9292 = vmatpush1.bf16.msra.mxu0 %v9291_v26  ;;  %9358 = vmatprep.subr.bf16.mxu1 %v9357_v2  ;;  %v5521_v26 = vld [vmem:[%s18566_s4 + $0x790] sm:$0xff]  ;;  %v9373_v31 = vpack.c.bf16 %v5292_v44, %v5284_v30 }
 0x8c4   :  { %9294 = vmatprep.subr.bf16.mxu0 %v9293_v7  ;;  %v9371_v18 = vpack.c.bf16 %v5529_v27, %v5521_v26  ;;  %v5294_v7 = vld [vmem:[%s18566_s4 + $0x78] sm:$0xff] }
 0x8c5   :  { %v9437_v47 = vpack.c.bf16 %v5294_v7, %v5286_v3 }
 0x8c6   :  { %9360 = vmatpush1.bf16.msra.mxu1 %v9359_v13 }
 0x8c7   :  { %9296 = vmatpush1.bf16.msra.mxu0 %v9295_v53  ;;  %9362 = vmatprep.subr.bf16.mxu1 %v9361_v39 }
 0x8c8   :  { %9298 = vmatprep.subr.bf16.mxu0 %v9297_v15 }
 0x8ca   :  { %9364 = vmatpush1.bf16.msra.mxu1 %v9363_v33 }
 0x8cb   :  { %9300 = vmatpush1.bf16.msra.mxu0 %v9299_v40  ;;  %9366 = vmatprep.subr.bf16.mxu1 %v9365_v56 }
 0x8cc   :  { %9302 = vmatprep.subr.bf16.mxu0 %v9301_v51 }
 0x8ce   :  { %9368 = vmatpush1.bf16.msra.mxu1 %v9367_v11 }
 0x8cf   :  { %9304 = vmatpush1.bf16.msra.mxu0 %v9303_v32  ;;  %9370 = vmatprep.subr.bf16.mxu1 %v9369_v9 }
 0x8d0   :  { %9306 = vmatprep.subr.bf16.mxu0 %v9305_v10 }
 0x8d2   :  { %9372 = vmatpush1.bf16.msra.mxu1 %v9371_v18 }
 0x8d3   :  { %9308 = vmatpush1.bf16.msra.mxu0 %v9307_v6  ;;  %9438 = vmatprep.subr.bf16.mxu1 %v9437_v47 }
 0x8d4   :  { %9374 = vmatprep.subr.bf16.mxu0 %v9373_v31 }
 0x923   :  { %v4941_v22 = vpop.f32.mrb[28].mxu0  ;;  %v5018_v25 = vpop.f32.mrb[28].mxu1 }
 0x924   :  { %v9909_v2 = vadd.f32 %v4941_v22, %v11107_v48  ;;  %v4943_v53 = vpop.f32.mrb[29].mxu0  ;;  %v5020_v14 = vpop.f32.mrb[29].mxu1  ;;  %v9945_v28 = vadd.f32 %v5018_v25, %v11113_v50 }
 0x925   :  { %v9910_v13 = vadd.f32 %v4943_v53, %v11110_v49  ;;  %v9946_v47 = vadd.f32 %v5020_v14, %v11124_v0 }
 0x926   :  { %10317 = vtanh.f32 %v9909_v2 }
 0x927   :  { %v4947_v19 = vpop.f32.mrb[30].mxu0  ;;  %v5024_v55 = vpop.f32.mrb[30].mxu1  ;;  %10319 = vtanh.f32 %v9910_v13 }
 0x928   :  { %v9911_v59 = vadd.f32 %v4947_v19, %v11107_v48  ;;  %v4949_v15 = vpop.f32.mrb[31].mxu0  ;;  %v5026_v29 = vpop.f32.mrb[31].mxu1  ;;  %10321 = vtanh.f32 %v9945_v28  ;;  %v9947_v57 = vadd.f32 %v5024_v55, %v11113_v50 }
 0x929   :  { %v9912_v34 = vadd.f32 %v4949_v15, %v11110_v49  ;;  %v9948_v55 = vadd.f32 %v5026_v29, %v11124_v0 }
 0x92a   :  { %10323 = vtanh.f32 %v9911_v59 }
 0x92b   :  { %10325 = vtanh.f32 %v9912_v34 }
 0x92c   :  { %10327 = vtanh.f32 %v9947_v57 }
 0x930   :  { %v10318_v39 = vpop.eup %10317 }
 0x931   :  { %v5208_v40 = vmul.f32 0.5, %v10318_v39  ;;  %v10320_v61 = vpop.eup %10319 }
 0x932   :  { %v10322_v45 = vpop.eup %10321  ;;  %v5212_v5 = vmul.f32 0.5, %v10320_v61 }
 0x933   :  { %v5210_v33 = vadd.f32 0.5, %v5208_v40 }
 0x934   :  { %v10324_v36 = vpop.eup %10323  ;;  %v5214_v60 = vadd.f32 0.5, %v5212_v5 }
 0x935   :  { %v5222_v51 = vmul.f32 %v10322_v45, %v5210_v33  ;;  %v5209_v41 = vmul.f32 0.5, %v10324_v36  ;;  %v10326_v20 = vpop.eup %10325 }
 0x936   :  { %v5220_v63 = vmul.f32 %v5214_v60, %v16110_v17  ;;  %v5213_v32 = vmul.f32 0.5, %v10326_v20  ;;  %v10328_v38 = vpop.eup %10327 }
 0x937   :  { %v5211_v56 = vadd.f32 0.5, %v5209_v41 }
 0x938   :  { %v16932_v62 = vadd.f32 %v5222_v51, %v5220_v63  ;;  %v5215_v11 = vadd.f32 0.5, %v5213_v32  ;;  %v5285_v32 = vld [vmem:[%s18566_s4 + $0x30] sm:$0xff] }
 0x939   :  { %v5223_v1 = vmul.f32 %v10328_v38, %v5211_v56  ;;  %v5283_v56 = vld [vmem:[%s18566_s4 + $0x20] sm:$0xff]  ;;  %v5293_v38 = vld [vmem:[%s18566_s4 + $0x70] sm:$0xff] }
 0x93a   :  { %v5221_v12 = vmul.f32 %v5215_v11, %v16113_v16  ;;  %v5300_v11 = vld [vmem:[%s18566_s4 + $0xa8] sm:$0xff] }
 0x93c   :  { %v16935_v35 = vadd.f32 %v5223_v1, %v5221_v12 }
 0x963   :  { %v5095_v10 = vpop.f32.mrb[64].mxu0  ;;  %v5172_v54 = vpop.f32.mrb[64].mxu1 }
 0x964   :  { %v5230_v52 = vadd.f32 %v5095_v10, %v11978_v23  ;;  %v5097_v8 = vpop.f32.mrb[65].mxu0  ;;  %v5174_v9 = vpop.f32.mrb[65].mxu1  ;;  %v5232_v6 = vadd.f32 %v5172_v54, %v11981_v21  ;;  %v5308_v54 = vld [vmem:[%s18566_s4 + $0xe8] sm:$0xff] }
 0x965   :  { %v5231_v17 = vadd.f32 %v5097_v8, %v11984_v24  ;;  %v5233_v31 = vadd.f32 %v5174_v9, %v11993_v37  ;;  %v5310_v8 = vld [vmem:[%s18566_s4 + $0xf8] sm:$0xff] }
 0x966   :  { %10329 = vtanh.f32 %v5230_v52  ;;  %v5302_v52 = vld [vmem:[%s18566_s4 + $0xb8] sm:$0xff] }
 0x967   :  { %v5101_v26 = vpop.f32.mrb[66].mxu0  ;;  %v5178_v27 = vpop.f32.mrb[66].mxu1  ;;  %10331 = vtanh.f32 %v5231_v17 }
 0x968   :  { %v5234_v18 = vadd.f32 %v5101_v26, %v11978_v23  ;;  %v5103_v30 = vpop.f32.mrb[67].mxu0  ;;  %v5180_v16 = vpop.f32.mrb[67].mxu1  ;;  %10333 = vtanh.f32 %v5232_v6  ;;  %v5236_v3 = vadd.f32 %v5178_v27, %v11981_v21 }
 0x969   :  { %v5235_v44 = vadd.f32 %v5103_v30, %v11984_v24  ;;  %v5237_v13 = vadd.f32 %v5180_v16, %v11993_v37  ;;  %v5299_v30 = vld [vmem:[%s18566_s4 + $0xa0] sm:$0xff] }
 0x96a   :  { %10335 = vtanh.f32 %v5234_v18  ;;  %v9439_v18 = vpack.c.bf16 %v5293_v38, %v5285_v32  ;;  %v5333_v38 = vld [vmem:[%s18566_s4 + $0x1b0] sm:$0xff] }
 0x96b   :  { %10337 = vtanh.f32 %v5235_v44  ;;  %v9377_v44 = vpack.c.bf16 %v5308_v54, %v5300_v11  ;;  %v5341_v11 = vld [vmem:[%s18566_s4 + $0x1f0] sm:$0xff]  ;;  %v5358_v54 = vld [vmem:[%s18566_s4 + $0x278] sm:$0xff] }
 0x96c   :  { %10339 = vtanh.f32 %v5236_v3  ;;  %v9441_v3 = vpack.c.bf16 %v5310_v8, %v5302_v52 }
 0x96d   :  { %10341 = vtanh.f32 %v5233_v31  ;;  %v5307_v31 = vld [vmem:[%s18566_s4 + $0xe0] sm:$0xff] }
 0x96e   :  { %10343 = vtanh.f32 %v9946_v47  ;;  %v5309_v47 = vld [vmem:[%s18566_s4 + $0xf0] sm:$0xff] }
 0x96f   :  { %10345 = vtanh.f32 %v5237_v13  ;;  %v5324_v13 = vld [vmem:[%s18566_s4 + $0x168] sm:$0xff] }
 0x970   :  { %v10330_v7 = vpop.eup %10329  ;;  %10347 = vtanh.f32 %v9948_v55  ;;  %v5326_v55 = vld [vmem:[%s18566_s4 + $0x178] sm:$0xff] }
 0x971   :  { %v5246_v22 = vmul.f32 0.5, %v10330_v7  ;;  %v10332_v25 = vpop.eup %10331  ;;  %10349 = vtanh.f32 %v16932_v62  ;;  %v5301_v7 = vld [vmem:[%s18566_s4 + $0xb0] sm:$0xff] }
 0x972   :  { %v10334_v2 = vpop.eup %10333  ;;  %v5250_v28 = vmul.f32 0.5, %v10332_v25 }
 0x973   :  { %v5248_v53 = vadd.f32 0.5, %v5246_v22 }
 0x974   :  { %v10336_v19 = vpop.eup %10335  ;;  %v5252_v59 = vadd.f32 0.5, %v5250_v28 }
 0x975   :  { %v5260_v15 = vmul.f32 %v10334_v2, %v5248_v53  ;;  %v5247_v34 = vmul.f32 0.5, %v10336_v19  ;;  %v10338_v57 = vpop.eup %10337  ;;  %v5316_v2 = vld [vmem:[%s18566_s4 + $0x128] sm:$0xff]  ;;  %v5318_v19 = vld [vmem:[%s18566_s4 + $0x138] sm:$0xff] }
 0x976   :  { %v5258_v39 = vmul.f32 %v5252_v59, %v16126_v58  ;;  %v5251_v14 = vmul.f32 0.5, %v10338_v57  ;;  %v10340_v61 = vpop.eup %10339  ;;  %v5315_v57 = vld [vmem:[%s18566_s4 + $0x120] sm:$0xff] }
 0x977   :  { %v5249_v40 = vadd.f32 0.5, %v5247_v34  ;;  %v10342_v36 = vpop.eup %10341  ;;  %v9443_v34 = vpack.c.bf16 %v5309_v47, %v5301_v7  ;;  %v5372_v7 = vld [vmem:[%s18566_s4 + $0x2e8] sm:$0xff]  ;;  %v5366_v47 = vld [vmem:[%s18566_s4 + $0x2b8] sm:$0xff] }
 0x978   :  { %v16948_v45 = vadd.f32 %v5260_v15, %v5258_v39  ;;  %v5253_v33 = vadd.f32 0.5, %v5251_v14  ;;  %v10344_v51 = vpop.eup %10343  ;;  %v5254_v58 = vmul.f32 0.5, %v10342_v36  ;;  %v9379_v15 = vpack.c.bf16 %v5307_v31, %v5299_v30  ;;  %v5323_v39 = vld [vmem:[%s18566_s4 + $0x160] sm:$0xff]  ;;  %v5317_v14 = vld [vmem:[%s18566_s4 + $0x130] sm:$0xff]  ;;  %v5340_v36 = vld [vmem:[%s18566_s4 + $0x1e8] sm:$0xff] }
 0x979   :  { %v5261_v5 = vmul.f32 %v10340_v61, %v5249_v40  ;;  %v10346_v41 = vpop.eup %10345  ;;  %v5216_v20 = vmul.f32 0.5, %v10344_v51  ;;  %v5325_v61 = vld [vmem:[%s18566_s4 + $0x170] sm:$0xff]  ;;  %v5334_v51 = vld [vmem:[%s18566_s4 + $0x1b8] sm:$0xff]  ;;  %v5364_v31 = vld [vmem:[%s18566_s4 + $0x2a8] sm:$0xff] }
 0x97a   :  { %10351 = vtanh.f32 %v16948_v45  ;;  %v5259_v29 = vmul.f32 %v5253_v33, %v16131_v4  ;;  %v10348_v63 = vpop.eup %10347  ;;  %v5291_v4 = vld [vmem:[%s18566_s4 + $0x60] sm:$0xff]  ;;  %v5256_v12 = vadd.f32 0.5, %v5254_v58  ;;  %v5255_v10 = vmul.f32 0.5, %v10346_v41  ;;  %v5332_v33 = vld [vmem:[%s18566_s4 + $0x1a8] sm:$0xff]  ;;  %v5342_v58 = vld [vmem:[%s18566_s4 + $0x1f8] sm:$0xff] }
 0x97b   :  { %10353 = vtanh.f32 %v16935_v35  ;;  %v10350_v1 = vpop.eup %10349  ;;  %v5218_v6 = vadd.f32 0.5, %v5216_v20  ;;  %v5217_v17 = vmul.f32 0.5, %v10348_v63  ;;  %v9375_v27 = vpack.c.bf16 %v5291_v4, %v5283_v56  ;;  %v5331_v63 = vld [vmem:[%s18566_s4 + $0x1a0] sm:$0xff] }
 0x97c   :  { %v16953_v60 = vadd.f32 %v5261_v5, %v5259_v29  ;;  %v5257_v25 = vadd.f32 0.5, %v5255_v10  ;;  %v9381_v5 = vpack.c.bf16 %v5324_v13, %v5316_v2  ;;  %v9445_v29 = vpack.c.bf16 %v5326_v55, %v5318_v19  ;;  %v5339_v56 = vld [vmem:[%s18566_s4 + $0x1e0] sm:$0xff]  ;;  %v5350_v10 = vld [vmem:[%s18566_s4 + $0x238] sm:$0xff] }
 0x97d   :  { %v16984_v16 = vmul.f32 %v10350_v1, %v5218_v6  ;;  %v5219_v28 = vadd.f32 0.5, %v5217_v17  ;;  %v9383_v41 = vpack.c.bf16 %v5323_v39, %v5315_v57  ;;  %v9447_v20 = vpack.c.bf16 %v5325_v61, %v5317_v14  ;;  %v5348_v1 = vld [vmem:[%s18566_s4 + $0x228] sm:$0xff]  ;;  %v5347_v6 = vld [vmem:[%s18566_s4 + $0x220] sm:$0xff]  ;;  %v5373_v57 = vld [vmem:[%s18566_s4 + $0x2f0] sm:$0xff] }
 0x97e   :  { %10355 = vtanh.f32 %v16953_v60  ;;  %v9385_v4 = vpack.c.bf16 %v5340_v36, %v5332_v33  ;;  %v9449_v32 = vpack.c.bf16 %v5342_v58, %v5334_v51  ;;  %v9387_v8 = vpack.c.bf16 %v5339_v56, %v5331_v63  ;;  %v5355_v17 = vld [vmem:[%s18566_s4 + $0x260] sm:$0xff]  ;;  %v5380_v39 = vld [vmem:[%s18566_s4 + $0x328] sm:$0xff]  ;;  %v5382_v61 = vld [vmem:[%s18566_s4 + $0x338] sm:$0xff] }
 0x97f   :  { %v9453_v30 = vpack.c.bf16 %v5358_v54, %v5350_v10  ;;  %v9391_v2 = vpack.c.bf16 %v5355_v17, %v5347_v6  ;;  %v5371_v13 = vld [vmem:[%s18566_s4 + $0x2e0] sm:$0xff]  ;;  %v9393_v55 = vpack.c.bf16 %v5372_v7, %v5364_v31  ;;  %v5388_v14 = vld [vmem:[%s18566_s4 + $0x368] sm:$0xff]  ;;  %v5390_v33 = vld [vmem:[%s18566_s4 + $0x378] sm:$0xff] }
 0x980   :  { %v5379_v36 = vld [vmem:[%s18566_s4 + $0x320] sm:$0xff]  ;;  %v9397_v58 = vpack.c.bf16 %v5388_v14, %v5380_v39  ;;  %v5389_v63 = vld [vmem:[%s18566_s4 + $0x370] sm:$0xff]  ;;  %v5396_v56 = vld [vmem:[%s18566_s4 + $0x3a8] sm:$0xff] }
 0x981   :  { %v5387_v51 = vld [vmem:[%s18566_s4 + $0x360] sm:$0xff]  ;;  %v5412_v6 = vld [vmem:[%s18566_s4 + $0x428] sm:$0xff]  ;;  %v5429_v39 = vld [vmem:[%s18566_s4 + $0x4b0] sm:$0xff] }
 0x982   :  { %v5403_v10 = vld [vmem:[%s18566_s4 + $0x3e0] sm:$0xff]  ;;  %v5420_v17 = vld [vmem:[%s18566_s4 + $0x468] sm:$0xff]  ;;  %v5437_v14 = vld [vmem:[%s18566_s4 + $0x4f0] sm:$0xff] }
 0x983   :  { %v9405_v31 = vpack.c.bf16 %v5420_v17, %v5412_v6  ;;  %v5461_v6 = vld [vmem:[%s18566_s4 + $0x5b0] sm:$0xff] }
 0x984   :  { %v10352_v9 = vpop.eup %10351  ;;  %v5469_v17 = vld [vmem:[%s18566_s4 + $0x5f0] sm:$0xff] }
 0x985   :  { %v5266_v26 = vmul.f32 %v10352_v9, %v5256_v12  ;;  %v10354_v22 = vpop.eup %10353  ;;  %v5356_v12 = vld [vmem:[%s18566_s4 + $0x268] sm:$0xff]  ;;  %v9451_v9 = vpack.c.bf16 %v5341_v11, %v5333_v38  ;;  %v5406_v38 = vld [vmem:[%s18566_s4 + $0x3f8] sm:$0xff]  ;;  %v9399_v11 = vpack.c.bf16 %v5387_v51, %v5379_v36  ;;  %v9475_v51 = vpack.c.bf16 %v5437_v14, %v5429_v39 }
 0x986   :  { %v17017_v40 = vmul.f32 %v10354_v22, %v5219_v28  ;;  %v5374_v22 = vld [vmem:[%s18566_s4 + $0x2f8] sm:$0xff]  ;;  %v5363_v28 = vld [vmem:[%s18566_s4 + $0x2a0] sm:$0xff] }
 0x987   :  { %5599 = vmatprep.mubr.f32.mxu0 %v5266_v26  ;;  %5676 = vmatprep.mubr.f32.mxu1 %v5266_v26  ;;  %10357 = vtanh.f32 %v5266_v26 }
 0x988   :  { %v10356_v53 = vpop.eup %10355  ;;  %5600 = vmatmul.mubr.f32.vlgmr.msra.gmra.mrb[32].mxu0 %v16984_v16  ;;  %5677 = vmatmul.mubr.f32.vlgmr.msra.gmra.mrb[32].mxu1 %v16984_v16 }
 0x989   :  { %v17009_v59 = vmul.f32 %v10356_v53, %v5257_v25  ;;  %9376 = vmatpush1.bf16.msra.mxu0 %v9375_v27  ;;  %9440 = vmatpush1.bf16.msra.mxu1 %v9439_v18  ;;  %v9389_v18 = vpack.c.bf16 %v5356_v12, %v5348_v1  ;;  %v5395_v12 = vld [vmem:[%s18566_s4 + $0x3a0] sm:$0xff] }
 0x98a   :  { %9378 = vmatprep.subr.bf16.mxu0 %v9377_v44  ;;  %9442 = vmatprep.subr.bf16.mxu1 %v9441_v3  ;;  %v5349_v44 = vld [vmem:[%s18566_s4 + $0x230] sm:$0xff] }
 0x98b   :  { %5605 = vmatprep.mubr.f32.mxu0 %v17009_v59  ;;  %5682 = vmatprep.mubr.f32.mxu1 %v17009_v59  ;;  %10359 = vtanh.f32 %v17009_v59  ;;  %v5357_v3 = vld [vmem:[%s18566_s4 + $0x270] sm:$0xff] }
 0x98c   :  { %5606 = vmatmul.mubr.f32.gmra.mrb[34].mxu0 %v17017_v40  ;;  %5683 = vmatmul.mubr.f32.gmra.mrb[34].mxu1 %v17017_v40  ;;  %v9455_v53 = vpack.c.bf16 %v5357_v3, %v5349_v44  ;;  %v5411_v44 = vld [vmem:[%s18566_s4 + $0x420] sm:$0xff] }
 0x98d   :  { %9380 = vmatpush1.bf16.msra.mxu0 %v9379_v15  ;;  %9444 = vmatpush1.bf16.msra.mxu1 %v9443_v34  ;;  %v9457_v15 = vpack.c.bf16 %v5374_v22, %v5366_v47  ;;  %v5365_v34 = vld [vmem:[%s18566_s4 + $0x2b0] sm:$0xff]  ;;  %v5419_v3 = vld [vmem:[%s18566_s4 + $0x460] sm:$0xff] }
 0x98e   :  { %5753 = vmatprep.mubr.f32.mxu0 %v5266_v26  ;;  %5830 = vmatprep.mubr.f32.mxu1 %v5266_v26  ;;  %v10479_v26 = vld [vmem:[%s18571_s6] ss:$0 sm:$0xff]  ;;  %v5413_v47 = vld [vmem:[%s18566_s4 + $0x430] sm:$0xff] }
 0x98f   :  { %9382 = vmatprep.subr.bf16.mxu0 %v9381_v5  ;;  %9446 = vmatprep.subr.bf16.mxu1 %v9445_v29  ;;  %v9395_v5 = vpack.c.bf16 %v5371_v13, %v5363_v28  ;;  %v9459_v29 = vpack.c.bf16 %v5373_v57, %v5365_v34  ;;  %v5421_v22 = vld [vmem:[%s18566_s4 + $0x470] sm:$0xff]  ;;  %v5438_v28 = vld [vmem:[%s18566_s4 + $0x4f8] sm:$0xff]  ;;  %v9407_v13 = vpack.c.bf16 %v5419_v3, %v5411_v44 }
 0x990   :  { %v9483_v3 = vpack.c.bf16 %v5469_v17, %v5461_v6  ;;  %v5531_v17 = vld [vmem:[%s18566_s4 + $0x7e0] sm:$0xff] }
 0x991   :  { %v10358_v52 = vpop.eup %10357  ;;  %9384 = vmatpush1.bf16.msra.mxu0 %v9383_v41  ;;  %9448 = vmatpush1.bf16.msra.mxu1 %v9447_v20  ;;  %v9461_v41 = vpack.c.bf16 %v5390_v33, %v5382_v61  ;;  %v5381_v20 = vld [vmem:[%s18566_s4 + $0x330] sm:$0xff]  ;;  %v5444_v61 = vld [vmem:[%s18566_s4 + $0x528] sm:$0xff] }
 0x992   :  { %9386 = vmatprep.subr.bf16.mxu0 %v9385_v4  ;;  %9450 = vmatprep.subr.bf16.mxu1 %v9449_v32  ;;  %v6973_v27 = vmul.f32 %v10479_v26, %v10358_v52  ;;  %v5404_v4 = vld [vmem:[%s18566_s4 + $0x3e8] sm:$0xff]  ;;  %v5398_v32 = vld [vmem:[%s18566_s4 + $0x3b8] sm:$0xff]  ;;  %v9463_v1 = vpack.c.bf16 %v5389_v63, %v5381_v20 }
 0x993   :  { %v9401_v54 = vpack.c.bf16 %v5404_v4, %v5396_v56  ;;  %v9465_v52 = vpack.c.bf16 %v5406_v38, %v5398_v32  ;;  %v5452_v33 = vld [vmem:[%s18566_s4 + $0x568] sm:$0xff]  ;;  %v5445_v56 = vld [vmem:[%s18566_s4 + $0x530] sm:$0xff] }
 0x994   :  { %7005 = vadd.xlane.f32.xlu0 %v6973_v27  ;;  %v5422_v27 = vld [vmem:[%s18566_s4 + $0x478] sm:$0xff]  ;;  %v9413_v20 = vpack.c.bf16 %v5452_v33, %v5444_v61  ;;  %v5453_v4 = vld [vmem:[%s18566_s4 + $0x570] sm:$0xff]  ;;  %v5460_v32 = vld [vmem:[%s18566_s4 + $0x5a8] sm:$0xff] }
 0x995   :  { %v10360_v25 = vpop.eup %10359  ;;  %9388 = vmatpush1.bf16.msra.mxu0 %v9387_v8  ;;  %9452 = vmatpush1.bf16.msra.mxu1 %v9451_v9  ;;  %v5397_v8 = vld [vmem:[%s18566_s4 + $0x3b0] sm:$0xff]  ;;  %v5468_v38 = vld [vmem:[%s18566_s4 + $0x5e8] sm:$0xff] }
 0x996   :  { %9390 = vmatprep.subr.bf16.mxu0 %v9389_v18  ;;  %9454 = vmatprep.subr.bf16.mxu1 %v9453_v30  ;;  %v6974_v19 = vmul.f32 %v10479_v26, %v10360_v25  ;;  %v5405_v9 = vld [vmem:[%s18566_s4 + $0x3f0] sm:$0xff]  ;;  %v5414_v26 = vld [vmem:[%s18566_s4 + $0x438] sm:$0xff]  ;;  %v9403_v18 = vpack.c.bf16 %v5403_v10, %v5395_v12  ;;  %v5428_v25 = vld [vmem:[%s18566_s4 + $0x4a8] sm:$0xff]  ;;  %v9479_v10 = vpack.c.bf16 %v5453_v4, %v5445_v56 }
 0x997   :  { %v9467_v30 = vpack.c.bf16 %v5405_v9, %v5397_v8  ;;  %v9469_v7 = vpack.c.bf16 %v5422_v27, %v5414_v26  ;;  %v9417_v8 = vpack.c.bf16 %v5468_v38, %v5460_v32  ;;  %v5476_v26 = vld [vmem:[%s18566_s4 + $0x628] sm:$0xff]  ;;  %v5493_v61 = vld [vmem:[%s18566_s4 + $0x6b0] sm:$0xff] }
 0x998   :  { %7007 = vadd.xlane.f32.xlu1 %v6974_v19  ;;  %v9471_v19 = vpack.c.bf16 %v5421_v22, %v5413_v47  ;;  %v5484_v27 = vld [vmem:[%s18566_s4 + $0x668] sm:$0xff]  ;;  %v5501_v33 = vld [vmem:[%s18566_s4 + $0x6f0] sm:$0xff] }
 0x999   :  { %9392 = vmatpush1.bf16.msra.mxu0 %v9391_v2  ;;  %9456 = vmatpush1.bf16.msra.mxu1 %v9455_v53  ;;  %v5436_v2 = vld [vmem:[%s18566_s4 + $0x4e8] sm:$0xff]  ;;  %v5430_v53 = vld [vmem:[%s18566_s4 + $0x4b8] sm:$0xff]  ;;  %v9421_v47 = vpack.c.bf16 %v5484_v27, %v5476_v26  ;;  %v5509_v32 = vld [vmem:[%s18566_s4 + $0x730] sm:$0xff] }
 0x99a   :  { %9394 = vmatprep.subr.bf16.mxu0 %v9393_v55  ;;  %9458 = vmatprep.subr.bf16.mxu1 %v9457_v15  ;;  %v5427_v55 = vld [vmem:[%s18566_s4 + $0x4a0] sm:$0xff]  ;;  %v9409_v34 = vpack.c.bf16 %v5436_v2, %v5428_v25  ;;  %v9473_v57 = vpack.c.bf16 %v5438_v28, %v5430_v53  ;;  %v5477_v25 = vld [vmem:[%s18566_s4 + $0x630] sm:$0xff]  ;;  %v5492_v53 = vld [vmem:[%s18566_s4 + $0x6a8] sm:$0xff] }
 0x99b   :  { %v5435_v15 = vld [vmem:[%s18566_s4 + $0x4e0] sm:$0xff]  ;;  %v5485_v2 = vld [vmem:[%s18566_s4 + $0x670] sm:$0xff]  ;;  %v5500_v28 = vld [vmem:[%s18566_s4 + $0x6e8] sm:$0xff] }
 0x99c   :  { %v9411_v36 = vpack.c.bf16 %v5435_v15, %v5427_v55  ;;  %v9487_v15 = vpack.c.bf16 %v5485_v2, %v5477_v25  ;;  %v9425_v39 = vpack.c.bf16 %v5500_v28, %v5492_v53  ;;  %v5517_v38 = vld [vmem:[%s18566_s4 + $0x770] sm:$0xff]  ;;  %v5956_v28 = vld [vmem:[%s18566_s4 + $0x88] sm:$0xff] }
 0x99d   :  { %9396 = vmatpush1.bf16.msra.mxu0 %v9395_v5  ;;  %9460 = vmatpush1.bf16.msra.mxu1 %v9459_v29  ;;  %v5446_v5 = vld [vmem:[%s18566_s4 + $0x538] sm:$0xff]  ;;  %v5525_v26 = vld [vmem:[%s18566_s4 + $0x7b0] sm:$0xff] }
 0x99e   :  { %9398 = vmatprep.subr.bf16.mxu0 %v9397_v58  ;;  %9462 = vmatprep.subr.bf16.mxu1 %v9461_v41  ;;  %v5454_v29 = vld [vmem:[%s18566_s4 + $0x578] sm:$0xff]  ;;  %v5443_v58 = vld [vmem:[%s18566_s4 + $0x520] sm:$0xff]  ;;  %v5533_v27 = vld [vmem:[%s18566_s4 + $0x7f0] sm:$0xff] }
 0x99f   :  { %v5451_v41 = vld [vmem:[%s18566_s4 + $0x560] sm:$0xff]  ;;  %v9477_v63 = vpack.c.bf16 %v5454_v29, %v5446_v5  ;;  %v5508_v5 = vld [vmem:[%s18566_s4 + $0x728] sm:$0xff]  ;;  %v5941_v25 = vld [vmem:[%s18566_s4 + $0x10] sm:$0xff] }
 0x9a0   :  { %v9415_v12 = vpack.c.bf16 %v5451_v41, %v5443_v58  ;;  %v5516_v29 = vld [vmem:[%s18566_s4 + $0x768] sm:$0xff]  ;;  %v9491_v41 = vpack.c.bf16 %v5501_v33, %v5493_v61  ;;  %v5949_v2 = vld [vmem:[%s18566_s4 + $0x50] sm:$0xff] }
 0x9a1   :  { %9400 = vmatpush1.bf16.msra.mxu0 %v9399_v11  ;;  %9464 = vmatpush1.bf16.msra.mxu1 %v9463_v1  ;;  %v5462_v11 = vld [vmem:[%s18566_s4 + $0x5b8] sm:$0xff]  ;;  %v9429_v56 = vpack.c.bf16 %v5516_v29, %v5508_v5  ;;  %v9567_v53 = vpack.c.bf16 %v5949_v2, %v5941_v25  ;;  %v5957_v61 = vld [vmem:[%s18566_s4 + $0x90] sm:$0xff]  ;;  %v5972_v5 = vld [vmem:[%s18566_s4 + $0x108] sm:$0xff] }
 0x9a2   :  { %9402 = vmatprep.subr.bf16.mxu0 %v9401_v54  ;;  %9466 = vmatprep.subr.bf16.mxu1 %v9465_v52  ;;  %v5470_v1 = vld [vmem:[%s18566_s4 + $0x5f8] sm:$0xff]  ;;  %v5459_v54 = vld [vmem:[%s18566_s4 + $0x5a0] sm:$0xff]  ;;  %v5965_v33 = vld [vmem:[%s18566_s4 + $0xd0] sm:$0xff] }
 0x9a3   :  { %v5467_v52 = vld [vmem:[%s18566_s4 + $0x5e0] sm:$0xff]  ;;  %v9481_v9 = vpack.c.bf16 %v5470_v1, %v5462_v11  ;;  %v5524_v11 = vld [vmem:[%s18566_s4 + $0x7a8] sm:$0xff]  ;;  %v9571_v29 = vpack.c.bf16 %v5965_v33, %v5957_v61 }
 0x9a4   :  { %v9419_v44 = vpack.c.bf16 %v5467_v52, %v5459_v54  ;;  %v5532_v1 = vld [vmem:[%s18566_s4 + $0x7e8] sm:$0xff]  ;;  %v9495_v52 = vpack.c.bf16 %v5517_v38, %v5509_v32  ;;  %v5981_v38 = vld [vmem:[%s18566_s4 + $0x150] sm:$0xff] }
 0x9a5   :  { %9404 = vmatpush1.bf16.msra.mxu0 %v9403_v18  ;;  %9468 = vmatpush1.bf16.msra.mxu1 %v9467_v30  ;;  %v5478_v18 = vld [vmem:[%s18566_s4 + $0x638] sm:$0xff]  ;;  %v6020_v25 = vld [vmem:[%s18566_s4 + $0x288] sm:$0xff] }
 0x9a6   :  { %9406 = vmatprep.subr.bf16.mxu0 %v9405_v31  ;;  %9470 = vmatprep.subr.bf16.mxu1 %v9469_v7  ;;  %v5486_v30 = vld [vmem:[%s18566_s4 + $0x678] sm:$0xff]  ;;  %v5475_v31 = vld [vmem:[%s18566_s4 + $0x620] sm:$0xff]  ;;  %v6028_v2 = vld [vmem:[%s18566_s4 + $0x2c8] sm:$0xff] }
 0x9a7   :  { %v5483_v7 = vld [vmem:[%s18566_s4 + $0x660] sm:$0xff]  ;;  %v9485_v22 = vpack.c.bf16 %v5486_v30, %v5478_v18  ;;  %v9499_v30 = vpack.c.bf16 %v5533_v27, %v5525_v26  ;;  %v5997_v26 = vld [vmem:[%s18566_s4 + $0x1d0] sm:$0xff]  ;;  %v6036_v61 = vld [vmem:[%s18566_s4 + $0x308] sm:$0xff] }
 0x9a8   :  { %v9423_v55 = vpack.c.bf16 %v5483_v7, %v5475_v31  ;;  %v5947_v7 = vld [vmem:[%s18566_s4 + $0x40] sm:$0xff]  ;;  %v6044_v33 = vld [vmem:[%s18566_s4 + $0x348] sm:$0xff] }
 0x9a9   :  { %9408 = vmatpush1.bf16.msra.mxu0 %v9407_v13  ;;  %9472 = vmatpush1.bf16.msra.mxu1 %v9471_v19  ;;  %v5494_v13 = vld [vmem:[%s18566_s4 + $0x6b8] sm:$0xff] }
 0x9aa   :  { %9410 = vmatprep.subr.bf16.mxu0 %v9409_v34  ;;  %9474 = vmatprep.subr.bf16.mxu1 %v9473_v57  ;;  %v5502_v19 = vld [vmem:[%s18566_s4 + $0x6f8] sm:$0xff]  ;;  %v5491_v34 = vld [vmem:[%s18566_s4 + $0x6a0] sm:$0xff] }
 0x9ab   :  { %v5499_v57 = vld [vmem:[%s18566_s4 + $0x6e0] sm:$0xff]  ;;  %v9489_v14 = vpack.c.bf16 %v5502_v19, %v5494_v13  ;;  %v5964_v13 = vld [vmem:[%s18566_s4 + $0xc8] sm:$0xff]  ;;  %v5958_v19 = vld [vmem:[%s18566_s4 + $0x98] sm:$0xff] }
 0x9ac   :  { %v9427_v58 = vpack.c.bf16 %v5499_v57, %v5491_v34  ;;  %v5955_v34 = vld [vmem:[%s18566_s4 + $0x80] sm:$0xff] }
 0x9ad   :  { %9412 = vmatpush1.bf16.msra.mxu0 %v9411_v36  ;;  %9476 = vmatpush1.bf16.msra.mxu1 %v9475_v51  ;;  %v5510_v36 = vld [vmem:[%s18566_s4 + $0x738] sm:$0xff]  ;;  %v5963_v57 = vld [vmem:[%s18566_s4 + $0xc0] sm:$0xff] }
 0x9ae   :  { %9414 = vmatprep.subr.bf16.mxu0 %v9413_v20  ;;  %9478 = vmatprep.subr.bf16.mxu1 %v9477_v63  ;;  %v5518_v51 = vld [vmem:[%s18566_s4 + $0x778] sm:$0xff]  ;;  %v5507_v20 = vld [vmem:[%s18566_s4 + $0x720] sm:$0xff] }
 0x9af   :  { %v5515_v63 = vld [vmem:[%s18566_s4 + $0x760] sm:$0xff]  ;;  %v9493_v4 = vpack.c.bf16 %v5518_v51, %v5510_v36  ;;  %v5980_v36 = vld [vmem:[%s18566_s4 + $0x148] sm:$0xff]  ;;  %v5974_v51 = vld [vmem:[%s18566_s4 + $0x118] sm:$0xff] }
 0x9b0   :  { %v9431_v54 = vpack.c.bf16 %v5515_v63, %v5507_v20  ;;  %v5971_v63 = vld [vmem:[%s18566_s4 + $0x100] sm:$0xff] }
 0x9b1   :  { %9416 = vmatpush1.bf16.msra.mxu0 %v9415_v12  ;;  %9480 = vmatpush1.bf16.msra.mxu1 %v9479_v10  ;;  %v5526_v12 = vld [vmem:[%s18566_s4 + $0x7b8] sm:$0xff] }
 0x9b2   :  { %9418 = vmatprep.subr.bf16.mxu0 %v9417_v8  ;;  %9482 = vmatprep.subr.bf16.mxu1 %v9481_v9  ;;  %v5534_v10 = vld [vmem:[%s18566_s4 + $0x7f8] sm:$0xff]  ;;  %v5523_v8 = vld [vmem:[%s18566_s4 + $0x7a0] sm:$0xff]  ;;  %v9433_v9 = vpack.c.bf16 %v5532_v1, %v5524_v11  ;;  %v5988_v11 = vld [vmem:[%s18566_s4 + $0x188] sm:$0xff] }
 0x9b3   :  { %v9497_v6 = vpack.c.bf16 %v5534_v10, %v5526_v12  ;;  %v9435_v18 = vpack.c.bf16 %v5531_v17, %v5523_v8  ;;  %v5996_v1 = vld [vmem:[%s18566_s4 + $0x1c8] sm:$0xff]  ;;  %v5987_v8 = vld [vmem:[%s18566_s4 + $0x180] sm:$0xff]  ;;  %v5989_v17 = vld [vmem:[%s18566_s4 + $0x190] sm:$0xff] }
 0x9b4   :  { %v9513_v10 = vpack.c.bf16 %v5996_v1, %v5988_v11  ;;  %v6052_v11 = vld [vmem:[%s18566_s4 + $0x388] sm:$0xff] }
 0x9b5   :  { %9420 = vmatpush1.bf16.msra.mxu0 %v9419_v44  ;;  %9484 = vmatpush1.bf16.msra.mxu1 %v9483_v3  ;;  %v5940_v44 = vld [vmem:[%s18566_s4 + $0x8] sm:$0xff] }
 0x9b6   :  { %9422 = vmatprep.subr.bf16.mxu0 %v9421_v47  ;;  %9486 = vmatprep.subr.bf16.mxu1 %v9485_v22  ;;  %v5948_v3 = vld [vmem:[%s18566_s4 + $0x48] sm:$0xff] }
 0x9b7   :  { %v9501_v31 = vpack.c.bf16 %v5948_v3, %v5940_v44  ;;  %v6006_v44 = vld [vmem:[%s18566_s4 + $0x218] sm:$0xff]  ;;  %v9579_v3 = vpack.c.bf16 %v5997_v26, %v5989_v17  ;;  %v6060_v1 = vld [vmem:[%s18566_s4 + $0x3c8] sm:$0xff]  ;;  %v6061_v26 = vld [vmem:[%s18566_s4 + $0x3d0] sm:$0xff] }
 0x9b9   :  { %9424 = vmatpush1.bf16.msra.mxu0 %v9423_v55  ;;  %9488 = vmatpush1.bf16.msra.mxu1 %v9487_v15  ;;  %v9505_v55 = vpack.c.bf16 %v5964_v13, %v5956_v28  ;;  %v5966_v15 = vld [vmem:[%s18566_s4 + $0xd8] sm:$0xff] }
 0x9ba   :  { %9426 = vmatprep.subr.bf16.mxu0 %v9425_v39  ;;  %9490 = vmatprep.subr.bf16.mxu1 %v9489_v14  ;;  %v9569_v39 = vpack.c.bf16 %v5966_v15, %v5958_v19  ;;  %v9507_v14 = vpack.c.bf16 %v5963_v57, %v5955_v34  ;;  %v6030_v28 = vld [vmem:[%s18566_s4 + $0x2d8] sm:$0xff]  ;;  %v6019_v15 = vld [vmem:[%s18566_s4 + $0x280] sm:$0xff]  ;;  %v6021_v57 = vld [vmem:[%s18566_s4 + $0x290] sm:$0xff] }
 0x9bb   :  { %v6027_v34 = vld [vmem:[%s18566_s4 + $0x2c0] sm:$0xff] }
 0x9bd   :  { %9428 = vmatpush1.bf16.msra.mxu0 %v9427_v58  ;;  %9492 = vmatpush1.bf16.msra.mxu1 %v9491_v41  ;;  %v5982_v58 = vld [vmem:[%s18566_s4 + $0x158] sm:$0xff]  ;;  %v9509_v41 = vpack.c.bf16 %v5980_v36, %v5972_v5  ;;  %v9523_v36 = vpack.c.bf16 %v6027_v34, %v6019_v15  ;;  %v6091_v15 = vld [vmem:[%s18566_s4 + $0x4c0] sm:$0xff] }
 0x9be   :  { %9430 = vmatprep.subr.bf16.mxu0 %v9429_v56  ;;  %9494 = vmatprep.subr.bf16.mxu1 %v9493_v4  ;;  %v9573_v20 = vpack.c.bf16 %v5982_v58, %v5974_v51  ;;  %v5979_v56 = vld [vmem:[%s18566_s4 + $0x140] sm:$0xff]  ;;  %v5973_v4 = vld [vmem:[%s18566_s4 + $0x110] sm:$0xff]  ;;  %v6038_v5 = vld [vmem:[%s18566_s4 + $0x318] sm:$0xff]  ;;  %v9525_v58 = vpack.c.bf16 %v6044_v33, %v6036_v61 }
 0x9bf   :  { %v9511_v32 = vpack.c.bf16 %v5979_v56, %v5971_v63  ;;  %v9575_v12 = vpack.c.bf16 %v5981_v38, %v5973_v4  ;;  %v6037_v56 = vld [vmem:[%s18566_s4 + $0x310] sm:$0xff]  ;;  %v6100_v33 = vld [vmem:[%s18566_s4 + $0x508] sm:$0xff] }
 0x9c0   :  { %v6045_v4 = vld [vmem:[%s18566_s4 + $0x350] sm:$0xff] }
 0x9c1   :  { %9432 = vmatpush1.bf16.msra.mxu0 %v9431_v54  ;;  %9496 = vmatpush1.bf16.msra.mxu1 %v9495_v52  ;;  %v5990_v54 = vld [vmem:[%s18566_s4 + $0x198] sm:$0xff]  ;;  %v9591_v38 = vpack.c.bf16 %v6045_v4, %v6037_v56  ;;  %v6101_v56 = vld [vmem:[%s18566_s4 + $0x510] sm:$0xff] }
 0x9c2   :  { %9434 = vmatprep.subr.bf16.mxu0 %v9433_v9  ;;  %9498 = vmatprep.subr.bf16.mxu1 %v9497_v6  ;;  %v5998_v52 = vld [vmem:[%s18566_s4 + $0x1d8] sm:$0xff]  ;;  %v5995_v6 = vld [vmem:[%s18566_s4 + $0x1c0] sm:$0xff]  ;;  %v6109_v4 = vld [vmem:[%s18566_s4 + $0x550] sm:$0xff] }
 0x9c3   :  { %v9577_v9 = vpack.c.bf16 %v5998_v52, %v5990_v54  ;;  %v9515_v27 = vpack.c.bf16 %v5995_v6, %v5987_v8  ;;  %v6062_v54 = vld [vmem:[%s18566_s4 + $0x3d8] sm:$0xff]  ;;  %v6051_v8 = vld [vmem:[%s18566_s4 + $0x380] sm:$0xff]  ;;  %v6053_v6 = vld [vmem:[%s18566_s4 + $0x390] sm:$0xff] }
 0x9c5   :  { %9436 = vmatpush1.bf16.msra.mxu0 %v9435_v18  ;;  %9500 = vmatpush1.bf16.msra.mxu1 %v9499_v30  ;;  %v6004_v18 = vld [vmem:[%s18566_s4 + $0x208] sm:$0xff] }
 0x9c6   :  { %9502 = vmatprep.subr.bf16.mxu0 %v9501_v31  ;;  %v6012_v30 = vld [vmem:[%s18566_s4 + $0x248] sm:$0xff]  ;;  %v6014_v31 = vld [vmem:[%s18566_s4 + $0x258] sm:$0xff] }
 0x9c8   :  { %5754 = vmatmul.mubr.f32.vlgmr.msra.gmra.mrb[68].mxu0 %v16984_v16  ;;  %5831 = vmatmul.mubr.f32.vlgmr.msra.gmra.mrb[68].mxu1 %v16984_v16  ;;  %v5942_v16 = vld [vmem:[%s18566_s4 + $0x18] sm:$0xff] }
 0x9c9   :  { %5759 = vmatprep.mubr.f32.mxu0 %v17009_v59  ;;  %5836 = vmatprep.mubr.f32.mxu1 %v17009_v59  ;;  %v5950_v59 = vld [vmem:[%s18566_s4 + $0x58] sm:$0xff] }
 0x9ca   :  { %v9565_v47 = vpack.c.bf16 %v5950_v59, %v5942_v16  ;;  %v9517_v16 = vpack.c.bf16 %v6012_v30, %v6004_v18  ;;  %v6003_v59 = vld [vmem:[%s18566_s4 + $0x200] sm:$0xff]  ;;  %v6068_v18 = vld [vmem:[%s18566_s4 + $0x408] sm:$0xff] }
 0x9cb   :  { %v6076_v30 = vld [vmem:[%s18566_s4 + $0x448] sm:$0xff] }
 0x9cc   :  { %5760 = vmatmul.mubr.f32.gmra.mrb[70].mxu0 %v17017_v40  ;;  %5837 = vmatmul.mubr.f32.gmra.mrb[70].mxu1 %v17017_v40  ;;  %v5939_v40 = vld [vmem:[%s18566_s4] sm:$0xff] }
 0x9cd   :  { %v9503_v22 = vpack.c.bf16 %v5947_v7, %v5939_v40  ;;  %9566 = vmatprep.subr.bf16.mxu1 %v9565_v47  ;;  %v6011_v40 = vld [vmem:[%s18566_s4 + $0x240] sm:$0xff]  ;;  %v9581_v7 = vpack.c.bf16 %v6014_v31, %v6006_v44  ;;  %v6005_v47 = vld [vmem:[%s18566_s4 + $0x210] sm:$0xff]  ;;  %v6070_v44 = vld [vmem:[%s18566_s4 + $0x418] sm:$0xff] }
 0x9ce   :  { %9568 = vmatpush1.bf16.msra.mxu1 %v9567_v53  ;;  %v6022_v53 = vld [vmem:[%s18566_s4 + $0x298] sm:$0xff]  ;;  %v9519_v13 = vpack.c.bf16 %v6011_v40, %v6003_v59  ;;  %v6067_v31 = vld [vmem:[%s18566_s4 + $0x400] sm:$0xff] }
 0x9cf   :  { %9504 = vmatpush1.bf16.msra.mxu0 %v9503_v22  ;;  %9570 = vmatprep.subr.bf16.mxu1 %v9569_v39  ;;  %v6013_v22 = vld [vmem:[%s18566_s4 + $0x250] sm:$0xff]  ;;  %v9585_v39 = vpack.c.bf16 %v6030_v28, %v6022_v53  ;;  %v6075_v59 = vld [vmem:[%s18566_s4 + $0x440] sm:$0xff]  ;;  %v6092_v53 = vld [vmem:[%s18566_s4 + $0x4c8] sm:$0xff] }
 0x9d0   :  { %9506 = vmatprep.subr.bf16.mxu0 %v9505_v55  ;;  %v9583_v19 = vpack.c.bf16 %v6013_v22, %v6005_v47  ;;  %v9521_v55 = vpack.c.bf16 %v6028_v2, %v6020_v25  ;;  %v6069_v47 = vld [vmem:[%s18566_s4 + $0x410] sm:$0xff]  ;;  %v6084_v2 = vld [vmem:[%s18566_s4 + $0x488] sm:$0xff]  ;;  %v6086_v28 = vld [vmem:[%s18566_s4 + $0x498] sm:$0xff] }
 0x9d1   :  { %v6077_v22 = vld [vmem:[%s18566_s4 + $0x450] sm:$0xff] }
 0x9d2   :  { %9572 = vmatpush1.bf16.msra.mxu1 %v9571_v29  ;;  %v6046_v29 = vld [vmem:[%s18566_s4 + $0x358] sm:$0xff]  ;;  %v9599_v25 = vpack.c.bf16 %v6077_v22, %v6069_v47  ;;  %v6141_v47 = vld [vmem:[%s18566_s4 + $0x650] sm:$0xff] }
 0x9d3   :  { %9508 = vmatpush1.bf16.msra.mxu0 %v9507_v14  ;;  %9574 = vmatprep.subr.bf16.mxu1 %v9573_v20  ;;  %v6029_v14 = vld [vmem:[%s18566_s4 + $0x2d0] sm:$0xff]  ;;  %v6043_v20 = vld [vmem:[%s18566_s4 + $0x340] sm:$0xff]  ;;  %v9589_v63 = vpack.c.bf16 %v6046_v29, %v6038_v5  ;;  %v6108_v5 = vld [vmem:[%s18566_s4 + $0x548] sm:$0xff] }
 0x9d4   :  { %9510 = vmatprep.subr.bf16.mxu0 %v9509_v41  ;;  %v9587_v51 = vpack.c.bf16 %v6029_v14, %v6021_v57  ;;  %v6035_v41 = vld [vmem:[%s18566_s4 + $0x300] sm:$0xff]  ;;  %v6093_v14 = vld [vmem:[%s18566_s4 + $0x4d0] sm:$0xff]  ;;  %v6102_v29 = vld [vmem:[%s18566_s4 + $0x518] sm:$0xff] }
 0x9d6   :  { %9576 = vmatpush1.bf16.msra.mxu1 %v9575_v12  ;;  %v6054_v12 = vld [vmem:[%s18566_s4 + $0x398] sm:$0xff] }
 0x9d7   :  { %9512 = vmatpush1.bf16.msra.mxu0 %v9511_v32  ;;  %9578 = vmatprep.subr.bf16.mxu1 %v9577_v9  ;;  %v9527_v32 = vpack.c.bf16 %v6043_v20, %v6035_v41  ;;  %v9593_v52 = vpack.c.bf16 %v6062_v54, %v6054_v12  ;;  %v6059_v9 = vld [vmem:[%s18566_s4 + $0x3c0] sm:$0xff] }
 0x9d8   :  { %9514 = vmatprep.subr.bf16.mxu0 %v9513_v10  ;;  %v9529_v10 = vpack.c.bf16 %v6060_v1, %v6052_v11  ;;  %v9531_v17 = vpack.c.bf16 %v6059_v9, %v6051_v8  ;;  %v6107_v41 = vld [vmem:[%s18566_s4 + $0x540] sm:$0xff]  ;;  %v6124_v11 = vld [vmem:[%s18566_s4 + $0x5c8] sm:$0xff]  ;;  %v6118_v1 = vld [vmem:[%s18566_s4 + $0x598] sm:$0xff] }
 0x9d9   :  { %v6115_v54 = vld [vmem:[%s18566_s4 + $0x580] sm:$0xff] }
 0x9da   :  { %9580 = vmatpush1.bf16.msra.mxu1 %v9579_v3  ;;  %v9533_v3 = vpack.c.bf16 %v6076_v30, %v6068_v18  ;;  %v6140_v18 = vld [vmem:[%s18566_s4 + $0x648] sm:$0xff]  ;;  %v6134_v30 = vld [vmem:[%s18566_s4 + $0x618] sm:$0xff] }
 0x9db   :  { %9516 = vmatpush1.bf16.msra.mxu0 %v9515_v27  ;;  %9582 = vmatprep.subr.bf16.mxu1 %v9581_v7  ;;  %v9595_v27 = vpack.c.bf16 %v6061_v26, %v6053_v6  ;;  %v9535_v7 = vpack.c.bf16 %v6075_v59, %v6067_v31  ;;  %v6117_v6 = vld [vmem:[%s18566_s4 + $0x590] sm:$0xff]  ;;  %v6139_v31 = vld [vmem:[%s18566_s4 + $0x640] sm:$0xff] }
 0x9dc   :  { %9518 = vmatprep.subr.bf16.mxu0 %v9517_v16  ;;  %v6078_v16 = vld [vmem:[%s18566_s4 + $0x458] sm:$0xff] }
 0x9dd   :  { %v9597_v40 = vpack.c.bf16 %v6078_v16, %v6070_v44  ;;  %v6131_v16 = vld [vmem:[%s18566_s4 + $0x600] sm:$0xff] }
 0x9de   :  { %9584 = vmatpush1.bf16.msra.mxu1 %v9583_v19  ;;  %v6094_v19 = vld [vmem:[%s18566_s4 + $0x4d8] sm:$0xff] }
 0x9df   :  { %9520 = vmatpush1.bf16.msra.mxu0 %v9519_v13  ;;  %9586 = vmatprep.subr.bf16.mxu1 %v9585_v39  ;;  %v9537_v13 = vpack.c.bf16 %v6092_v53, %v6084_v2  ;;  %v9601_v34 = vpack.c.bf16 %v6094_v19, %v6086_v28  ;;  %v6085_v39 = vld [vmem:[%s18566_s4 + $0x490] sm:$0xff]  ;;  %v6156_v2 = vld [vmem:[%s18566_s4 + $0x6c8] sm:$0xff]  ;;  %v6150_v53 = vld [vmem:[%s18566_s4 + $0x698] sm:$0xff] }
 0x9e0   :  { %9522 = vmatprep.subr.bf16.mxu0 %v9521_v55  ;;  %v6083_v55 = vld [vmem:[%s18566_s4 + $0x480] sm:$0xff]  ;;  %v9603_v61 = vpack.c.bf16 %v6093_v14, %v6085_v39  ;;  %v6157_v39 = vld [vmem:[%s18566_s4 + $0x6d0] sm:$0xff] }
 0x9e1   :  { %v9539_v57 = vpack.c.bf16 %v6091_v15, %v6083_v55  ;;  %v6147_v19 = vld [vmem:[%s18566_s4 + $0x680] sm:$0xff] }
 0x9e2   :  { %9588 = vmatpush1.bf16.msra.mxu1 %v9587_v51  ;;  %v6110_v51 = vld [vmem:[%s18566_s4 + $0x558] sm:$0xff]  ;;  %v6155_v55 = vld [vmem:[%s18566_s4 + $0x6c0] sm:$0xff] }
 0x9e3   :  { %9524 = vmatpush1.bf16.msra.mxu0 %v9523_v36  ;;  %9590 = vmatprep.subr.bf16.mxu1 %v9589_v63  ;;  %v9541_v36 = vpack.c.bf16 %v6108_v5, %v6100_v33  ;;  %v9605_v20 = vpack.c.bf16 %v6110_v51, %v6102_v29  ;;  %v6172_v33 = vld [vmem:[%s18566_s4 + $0x748] sm:$0xff]  ;;  %v6166_v5 = vld [vmem:[%s18566_s4 + $0x718] sm:$0xff]  ;;  %v6163_v51 = vld [vmem:[%s18566_s4 + $0x700] sm:$0xff] }
 0x9e4   :  { %9526 = vmatprep.subr.bf16.mxu0 %v9525_v58  ;;  %v6099_v58 = vld [vmem:[%s18566_s4 + $0x500] sm:$0xff] }
 0x9e5   :  { %v9543_v63 = vpack.c.bf16 %v6107_v41, %v6099_v58  ;;  %v6171_v58 = vld [vmem:[%s18566_s4 + $0x740] sm:$0xff] }
 0x9e6   :  { %9592 = vmatpush1.bf16.msra.mxu1 %v9591_v38  ;;  %v6116_v38 = vld [vmem:[%s18566_s4 + $0x588] sm:$0xff] }
 0x9e7   :  { %9528 = vmatpush1.bf16.msra.mxu0 %v9527_v32  ;;  %9594 = vmatprep.subr.bf16.mxu1 %v9593_v52  ;;  %v9607_v32 = vpack.c.bf16 %v6109_v4, %v6101_v56  ;;  %v9545_v12 = vpack.c.bf16 %v6124_v11, %v6116_v38  ;;  %v6123_v52 = vld [vmem:[%s18566_s4 + $0x5c0] sm:$0xff]  ;;  %v6173_v56 = vld [vmem:[%s18566_s4 + $0x750] sm:$0xff]  ;;  %v6188_v38 = vld [vmem:[%s18566_s4 + $0x7c8] sm:$0xff] }
 0x9e8   :  { %9530 = vmatprep.subr.bf16.mxu0 %v9529_v10  ;;  %v6126_v10 = vld [vmem:[%s18566_s4 + $0x5d8] sm:$0xff]  ;;  %v9547_v9 = vpack.c.bf16 %v6123_v52, %v6115_v54  ;;  %v6187_v54 = vld [vmem:[%s18566_s4 + $0x7c0] sm:$0xff] }
 0x9e9   :  { %v9609_v8 = vpack.c.bf16 %v6126_v10, %v6118_v1  ;;  %v6182_v11 = vld [vmem:[%s18566_s4 + $0x798] sm:$0xff]  ;;  %v6179_v10 = vld [vmem:[%s18566_s4 + $0x780] sm:$0xff] }
 0x9ea   :  { %9596 = vmatpush1.bf16.msra.mxu1 %v9595_v27  ;;  %v6132_v27 = vld [vmem:[%s18566_s4 + $0x608] sm:$0xff] }
 0x9eb   :  { %9532 = vmatpush1.bf16.msra.mxu0 %v9531_v17  ;;  %9598 = vmatprep.subr.bf16.mxu1 %v9597_v40  ;;  %v6125_v17 = vld [vmem:[%s18566_s4 + $0x5d0] sm:$0xff]  ;;  %v9549_v44 = vpack.c.bf16 %v6140_v18, %v6132_v27  ;;  %v9551_v40 = vpack.c.bf16 %v6139_v31, %v6131_v16  ;;  %v5952_v27 = vld [vmem:[%s18566_s4 + $0x68] sm:$0xff]  ;;  %v5946_v18 = vld [vmem:[%s18566_s4 + $0x38] sm:$0xff] }
 0x9ec   :  { %9534 = vmatprep.subr.bf16.mxu0 %v9533_v3  ;;  %v9611_v26 = vpack.c.bf16 %v6125_v17, %v6117_v6  ;;  %v6142_v3 = vld [vmem:[%s18566_s4 + $0x658] sm:$0xff]  ;;  %v6189_v6 = vld [vmem:[%s18566_s4 + $0x7d0] sm:$0xff] }
 0x9ed   :  { %v9613_v59 = vpack.c.bf16 %v6142_v3, %v6134_v30 }
 0x9ee   :  { %9600 = vmatpush1.bf16.msra.mxu1 %v9599_v25  ;;  %v6148_v25 = vld [vmem:[%s18566_s4 + $0x688] sm:$0xff] }
 0x9ef   :  { %9536 = vmatpush1.bf16.msra.mxu0 %v9535_v7  ;;  %9602 = vmatprep.subr.bf16.mxu1 %v9601_v34  ;;  %v6133_v7 = vld [vmem:[%s18566_s4 + $0x610] sm:$0xff]  ;;  %v9553_v28 = vpack.c.bf16 %v6156_v2, %v6148_v25  ;;  %v9555_v34 = vpack.c.bf16 %v6155_v55, %v6147_v19 }
 0x9f0   :  { %9538 = vmatprep.subr.bf16.mxu0 %v9537_v13  ;;  %v9615_v22 = vpack.c.bf16 %v6141_v47, %v6133_v7  ;;  %v6158_v13 = vld [vmem:[%s18566_s4 + $0x6d8] sm:$0xff] }
 0x9f1   :  { %v9617_v15 = vpack.c.bf16 %v6158_v13, %v6150_v53 }
 0x9f2   :  { %9604 = vmatpush1.bf16.msra.mxu1 %v9603_v61  ;;  %v6164_v61 = vld [vmem:[%s18566_s4 + $0x708] sm:$0xff] }
 0x9f3   :  { %9540 = vmatpush1.bf16.msra.mxu0 %v9539_v57  ;;  %9606 = vmatprep.subr.bf16.mxu1 %v9605_v20  ;;  %v6149_v57 = vld [vmem:[%s18566_s4 + $0x690] sm:$0xff]  ;;  %v9557_v29 = vpack.c.bf16 %v6172_v33, %v6164_v61  ;;  %v9559_v20 = vpack.c.bf16 %v6171_v58, %v6163_v51 }
 0x9f4   :  { %9542 = vmatprep.subr.bf16.mxu0 %v9541_v36  ;;  %v9619_v14 = vpack.c.bf16 %v6157_v39, %v6149_v57  ;;  %v6174_v36 = vld [vmem:[%s18566_s4 + $0x758] sm:$0xff] }
 0x9f5   :  { %v9621_v41 = vpack.c.bf16 %v6174_v36, %v6166_v5 }
 0x9f6   :  { %9608 = vmatpush1.bf16.msra.mxu1 %v9607_v32  ;;  %v6180_v32 = vld [vmem:[%s18566_s4 + $0x788] sm:$0xff] }
 0x9f7   :  { %9544 = vmatpush1.bf16.msra.mxu0 %v9543_v63  ;;  %9610 = vmatprep.subr.bf16.mxu1 %v9609_v8  ;;  %v6165_v63 = vld [vmem:[%s18566_s4 + $0x710] sm:$0xff]  ;;  %v9561_v1 = vpack.c.bf16 %v6188_v38, %v6180_v32  ;;  %v9563_v8 = vpack.c.bf16 %v6187_v54, %v6179_v10 }
 0x9f8   :  { %9546 = vmatprep.subr.bf16.mxu0 %v9545_v12  ;;  %v9623_v4 = vpack.c.bf16 %v6173_v56, %v6165_v63  ;;  %v6190_v12 = vld [vmem:[%s18566_s4 + $0x7d8] sm:$0xff] }
 0x9f9   :  { %v9625_v52 = vpack.c.bf16 %v6190_v12, %v6182_v11 }
 0x9fa   :  { %9612 = vmatpush1.bf16.msra.mxu1 %v9611_v26  ;;  %v5944_v26 = vld [vmem:[%s18566_s4 + $0x28] sm:$0xff] }
 0x9fb   :  { %9548 = vmatpush1.bf16.msra.mxu0 %v9547_v9  ;;  %9614 = vmatprep.subr.bf16.mxu1 %v9613_v59  ;;  %v6181_v9 = vld [vmem:[%s18566_s4 + $0x790] sm:$0xff]  ;;  %v17744_v30 = vpack.c.bf16 %v5952_v27, %v5944_v26 }
 0x9fc   :  { %9550 = vmatprep.subr.bf16.mxu0 %v9549_v44  ;;  %v9627_v17 = vpack.c.bf16 %v6189_v6, %v6181_v9  ;;  %v5954_v44 = vld [vmem:[%s18566_s4 + $0x78] sm:$0xff] }
 0x9fd   :  { %v17749_v3 = vpack.c.bf16 %v5954_v44, %v5946_v18 }
 0x9fe   :  { %9616 = vmatpush1.bf16.msra.mxu1 %v9615_v22 }
 0x9ff   :  { %9552 = vmatpush1.bf16.msra.mxu0 %v9551_v40  ;;  %9618 = vmatprep.subr.bf16.mxu1 %v9617_v15 }
 0xa00   :  { %9554 = vmatprep.subr.bf16.mxu0 %v9553_v28 }
 0xa02   :  { %9620 = vmatpush1.bf16.msra.mxu1 %v9619_v14 }
 0xa03   :  { %9556 = vmatpush1.bf16.msra.mxu0 %v9555_v34  ;;  %9622 = vmatprep.subr.bf16.mxu1 %v9621_v41 }
 0xa04   :  { %9558 = vmatprep.subr.bf16.mxu0 %v9557_v29 }
 0xa06   :  { %9624 = vmatpush1.bf16.msra.mxu1 %v9623_v4 }
 0xa07   :  { %9560 = vmatpush1.bf16.msra.mxu0 %v9559_v20  ;;  %9626 = vmatprep.subr.bf16.mxu1 %v9625_v52 }
 0xa08   :  { %9562 = vmatprep.subr.bf16.mxu0 %v9561_v1 }
 0xa0a   :  { %9628 = vmatpush1.bf16.msra.mxu1 %v9627_v17 }
 0xa0b   :  { %9564 = vmatpush1.bf16.msra.mxu0 %v9563_v8  ;;  %9694 = vmatprep.subr.bf16.mxu1 %v17749_v3 }
 0xa0c   :  { %9630 = vmatprep.subr.bf16.mxu0 %v17744_v30 }
 0xa5b   :  { %v5601_v16 = vpop.f32.mrb[32].mxu0  ;;  %v5678_v31 = vpop.f32.mrb[32].mxu1 }
 0xa5c   :  { %v9913_v59 = vadd.f32 %v5601_v16, %v11107_v48  ;;  %v5603_v40 = vpop.f32.mrb[33].mxu0  ;;  %v5680_v7 = vpop.f32.mrb[33].mxu1  ;;  %v9949_v47 = vadd.f32 %v5678_v31, %v11113_v50 }
 0xa5d   :  { %v9914_v22 = vadd.f32 %v5603_v40, %v11110_v49  ;;  %v9950_v31 = vadd.f32 %v5680_v7, %v11124_v0 }
 0xa5e   :  { %10361 = vtanh.f32 %v9913_v59 }
 0xa5f   :  { %v5607_v25 = vpop.f32.mrb[34].mxu0  ;;  %v5684_v2 = vpop.f32.mrb[34].mxu1  ;;  %10363 = vtanh.f32 %v9914_v22 }
 0xa60   :  { %v9915_v53 = vadd.f32 %v5607_v25, %v11107_v48  ;;  %v5609_v28 = vpop.f32.mrb[35].mxu0  ;;  %v5686_v13 = vpop.f32.mrb[35].mxu1  ;;  %10365 = vtanh.f32 %v9949_v47  ;;  %v9951_v55 = vadd.f32 %v5684_v2, %v11113_v50  ;;  %v6151_v48 = vld [vmem:[%s18566_s4 + $0x6a0] sm:$0xff] }
 0xa61   :  { %v9916_v19 = vadd.f32 %v5609_v28, %v11110_v49  ;;  %v9952_v28 = vadd.f32 %v5686_v13, %v11124_v0  ;;  %v6143_v0 = vld [vmem:[%s18566_s4 + $0x660] sm:$0xff] }
 0xa62   :  { %10367 = vtanh.f32 %v9915_v53 }
 0xa63   :  { %10369 = vtanh.f32 %v9916_v19 }
 0xa64   :  { %10371 = vtanh.f32 %v9951_v55 }
 0xa68   :  { %v10362_v15 = vpop.eup %10361 }
 0xa69   :  { %v5868_v34 = vmul.f32 0.5, %v10362_v15  ;;  %v10364_v57 = vpop.eup %10363 }
 0xa6a   :  { %v10366_v39 = vpop.eup %10365  ;;  %v5872_v61 = vmul.f32 0.5, %v10364_v57 }
 0xa6b   :  { %v5870_v14 = vadd.f32 0.5, %v5868_v34 }
 0xa6c   :  { %v10368_v33 = vpop.eup %10367  ;;  %v5874_v5 = vadd.f32 0.5, %v5872_v61 }
 0xa6d   :  { %v5882_v29 = vmul.f32 %v10366_v39, %v5870_v14  ;;  %v5869_v36 = vmul.f32 0.5, %v10368_v33  ;;  %v10370_v51 = vpop.eup %10369 }
 0xa6e   :  { %v5880_v58 = vmul.f32 %v5874_v5, %v16932_v62  ;;  %v5873_v20 = vmul.f32 0.5, %v10370_v51  ;;  %v10372_v63 = vpop.eup %10371 }
 0xa6f   :  { %v5871_v41 = vadd.f32 0.5, %v5869_v36 }
 0xa70   :  { %v17760_v56 = vadd.f32 %v5882_v29, %v5880_v58  ;;  %v5875_v4 = vadd.f32 0.5, %v5873_v20 }
 0xa71   :  { %v5883_v32 = vmul.f32 %v10372_v63, %v5871_v41  ;;  %v5943_v63 = vld [vmem:[%s18566_s4 + $0x20] sm:$0xff] }
 0xa72   :  { %18620 = vst [vmem:[#allocation16_spill] sm:$0xff] %v17760_v56  ;;  %v5881_v38 = vmul.f32 %v5875_v4, %v16935_v35  ;;  %v5945_v4 = vld [vmem:[%s18566_s4 + $0x30] sm:$0xff] }
 0xa74   :  { %v17763_v11 = vadd.f32 %v5883_v32, %v5881_v38  ;;  %v5953_v32 = vld [vmem:[%s18566_s4 + $0x70] sm:$0xff]  ;;  %v5960_v38 = vld [vmem:[%s18566_s4 + $0xa8] sm:$0xff] }
 0xa76   :  { %18621 = vst [vmem:[#allocation17_spill] sm:$0xff] %v17763_v11 }
 0xa9b   :  { %v5755_v1 = vpop.f32.mrb[68].mxu0  ;;  %v5832_v12 = vpop.f32.mrb[68].mxu1 }
 0xa9c   :  { %v5890_v10 = vadd.f32 %v5755_v1, %v11978_v23  ;;  %v5757_v54 = vpop.f32.mrb[69].mxu0  ;;  %v5834_v52 = vpop.f32.mrb[69].mxu1  ;;  %v5892_v8 = vadd.f32 %v5832_v12, %v11981_v21 }
 0xa9d   :  { %v5891_v62 = vadd.f32 %v5757_v54, %v11984_v24  ;;  %v5893_v44 = vadd.f32 %v5834_v52, %v11993_v37  ;;  %v5968_v54 = vld [vmem:[%s18566_s4 + $0xe8] sm:$0xff]  ;;  %v5962_v52 = vld [vmem:[%s18566_s4 + $0xb8] sm:$0xff] }
 0xa9e   :  { %10373 = vtanh.f32 %v5890_v10 }
 0xa9f   :  { %v5761_v9 = vpop.f32.mrb[70].mxu0  ;;  %v5838_v6 = vpop.f32.mrb[70].mxu1  ;;  %10375 = vtanh.f32 %v5891_v62 }
 0xaa0   :  { %v5894_v17 = vadd.f32 %v5761_v9, %v11978_v23  ;;  %v5763_v26 = vpop.f32.mrb[71].mxu0  ;;  %v5840_v35 = vpop.f32.mrb[71].mxu1  ;;  %10377 = vtanh.f32 %v5892_v8  ;;  %v5896_v18 = vadd.f32 %v5838_v6, %v11981_v21  ;;  %v5970_v8 = vld [vmem:[%s18566_s4 + $0xf8] sm:$0xff]  ;;  %v6127_v21 = vld [vmem:[%s18566_s4 + $0x5e0] sm:$0xff] }
 0xaa1   :  { %v5895_v27 = vadd.f32 %v5763_v26, %v11984_v24  ;;  %v5897_v2 = vadd.f32 %v5840_v35, %v11993_v37  ;;  %v17811_v35 = vpack.c.bf16 %v5953_v32, %v5945_v4  ;;  %v5999_v4 = vld [vmem:[%s18566_s4 + $0x1e0] sm:$0xff] }
 0xaa2   :  { %10379 = vtanh.f32 %v5894_v17  ;;  %v6119_v24 = vld [vmem:[%s18566_s4 + $0x5a0] sm:$0xff] }
 0xaa3   :  { %10381 = vtanh.f32 %v5895_v27  ;;  %v5959_v27 = vld [vmem:[%s18566_s4 + $0xa0] sm:$0xff] }
 0xaa4   :  { %10383 = vtanh.f32 %v5896_v18 }
 0xaa5   :  { %10385 = vtanh.f32 %v5893_v44  ;;  %v17818_v44 = vpack.c.bf16 %v5968_v54, %v5960_v38  ;;  %v6016_v54 = vld [vmem:[%s18566_s4 + $0x268] sm:$0xff] }
 0xaa6   :  { %10387 = vtanh.f32 %v9950_v31  ;;  %v5967_v31 = vld [vmem:[%s18566_s4 + $0xe0] sm:$0xff] }
 0xaa7   :  { %10389 = vtanh.f32 %v5897_v2 }
 0xaa8   :  { %v10374_v16 = vpop.eup %10373  ;;  %10391 = vtanh.f32 %v9952_v28  ;;  %v5984_v28 = vld [vmem:[%s18566_s4 + $0x168] sm:$0xff] }
 0xaa9   :  { %v5906_v59 = vmul.f32 0.5, %v10374_v16  ;;  %v10376_v40 = vpop.eup %10375  ;;  %10393 = vtanh.f32 %v17760_v56  ;;  %v17820_v16 = vpack.c.bf16 %v5970_v8, %v5962_v52  ;;  %v6010_v52 = vld [vmem:[%s18566_s4 + $0x238] sm:$0xff]  ;;  %v6135_v56 = vld [vmem:[%s18566_s4 + $0x620] sm:$0xff] }
 0xaaa   :  { %v10378_v47 = vpop.eup %10377  ;;  %v5910_v25 = vmul.f32 0.5, %v10376_v40  ;;  %v5969_v40 = vld [vmem:[%s18566_s4 + $0xf0] sm:$0xff]  ;;  %v6018_v8 = vld [vmem:[%s18566_s4 + $0x278] sm:$0xff] }
 0xaab   :  { %v5908_v22 = vadd.f32 0.5, %v5906_v59  ;;  %v5961_v59 = vld [vmem:[%s18566_s4 + $0xb0] sm:$0xff] }
 0xaac   :  { %v10380_v53 = vpop.eup %10379  ;;  %v5912_v19 = vadd.f32 0.5, %v5910_v25  ;;  %v5976_v25 = vld [vmem:[%s18566_s4 + $0x128] sm:$0xff] }
 0xaad   :  { %v5920_v55 = vmul.f32 %v10378_v47, %v5908_v22  ;;  %v5907_v15 = vmul.f32 0.5, %v10380_v53  ;;  %v10382_v34 = vpop.eup %10381 }
 0xaae   :  { %v5918_v57 = vmul.f32 %v5912_v19, %v16948_v45  ;;  %v5911_v7 = vmul.f32 0.5, %v10382_v34  ;;  %v10384_v14 = vpop.eup %10383  ;;  %v5978_v19 = vld [vmem:[%s18566_s4 + $0x138] sm:$0xff]  ;;  %v17849_v34 = vpack.c.bf16 %v5967_v31, %v5959_v27  ;;  %v6015_v27 = vld [vmem:[%s18566_s4 + $0x260] sm:$0xff] }
 0xaaf   :  { %v5909_v39 = vadd.f32 0.5, %v5907_v15  ;;  %v10386_v29 = vpop.eup %10385  ;;  %v17943_v31 = vld [vmem:[%s18571_s6] ss:$0 sm:$0xff] }
 0xab0   :  { %v17776_v61 = vadd.f32 %v5920_v55, %v5918_v57  ;;  %v5913_v33 = vadd.f32 0.5, %v5911_v7  ;;  %v10388_v51 = vpop.eup %10387  ;;  %v5914_v45 = vmul.f32 0.5, %v10386_v29  ;;  %v5986_v55 = vld [vmem:[%s18566_s4 + $0x178] sm:$0xff]  ;;  %v17851_v57 = vpack.c.bf16 %v5969_v40, %v5961_v59  ;;  %v5983_v7 = vld [vmem:[%s18566_s4 + $0x160] sm:$0xff]  ;;  %18624 = vst [vmem:[#allocation20_spill] sm:$0xff] %v17943_v31 }
 0xab1   :  { %v5921_v5 = vmul.f32 %v10384_v14, %v5909_v39  ;;  %v10390_v58 = vpop.eup %10389  ;;  %v5876_v41 = vmul.f32 0.5, %v10388_v51  ;;  %v5975_v39 = vld [vmem:[%s18566_s4 + $0x120] sm:$0xff]  ;;  %v17874_v29 = vpack.c.bf16 %v5984_v28, %v5976_v25  ;;  %v17876_v51 = vpack.c.bf16 %v5986_v55, %v5978_v19  ;;  %v6017_v25 = vld [vmem:[%s18566_s4 + $0x270] sm:$0xff]  ;;  %v6026_v28 = vld [vmem:[%s18566_s4 + $0x2b8] sm:$0xff] }
 0xab2   :  { %18622 = vst [vmem:[#allocation18_spill] sm:$0xff] %v17776_v61  ;;  %10395 = vtanh.f32 %v17776_v61  ;;  %v5919_v13 = vmul.f32 %v5913_v33, %v16953_v60  ;;  %v10392_v20 = vpop.eup %10391  ;;  %v5951_v60 = vld [vmem:[%s18566_s4 + $0x60] sm:$0xff]  ;;  %v5916_v12 = vadd.f32 0.5, %v5914_v45  ;;  %v5915_v10 = vmul.f32 0.5, %v10390_v58  ;;  %v5977_v33 = vld [vmem:[%s18566_s4 + $0x130] sm:$0xff]  ;;  %v6000_v45 = vld [vmem:[%s18566_s4 + $0x1e8] sm:$0xff] }
 0xab3   :  { %10397 = vtanh.f32 %v17763_v11  ;;  %v10394_v1 = vpop.eup %10393  ;;  %v5878_v9 = vadd.f32 0.5, %v5876_v41  ;;  %v5877_v6 = vmul.f32 0.5, %v10392_v20  ;;  %v17809_v26 = vpack.c.bf16 %v5951_v60, %v5943_v63  ;;  %v5994_v58 = vld [vmem:[%s18566_s4 + $0x1b8] sm:$0xff]  ;;  %v5991_v60 = vld [vmem:[%s18566_s4 + $0x1a0] sm:$0xff] }
 0xab4   :  { %v17781_v36 = vadd.f32 %v5921_v5, %v5919_v13  ;;  %v5917_v22 = vadd.f32 0.5, %v5915_v10  ;;  %v5985_v5 = vld [vmem:[%s18566_s4 + $0x170] sm:$0xff]  ;;  %v5992_v13 = vld [vmem:[%s18566_s4 + $0x1a8] sm:$0xff]  ;;  %v6002_v41 = vld [vmem:[%s18566_s4 + $0x1f8] sm:$0xff]  ;;  %v17892_v20 = vpack.c.bf16 %v5983_v7, %v5975_v39 }
 0xab5   :  { %v17816_v18 = vmul.f32 %v10394_v1, %v5878_v9  ;;  %v5879_v53 = vadd.f32 0.5, %v5877_v6  ;;  %v17894_v63 = vpack.c.bf16 %v5985_v5, %v5977_v33  ;;  %v17902_v32 = vpack.c.bf16 %v6000_v45, %v5992_v13  ;;  %v5993_v1 = vld [vmem:[%s18566_s4 + $0x1b0] sm:$0xff]  ;;  %v6008_v10 = vld [vmem:[%s18566_s4 + $0x228] sm:$0xff]  ;;  %v6034_v19 = vld [vmem:[%s18566_s4 + $0x2f8] sm:$0xff] }
 0xab6   :  { %18623 = vst [vmem:[#allocation19_spill] sm:$0xff] %v17781_v36  ;;  %10399 = vtanh.f32 %v17781_v36  ;;  %v17904_v38 = vpack.c.bf16 %v6002_v41, %v5994_v58  ;;  %v17928_v9 = vpack.c.bf16 %v5999_v4, %v5991_v60  ;;  %v17946_v40 = vpack.c.bf16 %v6016_v54, %v6008_v10  ;;  %v6023_v33 = vld [vmem:[%s18566_s4 + $0x2a0] sm:$0xff]  ;;  %v6025_v41 = vld [vmem:[%s18566_s4 + $0x2b0] sm:$0xff]  ;;  %v6040_v4 = vld [vmem:[%s18566_s4 + $0x328] sm:$0xff] }
 0xab7   :  { %v6031_v5 = vld [vmem:[%s18566_s4 + $0x2e0] sm:$0xff]  ;;  %v17985_v58 = vpack.c.bf16 %v6034_v19, %v6026_v28  ;;  %v6033_v60 = vld [vmem:[%s18566_s4 + $0x2f0] sm:$0xff]  ;;  %v6050_v10 = vld [vmem:[%s18566_s4 + $0x378] sm:$0xff] }
 0xab8   :  { %v18007_v54 = vpack.c.bf16 %v6031_v5, %v6023_v33  ;;  %v6066_v28 = vld [vmem:[%s18566_s4 + $0x3f8] sm:$0xff]  ;;  %v6055_v33 = vld [vmem:[%s18566_s4 + $0x3a0] sm:$0xff] }
 0xab9   :  { %v6063_v5 = vld [vmem:[%s18566_s4 + $0x3e0] sm:$0xff] }
 0xaba   :  { %v6111_v36 = vld [vmem:[%s18566_s4 + $0x560] sm:$0xff] }
 0xabc   :  { %v10396_v62 = vpop.eup %10395 }
 0xabd   :  { %v5926_v17 = vmul.f32 %v10396_v62, %v5916_v12  ;;  %v10398_v47 = vpop.eup %10397  ;;  %v6001_v12 = vld [vmem:[%s18566_s4 + $0x1f0] sm:$0xff] }
 0xabe   :  { %v17859_v14 = vmul.f32 %v10398_v47, %v5879_v53  ;;  %v17930_v6 = vpack.c.bf16 %v6001_v12, %v5993_v1  ;;  %v17948_v47 = vpack.c.bf16 %v6018_v8, %v6010_v52  ;;  %v6032_v53 = vld [vmem:[%s18566_s4 + $0x2e8] sm:$0xff]  ;;  %v6042_v12 = vld [vmem:[%s18566_s4 + $0x338] sm:$0xff]  ;;  %v18009_v52 = vpack.c.bf16 %v6033_v60, %v6025_v41  ;;  %v6039_v8 = vld [vmem:[%s18566_s4 + $0x320] sm:$0xff] }
 0xabf   :  { %6259 = vmatprep.mubr.f32.mxu0 %v5926_v17  ;;  %6336 = vmatprep.mubr.f32.mxu1 %v5926_v17  ;;  %10401 = vtanh.f32 %v5926_v17  ;;  %v6048_v1 = vld [vmem:[%s18566_s4 + $0x368] sm:$0xff]  ;;  %v6057_v60 = vld [vmem:[%s18566_s4 + $0x3b0] sm:$0xff] }
 0xac0   :  { %v10400_v2 = vpop.eup %10399  ;;  %6260 = vmatmul.mubr.f32.vlgmr.msra.gmra.mrb[36].mxu0 %v17816_v18  ;;  %6337 = vmatmul.mubr.f32.vlgmr.msra.gmra.mrb[36].mxu1 %v17816_v18 }
 0xac1   :  { %v17845_v15 = vmul.f32 %v10400_v2, %v5917_v22  ;;  %9632 = vmatpush1.bf16.msra.mxu0 %v17809_v26  ;;  %9696 = vmatpush1.bf16.msra.mxu1 %v17811_v35  ;;  %v6009_v22 = vld [vmem:[%s18566_s4 + $0x230] sm:$0xff]  ;;  %v6024_v2 = vld [vmem:[%s18566_s4 + $0x2a8] sm:$0xff] }
 0xac2   :  { %9634 = vmatprep.subr.bf16.mxu0 %v17818_v44  ;;  %9698 = vmatprep.subr.bf16.mxu1 %v17820_v16  ;;  %v17972_v7 = vpack.c.bf16 %v6017_v25, %v6009_v22  ;;  %v17983_v45 = vpack.c.bf16 %v6032_v53, %v6024_v2  ;;  %v6049_v22 = vld [vmem:[%s18566_s4 + $0x370] sm:$0xff]  ;;  %v6056_v25 = vld [vmem:[%s18566_s4 + $0x3a8] sm:$0xff]  ;;  %v6058_v53 = vld [vmem:[%s18566_s4 + $0x3b8] sm:$0xff] }
 0xac3   :  { %6265 = vmatprep.mubr.f32.mxu0 %v17845_v15  ;;  %6342 = vmatprep.mubr.f32.mxu1 %v17845_v15  ;;  %10403 = vtanh.f32 %v17845_v15  ;;  %v6064_v2 = vld [vmem:[%s18566_s4 + $0x3e8] sm:$0xff]  ;;  %v18057_v41 = vpack.c.bf16 %v6066_v28, %v6058_v53  ;;  %v6073_v28 = vld [vmem:[%s18566_s4 + $0x430] sm:$0xff] }
 0xac4   :  { %6266 = vmatmul.mubr.f32.gmra.mrb[38].mxu0 %v17859_v14  ;;  %6343 = vmatmul.mubr.f32.gmra.mrb[38].mxu1 %v17859_v14 }
 0xac5   :  { %9636 = vmatpush1.bf16.msra.mxu0 %v17849_v34  ;;  %9700 = vmatpush1.bf16.msra.mxu1 %v17851_v57 }
 0xac6   :  { %6413 = vmatprep.mubr.f32.mxu0 %v5926_v17  ;;  %6490 = vmatprep.mubr.f32.mxu1 %v5926_v17  ;;  %v6007_v17 = vld [vmem:[%s18566_s4 + $0x220] sm:$0xff] }
 0xac7   :  { %9638 = vmatprep.subr.bf16.mxu0 %v17874_v29  ;;  %9702 = vmatprep.subr.bf16.mxu1 %v17876_v51  ;;  %v17970_v39 = vpack.c.bf16 %v6015_v27, %v6007_v17  ;;  %v18019_v17 = vpack.c.bf16 %v6048_v1, %v6040_v4  ;;  %v18021_v27 = vpack.c.bf16 %v6050_v10, %v6042_v12  ;;  %v6065_v4 = vld [vmem:[%s18566_s4 + $0x3f0] sm:$0xff]  ;;  %v6072_v1 = vld [vmem:[%s18566_s4 + $0x428] sm:$0xff]  ;;  %v6074_v10 = vld [vmem:[%s18566_s4 + $0x438] sm:$0xff] }
 0xac8   :  { %v6080_v12 = vld [vmem:[%s18566_s4 + $0x468] sm:$0xff] }
 0xac9   :  { %v10402_v62 = vpop.eup %10401  ;;  %9640 = vmatpush1.bf16.msra.mxu0 %v17892_v20  ;;  %9704 = vmatpush1.bf16.msra.mxu1 %v17894_v63 }
 0xaca   :  { %9642 = vmatprep.subr.bf16.mxu0 %v17902_v32  ;;  %9706 = vmatprep.subr.bf16.mxu1 %v17904_v38  ;;  %v6975_v59 = vmul.f32 %v17943_v31, %v10402_v62  ;;  %v6047_v62 = vld [vmem:[%s18566_s4 + $0x360] sm:$0xff] }
 0xacb   :  { %v18043_v19 = vpack.c.bf16 %v6047_v62, %v6039_v8  ;;  %v6082_v8 = vld [vmem:[%s18566_s4 + $0x478] sm:$0xff]  ;;  %v18079_v62 = vpack.c.bf16 %v6063_v5, %v6055_v33  ;;  %v6081_v33 = vld [vmem:[%s18566_s4 + $0x470] sm:$0xff]  ;;  %v6088_v5 = vld [vmem:[%s18566_s4 + $0x4a8] sm:$0xff] }
 0xacc   :  { %7009 = vadd.xlane.f32.xlu0 %v6975_v59  ;;  %v6041_v59 = vld [vmem:[%s18566_s4 + $0x330] sm:$0xff]  ;;  %v18093_v53 = vpack.c.bf16 %v6082_v8, %v6074_v10  ;;  %v18117_v10 = vpack.c.bf16 %v6081_v33, %v6073_v28  ;;  %v6087_v8 = vld [vmem:[%s18566_s4 + $0x4a0] sm:$0xff]  ;;  %v6104_v28 = vld [vmem:[%s18566_s4 + $0x528] sm:$0xff] }
 0xacd   :  { %v10404_v55 = vpop.eup %10403  ;;  %9644 = vmatpush1.bf16.msra.mxu0 %v17928_v9  ;;  %9708 = vmatpush1.bf16.msra.mxu1 %v17930_v6  ;;  %v6112_v33 = vld [vmem:[%s18566_s4 + $0x568] sm:$0xff] }
 0xace   :  { %9646 = vmatprep.subr.bf16.mxu0 %v17946_v40  ;;  %9710 = vmatprep.subr.bf16.mxu1 %v17948_v47  ;;  %v6976_v13 = vmul.f32 %v17943_v31, %v10404_v55  ;;  %v18045_v55 = vpack.c.bf16 %v6049_v22, %v6041_v59  ;;  %v18081_v59 = vpack.c.bf16 %v6065_v4, %v6057_v60  ;;  %v6071_v22 = vld [vmem:[%s18566_s4 + $0x420] sm:$0xff]  ;;  %v6096_v60 = vld [vmem:[%s18566_s4 + $0x4e8] sm:$0xff]  ;;  %v6090_v4 = vld [vmem:[%s18566_s4 + $0x4b8] sm:$0xff] }
 0xacf   :  { %v18127_v43 = vpack.c.bf16 %v6096_v60, %v6088_v5  ;;  %v6106_v5 = vld [vmem:[%s18566_s4 + $0x538] sm:$0xff]  ;;  %v6103_v31 = vld [vmem:[%s18566_s4 + $0x520] sm:$0xff]  ;;  %v18163_v61 = vpack.c.bf16 %v6112_v33, %v6104_v28 }
 0xad0   :  { %7011 = vadd.xlane.f32.xlu1 %v6976_v13  ;;  %v18055_v13 = vpack.c.bf16 %v6064_v2, %v6056_v25  ;;  %v6079_v25 = vld [vmem:[%s18566_s4 + $0x460] sm:$0xff]  ;;  %v18091_v2 = vpack.c.bf16 %v6080_v12, %v6072_v1  ;;  %v6098_v1 = vld [vmem:[%s18566_s4 + $0x4f8] sm:$0xff] }
 0xad1   :  { %9648 = vmatpush1.bf16.msra.mxu0 %v17970_v39  ;;  %9712 = vmatpush1.bf16.msra.mxu1 %v17972_v7  ;;  %v18115_v12 = vpack.c.bf16 %v6079_v25, %v6071_v22  ;;  %v18129_v46 = vpack.c.bf16 %v6098_v1, %v6090_v4  ;;  %v6089_v22 = vld [vmem:[%s18566_s4 + $0x4b0] sm:$0xff]  ;;  %v6114_v60 = vld [vmem:[%s18566_s4 + $0x578] sm:$0xff]  ;;  %v18151_v4 = vpack.c.bf16 %v6095_v42, %v6087_v8 }
 0xad2   :  { %9650 = vmatprep.subr.bf16.mxu0 %v17983_v45  ;;  %9714 = vmatprep.subr.bf16.mxu1 %v17985_v58  ;;  %v6097_v25 = vld [vmem:[%s18566_s4 + $0x4f0] sm:$0xff]  ;;  %v18165_v37 = vpack.c.bf16 %v6114_v60, %v6106_v5  ;;  %v6122_v28 = vld [vmem:[%s18566_s4 + $0x5b8] sm:$0xff]  ;;  %v18187_v5 = vpack.c.bf16 %v6111_v36, %v6103_v31 }
 0xad3   :  { %v18153_v1 = vpack.c.bf16 %v6097_v25, %v6089_v22  ;;  %v6105_v42 = vld [vmem:[%s18566_s4 + $0x530] sm:$0xff]  ;;  %v6120_v22 = vld [vmem:[%s18566_s4 + $0x5a8] sm:$0xff]  ;;  %v6130_v33 = vld [vmem:[%s18566_s4 + $0x5f8] sm:$0xff] }
 0xad4   :  { %v6113_v8 = vld [vmem:[%s18566_s4 + $0x570] sm:$0xff]  ;;  %v6128_v25 = vld [vmem:[%s18566_s4 + $0x5e8] sm:$0xff]  ;;  %v18201_v11 = vpack.c.bf16 %v6130_v33, %v6122_v28  ;;  %v18223_v28 = vpack.c.bf16 %v6127_v21, %v6119_v24 }
 0xad5   :  { %9652 = vmatpush1.bf16.msra.mxu0 %v18007_v54  ;;  %9716 = vmatpush1.bf16.msra.mxu1 %v18009_v52  ;;  %v18189_v60 = vpack.c.bf16 %v6113_v8, %v6105_v42  ;;  %v18199_v23 = vpack.c.bf16 %v6128_v25, %v6120_v22  ;;  %v6121_v36 = vld [vmem:[%s18566_s4 + $0x5b0] sm:$0xff]  ;;  %v6136_v42 = vld [vmem:[%s18566_s4 + $0x628] sm:$0xff]  ;;  %v6138_v22 = vld [vmem:[%s18566_s4 + $0x638] sm:$0xff] }
 0xad6   :  { %9654 = vmatprep.subr.bf16.mxu0 %v18019_v17  ;;  %9718 = vmatprep.subr.bf16.mxu1 %v18021_v27  ;;  %18626 = vst [vmem:[#allocation22_spill] sm:$0xff] %v18201_v11  ;;  %v6129_v31 = vld [vmem:[%s18566_s4 + $0x5f0] sm:$0xff]  ;;  %v6144_v8 = vld [vmem:[%s18566_s4 + $0x668] sm:$0xff]  ;;  %v6146_v25 = vld [vmem:[%s18566_s4 + $0x678] sm:$0xff] }
 0xad7   :  { %18625 = vst [vmem:[#allocation21_spill] sm:$0xff] %v18199_v23  ;;  %18627 = vst [vmem:[#allocation23_spill] sm:$0xff] %v18223_v28  ;;  %v18225_v33 = vpack.c.bf16 %v6129_v31, %v6121_v36  ;;  %v18235_v49 = vpack.c.bf16 %v6144_v8, %v6136_v42  ;;  %v18237_v50 = vpack.c.bf16 %v6146_v25, %v6138_v22  ;;  %v6137_v21 = vld [vmem:[%s18566_s4 + $0x630] sm:$0xff]  ;;  %v6152_v36 = vld [vmem:[%s18566_s4 + $0x6a8] sm:$0xff] }
 0xad8   :  { %v6145_v24 = vld [vmem:[%s18566_s4 + $0x670] sm:$0xff]  ;;  %v6160_v31 = vld [vmem:[%s18566_s4 + $0x6e8] sm:$0xff]  ;;  %v6154_v42 = vld [vmem:[%s18566_s4 + $0x6b8] sm:$0xff]  ;;  %v18259_v22 = vpack.c.bf16 %v6143_v0, %v6135_v56 }
 0xad9   :  { %9656 = vmatpush1.bf16.msra.mxu0 %v18043_v19  ;;  %9720 = vmatpush1.bf16.msra.mxu1 %v18045_v55  ;;  %18628 = vst [vmem:[#allocation24_spill] sm:$0xff] %v18225_v33  ;;  %18629 = vst [vmem:[#allocation25_spill] sm:$0xff] %v18235_v49  ;;  %v6162_v8 = vld [vmem:[%s18566_s4 + $0x6f8] sm:$0xff]  ;;  %v18261_v25 = vpack.c.bf16 %v6145_v24, %v6137_v21  ;;  %v6153_v0 = vld [vmem:[%s18566_s4 + $0x6b0] sm:$0xff] }
 0xada   :  { %9658 = vmatprep.subr.bf16.mxu0 %v18055_v13  ;;  %9722 = vmatprep.subr.bf16.mxu1 %v18057_v41  ;;  %18630 = vst [vmem:[#allocation26_spill] sm:$0xff] %v18237_v50  ;;  %18631 = vst [vmem:[#allocation27_spill] sm:$0xff] %v18259_v22  ;;  %v6161_v56 = vld [vmem:[%s18566_s4 + $0x6f0] sm:$0xff]  ;;  %v6168_v21 = vld [vmem:[%s18566_s4 + $0x728] sm:$0xff] }
 0xadb   :  { %18632 = vst [vmem:[#allocation28_spill] sm:$0xff] %v18261_v25  ;;  %v6176_v24 = vld [vmem:[%s18566_s4 + $0x768] sm:$0xff] }
 0xadd   :  { %9660 = vmatpush1.bf16.msra.mxu0 %v18079_v62  ;;  %9724 = vmatpush1.bf16.msra.mxu1 %v18081_v59 }
 0xade   :  { %9662 = vmatprep.subr.bf16.mxu0 %v18091_v2  ;;  %9726 = vmatprep.subr.bf16.mxu1 %v18093_v53 }
 0xae1   :  { %9664 = vmatpush1.bf16.msra.mxu0 %v18115_v12  ;;  %9728 = vmatpush1.bf16.msra.mxu1 %v18117_v10 }
 0xae2   :  { %9666 = vmatprep.subr.bf16.mxu0 %v18127_v43  ;;  %9730 = vmatprep.subr.bf16.mxu1 %v18129_v46 }
 0xae5   :  { %9668 = vmatpush1.bf16.msra.mxu0 %v18151_v4  ;;  %9732 = vmatpush1.bf16.msra.mxu1 %v18153_v1 }
 0xae6   :  { %9670 = vmatprep.subr.bf16.mxu0 %v18163_v61  ;;  %9734 = vmatprep.subr.bf16.mxu1 %v18165_v37 }
 0xae9   :  { %9672 = vmatpush1.bf16.msra.mxu0 %v18187_v5  ;;  %9736 = vmatpush1.bf16.msra.mxu1 %v18189_v60 }
 0xaea   :  { %9674 = vmatprep.subr.bf16.mxu0 %v18199_v23  ;;  %9738 = vmatprep.subr.bf16.mxu1 %v18201_v11  ;;  %v6159_v11 = vld [vmem:[%s18566_s4 + $0x6e0] sm:$0xff]  ;;  %v18271_v23 = vpack.c.bf16 %v6160_v31, %v6152_v36  ;;  %v6170_v36 = vld [vmem:[%s18566_s4 + $0x738] sm:$0xff] }
 0xaeb   :  { %v6178_v31 = vld [vmem:[%s18566_s4 + $0x778] sm:$0xff] }
 0xaec   :  { %18633 = vst [vmem:[#allocation29_spill] sm:$0xff] %v18271_v23 }
 0xaed   :  { %9676 = vmatpush1.bf16.msra.mxu0 %v18223_v28  ;;  %9740 = vmatpush1.bf16.msra.mxu1 %v18225_v33  ;;  %v18273_v28 = vpack.c.bf16 %v6162_v8, %v6154_v42  ;;  %v18295_v42 = vpack.c.bf16 %v6159_v11, %v6151_v48  ;;  %v18297_v8 = vpack.c.bf16 %v6161_v56, %v6153_v0  ;;  %v6169_v48 = vld [vmem:[%s18566_s4 + $0x730] sm:$0xff]  ;;  %v6184_v0 = vld [vmem:[%s18566_s4 + $0x7a8] sm:$0xff] }
 0xaee   :  { %9678 = vmatprep.subr.bf16.mxu0 %v18235_v49  ;;  %9742 = vmatprep.subr.bf16.mxu1 %v18237_v50  ;;  %v6167_v50 = vld [vmem:[%s18566_s4 + $0x720] sm:$0xff]  ;;  %v18307_v33 = vpack.c.bf16 %v6176_v24, %v6168_v21  ;;  %v6177_v11 = vld [vmem:[%s18566_s4 + $0x770] sm:$0xff]  ;;  %v6192_v56 = vld [vmem:[%s18566_s4 + $0x7e8] sm:$0xff] }
 0xaef   :  { %18634 = vst [vmem:[#allocation30_spill] sm:$0xff] %v18273_v28  ;;  %18635 = vst [vmem:[#allocation31_spill] sm:$0xff] %v18297_v8  ;;  %v6175_v49 = vld [vmem:[%s18566_s4 + $0x760] sm:$0xff]  ;;  %v6186_v21 = vld [vmem:[%s18566_s4 + $0x7b8] sm:$0xff] }
 0xaf0   :  { %v6194_v24 = vld [vmem:[%s18566_s4 + $0x7f8] sm:$0xff] }
 0xaf1   :  { %9680 = vmatpush1.bf16.msra.mxu0 %v18259_v22  ;;  %9744 = vmatpush1.bf16.msra.mxu1 %v18261_v25  ;;  %v18309_v22 = vpack.c.bf16 %v6178_v31, %v6170_v36  ;;  %v18331_v36 = vpack.c.bf16 %v6175_v49, %v6167_v50  ;;  %v18333_v31 = vpack.c.bf16 %v6177_v11, %v6169_v48  ;;  %v6185_v49 = vld [vmem:[%s18566_s4 + $0x7b0] sm:$0xff] }
 0xaf2   :  { %9682 = vmatprep.subr.bf16.mxu0 %v18271_v23  ;;  %9746 = vmatprep.subr.bf16.mxu1 %v18273_v28  ;;  %v6183_v28 = vld [vmem:[%s18566_s4 + $0x7a0] sm:$0xff]  ;;  %v18340_v23 = vpack.c.bf16 %v6192_v56, %v6184_v0  ;;  %v18342_v25 = vpack.c.bf16 %v6194_v24, %v6186_v21  ;;  %v6193_v50 = vld [vmem:[%s18566_s4 + $0x7f0] sm:$0xff] }
 0xaf3   :  { %v18357_v11 = vpack.c.bf16 %v6193_v50, %v6185_v49 }
 0xaf5   :  { %9684 = vmatpush1.bf16.msra.mxu0 %v18295_v42  ;;  %9748 = vmatpush1.bf16.msra.mxu1 %v18297_v8  ;;  %v6191_v8 = vld [vmem:[%s18566_s4 + $0x7e0] sm:$0xff] }
 0xaf6   :  { %9686 = vmatprep.subr.bf16.mxu0 %v18307_v33  ;;  %9750 = vmatprep.subr.bf16.mxu1 %v18309_v22  ;;  %v18355_v48 = vpack.c.bf16 %v6191_v8, %v6183_v28 }
 0xaf9   :  { %9688 = vmatpush1.bf16.msra.mxu0 %v18331_v36  ;;  %9752 = vmatpush1.bf16.msra.mxu1 %v18333_v31 }
 0xafa   :  { %9690 = vmatprep.subr.bf16.mxu0 %v18340_v23  ;;  %9754 = vmatprep.subr.bf16.mxu1 %v18342_v25 }
 0xafd   :  { %9692 = vmatpush1.bf16.msra.mxu0 %v18355_v48  ;;  %9756 = vmatpush1.bf16.msra.mxu1 %v18357_v11 }
 0xafe   :  { %9758 = vmatprep.subr.bf16.mxu0 %v17744_v30  ;;  %9822 = vmatprep.subr.bf16.mxu1 %v17749_v3  ;;  %v18636_v30 = vld [vmem:[#allocation21_spill] sm:$0xff]  ;;  %v18637_v3 = vld [vmem:[#allocation22_spill] sm:$0xff] }
 0xb00   :  { %6414 = vmatmul.mubr.f32.vlgmr.msra.gmra.mrb[72].mxu0 %v17816_v18  ;;  %6491 = vmatmul.mubr.f32.vlgmr.msra.gmra.mrb[72].mxu1 %v17816_v18  ;;  %v18642_v18 = vld [vmem:[#allocation27_spill] sm:$0xff] }
 0xb01   :  { %6419 = vmatprep.mubr.f32.mxu0 %v17845_v15  ;;  %6496 = vmatprep.mubr.f32.mxu1 %v17845_v15 }
 0xb02   :  { %9760 = vmatpush1.bf16.msra.mxu0 %v17809_v26  ;;  %9824 = vmatpush1.bf16.msra.mxu1 %v17811_v35  ;;  %v18638_v26 = vld [vmem:[#allocation23_spill] sm:$0xff]  ;;  %v18641_v35 = vld [vmem:[#allocation26_spill] sm:$0xff] }
 0xb03   :  { %9762 = vmatprep.subr.bf16.mxu0 %v17818_v44  ;;  %9826 = vmatprep.subr.bf16.mxu1 %v17820_v16  ;;  %v18645_v44 = vld [vmem:[#allocation30_spill] sm:$0xff]  ;;  %v18646_v16 = vld [vmem:[#allocation31_spill] sm:$0xff] }
 0xb04   :  { %6420 = vmatmul.mubr.f32.gmra.mrb[74].mxu0 %v17859_v14  ;;  %6497 = vmatmul.mubr.f32.gmra.mrb[74].mxu1 %v17859_v14 }
 0xb06   :  { %9764 = vmatpush1.bf16.msra.mxu0 %v17849_v34  ;;  %9828 = vmatpush1.bf16.msra.mxu1 %v17851_v57  ;;  %v18647_v57 = vld [vmem:[#allocation8_spill] sm:$0xff] }
 0xb07   :  { %9766 = vmatprep.subr.bf16.mxu0 %v17874_v29  ;;  %9830 = vmatprep.subr.bf16.mxu1 %v17876_v51 }
 0xb0a   :  { %9768 = vmatpush1.bf16.msra.mxu0 %v17892_v20  ;;  %9832 = vmatpush1.bf16.msra.mxu1 %v17894_v63  ;;  %v18648_v20 = vld [vmem:[#allocation10_spill] sm:$0xff] }
 0xb0b   :  { %9770 = vmatprep.subr.bf16.mxu0 %v17902_v32  ;;  %9834 = vmatprep.subr.bf16.mxu1 %v17904_v38  ;;  %v18649_v32 = vld [vmem:[#allocation9_spill] sm:$0xff] }
 0xb0e   :  { %9772 = vmatpush1.bf16.msra.mxu0 %v17928_v9  ;;  %9836 = vmatpush1.bf16.msra.mxu1 %v17930_v6 }
 0xb0f   :  { %9774 = vmatprep.subr.bf16.mxu0 %v17946_v40  ;;  %9838 = vmatprep.subr.bf16.mxu1 %v17948_v47 }
 0xb12   :  { %9776 = vmatpush1.bf16.msra.mxu0 %v17970_v39  ;;  %9840 = vmatpush1.bf16.msra.mxu1 %v17972_v7 }
 0xb13   :  { %9778 = vmatprep.subr.bf16.mxu0 %v17983_v45  ;;  %9842 = vmatprep.subr.bf16.mxu1 %v17985_v58  ;;  %v18650_v45 = vld [vmem:[#allocation11_spill] sm:$0xff] }
 0xb16   :  { %9780 = vmatpush1.bf16.msra.mxu0 %v18007_v54  ;;  %9844 = vmatpush1.bf16.msra.mxu1 %v18009_v52 }
 0xb17   :  { %9782 = vmatprep.subr.bf16.mxu0 %v18019_v17  ;;  %9846 = vmatprep.subr.bf16.mxu1 %v18021_v27 }
 0xb1a   :  { %9784 = vmatpush1.bf16.msra.mxu0 %v18043_v19  ;;  %9848 = vmatpush1.bf16.msra.mxu1 %v18045_v55 }
 0xb1b   :  { %9786 = vmatprep.subr.bf16.mxu0 %v18055_v13  ;;  %9850 = vmatprep.subr.bf16.mxu1 %v18057_v41 }
 0xb1e   :  { %9788 = vmatpush1.bf16.msra.mxu0 %v18079_v62  ;;  %9852 = vmatpush1.bf16.msra.mxu1 %v18081_v59 }
 0xb1f   :  { %9790 = vmatprep.subr.bf16.mxu0 %v18091_v2  ;;  %9854 = vmatprep.subr.bf16.mxu1 %v18093_v53 }
 0xb22   :  { %9792 = vmatpush1.bf16.msra.mxu0 %v18115_v12  ;;  %9856 = vmatpush1.bf16.msra.mxu1 %v18117_v10  ;;  %v18651_v12 = vld [vmem:[#allocation16_spill] sm:$0xff] }
 0xb23   :  { %9794 = vmatprep.subr.bf16.mxu0 %v18127_v43  ;;  %9858 = vmatprep.subr.bf16.mxu1 %v18129_v46  ;;  %v18639_v43 = vld [vmem:[#allocation24_spill] sm:$0xff]  ;;  %v18640_v46 = vld [vmem:[#allocation25_spill] sm:$0xff] }
 0xb26   :  { %9796 = vmatpush1.bf16.msra.mxu0 %v18151_v4  ;;  %9860 = vmatpush1.bf16.msra.mxu1 %v18153_v1 }
 0xb27   :  { %9798 = vmatprep.subr.bf16.mxu0 %v18163_v61  ;;  %9862 = vmatprep.subr.bf16.mxu1 %v18165_v37  ;;  %v18643_v61 = vld [vmem:[#allocation28_spill] sm:$0xff]  ;;  %v18644_v37 = vld [vmem:[#allocation29_spill] sm:$0xff] }
 0xb2a   :  { %9800 = vmatpush1.bf16.msra.mxu0 %v18187_v5  ;;  %9864 = vmatpush1.bf16.msra.mxu1 %v18189_v60 }
 0xb2b   :  { %9802 = vmatprep.subr.bf16.mxu0 %v18636_v30  ;;  %9866 = vmatprep.subr.bf16.mxu1 %v18637_v3  ;;  %v18653_v3 = vld [vmem:[#allocation12_spill] sm:$0xff] }
 0xb2e   :  { %9804 = vmatpush1.bf16.msra.mxu0 %v18638_v26  ;;  %9868 = vmatpush1.bf16.msra.mxu1 %v18639_v43 }
 0xb2f   :  { %9806 = vmatprep.subr.bf16.mxu0 %v18640_v46  ;;  %9870 = vmatprep.subr.bf16.mxu1 %v18641_v35  ;;  %v18654_v35 = vld [vmem:[#allocation13_spill] sm:$0xff] }
 0xb32   :  { %9808 = vmatpush1.bf16.msra.mxu0 %v18642_v18  ;;  %9872 = vmatpush1.bf16.msra.mxu1 %v18643_v61  ;;  %v18655_v61 = vld [vmem:[#allocation14_spill] sm:$0xff] }
 0xb33   :  { %9810 = vmatprep.subr.bf16.mxu0 %v18644_v37  ;;  %9874 = vmatprep.subr.bf16.mxu1 %v18645_v44 }
 0xb36   :  { %9812 = vmatpush1.bf16.msra.mxu0 %v18295_v42  ;;  %9876 = vmatpush1.bf16.msra.mxu1 %v18646_v16 }
 0xb37   :  { %9814 = vmatprep.subr.bf16.mxu0 %v18307_v33  ;;  %9878 = vmatprep.subr.bf16.mxu1 %v18309_v22  ;;  %v18652_v22 = vld [vmem:[#allocation17_spill] sm:$0xff] }
 0xb3a   :  { %9816 = vmatpush1.bf16.msra.mxu0 %v18331_v36  ;;  %9880 = vmatpush1.bf16.msra.mxu1 %v18333_v31 }
 0xb3b   :  { %9818 = vmatprep.subr.bf16.mxu0 %v18340_v23  ;;  %9882 = vmatprep.subr.bf16.mxu1 %v18342_v25 }
 0xb3e   :  { %9820 = vmatpush1.bf16.msra.mxu0 %v18355_v48  ;;  %9884 = vmatpush1.bf16.msra.mxu1 %v18357_v11 }
 0xb93   :  { %v6261_v15 = vpop.f32.mrb[36].mxu0  ;;  %v6338_v34 = vpop.f32.mrb[36].mxu1 }
 0xb94   :  { %v9917_v14 = vadd.f32 %v6261_v15, %v18647_v57  ;;  %v6263_v29 = vpop.f32.mrb[37].mxu0  ;;  %v6340_v51 = vpop.f32.mrb[37].mxu1  ;;  %v9953_v63 = vadd.f32 %v6338_v34, %v18648_v20 }
 0xb95   :  { %v9918_v38 = vadd.f32 %v6263_v29, %v18649_v32  ;;  %v9954_v58 = vadd.f32 %v6340_v51, %v18650_v45  ;;  %v18656_v51 = vld [vmem:[#allocation15_spill] sm:$0xff] }
 0xb96   :  { %10405 = vtanh.f32 %v9917_v14 }
 0xb97   :  { %v6267_v9 = vpop.f32.mrb[38].mxu0  ;;  %v6344_v6 = vpop.f32.mrb[38].mxu1  ;;  %10407 = vtanh.f32 %v9918_v38 }
 0xb98   :  { %v9919_v23 = vadd.f32 %v6267_v9, %v18647_v57  ;;  %v6269_v40 = vpop.f32.mrb[39].mxu0  ;;  %v6346_v47 = vpop.f32.mrb[39].mxu1  ;;  %10409 = vtanh.f32 %v9953_v63  ;;  %v9955_v7 = vadd.f32 %v6344_v6, %v18648_v20 }
 0xb99   :  { %v9920_v39 = vadd.f32 %v6269_v40, %v18649_v32  ;;  %v9956_v13 = vadd.f32 %v6346_v47, %v18650_v45 }
 0xb9a   :  { %10411 = vtanh.f32 %v9919_v23 }
 0xb9b   :  { %10413 = vtanh.f32 %v9920_v39 }
 0xb9c   :  { %10415 = vtanh.f32 %v9955_v7 }
 0xb9d   :  { %10417 = vtanh.f32 %v9954_v58 }
 0xb9e   :  { %10419 = vtanh.f32 %v9956_v13 }
 0xba0   :  { %v10406_v54 = vpop.eup %10405 }
 0xba1   :  { %v6528_v52 = vmul.f32 0.5, %v10406_v54  ;;  %v10408_v17 = vpop.eup %10407  ;;  %v18657_v54 = vld [vmem:[#allocation18_spill] sm:$0xff] }
 0xba2   :  { %v10410_v27 = vpop.eup %10409  ;;  %v6532_v55 = vmul.f32 0.5, %v10408_v17 }
 0xba3   :  { %v6530_v19 = vadd.f32 0.5, %v6528_v52 }
 0xba4   :  { %v10412_v41 = vpop.eup %10411  ;;  %v6534_v62 = vadd.f32 0.5, %v6532_v55 }
 0xba5   :  { %v6542_v59 = vmul.f32 %v10410_v27, %v6530_v19  ;;  %v6529_v2 = vmul.f32 0.5, %v10412_v41  ;;  %v10414_v53 = vpop.eup %10413 }
 0xba6   :  { %v6540_v10 = vmul.f32 %v6534_v62, %v18651_v12  ;;  %v6533_v1 = vmul.f32 0.5, %v10414_v53  ;;  %v10416_v5 = vpop.eup %10415  ;;  %v18658_v62 = vld [vmem:[#allocation19_spill] sm:$0xff] }
 0xba7   :  { %v6531_v4 = vadd.f32 0.5, %v6529_v2  ;;  %v10418_v42 = vpop.eup %10417 }
 0xba8   :  { %v6544_v60 = vadd.f32 %v6542_v59, %v6540_v10  ;;  %v6535_v28 = vadd.f32 0.5, %v6533_v1  ;;  %v6536_v0 = vmul.f32 0.5, %v10418_v42  ;;  %v10420_v56 = vpop.eup %10419  ;;  %v18659_v42 = vld [vmem:[#allocation20_spill] sm:$0xff] }
 0xba9   :  { %v6543_v33 = vmul.f32 %v10416_v5, %v6531_v4  ;;  %v6537_v24 = vmul.f32 0.5, %v10420_v56 }
 0xbaa   :  { %10421 = vtanh.f32 %v6544_v60  ;;  %v6541_v25 = vmul.f32 %v6535_v28, %v18652_v22  ;;  %v6538_v21 = vadd.f32 0.5, %v6536_v0 }
 0xbab   :  { %v6539_v49 = vadd.f32 0.5, %v6537_v24 }
 0xbac   :  { %v6545_v8 = vadd.f32 %v6543_v33, %v6541_v25 }
 0xbae   :  { %10423 = vtanh.f32 %v6545_v8 }
 0xbb4   :  { %v10422_v36 = vpop.eup %10421 }
 0xbb5   :  { %v6548_v31 = vmul.f32 %v10422_v36, %v6538_v21  ;;  %v18465_v21 = vpop.permute.xlu1 %7030 }
 0xbb8   :  { %v10424_v50 = vpop.eup %10423 }
 0xbb9   :  { %v18443_v48 = vmul.f32 %v10424_v50, %v6539_v49  ;;  %v18467_v24 = vpop.permute.xlu1 %7034 }
 0xbbd   :  { %v18469_v36 = vpop.permute.xlu1 %7041 }
 0xbd3   :  { %v6415_v11 = vpop.f32.mrb[72].mxu0  ;;  %v6492_v30 = vpop.f32.mrb[72].mxu1 }
 0xbd4   :  { %v6550_v26 = vadd.f32 %v6415_v11, %v18653_v3  ;;  %v6417_v43 = vpop.f32.mrb[73].mxu0  ;;  %v6494_v46 = vpop.f32.mrb[73].mxu1  ;;  %v6552_v18 = vadd.f32 %v6492_v30, %v18654_v35 }
 0xbd5   :  { %v6551_v37 = vadd.f32 %v6417_v43, %v18655_v61  ;;  %v6553_v20 = vadd.f32 %v6494_v46, %v18656_v51  ;;  %v18474_v43 = vpop.permute.xlu1 %7045 }
 0xbd6   :  { %10425 = vtanh.f32 %v6550_v26 }
 0xbd7   :  { %v6421_v44 = vpop.f32.mrb[74].mxu0  ;;  %v6498_v16 = vpop.f32.mrb[74].mxu1  ;;  %10427 = vtanh.f32 %v6551_v37 }
 0xbd8   :  { %v6554_v15 = vadd.f32 %v6421_v44, %v18653_v3  ;;  %v6423_v34 = vpop.f32.mrb[75].mxu0  ;;  %v6500_v57 = vpop.f32.mrb[75].mxu1  ;;  %10429 = vtanh.f32 %v6552_v18  ;;  %v6556_v29 = vadd.f32 %v6498_v16, %v18654_v35 }
 0xbd9   :  { %v6555_v14 = vadd.f32 %v6423_v34, %v18655_v61  ;;  %v6557_v40 = vadd.f32 %v6500_v57, %v18656_v51  ;;  %v18479_v57 = vpop.permute.xlu1 %7052 }
 0xbda   :  { %10431 = vtanh.f32 %v6554_v15 }
 0xbdb   :  { %10433 = vtanh.f32 %v6555_v14 }
 0xbdc   :  { %10435 = vtanh.f32 %v6556_v29 }
 0xbdd   :  { %10437 = vtanh.f32 %v6553_v20 }
 0xbde   :  { %10439 = vtanh.f32 %v6557_v40 }
 0xbe0   :  { %v10426_v63 = vpop.eup %10425 }
 0xbe1   :  { %v6566_v32 = vmul.f32 0.5, %v10426_v63  ;;  %v10428_v38 = vpop.eup %10427 }
 0xbe2   :  { %v10430_v9 = vpop.eup %10429  ;;  %v6570_v23 = vmul.f32 0.5, %v10428_v38  ;;  %v18482_v38 = vpop.permute.xlu1 %7056 }
 0xbe3   :  { %v6568_v6 = vadd.f32 0.5, %v6566_v32 }
 0xbe4   :  { %v10432_v47 = vpop.eup %10431  ;;  %v6572_v39 = vadd.f32 0.5, %v6570_v23 }
 0xbe5   :  { %v6580_v7 = vmul.f32 %v10430_v9, %v6568_v6  ;;  %v6567_v45 = vmul.f32 0.5, %v10432_v47  ;;  %v10434_v58 = vpop.eup %10433 }
 0xbe6   :  { %v6578_v52 = vmul.f32 %v6572_v39, %v18657_v54  ;;  %v6571_v27 = vmul.f32 0.5, %v10434_v58  ;;  %v10436_v19 = vpop.eup %10435  ;;  %v18486_v54 = vpop.permute.xlu1 %7063 }
 0xbe7   :  { %v6569_v17 = vadd.f32 0.5, %v6567_v45  ;;  %v10438_v2 = vpop.eup %10437 }
 0xbe8   :  { %v18454_v55 = vadd.f32 %v6580_v7, %v6578_v52  ;;  %v6573_v13 = vadd.f32 0.5, %v6571_v27  ;;  %v6574_v12 = vmul.f32 0.5, %v10438_v2  ;;  %v10440_v10 = vpop.eup %10439 }
 0xbe9   :  { %v6581_v41 = vmul.f32 %v10436_v19, %v6569_v17  ;;  %v6575_v1 = vmul.f32 0.5, %v10440_v10  ;;  %v18488_v19 = vpop.permute.xlu0 %7182 }
 0xbea   :  { %10441 = vtanh.f32 %v18454_v55  ;;  %v6579_v59 = vmul.f32 %v6573_v13, %v18658_v62  ;;  %v6576_v4 = vadd.f32 0.5, %v6574_v12  ;;  %v7068_v62 = vpop.permute.xlu1 %7067 }
 0xbeb   :  { %v6577_v28 = vadd.f32 0.5, %v6575_v1 }
 0xbec   :  { %v18458_v53 = vadd.f32 %v6581_v41, %v6579_v59 }
 0xbed   :  { %v7075_v2 = vpop.permute.xlu0 %7074 }
 0xbee   :  { %10443 = vtanh.f32 %v18458_v53  ;;  %v7079_v1 = vpop.permute.xlu1 %7078 }
 0xbf4   :  { %v10442_v5 = vpop.eup %10441 }
 0xbf5   :  { %v6586_v60 = vmul.f32 %v10442_v5, %v6576_v4 }
 0xbf7   :  { %6791 = vmatprep.mubr.f32.mxu0 %v6586_v60  ;;  %10445 = vtanh.f32 %v6586_v60  ;;  %6868 = vmatprep.mubr.f32.mxu1 %v6586_v60  ;;  %v18491_v60 = vpop.permute.xlu0 %7085 }
 0xbf8   :  { %v10444_v33 = vpop.eup %10443  ;;  %6792 = vmatmul.mubr.f32.vlgmr.msra.gmra.mrb[76].mxu0 %v6548_v31  ;;  %6869 = vmatmul.mubr.f32.vlgmr.msra.gmra.mrb[76].mxu1 %v6548_v31 }
 0xbf9   :  { %v6587_v22 = vmul.f32 %v10444_v33, %v6577_v28 }
 0xbfb   :  { %6797 = vmatprep.mubr.f32.mxu0 %v6587_v22  ;;  %10447 = vtanh.f32 %v6587_v22  ;;  %6874 = vmatprep.mubr.f32.mxu1 %v6587_v22 }
 0xbfc   :  { %6798 = vmatmul.mubr.f32.gmra.mrb[78].mxu0 %v18443_v48  ;;  %6875 = vmatmul.mubr.f32.gmra.mrb[78].mxu1 %v18443_v48 }
 0xc01   :  { %v10446_v25 = vpop.eup %10445 }
 0xc02   :  { %v6977_v8 = vmul.f32 %v18659_v42, %v10446_v25  ;;  %v7090_v25 = vpop.permute.xlu1 %7089 }
 0xc04   :  { %7013 = vadd.xlane.f32.xlu0 %v6977_v8 }
 0xc05   :  { %v10448_v0 = vpop.eup %10447 }
 0xc06   :  { %v6978_v56 = vmul.f32 %v18659_v42, %v10448_v0  ;;  %v7101_v8 = vpop.permute.xlu1 %7100 }
 0xc08   :  { %7015 = vadd.xlane.f32.xlu1 %v6978_v56 }
 0xccb   :  { %v6793_v31 = vpop.f32.mrb[76].mxu0  ;;  %v6870_v49 = vpop.f32.mrb[76].mxu1 }
 0xccc   :  { %v6794_v50 = vadd.f32 %v6793_v31, %v18653_v3  ;;  %v6795_v11 = vpop.f32.mrb[77].mxu0  ;;  %v6872_v48 = vpop.f32.mrb[77].mxu1  ;;  %v6871_v30 = vadd.f32 %v6870_v49, %v18654_v35 }
 0xccd   :  { %v6796_v26 = vadd.f32 %v6795_v11, %v18655_v61  ;;  %v6873_v14 = vadd.f32 %v6872_v48, %v18656_v51 }
 0xcce   :  { %10449 = vtanh.f32 %v6794_v50  ;;  %v18498_v50 = vpop.permute.xlu1 %7111 }
 0xccf   :  { %v6799_v46 = vpop.f32.mrb[78].mxu0  ;;  %v6876_v18 = vpop.f32.mrb[78].mxu1  ;;  %10451 = vtanh.f32 %v6796_v26 }
 0xcd0   :  { %v6800_v37 = vadd.f32 %v6799_v46, %v18653_v3  ;;  %v6801_v44 = vpop.f32.mrb[79].mxu0  ;;  %v6878_v16 = vpop.f32.mrb[79].mxu1  ;;  %10453 = vtanh.f32 %v6871_v30  ;;  %v6877_v34 = vadd.f32 %v6876_v18, %v18654_v35 }
 0xcd1   :  { %v6802_v15 = vadd.f32 %v6801_v44, %v18655_v61  ;;  %v6879_v61 = vadd.f32 %v6878_v16, %v18656_v51  ;;  %v18660_v44 = vld [vmem:[#allocation7_spill] sm:$0xff] }
 0xcd2   :  { %10455 = vtanh.f32 %v6800_v37  ;;  %v18503_v30 = vpop.permute.xlu1 %7122  ;;  %v10481_v37 = vld [vmem:[%s18569_s1 + $0x8] sm:$0x3] }
 0xcd3   :  { %10457 = vtanh.f32 %v6802_v15  ;;  %v7127_v16 = vrot.slane %v10481_v37, %v18660_v44 }
 0xcd4   :  { %10459 = vtanh.f32 %v6877_v34 }
 0xcd5   :  { %10461 = vtanh.f32 %v6873_v14 }
 0xcd6   :  { %10463 = vtanh.f32 %v6879_v61  ;;  %v6986_v46 = vpop.xlane.xlu1 %6985 }
 0xcd8   :  { %v10450_v29 = vpop.eup %10449 }
 0xcd9   :  { %v6889_v20 = vmul.f32 0.5, %v10450_v29  ;;  %v10452_v63 = vpop.eup %10451 }
 0xcda   :  { %v10454_v32 = vpop.eup %10453  ;;  %v6893_v9 = vmul.f32 0.5, %v10452_v63  ;;  %v6988_v14 = vpop.xlane.xlu1 %6987  ;;  %v7157_v63 = vmul.f32 %v18469_v36, %v6986_v46 }
 0xcdb   :  { %v6891_v3 = vadd.f32 0.5, %v6889_v20  ;;  %v7158_v29 = vmul.f32 %v18474_v43, %v6988_v14  ;;  %v18661_v14 = vlaneseq }
 0xcdc   :  { %v10456_v6 = vpop.eup %10455  ;;  %v6895_v23 = vadd.f32 0.5, %v6893_v9 }
 0xcdd   :  { %v6903_v35 = vmul.f32 %v10454_v32, %v6891_v3  ;;  %v6890_v40 = vmul.f32 0.5, %v10456_v6  ;;  %v10458_v47 = vpop.eup %10457  ;;  %v7188_v9 = vadd.f32 %v18488_v19, %v7158_v29 }
 0xcde   :  { %v6901_v39 = vmul.f32 %v6895_v23, %v18454_v55  ;;  %v6894_v45 = vmul.f32 0.5, %v10458_v47  ;;  %v10460_v58 = vpop.eup %10459  ;;  %v6992_v32 = vpop.xlane.xlu1 %6991 }
 0xcdf   :  { %v6892_v7 = vadd.f32 0.5, %v6890_v40  ;;  %v10462_v13 = vpop.eup %10461 }
 0xce0   :  { %v6905_v52 = vadd.f32 %v6903_v35, %v6901_v39  ;;  %v6896_v17 = vadd.f32 0.5, %v6894_v45  ;;  %v6897_v59 = vmul.f32 0.5, %v10462_v13  ;;  %v10464_v55 = vpop.eup %10463 }
 0xce1   :  { %v6904_v27 = vmul.f32 %v10460_v58, %v6892_v7  ;;  %v6898_v10 = vmul.f32 0.5, %v10464_v55 }
 0xce2   :  { %10465 = vtanh.f32 %v6905_v52  ;;  %v6902_v51 = vmul.f32 %v6896_v17, %v18458_v53  ;;  %v6899_v12 = vadd.f32 0.5, %v6897_v59  ;;  %v18493_v53 = vpop.permute.xlu0 %7096  ;;  %v6996_v6 = vpop.xlane.xlu1 %6995 }
 0xce3   :  { %v6900_v28 = vadd.f32 0.5, %v6898_v10  ;;  %v7162_v35 = vmul.f32 %v7068_v62, %v6996_v6 }
 0xce4   :  { %v6906_v41 = vadd.f32 %v6904_v27, %v6902_v51 }
 0xce6   :  { %10467 = vtanh.f32 %v6906_v41  ;;  %v18495_v56 = vpop.permute.xlu0 %7107  ;;  %v7000_v47 = vpop.xlane.xlu1 %6999 }
 0xce7   :  { %v7164_v7 = vmul.f32 %v7079_v1, %v7000_v47 }
 0xce9   :  { %v7194_v17 = vadd.f32 %v18488_v19, %v7164_v7 }
 0xcea   :  { %v18501_v48 = vpop.permute.xlu0 %7118  ;;  %v7004_v58 = vpop.xlane.xlu1 %7003 }
 0xceb   :  { %v7166_v27 = vmul.f32 %v7090_v25, %v7004_v58 }
 0xcec   :  { %v10466_v4 = vpop.eup %10465 }
 0xced   :  { %v6909_v5 = vmul.f32 %v10466_v4, %v6899_v12  ;;  %v7196_v62 = vadd.f32 %v18488_v19, %v7166_v27 }
 0xcee   :  { %v6982_v26 = vpop.xlane.xlu0 %6981  ;;  %v7008_v13 = vpop.xlane.xlu1 %7007 }
 0xcef   :  { %10469 = vtanh.f32 %v6909_v5  ;;  %v7155_v34 = vmul.f32 %v18465_v21, %v6982_v26  ;;  %v7187_v21 = vadd.f32 %v18488_v19, %v7157_v63  ;;  %v7168_v59 = vmul.f32 %v7101_v8, %v7008_v13 }
 0xcf0   :  { %v10468_v33 = vpop.eup %10467 }
 0xcf1   :  { %v6910_v22 = vmul.f32 %v10468_v33, %v6900_v28  ;;  %v7185_v20 = vadd.f32 %v18488_v19, %v7155_v34  ;;  %v7198_v4 = vadd.f32 %v18488_v19, %v7168_v59 }
 0xcf2   :  { %v6984_v18 = vpop.xlane.xlu0 %6983  ;;  %v7012_v12 = vpop.xlane.xlu1 %7011 }
 0xcf3   :  { %10471 = vtanh.f32 %v6910_v22  ;;  %v7156_v15 = vmul.f32 %v18467_v24, %v6984_v18  ;;  %v7160_v24 = vmul.f32 %v18482_v38, %v6992_v32  ;;  %v7192_v38 = vadd.f32 %v18488_v19, %v7162_v35 }
 0xcf4   :  { %v7170_v1 = vmul.f32 %v18498_v50, %v7012_v12 }
 0xcf5   :  { %v7190_v43 = vadd.f32 %v18488_v19, %v7160_v24 }
 0xcf6   :  { %v6990_v3 = vpop.xlane.xlu0 %6989  ;;  %v7016_v28 = vpop.xlane.xlu1 %7015  ;;  %v7200_v22 = vadd.f32 %v18488_v19, %v7170_v1 }
 0xcf7   :  { %v7159_v61 = vmul.f32 %v18479_v57, %v6990_v3  ;;  %v7172_v25 = vmul.f32 %v18503_v30, %v7016_v28 }
 0xcf9   :  { %v10470_v0 = vpop.eup %10469  ;;  %v7189_v36 = vadd.f32 %v18488_v19, %v7159_v61 }
 0xcfa   :  { %v6979_v31 = vmul.f32 %v18659_v42, %v10470_v0  ;;  %v6994_v23 = vpop.xlane.xlu0 %6993  ;;  %v7202_v0 = vadd.f32 %v18488_v19, %v7172_v25 }
 0xcfb   :  { %v7161_v40 = vmul.f32 %v18486_v54, %v6994_v23 }
 0xcfc   :  { %7017 = vadd.xlane.f32.xlu0 %v6979_v31 }
 0xcfd   :  { %v10472_v49 = vpop.eup %10471  ;;  %v7191_v57 = vadd.f32 %v18488_v19, %v7161_v40 }
 0xcfe   :  { %v6980_v11 = vmul.f32 %v18659_v42, %v10472_v49  ;;  %v7186_v42 = vadd.f32 %v18488_v19, %v7156_v15  ;;  %v6998_v39 = vpop.xlane.xlu0 %6997 }
 0xcff   :  { %v7163_v45 = vmul.f32 %v7075_v2, %v6998_v39 }
 0xd00   :  { %7019 = vadd.xlane.f32.xlu1 %v6980_v11 }
 0xd01   :  { %v7193_v51 = vadd.f32 %v18488_v19, %v7163_v45 }
 0xd02   :  { %v7002_v52 = vpop.xlane.xlu0 %7001 }
 0xd03   :  { %v7165_v54 = vmul.f32 %v18491_v60, %v7002_v52 }
 0xd05   :  { %v7195_v55 = vadd.f32 %v18488_v19, %v7165_v54 }
 0xd06   :  { %v7006_v41 = vpop.xlane.xlu0 %7005 }
 0xd07   :  { %v7167_v2 = vmul.f32 %v18493_v53, %v7006_v41 }
 0xd09   :  { %v7197_v5 = vadd.f32 %v18488_v19, %v7167_v2 }
 0xd0a   :  { %v7010_v10 = vpop.xlane.xlu0 %7009 }
 0xd0b   :  { %v7169_v60 = vmul.f32 %v18495_v56, %v7010_v10 }
 0xd0d   :  { %v7199_v53 = vadd.f32 %v18488_v19, %v7169_v60 }
 0xd0e   :  { %v7014_v33 = vpop.xlane.xlu0 %7013 }
 0xd0f   :  { %v7171_v8 = vmul.f32 %v18501_v48, %v7014_v33 }
 0xd11   :  { %7133 = vbcast.lane.b32.xlu1 %v7127_v16, 264  ;;  %v7201_v31 = vadd.f32 %v18488_v19, %v7171_v8 }
 0xd12   :  { %7129 = vbcast.lane.b32.xlu0 %v7127_v16, 256 }
 0xd15   :  { %7229 = vperm.xlu1 %10032, %v7186_v42   ;;  %v7286_v42 = vand.u32 127, %v18661_v14 }
 0xd16   :  { %7226 = vperm.xlu0 %10031, %v7185_v20  }
 0xd17   :  { %v7291_v63 = vadd.s32 4294967288, %v7286_v42 }
 0xd19   :  { %7235 = vperm.xlu1 %10032, %v7188_v9   ;;  %v18662_v9 = vld [vmem:[#allocation6_spill] sm:$0xff] }
 0xd1a   :  { %7232 = vperm.xlu0 %10031, %v7187_v21   ;;  %v7289_v24 = vsub.s32 %v7286_v42, %v18662_v9  ;;  %v7294_v21 = vsub.s32 %v7291_v63, %v18662_v9 }
 0xd1d   :  { %7241 = vperm.xlu1 %10032, %v7190_v43  }
 0xd1e   :  { %7238 = vperm.xlu0 %10031, %v7189_v36  }
 0xd21   :  { %7247 = vperm.xlu1 %10032, %v7192_v38  }
 0xd22   :  { %7244 = vperm.xlu0 %10031, %v7191_v57  }
 0xd25   :  { %7253 = vperm.xlu1 %10032, %v7194_v17  }
 0xd26   :  { %7250 = vperm.xlu0 %10031, %v7193_v51  }
 0xd29   :  { %7259 = vperm.xlu1 %10032, %v7196_v62  }
 0xd2a   :  { %7256 = vperm.xlu0 %10031, %v7195_v55  }
 0xd2d   :  { %7265 = vperm.xlu1 %10032, %v7198_v4  }
 0xd2e   :  { %7262 = vperm.xlu0 %10031, %v7197_v5  }
 0xd31   :  { %7271 = vperm.xlu1 %10032, %v7200_v22  }
 0xd32   :  { %7268 = vperm.xlu0 %10031, %v7199_v53  }
 0xd35   :  { %7277 = vperm.xlu1 %10032, %v7202_v0  }
 0xd36   :  { %7274 = vperm.xlu0 %10031, %v7201_v31  }
 0xd89   :  { %v7018_v56 = vpop.xlane.xlu0 %7017 }
 0xd8d   :  { %v7130_v49 = vpop.permute.xlu0 %7129  ;;  %v7020_v50 = vpop.xlane.xlu1 %7019 }
 0xd8e   :  { %v7173_v11 = vmul.f32 %v7130_v49, %v7018_v56 }
 0xd90   :  { %v7203_v26 = vadd.f32 %v18488_v19, %v7173_v11 }
 0xd91   :  { %v7134_v46 = vpop.permute.xlu1 %7133 }
 0xd92   :  { %v7174_v30 = vmul.f32 %v7134_v46, %v7020_v50  ;;  %7280 = vperm.xlu0 %10031, %v7203_v26  }
 0xd94   :  { %v7204_v18 = vadd.f32 %v18488_v19, %v7174_v30 }
 0xd95   :  { %v7227_v48 = vpop.permute.xlu0 %7226  ;;  %v7230_v37 = vpop.permute.xlu1 %7229 }
 0xd96   :  { %7283 = vperm.xlu1 %10032, %v7204_v18   ;;  %v7290_v36 = vrot.slane %v7227_v48, %v7289_v24  ;;  %v7295_v40 = vrot.slane %v7230_v37, %v7294_v21 }
 0xd98   :  { %v7297_v51 = vsel %vm7296_vm1, %v7295_v40, %v7290_v36 }
 0xd99   :  { %v7233_v44 = vpop.permute.xlu0 %7232  ;;  %v7236_v16 = vpop.permute.xlu1 %7235 }
 0xd9a   :  { %v7301_v61 = vrot.slane %v7233_v44, %v7289_v24  ;;  %v7305_v19 = vrot.slane %v7236_v16, %v7294_v21 }
 0xd9c   :  { %v7306_v57 = vsel %vm7296_vm1, %v7305_v19, %v7301_v61 }
 0xd9d   :  { %v7239_v15 = vpop.permute.xlu0 %7238  ;;  %v7242_v34 = vpop.permute.xlu1 %7241  ;;  %v7380_v62 = vsel %vm7379_vm2, %v7306_v57, %v7297_v51 }
 0xd9e   :  { %v7310_v6 = vrot.slane %v7239_v15, %v7289_v24  ;;  %v7314_v23 = vrot.slane %v7242_v34, %v7294_v21 }
 0xda0   :  { %v7315_v52 = vsel %vm7296_vm1, %v7314_v23, %v7310_v6 }
 0xda1   :  { %v7245_v29 = vpop.permute.xlu0 %7244  ;;  %v7248_v20 = vpop.permute.xlu1 %7247  ;;  %v7382_v55 = vsel %vm7381_vm3, %v7315_v52, %v7380_v62 }
 0xda2   :  { %v7319_v47 = vrot.slane %v7245_v29, %v7289_v24  ;;  %v7323_v39 = vrot.slane %v7248_v20, %v7294_v21 }
 0xda4   :  { %v7324_v54 = vsel %vm7296_vm1, %v7323_v39, %v7319_v47 }
 0xda5   :  { %v7251_v32 = vpop.permute.xlu0 %7250  ;;  %v7254_v3 = vpop.permute.xlu1 %7253  ;;  %v7384_v12 = vsel %vm7383_vm4, %v7324_v54, %v7382_v55 }
 0xda6   :  { %v7328_v38 = vrot.slane %v7251_v32, %v7289_v24  ;;  %v7332_v7 = vrot.slane %v7254_v3, %v7294_v21 }
 0xda8   :  { %v7333_v59 = vsel %vm7296_vm1, %v7332_v7, %v7328_v38 }
 0xda9   :  { %v7257_v43 = vpop.permute.xlu0 %7256  ;;  %v7260_v35 = vpop.permute.xlu1 %7259  ;;  %v7386_v5 = vsel %vm7385_vm5, %v7333_v59, %v7384_v12 }
 0xdaa   :  { %v7337_v45 = vrot.slane %v7257_v43, %v7289_v24  ;;  %v7341_v58 = vrot.slane %v7260_v35, %v7294_v21 }
 0xdac   :  { %v7342_v2 = vsel %vm7296_vm1, %v7341_v58, %v7337_v45 }
 0xdad   :  { %v7263_v17 = vpop.permute.xlu0 %7262  ;;  %v7266_v27 = vpop.permute.xlu1 %7265  ;;  %v7388_v33 = vsel %vm7387_vm6, %v7342_v2, %v7386_v5 }
 0xdae   :  { %v7346_v13 = vrot.slane %v7263_v17, %v7289_v24  ;;  %v7350_v41 = vrot.slane %v7266_v27, %v7294_v21 }
 0xdb0   :  { %v7351_v10 = vsel %vm7296_vm1, %v7350_v41, %v7346_v13 }
 0xdb1   :  { %v7269_v4 = vpop.permute.xlu0 %7268  ;;  %v7272_v1 = vpop.permute.xlu1 %7271  ;;  %v7390_v22 = vsel %vm7389_vm7, %v7351_v10, %v7388_v33 }
 0xdb2   :  { %v7355_v60 = vrot.slane %v7269_v4, %v7289_v24  ;;  %v7359_v28 = vrot.slane %v7272_v1, %v7294_v21 }
 0xdb4   :  { %v7360_v25 = vsel %vm7296_vm1, %v7359_v28, %v7355_v60 }
 0xdb5   :  { %v7392_v53 = vsel %vm7391_vm8, %v7360_v25, %v7390_v22  ;;  %v7275_v8 = vpop.permute.xlu0 %7274  ;;  %v7278_v0 = vpop.permute.xlu1 %7277 }
 0xdb6   :  { %7396 = vst.msk [vmem:[%s18572_s8] sm:$0xff] %vm103_vm0, %v7392_v53  ;;  %v7364_v56 = vrot.slane %v7275_v8, %v7289_v24  ;;  %v7368_v49 = vrot.slane %v7278_v0, %v7294_v21 }
 0xdb8   :  { %v7369_v46 = vsel %vm7296_vm1, %v7368_v49, %v7364_v56 }
 0xe11   :  { %v7281_v31 = vpop.permute.xlu0 %7280 }
 0xe12   :  { %v7373_v11 = vrot.slane %v7281_v31, %v7289_v24 }
 0xe15   :  { %v7284_v50 = vpop.permute.xlu1 %7283 }
 0xe16   :  { %v7377_v26 = vrot.slane %v7284_v50, %v7294_v21 }
 0xe18   :  { %v7378_v30 = vsel %vm7296_vm1, %v7377_v26, %v7373_v11 }
 0xe19   :  { %v7393_v18 = vsel %vm7379_vm2, %v7378_v30, %v7369_v46 }
 0xe1a   :  { %7398 = vst.msk [vmem:[%s18572_s8 + $0x8] sm:$0x3] %vm7397_vm9, %v7393_v18 }

</bundles_post_ra>
